<compile_context>
chip_gen: v7x
topology: tpu7x:2x2x1
jax: 0.10.0
libtpu: 0.0.40
codegen_flags: <defaults>
</compile_context>

<pallas_src>
import functools

import jax
import jax.numpy as jnp
from jax import lax
from jax.experimental import pallas as pl
from jax.experimental.pallas import tpu as pltpu

BN_EPS = 1e-5
_VMEM_LIMIT = 32 * 1024 * 1024  # safe on v5e/v6e/v7x; buffers here are < 2 MiB


# ----------------------------------------------------------------------------
# Pallas kernel 1: conv-as-matmul with fused BatchNorm2d(batch stats) + ReLU.
# One launch per conv layer; single full-array block; bf16 output.
# ----------------------------------------------------------------------------
def _conv_bn_relu_kernel(p_ref, w_ref, o_ref):
    y = jnp.dot(p_ref[...], w_ref[...], preferred_element_type=jnp.float32)
    # Rows of y are exactly the (b, oh, ow) positions -> per-channel batch stats.
    mean = jnp.mean(y, axis=0, keepdims=True)
    var = jnp.mean(jnp.square(y - mean), axis=0, keepdims=True)
    yn = (y - mean) * lax.rsqrt(var + BN_EPS)
    o_ref[...] = jnp.maximum(yn, 0.0).astype(o_ref.dtype)


def conv_bn_relu(patches, w, *, use_pallas=True):
    """[M,K]bf16 @ [K,OC]bf16 -> BN(batch stats, no affine) -> ReLU -> bf16."""
    M, K = patches.shape
    K2, N = w.shape
    assert K == K2
    if not use_pallas:  # bf16-consistent pure-JAX reference path
        y = jnp.dot(patches, w, preferred_element_type=jnp.float32)
        mean = jnp.mean(y, axis=0, keepdims=True)
        var = jnp.mean(jnp.square(y - mean), axis=0, keepdims=True)
        return jnp.maximum((y - mean) * lax.rsqrt(var + BN_EPS),
                           0.0).astype(jnp.bfloat16)
    return pl.pallas_call(
        _conv_bn_relu_kernel,
        out_shape=jax.ShapeDtypeStruct((M, N), jnp.bfloat16),
        compiler_params=pltpu.CompilerParams(vmem_limit_bytes=_VMEM_LIMIT),
    )(patches, w)


# ----------------------------------------------------------------------------
# Pallas kernel 2: the whole FC stack fused into one launch:
#   fc1 -> BN1d -> ReLU -> fc2 -> BN1d -> ReLU -> last[task]   (dropout = id)
# All three folded bf16 weights are resident in VMEM.
# ----------------------------------------------------------------------------
def _bn1d_relu_f32(h):
    mean = jnp.mean(h, axis=0, keepdims=True)
    var = jnp.mean(jnp.square(h - mean), axis=0, keepdims=True)
    return jnp.maximum((h - mean) * lax.rsqrt(var + BN_EPS), 0.0)


def _fc_stack_kernel(x_ref, w1_ref, w2_ref, w3_ref, o_ref):
    h = jnp.dot(x_ref[...], w1_ref[...], preferred_element_type=jnp.float32)
    h = _bn1d_relu_f32(h).astype(jnp.bfloat16)
    h = jnp.dot(h, w2_ref[...], preferred_element_type=jnp.float32)
    h = _bn1d_relu_f32(h).astype(jnp.bfloat16)
    o_ref[...] = jnp.dot(h, w3_ref[...], preferred_element_type=jnp.float32)


def fc_stack(x, w1, w2, w3, *, use_pallas=True):
    """x [B, fc_in] bf16 -> logits [B, n_classes] f32 (one Pallas launch)."""
    if not use_pallas:
        h = jnp.dot(x, w1, preferred_element_type=jnp.float32)
        h = _bn1d_relu_f32(h).astype(jnp.bfloat16)
        h = jnp.dot(h, w2, preferred_element_type=jnp.float32)
        h = _bn1d_relu_f32(h).astype(jnp.bfloat16)
        return jnp.dot(h, w3, preferred_element_type=jnp.float32)
    B = x.shape[0]
    return pl.pallas_call(
        _fc_stack_kernel,
        out_shape=jax.ShapeDtypeStruct((B, w3.shape[1]), jnp.float32),
        compiler_params=pltpu.CompilerParams(vmem_limit_bytes=_VMEM_LIMIT),
    )(x, w1, w2, w3)


# ----------------------------------------------------------------------------
# XLA glue: im2col (transpose-free, unpadded), MaxPool2d(2).
# ----------------------------------------------------------------------------
def im2col(x, kh, kw):
    """NHWC bf16 -> [B*OH*OW, kh*kw*C] patches in (kh, kw, c) K-order."""
    B, H, W, C = x.shape
    OH, OW = H - kh + 1, W - kw + 1
    cols = [x[:, i:i + OH, j:j + OW, :] for i in range(kh) for j in range(kw)]
    patches = jnp.concatenate(cols, axis=-1).reshape(B * OH * OW, kh * kw * C)
    return patches, (B, OH, OW)


def maxpool2x2(x):
    """nn.MaxPool2d(2), floor mode, NHWC."""
    B, H, W, C = x.shape
    OH, OW = H // 2, W // 2
    x = x[:, :OH * 2, :OW * 2, :].reshape(B, OH, 2, OW, 2, C)
    return jnp.max(x, axis=(2, 4))


# ----------------------------------------------------------------------------
# Forward (joint=False, eval-mode dropout)
# ----------------------------------------------------------------------------
def forward(x_nchw, params, *, cfg, task_id, use_pallas=True):
    h = jnp.transpose(x_nchw, (0, 2, 3, 1)).astype(jnp.bfloat16)  # NCHW -> NHWC
    for name in ("conv1", "conv2", "conv3"):
        ksz, oc = cfg[name]["k"], cfg[name]["oc"]
        patches, (B, OH, OW) = im2col(h, ksz, ksz)
        y = conv_bn_relu(patches, params[name], use_pallas=use_pallas)
        h = maxpool2x2(y.reshape(B, OH, OW, oc))     # dropout = identity (eval)
    B = h.shape[0]
    flat = jnp.transpose(h, (0, 3, 1, 2)).reshape(B, -1)   # torch .view(bsz,-1)
    return fc_stack(flat, params["fc1"], params["fc2"], params["last"][task_id],
                    use_pallas=use_pallas)


# ----------------------------------------------------------------------------
# Parameter prep: fold subnet masks, reshape to matmul layout, cast bf16.
# (No zero-padding anywhere — kernels take full-extent blocks.)
# ----------------------------------------------------------------------------
def prepare_params(raw):
    params, cfg = {}, {}
    for name in ("conv1", "conv2", "conv3"):
        w, m = raw[name]["w"], raw[name]["wm"]          # torch [OC, IC, KH, KW]
        oc, ic, kh, kw = w.shape
        wf = jnp.transpose(w * m, (2, 3, 1, 0)).reshape(kh * kw * ic, oc)
        params[name] = wf.astype(jnp.bfloat16)
        cfg[name] = dict(oc=oc, k=kh)
    for name in ("fc1", "fc2"):
        w, m = raw[name]["w"], raw[name]["wm"]          # torch [OUT, IN]
        params[name] = (w * m).T.astype(jnp.bfloat16)
        cfg[name] = dict(out=w.shape[0])
    params["last"] = [w.T.astype(jnp.bfloat16) for w in raw["last"]]
    cfg["last"] = dict(out=raw["last"][0].shape[0])
    return params, cfg


def init_raw_params(key, *, in_ch=3, c1=64, c2=128, c3=256, fc_h=512,
                    n_classes=100, n_tasks=2, sparsity=0.5):
    ks = jax.random.split(key, 8)

    def conv_p(k, oc, ic, ksz):
        k1, k2 = jax.random.split(k)
        return dict(
            w=0.1 * jax.random.normal(k1, (oc, ic, ksz, ksz), jnp.float32),
            wm=jax.random.bernoulli(k2, 1.0 - sparsity,
                                    (oc, ic, ksz, ksz)).astype(jnp.float32))

    def fc_p(k, out_f, in_f):
        k1, k2 = jax.random.split(k)
        return dict(
            w=0.05 * jax.random.normal(k1, (out_f, in_f), jnp.float32),
            wm=jax.random.bernoulli(k2, 1.0 - sparsity,
                                    (out_f, in_f)).astype(jnp.float32))

    # spatial trace for 32x32 input: 32 -conv4-> 29 -pool-> 14 -conv3-> 12
    # -pool-> 6 -conv2-> 5 -pool-> 2  => smid = 2
    smid = 2
    fc_in = c3 * smid * smid
    last = []
    for t in range(n_tasks):                 # module appends two heads per task
        ka, kb = jax.random.split(jax.random.fold_in(ks[7], t))
        last.append(0.05 * jax.random.normal(ka, (n_classes, fc_h), jnp.float32))
        last.append(0.05 * jax.random.normal(kb, (n_classes, fc_h), jnp.float32))
    return dict(
        conv1=conv_p(ks[0], c1, in_ch, 4),
        conv2=conv_p(ks[1], c2, c1, 3),
        conv3=conv_p(ks[2], c3, c2, 2),
        fc1=fc_p(ks[3], fc_h, fc_in),
        fc2=fc_p(ks[4], fc_h, fc_h),
        last=last,
    )


if __name__ == "__main__":
    key = jax.random.PRNGKey(0)
    k_par, k_in = jax.random.split(key)

    # CIFAR-style 3x32x32 input, full conv widths (64/128/256), fc hidden
    # scaled 2048 -> 512 for a small but structurally faithful test.
    B, NCLS = 2, 100
    raw = init_raw_params(k_par, fc_h=512, n_classes=NCLS, n_tasks=2)
    params, cfg = prepare_params(raw)
    x = jax.random.normal(k_in, (B, 3, 32, 32), jnp.float32)   # NCHW like torch

    task_id = 0
    fwd = jax.jit(functools.partial(forward, cfg=cfg, task_id=task_id,
                                    use_pallas=True))
    y = jax.block_until_ready(fwd(x, params))

    # Self-check against a bf16-consistent pure-JAX reference (same folded bf16
    # weights / patches, same BN/ReLU math, f32 accumulation) -> only
    # summation-order differences expected.
    y_ref = forward(x, params, cfg=cfg, task_id=task_id, use_pallas=False)
    assert y.shape == (B, NCLS)
    assert bool(jnp.all(jnp.isfinite(y)))
    assert bool(jnp.allclose(y, y_ref, rtol=2e-2, atol=2e-2)), "mismatch vs reference"

    print("KERNEL_OK")
</pallas_src>

<mosaic_0001>
module attributes {stable_mosaic.version = 11 : i64} {
  func.func @_conv_bn_relu_kernel(%arg0: memref<1682x48xbf16, #tpu.memory_space<vmem>>, %arg1: memref<48x64xbf16, #tpu.memory_space<vmem>>, %arg2: memref<1682x64xbf16, #tpu.memory_space<vmem>>) attributes {dimension_semantics = [], scalar_prefetch = 0 : i64, scratch_operands = 0 : i64, tpu.core_type = #tpu.core_type<tc>} {
    %c0 = arith.constant 0 : index
    %c0_0 = arith.constant 0 : index
    %0 = vector.load %arg0[%c0, %c0_0] : memref<1682x48xbf16, #tpu.memory_space<vmem>>, vector<1682x48xbf16>
    %c0_1 = arith.constant 0 : index
    %c0_2 = arith.constant 0 : index
    %1 = vector.load %arg1[%c0_1, %c0_2] : memref<48x64xbf16, #tpu.memory_space<vmem>>, vector<48x64xbf16>
    %cst = arith.constant dense<0.000000e+00> : vector<1682x64xf32>
    %2 = tpu.matmul %0, %1, %cst {dimension_numbers = #tpu.dot_dimension_numbers<[1], [0], [0], [1], [0, 0, 1, 1], [], []>} : vector<1682x48xbf16>, vector<48x64xbf16>, vector<1682x64xf32> -> vector<1682x64xf32>
    %cst_3 = arith.constant dense<0.000000e+00> : vector<64xf32>
    %3 = vector.multi_reduction <add>, %2, %cst_3 [0] : vector<1682x64xf32> to vector<64xf32>
    %4 = vector.shape_cast %3 : vector<64xf32> to vector<1x64xf32>
    %cst_4 = arith.constant 1.682000e+03 : f32
    %5 = vector.broadcast %cst_4 : f32 to vector<1x64xf32>
    %6 = arith.divf %4, %5 : vector<1x64xf32>
    %7 = vector.broadcast %6 : vector<1x64xf32> to vector<1682x64xf32>
    %8 = arith.subf %2, %7 : vector<1682x64xf32>
    %9 = arith.mulf %8, %8 : vector<1682x64xf32>
    %cst_5 = arith.constant dense<0.000000e+00> : vector<64xf32>
    %10 = vector.multi_reduction <add>, %9, %cst_5 [0] : vector<1682x64xf32> to vector<64xf32>
    %11 = vector.shape_cast %10 : vector<64xf32> to vector<1x64xf32>
    %cst_6 = arith.constant 1.682000e+03 : f32
    %12 = vector.broadcast %cst_6 : f32 to vector<1x64xf32>
    %13 = arith.divf %11, %12 : vector<1x64xf32>
    %14 = vector.broadcast %6 : vector<1x64xf32> to vector<1682x64xf32>
    %15 = arith.subf %2, %14 : vector<1682x64xf32>
    %cst_7 = arith.constant 9.99999974E-6 : f32
    %16 = vector.broadcast %cst_7 : f32 to vector<1x64xf32>
    %17 = arith.addf %13, %16 : vector<1x64xf32>
    %18 = math.rsqrt %17 : vector<1x64xf32>
    %19 = vector.broadcast %18 : vector<1x64xf32> to vector<1682x64xf32>
    %20 = arith.mulf %15, %19 : vector<1682x64xf32>
    %cst_8 = arith.constant 0.000000e+00 : f32
    %21 = vector.broadcast %cst_8 : f32 to vector<1682x64xf32>
    %22 = arith.maximumf %20, %21 : vector<1682x64xf32>
    %23 = arith.truncf %22 : vector<1682x64xf32> to vector<1682x64xbf16>
    %c0_9 = arith.constant 0 : index
    %c0_10 = arith.constant 0 : index
    %24 = vector.load %arg2[%c0_9, %c0_10] : memref<1682x64xbf16, #tpu.memory_space<vmem>>, vector<1682x64xbf16>
    tpu.vector_store %arg2[%c0_9, %c0_10], %23 {strides = array<i32>} : memref<1682x64xbf16, #tpu.memory_space<vmem>>, vector<1682x64xbf16>,
    return
  }
}

module attributes {stable_mosaic.version = 11 : i64} {
  func.func @_conv_bn_relu_kernel(%arg0: memref<288x576xbf16, #tpu.memory_space<vmem>>, %arg1: memref<576x128xbf16, #tpu.memory_space<vmem>>, %arg2: memref<288x128xbf16, #tpu.memory_space<vmem>>) attributes {dimension_semantics = [], scalar_prefetch = 0 : i64, scratch_operands = 0 : i64, tpu.core_type = #tpu.core_type<tc>} {
    %c0 = arith.constant 0 : index
    %c0_0 = arith.constant 0 : index
    %0 = vector.load %arg0[%c0, %c0_0] : memref<288x576xbf16, #tpu.memory_space<vmem>>, vector<288x576xbf16>
    %c0_1 = arith.constant 0 : index
    %c0_2 = arith.constant 0 : index
    %1 = vector.load %arg1[%c0_1, %c0_2] : memref<576x128xbf16, #tpu.memory_space<vmem>>, vector<576x128xbf16>
    %cst = arith.constant dense<0.000000e+00> : vector<288x128xf32>
    %2 = tpu.matmul %0, %1, %cst {dimension_numbers = #tpu.dot_dimension_numbers<[1], [0], [0], [1], [0, 0, 1, 1], [], []>} : vector<288x576xbf16>, vector<576x128xbf16>, vector<288x128xf32> -> vector<288x128xf32>
    %cst_3 = arith.constant dense<0.000000e+00> : vector<128xf32>
    %3 = vector.multi_reduction <add>, %2, %cst_3 [0] : vector<288x128xf32> to vector<128xf32>
    %4 = vector.shape_cast %3 : vector<128xf32> to vector<1x128xf32>
    %cst_4 = arith.constant 2.880000e+02 : f32
    %5 = vector.broadcast %cst_4 : f32 to vector<1x128xf32>
    %6 = arith.divf %4, %5 : vector<1x128xf32>
    %7 = vector.broadcast %6 : vector<1x128xf32> to vector<288x128xf32>
    %8 = arith.subf %2, %7 : vector<288x128xf32>
    %9 = arith.mulf %8, %8 : vector<288x128xf32>
    %cst_5 = arith.constant dense<0.000000e+00> : vector<128xf32>
    %10 = vector.multi_reduction <add>, %9, %cst_5 [0] : vector<288x128xf32> to vector<128xf32>
    %11 = vector.shape_cast %10 : vector<128xf32> to vector<1x128xf32>
    %cst_6 = arith.constant 2.880000e+02 : f32
    %12 = vector.broadcast %cst_6 : f32 to vector<1x128xf32>
    %13 = arith.divf %11, %12 : vector<1x128xf32>
    %14 = vector.broadcast %6 : vector<1x128xf32> to vector<288x128xf32>
    %15 = arith.subf %2, %14 : vector<288x128xf32>
    %cst_7 = arith.constant 9.99999974E-6 : f32
    %16 = vector.broadcast %cst_7 : f32 to vector<1x128xf32>
    %17 = arith.addf %13, %16 : vector<1x128xf32>
    %18 = math.rsqrt %17 : vector<1x128xf32>
    %19 = vector.broadcast %18 : vector<1x128xf32> to vector<288x128xf32>
    %20 = arith.mulf %15, %19 : vector<288x128xf32>
    %cst_8 = arith.constant 0.000000e+00 : f32
    %21 = vector.broadcast %cst_8 : f32 to vector<288x128xf32>
    %22 = arith.maximumf %20, %21 : vector<288x128xf32>
    %23 = arith.truncf %22 : vector<288x128xf32> to vector<288x128xbf16>
    %c0_9 = arith.constant 0 : index
    %c0_10 = arith.constant 0 : index
    %24 = vector.load %arg2[%c0_9, %c0_10] : memref<288x128xbf16, #tpu.memory_space<vmem>>, vector<288x128xbf16>
    tpu.vector_store %arg2[%c0_9, %c0_10], %23 {strides = array<i32>} : memref<288x128xbf16, #tpu.memory_space<vmem>>, vector<288x128xbf16>,
    return
  }
}

module attributes {stable_mosaic.version = 11 : i64} {
  func.func @_conv_bn_relu_kernel(%arg0: memref<50x512xbf16, #tpu.memory_space<vmem>>, %arg1: memref<512x256xbf16, #tpu.memory_space<vmem>>, %arg2: memref<50x256xbf16, #tpu.memory_space<vmem>>) attributes {dimension_semantics = [], scalar_prefetch = 0 : i64, scratch_operands = 0 : i64, tpu.core_type = #tpu.core_type<tc>} {
    %c0 = arith.constant 0 : index
    %c0_0 = arith.constant 0 : index
    %0 = vector.load %arg0[%c0, %c0_0] : memref<50x512xbf16, #tpu.memory_space<vmem>>, vector<50x512xbf16>
    %c0_1 = arith.constant 0 : index
    %c0_2 = arith.constant 0 : index
    %1 = vector.load %arg1[%c0_1, %c0_2] : memref<512x256xbf16, #tpu.memory_space<vmem>>, vector<512x256xbf16>
    %cst = arith.constant dense<0.000000e+00> : vector<50x256xf32>
    %2 = tpu.matmul %0, %1, %cst {dimension_numbers = #tpu.dot_dimension_numbers<[1], [0], [0], [1], [0, 0, 1, 1], [], []>} : vector<50x512xbf16>, vector<512x256xbf16>, vector<50x256xf32> -> vector<50x256xf32>
    %cst_3 = arith.constant dense<0.000000e+00> : vector<256xf32>
    %3 = vector.multi_reduction <add>, %2, %cst_3 [0] : vector<50x256xf32> to vector<256xf32>
    %4 = vector.shape_cast %3 : vector<256xf32> to vector<1x256xf32>
    %cst_4 = arith.constant 5.000000e+01 : f32
    %5 = vector.broadcast %cst_4 : f32 to vector<1x256xf32>
    %6 = arith.divf %4, %5 : vector<1x256xf32>
    %7 = vector.broadcast %6 : vector<1x256xf32> to vector<50x256xf32>
    %8 = arith.subf %2, %7 : vector<50x256xf32>
    %9 = arith.mulf %8, %8 : vector<50x256xf32>
    %cst_5 = arith.constant dense<0.000000e+00> : vector<256xf32>
    %10 = vector.multi_reduction <add>, %9, %cst_5 [0] : vector<50x256xf32> to vector<256xf32>
    %11 = vector.shape_cast %10 : vector<256xf32> to vector<1x256xf32>
    %cst_6 = arith.constant 5.000000e+01 : f32
    %12 = vector.broadcast %cst_6 : f32 to vector<1x256xf32>
    %13 = arith.divf %11, %12 : vector<1x256xf32>
    %14 = vector.broadcast %6 : vector<1x256xf32> to vector<50x256xf32>
    %15 = arith.subf %2, %14 : vector<50x256xf32>
    %cst_7 = arith.constant 9.99999974E-6 : f32
    %16 = vector.broadcast %cst_7 : f32 to vector<1x256xf32>
    %17 = arith.addf %13, %16 : vector<1x256xf32>
    %18 = math.rsqrt %17 : vector<1x256xf32>
    %19 = vector.broadcast %18 : vector<1x256xf32> to vector<50x256xf32>
    %20 = arith.mulf %15, %19 : vector<50x256xf32>
    %cst_8 = arith.constant 0.000000e+00 : f32
    %21 = vector.broadcast %cst_8 : f32 to vector<50x256xf32>
    %22 = arith.maximumf %20, %21 : vector<50x256xf32>
    %23 = arith.truncf %22 : vector<50x256xf32> to vector<50x256xbf16>
    %c0_9 = arith.constant 0 : index
    %c0_10 = arith.constant 0 : index
    %24 = vector.load %arg2[%c0_9, %c0_10] : memref<50x256xbf16, #tpu.memory_space<vmem>>, vector<50x256xbf16>
    tpu.vector_store %arg2[%c0_9, %c0_10], %23 {strides = array<i32>} : memref<50x256xbf16, #tpu.memory_space<vmem>>, vector<50x256xbf16>,
    return
  }
}

module attributes {stable_mosaic.version = 11 : i64} {
  func.func @_fc_stack_kernel(%arg0: memref<2x1024xbf16, #tpu.memory_space<vmem>>, %arg1: memref<1024x512xbf16, #tpu.memory_space<vmem>>, %arg2: memref<512x512xbf16, #tpu.memory_space<vmem>>, %arg3: memref<512x100xbf16, #tpu.memory_space<vmem>>, %arg4: memref<2x100xf32, #tpu.memory_space<vmem>>) attributes {dimension_semantics = [], scalar_prefetch = 0 : i64, scratch_operands = 0 : i64, tpu.core_type = #tpu.core_type<tc>} {
    %c0 = arith.constant 0 : index
    %c0_0 = arith.constant 0 : index
    %0 = vector.load %arg0[%c0, %c0_0] : memref<2x1024xbf16, #tpu.memory_space<vmem>>, vector<2x1024xbf16>
    %c0_1 = arith.constant 0 : index
    %c0_2 = arith.constant 0 : index
    %1 = vector.load %arg1[%c0_1, %c0_2] : memref<1024x512xbf16, #tpu.memory_space<vmem>>, vector<1024x512xbf16>
    %cst = arith.constant dense<0.000000e+00> : vector<2x512xf32>
    %2 = tpu.matmul %0, %1, %cst {dimension_numbers = #tpu.dot_dimension_numbers<[1], [0], [0], [1], [0, 0, 1, 1], [], []>} : vector<2x1024xbf16>, vector<1024x512xbf16>, vector<2x512xf32> -> vector<2x512xf32>
    %cst_3 = arith.constant dense<0.000000e+00> : vector<512xf32>
    %3 = vector.multi_reduction <add>, %2, %cst_3 [0] : vector<2x512xf32> to vector<512xf32>
    %4 = vector.shape_cast %3 : vector<512xf32> to vector<1x512xf32>
    %cst_4 = arith.constant 2.000000e+00 : f32
    %5 = vector.broadcast %cst_4 : f32 to vector<1x512xf32>
    %6 = arith.divf %4, %5 : vector<1x512xf32>
    %7 = vector.broadcast %6 : vector<1x512xf32> to vector<2x512xf32>
    %8 = arith.subf %2, %7 : vector<2x512xf32>
    %9 = arith.mulf %8, %8 : vector<2x512xf32>
    %cst_5 = arith.constant dense<0.000000e+00> : vector<512xf32>
    %10 = vector.multi_reduction <add>, %9, %cst_5 [0] : vector<2x512xf32> to vector<512xf32>
    %11 = vector.shape_cast %10 : vector<512xf32> to vector<1x512xf32>
    %cst_6 = arith.constant 2.000000e+00 : f32
    %12 = vector.broadcast %cst_6 : f32 to vector<1x512xf32>
    %13 = arith.divf %11, %12 : vector<1x512xf32>
    %14 = vector.broadcast %6 : vector<1x512xf32> to vector<2x512xf32>
    %15 = arith.subf %2, %14 : vector<2x512xf32>
    %cst_7 = arith.constant 9.99999974E-6 : f32
    %16 = vector.broadcast %cst_7 : f32 to vector<1x512xf32>
    %17 = arith.addf %13, %16 : vector<1x512xf32>
    %18 = math.rsqrt %17 : vector<1x512xf32>
    %19 = vector.broadcast %18 : vector<1x512xf32> to vector<2x512xf32>
    %20 = arith.mulf %15, %19 : vector<2x512xf32>
    %cst_8 = arith.constant 0.000000e+00 : f32
    %21 = vector.broadcast %cst_8 : f32 to vector<2x512xf32>
    %22 = arith.maximumf %20, %21 : vector<2x512xf32>
    %23 = arith.truncf %22 : vector<2x512xf32> to vector<2x512xbf16>
    %c0_9 = arith.constant 0 : index
    %c0_10 = arith.constant 0 : index
    %24 = vector.load %arg2[%c0_9, %c0_10] : memref<512x512xbf16, #tpu.memory_space<vmem>>, vector<512x512xbf16>
    %cst_11 = arith.constant dense<0.000000e+00> : vector<2x512xf32>
    %25 = tpu.matmul %23, %24, %cst_11 {dimension_numbers = #tpu.dot_dimension_numbers<[1], [0], [0], [1], [0, 0, 1, 1], [], []>} : vector<2x512xbf16>, vector<512x512xbf16>, vector<2x512xf32> -> vector<2x512xf32>
    %cst_12 = arith.constant dense<0.000000e+00> : vector<512xf32>
    %26 = vector.multi_reduction <add>, %25, %cst_12 [0] : vector<2x512xf32> to vector<512xf32>
    %27 = vector.shape_cast %26 : vector<512xf32> to vector<1x512xf32>
    %cst_13 = arith.constant 2.000000e+00 : f32
    %28 = vector.broadcast %cst_13 : f32 to vector<1x512xf32>
    %29 = arith.divf %27, %28 : vector<1x512xf32>
    %30 = vector.broadcast %29 : vector<1x512xf32> to vector<2x512xf32>
    %31 = arith.subf %25, %30 : vector<2x512xf32>
    %32 = arith.mulf %31, %31 : vector<2x512xf32>
    %cst_14 = arith.constant dense<0.000000e+00> : vector<512xf32>
    %33 = vector.multi_reduction <add>, %32, %cst_14 [0] : vector<2x512xf32> to vector<512xf32>
    %34 = vector.shape_cast %33 : vector<512xf32> to vector<1x512xf32>
    %cst_15 = arith.constant 2.000000e+00 : f32
    %35 = vector.broadcast %cst_15 : f32 to vector<1x512xf32>
    %36 = arith.divf %34, %35 : vector<1x512xf32>
    %37 = vector.broadcast %29 : vector<1x512xf32> to vector<2x512xf32>
    %38 = arith.subf %25, %37 : vector<2x512xf32>
    %cst_16 = arith.constant 9.99999974E-6 : f32
    %39 = vector.broadcast %cst_16 : f32 to vector<1x512xf32>
    %40 = arith.addf %36, %39 : vector<1x512xf32>
    %41 = math.rsqrt %40 : vector<1x512xf32>
    %42 = vector.broadcast %41 : vector<1x512xf32> to vector<2x512xf32>
    %43 = arith.mulf %38, %42 : vector<2x512xf32>
    %cst_17 = arith.constant 0.000000e+00 : f32
    %44 = vector.broadcast %cst_17 : f32 to vector<2x512xf32>
    %45 = arith.maximumf %43, %44 : vector<2x512xf32>
    %46 = arith.truncf %45 : vector<2x512xf32> to vector<2x512xbf16>
    %c0_18 = arith.constant 0 : index
    %c0_19 = arith.constant 0 : index
    %47 = vector.load %arg3[%c0_18, %c0_19] : memref<512x100xbf16, #tpu.memory_space<vmem>>, vector<512x100xbf16>
    %cst_20 = arith.constant dense<0.000000e+00> : vector<2x100xf32>
    %48 = tpu.matmul %46, %47, %cst_20 {dimension_numbers = #tpu.dot_dimension_numbers<[1], [0], [0], [1], [0, 0, 1, 1], [], []>} : vector<2x512xbf16>, vector<512x100xbf16>, vector<2x100xf32> -> vector<2x100xf32>
    %c0_21 = arith.constant 0 : index
    %c0_22 = arith.constant 0 : index
    %49 = vector.load %arg4[%c0_21, %c0_22] : memref<2x100xf32, #tpu.memory_space<vmem>>, vector<2x100xf32>
    tpu.vector_store %arg4[%c0_21, %c0_22], %48 {strides = array<i32>} : memref<2x100xf32, #tpu.memory_space<vmem>>, vector<2x100xf32>,
    return
  }
}

</mosaic_0001>

<bundles_post_ra>
// kernel: forward.4
= control target key start
LH: loop header
LB: loop body
LE: loop exit
PB: predicated region body
PF: predicated region fallthrough
CT: control target
= control target key end

     0   :  { %vm775_vm0 = vcmask 392192   ;;  %vm1974_vm1 = vcmask 523264   ;;  %vm2394_vm2 = vcmask 517120   ;;  %vm4524_vm3 = vcmask 519168   ;;  %s11760_s1 = inlined_call_operand.vmem [shape: bf16[48,64], index: 1, kind: input, shape index: {}]   ;;  %s11761_s0 = inlined_call_operand.vmem [shape: bf16[1682,48], index: 0, kind: input, shape index: {}]   ;;  %s11762_s2 = inlined_call_operand.vmem [shape: bf16[1682,64], index: 2, kind: output, shape index: {}]  }
   0x1   :  { %v5711_v0 = vld [vmem:[%s11760_s1] sm:$0xff]   ;;  %v5712_v1 = vld [vmem:[%s11760_s1 + $0x8] sm:$0xff]   ;;  %v5713_v3 = vld [vmem:[%s11760_s1 + $0x10] sm:$0xff]   ;;  %vm4735_vm4 = vcmask 516096  }
   0x2   :  { %5487 = vmatprep.subr.bf16.mxu0 %v5711_v0  ;;  %5705 = vmatprep.subr.bf16.mxu1 %v5711_v0  ;;  %v5714_v2 = vld [vmem:[%s11761_s0] sm:$0xff]   ;;  %v5715_v4 = vld [vmem:[%s11761_s0 + $0x8] sm:$0xff]   ;;  %v5716_v5 = vld [vmem:[%s11761_s0 + $0x10] sm:$0xff]  }
   0x3   :  { %5488 = vmatpush3.bf16.msra.mxu0 %v5711_v0  ;;  %5708 = vmatpush3.bf16.msra.mxu1 %v5711_v0  ;;  %v5717_v6 = vld [vmem:[%s11761_s0 + $0x18] sm:$0xff]   ;;  %v5718_v7 = vld [vmem:[%s11761_s0 + $0x20] sm:$0xff]   ;;  %v5719_v8 = vld [vmem:[%s11761_s0 + $0x28] sm:$0xff]  }
   0x4   :  { %5489 = vmatprep.subr.bf16.mxu0 %v5712_v1  ;;  %5706 = vmatprep.subr.bf16.mxu1 %v5712_v1  ;;  %v5720_v9 = vld [vmem:[%s11761_s0 + $0x30] sm:$0xff]   ;;  %v5721_v10 = vld [vmem:[%s11761_s0 + $0x38] sm:$0xff]   ;;  %v5722_v11 = vld [vmem:[%s11761_s0 + $0x40] sm:$0xff]  }
   0x5   :  { %5493 = vmatprep.mubr.msk.bf16.mxu0 %vm775_vm0, %v5714_v2  ;;  %v5723_v12 = vld [vmem:[%s11761_s0 + $0x48] sm:$0xff]   ;;  %v5724_v13 = vld [vmem:[%s11761_s0 + $0x50] sm:$0xff]   ;;  %v5725_v14 = vld [vmem:[%s11761_s0 + $0x58] sm:$0xff]  }
   0x6   :  { %v5726_v15 = vld [vmem:[%s11761_s0 + $0x60] sm:$0xff]   ;;  %v5727_v16 = vld [vmem:[%s11761_s0 + $0x68] sm:$0xff]   ;;  %v5728_v17 = vld [vmem:[%s11761_s0 + $0x70] sm:$0xff]  }
   0x7   :  { %5490 = vmatpush3.bf16.msra.mxu0 %v5712_v1  ;;  %5709 = vmatpush3.bf16.msra.mxu1 %v5712_v1  ;;  %v5729_v18 = vld [vmem:[%s11761_s0 + $0x78] sm:$0xff]   ;;  %v5730_v19 = vld [vmem:[%s11761_s0 + $0x80] sm:$0xff]   ;;  %v5731_v20 = vld [vmem:[%s11761_s0 + $0x88] sm:$0xff]  }
   0x8   :  { %5491 = vmatprep.subr.bf16.mxu0 %v5713_v3  ;;  %5707 = vmatprep.subr.bf16.mxu1 %v5713_v3  ;;  %v5732_v21 = vld [vmem:[%s11761_s0 + $0x90] sm:$0xff]   ;;  %v5733_v22 = vld [vmem:[%s11761_s0 + $0x98] sm:$0xff]   ;;  %v5734_v23 = vld [vmem:[%s11761_s0 + $0xa0] sm:$0xff]  }
   0x9   :  { %v5735_v24 = vld [vmem:[%s11761_s0 + $0xa8] sm:$0xff]   ;;  %v5736_v25 = vld [vmem:[%s11761_s0 + $0xb0] sm:$0xff]   ;;  %v5769_v27 = vld [vmem:[%s11761_s0 + $0x1b8] sm:$0xff]  }
   0xa   :  { %v5768_v26 = vld [vmem:[%s11761_s0 + $0x1b0] sm:$0xff]   ;;  %v5737_v28 = vld [vmem:[%s11761_s0 + $0xb8] sm:$0xff]   ;;  %v5738_v29 = vld [vmem:[%s11761_s0 + $0xc0] sm:$0xff]  }
   0xb   :  { %5492 = vmatpush3.bf16.msra.mxu0 %v5713_v3  ;;  %5710 = vmatpush3.bf16.msra.mxu1 %v5713_v3  ;;  %v5770_v30 = vld [vmem:[%s11761_s0 + $0x1c0] sm:$0xff]   ;;  %v5771_v31 = vld [vmem:[%s11761_s0 + $0x1c8] sm:$0xff]   ;;  %v5740_v33 = vld [vmem:[%s11761_s0 + $0xd0] sm:$0xff]  }
   0xc   :  { %5601 = vmatprep.mubr.msk.bf16.mxu1 %vm775_vm0, %v5768_v26  ;;  %v5739_v32 = vld [vmem:[%s11761_s0 + $0xc8] sm:$0xff]   ;;  %v5772_v34 = vld [vmem:[%s11761_s0 + $0x1d0] sm:$0xff]   ;;  %v5773_v35 = vld [vmem:[%s11761_s0 + $0x1d8] sm:$0xff]  }
   0xd   :  { %v5741_v36 = vld [vmem:[%s11761_s0 + $0xd8] sm:$0xff]   ;;  %v5742_v37 = vld [vmem:[%s11761_s0 + $0xe0] sm:$0xff]   ;;  %v5775_v39 = vld [vmem:[%s11761_s0 + $0x1e8] sm:$0xff]  }
   0xe   :  { %5494 = vmatmul.mubr.msk.bf16.vlgmr.msra.gmra.mrb[0].mxu0 %vm775_vm0, %v5715_v4  ;;  %5602 = vmatmul.mubr.msk.bf16.vlgmr.msra.gmra.mrb[0].mxu1 %vm775_vm0, %v5769_v27  ;;  %v5774_v38 = vld [vmem:[%s11761_s0 + $0x1e0] sm:$0xff]   ;;  %v5743_v40 = vld [vmem:[%s11761_s0 + $0xe8] sm:$0xff]   ;;  %v5744_v41 = vld [vmem:[%s11761_s0 + $0xf0] sm:$0xff]  }
   0xf   :  { %5497 = vmatprep.mubr.msk.bf16.mxu0 %vm775_vm0, %v5716_v5  ;;  %5605 = vmatprep.mubr.msk.bf16.mxu1 %vm775_vm0, %v5770_v30  ;;  %v5776_v42 = vld [vmem:[%s11761_s0 + $0x1f0] sm:$0xff]   ;;  %v5777_v43 = vld [vmem:[%s11761_s0 + $0x1f8] sm:$0xff]   ;;  %v5746_v45 = vld [vmem:[%s11761_s0 + $0x100] sm:$0xff]  }
  0x10   :  { %v5745_v44 = vld [vmem:[%s11761_s0 + $0xf8] sm:$0xff]   ;;  %v5778_v46 = vld [vmem:[%s11761_s0 + $0x200] sm:$0xff]   ;;  %v5779_v47 = vld [vmem:[%s11761_s0 + $0x208] sm:$0xff]  }
  0x11   :  { %v5747_v48 = vld [vmem:[%s11761_s0 + $0x108] sm:$0xff]   ;;  %v5748_v49 = vld [vmem:[%s11761_s0 + $0x110] sm:$0xff]   ;;  %v5781_v51 = vld [vmem:[%s11761_s0 + $0x218] sm:$0xff]  }
  0x12   :  { %v5780_v50 = vld [vmem:[%s11761_s0 + $0x210] sm:$0xff]   ;;  %v5749_v52 = vld [vmem:[%s11761_s0 + $0x118] sm:$0xff]   ;;  %v5750_v53 = vld [vmem:[%s11761_s0 + $0x120] sm:$0xff]  }
  0x13   :  { %v5782_v54 = vld [vmem:[%s11761_s0 + $0x220] sm:$0xff]   ;;  %v5783_v55 = vld [vmem:[%s11761_s0 + $0x228] sm:$0xff]   ;;  %v5752_v57 = vld [vmem:[%s11761_s0 + $0x130] sm:$0xff]  }
  0x14   :  { %v5751_v56 = vld [vmem:[%s11761_s0 + $0x128] sm:$0xff]   ;;  %v5784_v58 = vld [vmem:[%s11761_s0 + $0x230] sm:$0xff]   ;;  %v5785_v59 = vld [vmem:[%s11761_s0 + $0x238] sm:$0xff]  }
  0x15   :  { %v5753_v60 = vld [vmem:[%s11761_s0 + $0x138] sm:$0xff]   ;;  %v5754_v61 = vld [vmem:[%s11761_s0 + $0x140] sm:$0xff]   ;;  %v5787_v63 = vld [vmem:[%s11761_s0 + $0x248] sm:$0xff]  }
  0x16   :  { %5498 = vmatmul.mubr.msk.bf16.gmra.mrb[4].mxu0 %vm775_vm0, %v5717_v6  ;;  %5606 = vmatmul.mubr.msk.bf16.gmra.mrb[4].mxu1 %vm775_vm0, %v5771_v31  ;;  %v5786_v62 = vld [vmem:[%s11761_s0 + $0x240] sm:$0xff]   ;;  %v5755_v0 = vld [vmem:[%s11761_s0 + $0x148] sm:$0xff]   ;;  %v5756_v1 = vld [vmem:[%s11761_s0 + $0x150] sm:$0xff]  }
  0x17   :  { %5501 = vmatprep.mubr.msk.bf16.mxu0 %vm775_vm0, %v5718_v7  ;;  %5609 = vmatprep.mubr.msk.bf16.mxu1 %vm775_vm0, %v5772_v34  ;;  %v5788_v2 = vld [vmem:[%s11761_s0 + $0x250] sm:$0xff]   ;;  %v5789_v3 = vld [vmem:[%s11761_s0 + $0x258] sm:$0xff]   ;;  %v5758_v5 = vld [vmem:[%s11761_s0 + $0x160] sm:$0xff]  }
  0x18   :  { %v5757_v4 = vld [vmem:[%s11761_s0 + $0x158] sm:$0xff]   ;;  %v5790_v6 = vld [vmem:[%s11761_s0 + $0x260] sm:$0xff]   ;;  %v5791_v7 = vld [vmem:[%s11761_s0 + $0x268] sm:$0xff]  }
  0x19   :  { %v5801_v27 = vld [vmem:[%s11761_s0 + $0x2b8] sm:$0xff]  }
  0x1e   :  { %5502 = vmatmul.mubr.msk.bf16.gmra.mrb[8].mxu0 %vm775_vm0, %v5719_v8  ;;  %5610 = vmatmul.mubr.msk.bf16.gmra.mrb[8].mxu1 %vm775_vm0, %v5773_v35  ;;  %v5759_v8 = vld [vmem:[%s11761_s0 + $0x168] sm:$0xff]  }
  0x1f   :  { %5505 = vmatprep.mubr.msk.bf16.mxu0 %vm775_vm0, %v5720_v9  ;;  %5613 = vmatprep.mubr.msk.bf16.mxu1 %vm775_vm0, %v5774_v38  ;;  %v5760_v9 = vld [vmem:[%s11761_s0 + $0x170] sm:$0xff]  }
  0x26   :  { %5506 = vmatmul.mubr.msk.bf16.gmra.mrb[12].mxu0 %vm775_vm0, %v5721_v10  ;;  %5614 = vmatmul.mubr.msk.bf16.gmra.mrb[12].mxu1 %vm775_vm0, %v5775_v39  ;;  %v5792_v10 = vld [vmem:[%s11761_s0 + $0x270] sm:$0xff]   ;;  %v5803_v39 = vld [vmem:[%s11761_s0 + $0x2c8] sm:$0xff]  }
  0x27   :  { %5509 = vmatprep.mubr.msk.bf16.mxu0 %vm775_vm0, %v5722_v11  ;;  %5617 = vmatprep.mubr.msk.bf16.mxu1 %vm775_vm0, %v5776_v42  ;;  %v5793_v11 = vld [vmem:[%s11761_s0 + $0x278] sm:$0xff]  }
  0x2e   :  { %5510 = vmatmul.mubr.msk.bf16.gmra.mrb[16].mxu0 %vm775_vm0, %v5723_v12  ;;  %5618 = vmatmul.mubr.msk.bf16.gmra.mrb[16].mxu1 %vm775_vm0, %v5777_v43  ;;  %v5761_v12 = vld [vmem:[%s11761_s0 + $0x178] sm:$0xff]  }
  0x2f   :  { %5513 = vmatprep.mubr.msk.bf16.mxu0 %vm775_vm0, %v5724_v13  ;;  %5621 = vmatprep.mubr.msk.bf16.mxu1 %vm775_vm0, %v5778_v46  ;;  %v5762_v13 = vld [vmem:[%s11761_s0 + $0x180] sm:$0xff]  }
  0x36   :  { %5514 = vmatmul.mubr.msk.bf16.gmra.mrb[20].mxu0 %vm775_vm0, %v5725_v14  ;;  %5622 = vmatmul.mubr.msk.bf16.gmra.mrb[20].mxu1 %vm775_vm0, %v5779_v47  ;;  %v5794_v14 = vld [vmem:[%s11761_s0 + $0x280] sm:$0xff]  }
  0x37   :  { %5517 = vmatprep.mubr.msk.bf16.mxu0 %vm775_vm0, %v5726_v15  ;;  %5625 = vmatprep.mubr.msk.bf16.mxu1 %vm775_vm0, %v5780_v50  ;;  %v5795_v15 = vld [vmem:[%s11761_s0 + $0x288] sm:$0xff]   ;;  %v5804_v50 = vld [vmem:[%s11761_s0 + $0x2d0] sm:$0xff]  }
  0x3e   :  { %5518 = vmatmul.mubr.msk.bf16.gmra.mrb[24].mxu0 %vm775_vm0, %v5727_v16  ;;  %5626 = vmatmul.mubr.msk.bf16.gmra.mrb[24].mxu1 %vm775_vm0, %v5781_v51  ;;  %v5763_v16 = vld [vmem:[%s11761_s0 + $0x188] sm:$0xff]  }
  0x3f   :  { %5521 = vmatprep.mubr.msk.bf16.mxu0 %vm775_vm0, %v5728_v17  ;;  %5629 = vmatprep.mubr.msk.bf16.mxu1 %vm775_vm0, %v5782_v54  ;;  %v5764_v17 = vld [vmem:[%s11761_s0 + $0x190] sm:$0xff]  }
  0x46   :  { %5522 = vmatmul.mubr.msk.bf16.gmra.mrb[28].mxu0 %vm775_vm0, %v5729_v18  ;;  %5630 = vmatmul.mubr.msk.bf16.gmra.mrb[28].mxu1 %vm775_vm0, %v5783_v55  ;;  %v5796_v18 = vld [vmem:[%s11761_s0 + $0x290] sm:$0xff]  }
  0x47   :  { %5525 = vmatprep.mubr.msk.bf16.mxu0 %vm775_vm0, %v5730_v19  ;;  %5633 = vmatprep.mubr.msk.bf16.mxu1 %vm775_vm0, %v5784_v58  ;;  %v5797_v19 = vld [vmem:[%s11761_s0 + $0x298] sm:$0xff]  }
  0x4e   :  { %5526 = vmatmul.mubr.msk.bf16.gmra.mrb[32].mxu0 %vm775_vm0, %v5731_v20  ;;  %5634 = vmatmul.mubr.msk.bf16.gmra.mrb[32].mxu1 %vm775_vm0, %v5785_v59  ;;  %v5765_v20 = vld [vmem:[%s11761_s0 + $0x198] sm:$0xff]  }
  0x4f   :  { %5529 = vmatprep.mubr.msk.bf16.mxu0 %vm775_vm0, %v5732_v21  ;;  %5637 = vmatprep.mubr.msk.bf16.mxu1 %vm775_vm0, %v5786_v62  ;;  %v5766_v21 = vld [vmem:[%s11761_s0 + $0x1a0] sm:$0xff]  }
  0x56   :  { %5530 = vmatmul.mubr.msk.bf16.gmra.mrb[36].mxu0 %vm775_vm0, %v5733_v22  ;;  %5638 = vmatmul.mubr.msk.bf16.gmra.mrb[36].mxu1 %vm775_vm0, %v5787_v63  ;;  %v5798_v22 = vld [vmem:[%s11761_s0 + $0x2a0] sm:$0xff]  }
  0x57   :  { %5533 = vmatprep.mubr.msk.bf16.mxu0 %vm775_vm0, %v5734_v23  ;;  %5641 = vmatprep.mubr.msk.bf16.mxu1 %vm775_vm0, %v5788_v2  ;;  %v5799_v23 = vld [vmem:[%s11761_s0 + $0x2a8] sm:$0xff]  }
  0x5e   :  { %5534 = vmatmul.mubr.msk.bf16.gmra.mrb[40].mxu0 %vm775_vm0, %v5735_v24  ;;  %5642 = vmatmul.mubr.msk.bf16.gmra.mrb[40].mxu1 %vm775_vm0, %v5789_v3  ;;  %v5767_v24 = vld [vmem:[%s11761_s0 + $0x1a8] sm:$0xff]  }
  0x5f   :  { %5537 = vmatprep.mubr.msk.bf16.mxu0 %vm775_vm0, %v5736_v25  ;;  %5645 = vmatprep.mubr.msk.bf16.mxu1 %vm775_vm0, %v5790_v6  ;;  %v5800_v25 = vld [vmem:[%s11761_s0 + $0x2b0] sm:$0xff]   ;;  %v5807_v3 = vld [vmem:[%s11761_s0 + $0x2e8] sm:$0xff]  }
  0x66   :  { %5538 = vmatmul.mubr.msk.bf16.gmra.mrb[44].mxu0 %vm775_vm0, %v5737_v28  ;;  %5646 = vmatmul.mubr.msk.bf16.gmra.mrb[44].mxu1 %vm775_vm0, %v5791_v7 }
  0x67   :  { %5541 = vmatprep.mubr.msk.bf16.mxu0 %vm775_vm0, %v5738_v29  ;;  %5649 = vmatprep.mubr.msk.bf16.mxu1 %vm775_vm0, %v5792_v10 }
  0x6e   :  { %5542 = vmatmul.mubr.msk.bf16.gmra.mrb[48].mxu0 %vm775_vm0, %v5739_v32  ;;  %5650 = vmatmul.mubr.msk.bf16.gmra.mrb[48].mxu1 %vm775_vm0, %v5793_v11 }
  0x6f   :  { %5545 = vmatprep.mubr.msk.bf16.mxu0 %vm775_vm0, %v5740_v33  ;;  %5653 = vmatprep.mubr.msk.bf16.mxu1 %vm775_vm0, %v5794_v14  ;;  %v5808_v14 = vld [vmem:[%s11761_s0 + $0x2f0] sm:$0xff]  }
  0x76   :  { %5546 = vmatmul.mubr.msk.bf16.gmra.mrb[52].mxu0 %vm775_vm0, %v5741_v36  ;;  %5654 = vmatmul.mubr.msk.bf16.gmra.mrb[52].mxu1 %vm775_vm0, %v5795_v15  ;;  %v5802_v36 = vld [vmem:[%s11761_s0 + $0x2c0] sm:$0xff]  }
  0x77   :  { %5549 = vmatprep.mubr.msk.bf16.mxu0 %vm775_vm0, %v5742_v37  ;;  %5657 = vmatprep.mubr.msk.bf16.mxu1 %vm775_vm0, %v5796_v18 }
  0x7e   :  { %5550 = vmatmul.mubr.msk.bf16.gmra.mrb[56].mxu0 %vm775_vm0, %v5743_v40  ;;  %5658 = vmatmul.mubr.msk.bf16.gmra.mrb[56].mxu1 %vm775_vm0, %v5797_v19 }
  0x7f   :  { %5553 = vmatprep.mubr.msk.bf16.mxu0 %vm775_vm0, %v5744_v41  ;;  %5661 = vmatprep.mubr.msk.bf16.mxu1 %vm775_vm0, %v5798_v22 }
  0x86   :  { %5554 = vmatmul.mubr.msk.bf16.gmra.mrb[60].mxu0 %vm775_vm0, %v5745_v44  ;;  %5662 = vmatmul.mubr.msk.bf16.gmra.mrb[60].mxu1 %vm775_vm0, %v5799_v23 }
  0x87   :  { %5557 = vmatprep.mubr.msk.bf16.mxu0 %vm775_vm0, %v5746_v45  ;;  %5665 = vmatprep.mubr.msk.bf16.mxu1 %vm775_vm0, %v5800_v25 }
  0x8e   :  { %5558 = vmatmul.mubr.msk.bf16.gmra.mrb[64].mxu0 %vm775_vm0, %v5747_v48  ;;  %5666 = vmatmul.mubr.msk.bf16.gmra.mrb[64].mxu1 %vm775_vm0, %v5801_v27 }
  0x8f   :  { %5561 = vmatprep.mubr.msk.bf16.mxu0 %vm775_vm0, %v5748_v49  ;;  %5669 = vmatprep.mubr.msk.bf16.mxu1 %vm775_vm0, %v5802_v36 }
  0x96   :  { %5562 = vmatmul.mubr.msk.bf16.gmra.mrb[68].mxu0 %vm775_vm0, %v5749_v52  ;;  %5670 = vmatmul.mubr.msk.bf16.gmra.mrb[68].mxu1 %vm775_vm0, %v5803_v39 }
  0x97   :  { %5565 = vmatprep.mubr.msk.bf16.mxu0 %vm775_vm0, %v5750_v53  ;;  %v5805_v53 = vld [vmem:[%s11761_s0 + $0x2d8] sm:$0xff]   ;;  %5673 = vmatprep.mubr.msk.bf16.mxu1 %vm775_vm0, %v5804_v50  ;;  %v5812_v50 = vld [vmem:[%s11761_s0 + $0x310] sm:$0xff]  }
  0x9e   :  { %5566 = vmatmul.mubr.msk.bf16.gmra.mrb[72].mxu0 %vm775_vm0, %v5751_v56  ;;  %5674 = vmatmul.mubr.msk.bf16.gmra.mrb[72].mxu1 %vm775_vm0, %v5805_v53 }
  0x9f   :  { %5569 = vmatprep.mubr.msk.bf16.mxu0 %vm775_vm0, %v5752_v57 }
  0xa6   :  { %5570 = vmatmul.mubr.msk.bf16.gmra.mrb[76].mxu0 %vm775_vm0, %v5753_v60 }
  0xa7   :  { %5573 = vmatprep.mubr.msk.bf16.mxu0 %vm775_vm0, %v5754_v61 }
  0xae   :  { %5574 = vmatmul.mubr.msk.bf16.gmra.mrb[80].mxu0 %vm775_vm0, %v5755_v0  ;;  %v5806_v0 = vld [vmem:[%s11761_s0 + $0x2e0] sm:$0xff]  }
  0xaf   :  { %5577 = vmatprep.mubr.msk.bf16.mxu0 %vm775_vm0, %v5756_v1  ;;  %5677 = vmatprep.mubr.msk.bf16.mxu1 %vm775_vm0, %v5806_v0 }
  0xb0   :  { %5678 = vmatmul.mubr.msk.bf16.gmra.mrb[76].mxu1 %vm775_vm0, %v5807_v3 }
  0xb1   :  { %5681 = vmatprep.mubr.msk.bf16.mxu1 %vm775_vm0, %v5808_v14 }
  0xb6   :  { %5578 = vmatmul.mubr.msk.bf16.gmra.mrb[84].mxu0 %vm775_vm0, %v5757_v4 }
  0xb7   :  { %5581 = vmatprep.mubr.msk.bf16.mxu0 %vm775_vm0, %v5758_v5 }
  0xbe   :  { %5582 = vmatmul.mubr.msk.bf16.gmra.mrb[88].mxu0 %vm775_vm0, %v5759_v8 }
  0xbf   :  { %5585 = vmatprep.mubr.msk.bf16.mxu0 %vm775_vm0, %v5760_v9 }
  0xc6   :  { %5586 = vmatmul.mubr.msk.bf16.gmra.mrb[92].mxu0 %vm775_vm0, %v5761_v12 }
  0xc7   :  { %5589 = vmatprep.mubr.msk.bf16.mxu0 %vm775_vm0, %v5762_v13 }
  0xce   :  { %5590 = vmatmul.mubr.msk.bf16.gmra.mrb[96].mxu0 %vm775_vm0, %v5763_v16 }
  0xcf   :  { %5593 = vmatprep.mubr.msk.bf16.mxu0 %vm775_vm0, %v5764_v17  ;;  %v5809_v17 = vld [vmem:[%s11761_s0 + $0x2f8] sm:$0xff]  }
  0xd0   :  { %5682 = vmatmul.mubr.msk.bf16.gmra.mrb[80].mxu1 %vm775_vm0, %v5809_v17 }
  0xd6   :  { %5594 = vmatmul.mubr.msk.bf16.gmra.mrb[100].mxu0 %vm775_vm0, %v5765_v20 }
  0xd7   :  { %5597 = vmatprep.mubr.msk.bf16.mxu0 %vm775_vm0, %v5766_v21 }
  0xde   :  { %5598 = vmatmul.mubr.msk.bf16.gmra.mrb[104].mxu0 %vm775_vm0, %v5767_v24 }
  0xe1   :  { %v6193_v26 = vpop.f32.mrb[0].mxu0 }
  0xe2   :  { %12294 = vst [vmem:[#allocation2_spill] sm:$0xff] %v6193_v26  ;;  %v6198_v28 = vpop.f32.mrb[1].mxu0  ;;  %v1978_v34 = vsel %vm1974_vm1, %v6193_v26, 0.0 }
  0xe3   :  { %12295 = vst [vmem:[#allocation3_spill] sm:$0xff] %v6198_v28  ;;  %v6201_v29 = vpop.f32.mrb[2].mxu0  ;;  %v1975_v31 = vsel %vm1974_vm1, %v6198_v28, 0.0 }
  0xe4   :  { %12296 = vst [vmem:[#allocation4_spill] sm:$0xff] %v6201_v29  ;;  %v6204_v30 = vpop.f32.mrb[3].mxu0  ;;  %v1980_v37 = vsel %vm1974_vm1, %v6201_v29, 0.0 }
  0xe5   :  { %12297 = vst [vmem:[#allocation5_spill] sm:$0xff] %v6204_v30  ;;  %v1976_v32 = vsel %vm1974_vm1, %v6204_v30, 0.0 }
  0xe6   :  { %v1977_v33 = vadd.f32 %v1976_v32, %v1975_v31  ;;  %v5810_v32 = vld [vmem:[%s11761_s0 + $0x300] sm:$0xff]  }
  0xe7   :  { %5685 = vmatprep.mubr.msk.bf16.mxu1 %vm775_vm0, %v5810_v32 }
  0xe8   :  { %v1979_v35 = vadd.f32 %v1978_v34, %v1977_v33 }
  0xe9   :  { %v6217_v38 = vpop.f32.mrb[4].mxu0 }
  0xea   :  { %12298 = vst [vmem:[#allocation6_spill] sm:$0xff] %v6217_v38  ;;  %v1981_v40 = vadd.f32 %v1980_v37, %v1979_v35  ;;  %v6222_v41 = vpop.f32.mrb[5].mxu0  ;;  %v1986_v48 = vsel %vm1974_vm1, %v6217_v38, 0.0  ;;  %v5811_v35 = vld [vmem:[%s11761_s0 + $0x308] sm:$0xff]  }
  0xeb   :  { %12299 = vst [vmem:[#allocation7_spill] sm:$0xff] %v6222_v41  ;;  %v1982_v42 = vsel %vm1974_vm1, %v6222_v41, 0.0  ;;  %v6227_v43 = vpop.f32.mrb[6].mxu0  ;;  %5686 = vmatmul.mubr.msk.bf16.gmra.mrb[84].mxu1 %vm775_vm0, %v5811_v35 }
  0xec   :  { %12300 = vst [vmem:[#allocation8_spill] sm:$0xff] %v6227_v43  ;;  %v1983_v44 = vadd.f32 %v1982_v42, %v1981_v40  ;;  %v6230_v45 = vpop.f32.mrb[7].mxu0  ;;  %v1988_v51 = vsel %vm1974_vm1, %v6227_v43, 0.0  ;;  %5689 = vmatprep.mubr.msk.bf16.mxu1 %vm775_vm0, %v5812_v50 }
  0xed   :  { %12301 = vst [vmem:[#allocation9_spill] sm:$0xff] %v6230_v45  ;;  %v1984_v46 = vsel %vm1974_vm1, %v6230_v45, 0.0 }
  0xee   :  { %v1985_v47 = vadd.f32 %v1984_v46, %v1983_v44 }
  0xf0   :  { %v1987_v49 = vadd.f32 %v1986_v48, %v1985_v47 }
  0xf1   :  { %v6241_v52 = vpop.f32.mrb[8].mxu0 }
  0xf2   :  { %12302 = vst [vmem:[#allocation10_spill] sm:$0xff] %v6241_v52  ;;  %v1989_v54 = vadd.f32 %v1988_v51, %v1987_v49  ;;  %v6246_v55 = vpop.f32.mrb[9].mxu0  ;;  %v1994_v62 = vsel %vm1974_vm1, %v6241_v52, 0.0 }
  0xf3   :  { %12303 = vst [vmem:[#allocation11_spill] sm:$0xff] %v6246_v55  ;;  %v1990_v56 = vsel %vm1974_vm1, %v6246_v55, 0.0  ;;  %v6251_v57 = vpop.f32.mrb[10].mxu0 }
  0xf4   :  { %12304 = vst [vmem:[#allocation12_spill] sm:$0xff] %v6251_v57  ;;  %v1991_v58 = vadd.f32 %v1990_v56, %v1989_v54  ;;  %v6254_v59 = vpop.f32.mrb[11].mxu0  ;;  %v1996_v1 = vsel %vm1974_vm1, %v6251_v57, 0.0  ;;  %v5813_v54 = vld [vmem:[%s11761_s0 + $0x318] sm:$0xff]  }
  0xf5   :  { %12305 = vst [vmem:[#allocation13_spill] sm:$0xff] %v6254_v59  ;;  %v1992_v60 = vsel %vm1974_vm1, %v6254_v59, 0.0  ;;  %5690 = vmatmul.mubr.msk.bf16.gmra.mrb[88].mxu1 %vm775_vm0, %v5813_v54  ;;  %v5818_v54 = vld [vmem:[%s11761_s0 + $0x340] sm:$0xff]  }
  0xf6   :  { %v1993_v61 = vadd.f32 %v1992_v60, %v1991_v58 }
  0xf8   :  { %v1995_v63 = vadd.f32 %v1994_v62, %v1993_v61 }
  0xf9   :  { %v6265_v2 = vpop.f32.mrb[12].mxu0 }
  0xfa   :  { %12306 = vst [vmem:[#allocation14_spill] sm:$0xff] %v6265_v2  ;;  %v1997_v4 = vadd.f32 %v1996_v1, %v1995_v63  ;;  %v6270_v5 = vpop.f32.mrb[13].mxu0  ;;  %v2002_v12 = vsel %vm1974_vm1, %v6265_v2, 0.0 }
  0xfb   :  { %12307 = vst [vmem:[#allocation15_spill] sm:$0xff] %v6270_v5  ;;  %v1998_v6 = vsel %vm1974_vm1, %v6270_v5, 0.0  ;;  %v6275_v7 = vpop.f32.mrb[14].mxu0 }
  0xfc   :  { %12308 = vst [vmem:[#allocation16_spill] sm:$0xff] %v6275_v7  ;;  %v1999_v8 = vadd.f32 %v1998_v6, %v1997_v4  ;;  %v6278_v9 = vpop.f32.mrb[15].mxu0  ;;  %v2004_v15 = vsel %vm1974_vm1, %v6275_v7, 0.0  ;;  %v5814_v6 = vld [vmem:[%s11761_s0 + $0x320] sm:$0xff]  }
  0xfd   :  { %12309 = vst [vmem:[#allocation17_spill] sm:$0xff] %v6278_v9  ;;  %v2000_v10 = vsel %vm1974_vm1, %v6278_v9, 0.0  ;;  %5693 = vmatprep.mubr.msk.bf16.mxu1 %vm775_vm0, %v5814_v6 }
  0xfe   :  { %v2001_v11 = vadd.f32 %v2000_v10, %v1999_v8 }
 0x100   :  { %v2003_v13 = vadd.f32 %v2002_v12, %v2001_v11  ;;  %v5815_v11 = vld [vmem:[%s11761_s0 + $0x328] sm:$0xff]  }
 0x101   :  { %v6289_v16 = vpop.f32.mrb[16].mxu0  ;;  %5694 = vmatmul.mubr.msk.bf16.gmra.mrb[92].mxu1 %vm775_vm0, %v5815_v11 }
 0x102   :  { %12310 = vst [vmem:[#allocation18_spill] sm:$0xff] %v6289_v16  ;;  %v2005_v18 = vadd.f32 %v2004_v15, %v2003_v13  ;;  %v6294_v19 = vpop.f32.mrb[17].mxu0  ;;  %v2010_v27 = vsel %vm1974_vm1, %v6289_v16, 0.0 }
 0x103   :  { %12311 = vst [vmem:[#allocation19_spill] sm:$0xff] %v6294_v19  ;;  %v2006_v20 = vsel %vm1974_vm1, %v6294_v19, 0.0  ;;  %v6299_v21 = vpop.f32.mrb[18].mxu0 }
 0x104   :  { %12312 = vst [vmem:[#allocation20_spill] sm:$0xff] %v6299_v21  ;;  %v2007_v22 = vadd.f32 %v2006_v20, %v2005_v18  ;;  %v6302_v23 = vpop.f32.mrb[19].mxu0  ;;  %v2012_v33 = vsel %vm1974_vm1, %v6299_v21, 0.0 }
 0x105   :  { %12313 = vst [vmem:[#allocation21_spill] sm:$0xff] %v6302_v23  ;;  %v2008_v24 = vsel %vm1974_vm1, %v6302_v23, 0.0 }
 0x106   :  { %v2009_v25 = vadd.f32 %v2008_v24, %v2007_v22 }
 0x108   :  { %v2011_v31 = vadd.f32 %v2010_v27, %v2009_v25  ;;  %v5816_v27 = vld [vmem:[%s11761_s0 + $0x330] sm:$0xff]  }
 0x109   :  { %v6313_v34 = vpop.f32.mrb[20].mxu0  ;;  %5697 = vmatprep.mubr.msk.bf16.mxu1 %vm775_vm0, %v5816_v27 }
 0x10a   :  { %12314 = vst [vmem:[#allocation22_spill] sm:$0xff] %v6313_v34  ;;  %v2013_v36 = vadd.f32 %v2012_v33, %v2011_v31  ;;  %v6318_v37 = vpop.f32.mrb[21].mxu0  ;;  %v2018_v48 = vsel %vm1974_vm1, %v6313_v34, 0.0  ;;  %v5817_v33 = vld [vmem:[%s11761_s0 + $0x338] sm:$0xff]  }
 0x10b   :  { %12315 = vst [vmem:[#allocation23_spill] sm:$0xff] %v6318_v37  ;;  %v2014_v39 = vsel %vm1974_vm1, %v6318_v37, 0.0  ;;  %v6323_v40 = vpop.f32.mrb[22].mxu0  ;;  %5698 = vmatmul.mubr.msk.bf16.gmra.mrb[96].mxu1 %vm775_vm0, %v5817_v33 }
 0x10c   :  { %12316 = vst [vmem:[#allocation24_spill] sm:$0xff] %v6323_v40  ;;  %v2015_v42 = vadd.f32 %v2014_v39, %v2013_v36  ;;  %v6326_v44 = vpop.f32.mrb[23].mxu0  ;;  %v2020_v51 = vsel %vm1974_vm1, %v6323_v40, 0.0  ;;  %5701 = vmatprep.mubr.msk.bf16.mxu1 %vm775_vm0, %v5818_v54 }
 0x10d   :  { %12317 = vst [vmem:[#allocation25_spill] sm:$0xff] %v6326_v44  ;;  %v2016_v46 = vsel %vm1974_vm1, %v6326_v44, 0.0 }
 0x10e   :  { %v2017_v47 = vadd.f32 %v2016_v46, %v2015_v42 }
 0x110   :  { %v2019_v49 = vadd.f32 %v2018_v48, %v2017_v47 }
 0x111   :  { %v6337_v53 = vpop.f32.mrb[24].mxu0 }
 0x112   :  { %12318 = vst [vmem:[#allocation26_spill] sm:$0xff] %v6337_v53  ;;  %v2021_v56 = vadd.f32 %v2020_v51, %v2019_v49  ;;  %v6342_v58 = vpop.f32.mrb[25].mxu0  ;;  %v2026_v3 = vsel %vm1974_vm1, %v6337_v53, 0.0 }
 0x113   :  { %12319 = vst [vmem:[#allocation27_spill] sm:$0xff] %v6342_v58  ;;  %v2022_v60 = vsel %vm1974_vm1, %v6342_v58, 0.0  ;;  %v6347_v61 = vpop.f32.mrb[26].mxu0 }
 0x114   :  { %12320 = vst [vmem:[#allocation28_spill] sm:$0xff] %v6347_v61  ;;  %v2023_v62 = vadd.f32 %v2022_v60, %v2021_v56  ;;  %v6350_v63 = vpop.f32.mrb[27].mxu0  ;;  %v2028_v8 = vsel %vm1974_vm1, %v6347_v61, 0.0 }
 0x115   :  { %12321 = vst [vmem:[#allocation29_spill] sm:$0xff] %v6350_v63  ;;  %v2024_v0 = vsel %vm1974_vm1, %v6350_v63, 0.0 }
 0x116   :  { %v2025_v1 = vadd.f32 %v2024_v0, %v2023_v62  ;;  %v5819_v62 = vld [vmem:[%s11761_s0 + $0x348] ss:$0 sps:$4 sm:$0x11]  }
 0x117   :  { %5702 = vmatmul.mubr.msk.bf16.gmra.mrb[100].mxu1 %vm775_vm0, %v5819_v62 }
 0x118   :  { %v2027_v4 = vadd.f32 %v2026_v3, %v2025_v1 }
 0x119   :  { %v6361_v10 = vpop.f32.mrb[28].mxu0 }
 0x11a   :  { %12322 = vst [vmem:[#allocation30_spill] sm:$0xff] %v6361_v10  ;;  %v2029_v12 = vadd.f32 %v2028_v8, %v2027_v4  ;;  %v6366_v13 = vpop.f32.mrb[29].mxu0  ;;  %v2034_v24 = vsel %vm1974_vm1, %v6361_v10, 0.0 }
 0x11b   :  { %12323 = vst [vmem:[#allocation31_spill] sm:$0xff] %v6366_v13  ;;  %v2030_v14 = vsel %vm1974_vm1, %v6366_v13, 0.0  ;;  %v6371_v15 = vpop.f32.mrb[30].mxu0 }
 0x11c   :  { %12324 = vst [vmem:[#allocation32_spill] sm:$0xff] %v6371_v15  ;;  %v2031_v17 = vadd.f32 %v2030_v14, %v2029_v12  ;;  %v6374_v18 = vpop.f32.mrb[31].mxu0  ;;  %v2036_v31 = vsel %vm1974_vm1, %v6371_v15, 0.0 }
 0x11d   :  { %12325 = vst [vmem:[#allocation33_spill] sm:$0xff] %v6374_v18  ;;  %v2032_v20 = vsel %vm1974_vm1, %v6374_v18, 0.0 }
 0x11e   :  { %v2033_v22 = vadd.f32 %v2032_v20, %v2031_v17 }
 0x120   :  { %v2035_v25 = vadd.f32 %v2034_v24, %v2033_v22 }
 0x121   :  { %v6385_v32 = vpop.f32.mrb[32].mxu0 }
 0x122   :  { %12326 = vst [vmem:[#allocation34_spill] sm:$0xff] %v6385_v32  ;;  %v2037_v35 = vadd.f32 %v2036_v31, %v2035_v25  ;;  %v6390_v36 = vpop.f32.mrb[33].mxu0  ;;  %v2042_v50 = vsel %vm1974_vm1, %v6385_v32, 0.0 }
 0x123   :  { %12327 = vst [vmem:[#allocation35_spill] sm:$0xff] %v6390_v36  ;;  %v2038_v39 = vsel %vm1974_vm1, %v6390_v36, 0.0  ;;  %v6395_v42 = vpop.f32.mrb[34].mxu0 }
 0x124   :  { %12328 = vst [vmem:[#allocation36_spill] sm:$0xff] %v6395_v42  ;;  %v2039_v46 = vadd.f32 %v2038_v39, %v2037_v35  ;;  %v6398_v47 = vpop.f32.mrb[35].mxu0  ;;  %v2044_v56 = vsel %vm1974_vm1, %v6395_v42, 0.0 }
 0x125   :  { %12329 = vst [vmem:[#allocation37_spill] sm:$0xff] %v6398_v47  ;;  %v2040_v48 = vsel %vm1974_vm1, %v6398_v47, 0.0 }
 0x126   :  { %v2041_v49 = vadd.f32 %v2040_v48, %v2039_v46  ;;  %v6442_v48 = vpop.f32.mrb[0].mxu1 }
 0x127   :  { %12338 = vst [vmem:[#allocation46_spill] sm:$0xff] %v6442_v48 }
 0x128   :  { %v2043_v51 = vadd.f32 %v2042_v50, %v2041_v49  ;;  %v6446_v50 = vpop.f32.mrb[1].mxu1 }
 0x129   :  { %v6409_v60 = vpop.f32.mrb[36].mxu0  ;;  %12339 = vst [vmem:[#allocation47_spill] sm:$0xff] %v6446_v50  ;;  %v6448_v54 = vpop.f32.mrb[2].mxu1 }
 0x12a   :  { %12330 = vst [vmem:[#allocation38_spill] sm:$0xff] %v6409_v60  ;;  %v2045_v0 = vadd.f32 %v2044_v56, %v2043_v51  ;;  %v6414_v1 = vpop.f32.mrb[37].mxu0  ;;  %v2050_v14 = vsel %vm1974_vm1, %v6409_v60, 0.0  ;;  %12340 = vst [vmem:[#allocation48_spill] sm:$0xff] %v6448_v54 }
 0x12b   :  { %12331 = vst [vmem:[#allocation39_spill] sm:$0xff] %v6414_v1  ;;  %v2046_v3 = vsel %vm1974_vm1, %v6414_v1, 0.0  ;;  %v6419_v4 = vpop.f32.mrb[38].mxu0 }
 0x12c   :  { %12332 = vst [vmem:[#allocation40_spill] sm:$0xff] %v6419_v4  ;;  %v2047_v6 = vadd.f32 %v2046_v3, %v2045_v0  ;;  %v6422_v8 = vpop.f32.mrb[39].mxu0  ;;  %v2052_v20 = vsel %vm1974_vm1, %v6419_v4, 0.0  ;;  %v6454_v0 = vpop.f32.mrb[3].mxu1 }
 0x12d   :  { %12333 = vst [vmem:[#allocation41_spill] sm:$0xff] %v6422_v8  ;;  %v2048_v11 = vsel %vm1974_vm1, %v6422_v8, 0.0  ;;  %12342 = vst [vmem:[#allocation50_spill] sm:$0xff] %v6454_v0 }
 0x12e   :  { %v2049_v12 = vadd.f32 %v2048_v11, %v2047_v6 }
 0x130   :  { %v2051_v17 = vadd.f32 %v2050_v14, %v2049_v12 }
 0x131   :  { %v6430_v22 = vpop.f32.mrb[40].mxu0 }
 0x132   :  { %12334 = vst [vmem:[#allocation42_spill] sm:$0xff] %v6430_v22  ;;  %v2053_v24 = vadd.f32 %v2052_v20, %v2051_v17  ;;  %v6432_v25 = vpop.f32.mrb[41].mxu0  ;;  %v2058_v49 = vsel %vm1974_vm1, %v6430_v22, 0.0 }
 0x133   :  { %12335 = vst [vmem:[#allocation43_spill] sm:$0xff] %v6432_v25  ;;  %v2054_v27 = vsel %vm1974_vm1, %v6432_v25, 0.0  ;;  %v6436_v31 = vpop.f32.mrb[42].mxu0 }
 0x134   :  { %12336 = vst [vmem:[#allocation44_spill] sm:$0xff] %v6436_v31  ;;  %v2055_v33 = vadd.f32 %v2054_v27, %v2053_v24  ;;  %v6438_v35 = vpop.f32.mrb[43].mxu0  ;;  %v2060_v56 = vsel %vm1974_vm1, %v6436_v31, 0.0  ;;  %v6466_v27 = vpop.f32.mrb[4].mxu1 }
 0x135   :  { %12337 = vst [vmem:[#allocation45_spill] sm:$0xff] %v6438_v35  ;;  %v2056_v39 = vsel %vm1974_vm1, %v6438_v35, 0.0  ;;  %12346 = vst [vmem:[#allocation54_spill] sm:$0xff] %v6466_v27 }
 0x136   :  { %v2057_v46 = vadd.f32 %v2056_v39, %v2055_v33  ;;  %v6470_v39 = vpop.f32.mrb[5].mxu1 }
 0x137   :  { %12347 = vst [vmem:[#allocation55_spill] sm:$0xff] %v6470_v39 }
 0x138   :  { %v2059_v51 = vadd.f32 %v2058_v49, %v2057_v46  ;;  %v6472_v49 = vpop.f32.mrb[6].mxu1 }
 0x139   :  { %v6452_v62 = vpop.f32.mrb[44].mxu0  ;;  %12348 = vst [vmem:[#allocation56_spill] sm:$0xff] %v6472_v49 }
 0x13a   :  { %12341 = vst [vmem:[#allocation49_spill] sm:$0xff] %v6452_v62  ;;  %v2061_v3 = vadd.f32 %v2060_v56, %v2059_v51  ;;  %v6456_v6 = vpop.f32.mrb[45].mxu0  ;;  %v2066_v33 = vsel %vm1974_vm1, %v6452_v62, 0.0 }
 0x13b   :  { %12343 = vst [vmem:[#allocation51_spill] sm:$0xff] %v6456_v6  ;;  %v2062_v11 = vsel %vm1974_vm1, %v6456_v6, 0.0  ;;  %v6460_v12 = vpop.f32.mrb[46].mxu0 }
 0x13c   :  { %12344 = vst [vmem:[#allocation52_spill] sm:$0xff] %v6460_v12  ;;  %v2063_v14 = vadd.f32 %v2062_v11, %v2061_v3  ;;  %v6462_v17 = vpop.f32.mrb[47].mxu0  ;;  %v2068_v51 = vsel %vm1974_vm1, %v6460_v12, 0.0  ;;  %v6478_v3 = vpop.f32.mrb[7].mxu1 }
 0x13d   :  { %12345 = vst [vmem:[#allocation53_spill] sm:$0xff] %v6462_v17  ;;  %v2064_v20 = vsel %vm1974_vm1, %v6462_v17, 0.0  ;;  %12350 = vst [vmem:[#allocation58_spill] sm:$0xff] %v6478_v3  ;;  %v6490_v12 = vpop.f32.mrb[8].mxu1 }
 0x13e   :  { %v2065_v24 = vadd.f32 %v2064_v20, %v2063_v14  ;;  %12354 = vst [vmem:[#allocation62_spill] sm:$0xff] %v6490_v12 }
 0x140   :  { %v2067_v46 = vadd.f32 %v2066_v33, %v2065_v24 }
 0x141   :  { %v6476_v56 = vpop.f32.mrb[48].mxu0 }
 0x142   :  { %12349 = vst [vmem:[#allocation57_spill] sm:$0xff] %v6476_v56  ;;  %v2069_v11 = vadd.f32 %v2068_v51, %v2067_v46  ;;  %v6480_v17 = vpop.f32.mrb[49].mxu0  ;;  %v2074_v31 = vsel %vm1974_vm1, %v6476_v56, 0.0  ;;  %v6494_v46 = vpop.f32.mrb[9].mxu1 }
 0x143   :  { %12351 = vst [vmem:[#allocation59_spill] sm:$0xff] %v6480_v17  ;;  %v2070_v14 = vsel %vm1974_vm1, %v6480_v17, 0.0  ;;  %v6484_v20 = vpop.f32.mrb[50].mxu0  ;;  %12355 = vst [vmem:[#allocation63_spill] sm:$0xff] %v6494_v46  ;;  %v6496_v22 = vpop.f32.mrb[10].mxu1 }
 0x144   :  { %12352 = vst [vmem:[#allocation60_spill] sm:$0xff] %v6484_v20  ;;  %v2071_v62 = vadd.f32 %v2070_v14, %v2069_v11  ;;  %v6486_v6 = vpop.f32.mrb[51].mxu0  ;;  %12356 = vst [vmem:[#allocation64_spill] sm:$0xff] %v6496_v22  ;;  %v2076_v17 = vsel %vm1974_vm1, %v6484_v20, 0.0  ;;  %v6502_v14 = vpop.f32.mrb[11].mxu1 }
 0x145   :  { %12353 = vst [vmem:[#allocation61_spill] sm:$0xff] %v6486_v6  ;;  %v2072_v24 = vsel %vm1974_vm1, %v6486_v6, 0.0  ;;  %12358 = vst [vmem:[#allocation66_spill] sm:$0xff] %v6502_v14  ;;  %v6514_v20 = vpop.f32.mrb[12].mxu1 }
 0x146   :  { %v2073_v33 = vadd.f32 %v2072_v24, %v2071_v62  ;;  %12362 = vst [vmem:[#allocation70_spill] sm:$0xff] %v6514_v20  ;;  %v6518_v60 = vpop.f32.mrb[13].mxu1 }
 0x147   :  { %12363 = vst [vmem:[#allocation71_spill] sm:$0xff] %v6518_v60 }
 0x148   :  { %v2075_v51 = vadd.f32 %v2074_v31, %v2073_v33 }
 0x149   :  { %v6500_v11 = vpop.f32.mrb[52].mxu0 }
 0x14a   :  { %12357 = vst [vmem:[#allocation65_spill] sm:$0xff] %v6500_v11  ;;  %v6504_v35 = vpop.f32.mrb[53].mxu0  ;;  %v2077_v62 = vadd.f32 %v2076_v17, %v2075_v51  ;;  %v2082_v4 = vsel %vm1974_vm1, %v6500_v11, 0.0  ;;  %v6520_v51 = vpop.f32.mrb[14].mxu1 }
 0x14b   :  { %12359 = vst [vmem:[#allocation67_spill] sm:$0xff] %v6504_v35  ;;  %v2078_v24 = vsel %vm1974_vm1, %v6504_v35, 0.0  ;;  %v6508_v6 = vpop.f32.mrb[54].mxu0  ;;  %12364 = vst [vmem:[#allocation72_spill] sm:$0xff] %v6520_v51 }
 0x14c   :  { %12360 = vst [vmem:[#allocation68_spill] sm:$0xff] %v6508_v6  ;;  %v2079_v56 = vadd.f32 %v2078_v24, %v2077_v62  ;;  %v6510_v25 = vpop.f32.mrb[55].mxu0  ;;  %v2084_v35 = vsel %vm1974_vm1, %v6508_v6, 0.0  ;;  %v6526_v24 = vpop.f32.mrb[15].mxu1 }
 0x14d   :  { %12361 = vst [vmem:[#allocation69_spill] sm:$0xff] %v6510_v25  ;;  %v2080_v31 = vsel %vm1974_vm1, %v6510_v25, 0.0  ;;  %12366 = vst [vmem:[#allocation74_spill] sm:$0xff] %v6526_v24  ;;  %v6538_v6 = vpop.f32.mrb[16].mxu1 }
 0x14e   :  { %v2081_v33 = vadd.f32 %v2080_v31, %v2079_v56  ;;  %12370 = vst [vmem:[#allocation78_spill] sm:$0xff] %v6538_v6  ;;  %v6542_v32 = vpop.f32.mrb[17].mxu1 }
 0x14f   :  { %12371 = vst [vmem:[#allocation79_spill] sm:$0xff] %v6542_v32 }
 0x150   :  { %v2083_v17 = vadd.f32 %v2082_v4, %v2081_v33 }
 0x151   :  { %v6524_v62 = vpop.f32.mrb[56].mxu0 }
 0x152   :  { %12365 = vst [vmem:[#allocation73_spill] sm:$0xff] %v6524_v62  ;;  %v6528_v8 = vpop.f32.mrb[57].mxu0  ;;  %v2085_v56 = vadd.f32 %v2084_v35, %v2083_v17  ;;  %v2090_v42 = vsel %vm1974_vm1, %v6524_v62, 0.0  ;;  %v6544_v17 = vpop.f32.mrb[18].mxu1 }
 0x153   :  { %12367 = vst [vmem:[#allocation75_spill] sm:$0xff] %v6528_v8  ;;  %v2086_v31 = vsel %vm1974_vm1, %v6528_v8, 0.0  ;;  %v6532_v25 = vpop.f32.mrb[58].mxu0  ;;  %12372 = vst [vmem:[#allocation80_spill] sm:$0xff] %v6544_v17 }
 0x154   :  { %12368 = vst [vmem:[#allocation76_spill] sm:$0xff] %v6532_v25  ;;  %v2087_v11 = vadd.f32 %v2086_v31, %v2085_v56  ;;  %v6534_v1 = vpop.f32.mrb[59].mxu0  ;;  %v2092_v8 = vsel %vm1974_vm1, %v6532_v25, 0.0  ;;  %v6550_v31 = vpop.f32.mrb[19].mxu1 }
 0x155   :  { %12369 = vst [vmem:[#allocation77_spill] sm:$0xff] %v6534_v1  ;;  %v2088_v4 = vsel %vm1974_vm1, %v6534_v1, 0.0  ;;  %12374 = vst [vmem:[#allocation82_spill] sm:$0xff] %v6550_v31  ;;  %v6562_v25 = vpop.f32.mrb[20].mxu1 }
 0x156   :  { %v2089_v33 = vadd.f32 %v2088_v4, %v2087_v11  ;;  %12378 = vst [vmem:[#allocation86_spill] sm:$0xff] %v6562_v25  ;;  %v6566_v10 = vpop.f32.mrb[21].mxu1 }
 0x157   :  { %12379 = vst [vmem:[#allocation87_spill] sm:$0xff] %v6566_v10 }
 0x158   :  { %v2091_v35 = vadd.f32 %v2090_v42, %v2089_v33 }
 0x159   :  { %v6548_v56 = vpop.f32.mrb[60].mxu0 }
 0x15a   :  { %12373 = vst [vmem:[#allocation81_spill] sm:$0xff] %v6548_v56  ;;  %v6552_v47 = vpop.f32.mrb[61].mxu0  ;;  %v2093_v11 = vadd.f32 %v2092_v8, %v2091_v35  ;;  %v2098_v15 = vsel %vm1974_vm1, %v6548_v56, 0.0  ;;  %v6568_v35 = vpop.f32.mrb[22].mxu1 }
 0x15b   :  { %12375 = vst [vmem:[#allocation83_spill] sm:$0xff] %v6552_v47  ;;  %v2094_v4 = vsel %vm1974_vm1, %v6552_v47, 0.0  ;;  %v6556_v1 = vpop.f32.mrb[62].mxu0  ;;  %12380 = vst [vmem:[#allocation88_spill] sm:$0xff] %v6568_v35 }
 0x15c   :  { %12376 = vst [vmem:[#allocation84_spill] sm:$0xff] %v6556_v1  ;;  %v2095_v62 = vadd.f32 %v2094_v4, %v2093_v11  ;;  %v6558_v36 = vpop.f32.mrb[63].mxu0  ;;  %v2100_v47 = vsel %vm1974_vm1, %v6556_v1, 0.0  ;;  %v6574_v4 = vpop.f32.mrb[23].mxu1 }
 0x15d   :  { %12377 = vst [vmem:[#allocation85_spill] sm:$0xff] %v6558_v36  ;;  %v2096_v42 = vsel %vm1974_vm1, %v6558_v36, 0.0  ;;  %12382 = vst [vmem:[#allocation90_spill] sm:$0xff] %v6574_v4  ;;  %v6586_v1 = vpop.f32.mrb[24].mxu1 }
 0x15e   :  { %v2097_v33 = vadd.f32 %v2096_v42, %v2095_v62  ;;  %12386 = vst [vmem:[#allocation94_spill] sm:$0xff] %v6586_v1  ;;  %v6590_v53 = vpop.f32.mrb[25].mxu1 }
 0x15f   :  { %12387 = vst [vmem:[#allocation95_spill] sm:$0xff] %v6590_v53 }
 0x160   :  { %v2099_v8 = vadd.f32 %v2098_v15, %v2097_v33 }
 0x161   :  { %v6572_v11 = vpop.f32.mrb[64].mxu0 }
 0x162   :  { %12381 = vst [vmem:[#allocation89_spill] sm:$0xff] %v6572_v11  ;;  %v6576_v18 = vpop.f32.mrb[65].mxu0  ;;  %v2101_v62 = vadd.f32 %v2100_v47, %v2099_v8  ;;  %v2106_v61 = vsel %vm1974_vm1, %v6572_v11, 0.0  ;;  %v6592_v8 = vpop.f32.mrb[26].mxu1 }
 0x163   :  { %12383 = vst [vmem:[#allocation91_spill] sm:$0xff] %v6576_v18  ;;  %v2102_v42 = vsel %vm1974_vm1, %v6576_v18, 0.0  ;;  %v6580_v36 = vpop.f32.mrb[66].mxu0  ;;  %12388 = vst [vmem:[#allocation96_spill] sm:$0xff] %v6592_v8 }
 0x164   :  { %12384 = vst [vmem:[#allocation92_spill] sm:$0xff] %v6580_v36  ;;  %v2103_v56 = vadd.f32 %v2102_v42, %v2101_v62  ;;  %v6582_v13 = vpop.f32.mrb[67].mxu0  ;;  %v2108_v18 = vsel %vm1974_vm1, %v6580_v36, 0.0  ;;  %v6598_v42 = vpop.f32.mrb[27].mxu1 }
 0x165   :  { %12385 = vst [vmem:[#allocation93_spill] sm:$0xff] %v6582_v13  ;;  %v2104_v15 = vsel %vm1974_vm1, %v6582_v13, 0.0  ;;  %12390 = vst [vmem:[#allocation98_spill] sm:$0xff] %v6598_v42  ;;  %v6610_v36 = vpop.f32.mrb[28].mxu1 }
 0x166   :  { %v2105_v33 = vadd.f32 %v2104_v15, %v2103_v56  ;;  %12394 = vst [vmem:[#allocation102_spill] sm:$0xff] %v6610_v36  ;;  %v6614_v34 = vpop.f32.mrb[29].mxu1 }
 0x167   :  { %12395 = vst [vmem:[#allocation103_spill] sm:$0xff] %v6614_v34 }
 0x168   :  { %v2107_v47 = vadd.f32 %v2106_v61, %v2105_v33 }
 0x169   :  { %v6596_v62 = vpop.f32.mrb[68].mxu0 }
 0x16a   :  { %12389 = vst [vmem:[#allocation97_spill] sm:$0xff] %v6596_v62  ;;  %v6600_v63 = vpop.f32.mrb[69].mxu0  ;;  %v2109_v56 = vadd.f32 %v2108_v18, %v2107_v47  ;;  %v2114_v40 = vsel %vm1974_vm1, %v6596_v62, 0.0  ;;  %v6616_v47 = vpop.f32.mrb[30].mxu1 }
 0x16b   :  { %12391 = vst [vmem:[#allocation99_spill] sm:$0xff] %v6600_v63  ;;  %v2110_v15 = vsel %vm1974_vm1, %v6600_v63, 0.0  ;;  %v6604_v13 = vpop.f32.mrb[70].mxu0  ;;  %12396 = vst [vmem:[#allocation104_spill] sm:$0xff] %v6616_v47 }
 0x16c   :  { %12392 = vst [vmem:[#allocation100_spill] sm:$0xff] %v6604_v13  ;;  %v2111_v11 = vadd.f32 %v2110_v15, %v2109_v56  ;;  %v6606_v58 = vpop.f32.mrb[71].mxu0  ;;  %v2116_v63 = vsel %vm1974_vm1, %v6604_v13, 0.0  ;;  %v6622_v15 = vpop.f32.mrb[31].mxu1 }
 0x16d   :  { %12393 = vst [vmem:[#allocation101_spill] sm:$0xff] %v6606_v58  ;;  %v2112_v61 = vsel %vm1974_vm1, %v6606_v58, 0.0  ;;  %12398 = vst [vmem:[#allocation106_spill] sm:$0xff] %v6622_v15  ;;  %v6634_v13 = vpop.f32.mrb[32].mxu1 }
 0x16e   :  { %v2113_v33 = vadd.f32 %v2112_v61, %v2111_v11  ;;  %12402 = vst [vmem:[#allocation110_spill] sm:$0xff] %v6634_v13  ;;  %v6638_v16 = vpop.f32.mrb[33].mxu1 }
 0x16f   :  { %12403 = vst [vmem:[#allocation111_spill] sm:$0xff] %v6638_v16 }
 0x170   :  { %v2115_v18 = vadd.f32 %v2114_v40, %v2113_v33 }
 0x171   :  { %v6620_v56 = vpop.f32.mrb[72].mxu0 }
 0x172   :  { %12397 = vst [vmem:[#allocation105_spill] sm:$0xff] %v6620_v56  ;;  %v6624_v44 = vpop.f32.mrb[73].mxu0  ;;  %v2117_v11 = vadd.f32 %v2116_v63, %v2115_v18  ;;  %v2122_v21 = vsel %vm1974_vm1, %v6620_v56, 0.0  ;;  %v6640_v18 = vpop.f32.mrb[34].mxu1 }
 0x173   :  { %12399 = vst [vmem:[#allocation107_spill] sm:$0xff] %v6624_v44  ;;  %v2118_v61 = vsel %vm1974_vm1, %v6624_v44, 0.0  ;;  %v6628_v58 = vpop.f32.mrb[74].mxu0 }
 0x174   :  { %12400 = vst [vmem:[#allocation108_spill] sm:$0xff] %v6628_v58  ;;  %v2119_v62 = vadd.f32 %v2118_v61, %v2117_v11  ;;  %v6630_v37 = vpop.f32.mrb[75].mxu0  ;;  %v2124_v44 = vsel %vm1974_vm1, %v6628_v58, 0.0  ;;  %v6646_v61 = vpop.f32.mrb[35].mxu1 }
 0x175   :  { %12401 = vst [vmem:[#allocation109_spill] sm:$0xff] %v6630_v37  ;;  %v2120_v40 = vsel %vm1974_vm1, %v6630_v37, 0.0  ;;  %12405 = vst [vmem:[#allocation113_spill] sm:$0xff] %v6646_v61  ;;  %v6658_v58 = vpop.f32.mrb[36].mxu1 }
 0x176   :  { %v2121_v33 = vadd.f32 %v2120_v40, %v2119_v62  ;;  %v6662_v2 = vpop.f32.mrb[37].mxu1 }
 0x177   :  { %12409 = vst [vmem:[#allocation117_spill] sm:$0xff] %v6662_v2 }
 0x178   :  { %v2123_v63 = vadd.f32 %v2122_v21, %v2121_v33 }
 0x179   :  { %v6644_v11 = vpop.f32.mrb[76].mxu0 }
 0x17a   :  { %12404 = vst [vmem:[#allocation112_spill] sm:$0xff] %v6644_v11  ;;  %v6648_v23 = vpop.f32.mrb[77].mxu0  ;;  %v2125_v62 = vadd.f32 %v2124_v44, %v2123_v63  ;;  %v2130_v7 = vsel %vm1974_vm1, %v6644_v11, 0.0  ;;  %v6664_v63 = vpop.f32.mrb[38].mxu1 }
 0x17b   :  { %12406 = vst [vmem:[#allocation114_spill] sm:$0xff] %v6648_v23  ;;  %v2126_v40 = vsel %vm1974_vm1, %v6648_v23, 0.0  ;;  %v6652_v37 = vpop.f32.mrb[78].mxu0 }
 0x17c   :  { %12407 = vst [vmem:[#allocation115_spill] sm:$0xff] %v6652_v37  ;;  %v2127_v56 = vadd.f32 %v2126_v40, %v2125_v62  ;;  %v6654_v19 = vpop.f32.mrb[79].mxu0  ;;  %v2132_v23 = vsel %vm1974_vm1, %v6652_v37, 0.0  ;;  %v6670_v40 = vpop.f32.mrb[39].mxu1 }
 0x17d   :  { %12408 = vst [vmem:[#allocation116_spill] sm:$0xff] %v6654_v19  ;;  %v2128_v21 = vsel %vm1974_vm1, %v6654_v19, 0.0  ;;  %v6682_v37 = vpop.f32.mrb[40].mxu1 }
 0x17e   :  { %v2129_v33 = vadd.f32 %v2128_v21, %v2127_v56  ;;  %v6686_v52 = vpop.f32.mrb[41].mxu1 }
 0x180   :  { %v2131_v44 = vadd.f32 %v2130_v7, %v2129_v33 }
 0x181   :  { %v6668_v62 = vpop.f32.mrb[80].mxu0 }
 0x182   :  { %12410 = vst [vmem:[#allocation118_spill] sm:$0xff] %v6668_v62  ;;  %v6672_v9 = vpop.f32.mrb[81].mxu0  ;;  %v2133_v56 = vadd.f32 %v2132_v23, %v2131_v44  ;;  %v2138_v57 = vsel %vm1974_vm1, %v6668_v62, 0.0  ;;  %v6688_v44 = vpop.f32.mrb[42].mxu1 }
 0x183   :  { %12411 = vst [vmem:[#allocation119_spill] sm:$0xff] %v6672_v9  ;;  %v2134_v21 = vsel %vm1974_vm1, %v6672_v9, 0.0  ;;  %v6676_v19 = vpop.f32.mrb[82].mxu0  ;;  %12414 = vst [vmem:[#allocation122_spill] sm:$0xff] %v6688_v44 }
 0x184   :  { %12412 = vst [vmem:[#allocation120_spill] sm:$0xff] %v6676_v19  ;;  %v2135_v11 = vadd.f32 %v2134_v21, %v2133_v56  ;;  %v6678_v5 = vpop.f32.mrb[83].mxu0  ;;  %v2140_v9 = vsel %vm1974_vm1, %v6676_v19, 0.0  ;;  %v6694_v21 = vpop.f32.mrb[43].mxu1 }
 0x185   :  { %12413 = vst [vmem:[#allocation121_spill] sm:$0xff] %v6678_v5  ;;  %v2136_v7 = vsel %vm1974_vm1, %v6678_v5, 0.0  ;;  %v6706_v19 = vpop.f32.mrb[44].mxu1 }
 0x186   :  { %v2137_v33 = vadd.f32 %v2136_v7, %v2135_v11  ;;  %12419 = vst [vmem:[#allocation127_spill] sm:$0xff] %v6706_v19  ;;  %v6710_v38 = vpop.f32.mrb[45].mxu1 }
 0x187   :  { %12420 = vst [vmem:[#allocation128_spill] sm:$0xff] %v6710_v38 }
 0x188   :  { %v2139_v23 = vadd.f32 %v2138_v57, %v2137_v33 }
 0x189   :  { %v6692_v56 = vpop.f32.mrb[84].mxu0 }
 0x18a   :  { %12415 = vst [vmem:[#allocation123_spill] sm:$0xff] %v6692_v56  ;;  %v6696_v59 = vpop.f32.mrb[85].mxu0  ;;  %v2141_v11 = vadd.f32 %v2140_v9, %v2139_v23  ;;  %v2146_v43 = vsel %vm1974_vm1, %v6692_v56, 0.0  ;;  %v6712_v23 = vpop.f32.mrb[46].mxu1 }
 0x18b   :  { %12416 = vst [vmem:[#allocation124_spill] sm:$0xff] %v6696_v59  ;;  %v2142_v7 = vsel %vm1974_vm1, %v6696_v59, 0.0  ;;  %v6700_v5 = vpop.f32.mrb[86].mxu0  ;;  %12421 = vst [vmem:[#allocation129_spill] sm:$0xff] %v6712_v23 }
 0x18c   :  { %12417 = vst [vmem:[#allocation125_spill] sm:$0xff] %v6700_v5  ;;  %v2143_v62 = vadd.f32 %v2142_v7, %v2141_v11  ;;  %v6702_v55 = vpop.f32.mrb[87].mxu0  ;;  %v2148_v59 = vsel %vm1974_vm1, %v6700_v5, 0.0  ;;  %v6718_v7 = vpop.f32.mrb[47].mxu1 }
 0x18d   :  { %12418 = vst [vmem:[#allocation126_spill] sm:$0xff] %v6702_v55  ;;  %v2144_v57 = vsel %vm1974_vm1, %v6702_v55, 0.0  ;;  %12423 = vst [vmem:[#allocation131_spill] sm:$0xff] %v6718_v7  ;;  %v6730_v5 = vpop.f32.mrb[48].mxu1 }
 0x18e   :  { %v2145_v33 = vadd.f32 %v2144_v57, %v2143_v62  ;;  %12427 = vst [vmem:[#allocation135_spill] sm:$0xff] %v6730_v5  ;;  %v6734_v26 = vpop.f32.mrb[49].mxu1 }
 0x18f   :  { %12428 = vst [vmem:[#allocation136_spill] sm:$0xff] %v6734_v26 }
 0x190   :  { %v2147_v9 = vadd.f32 %v2146_v43, %v2145_v33 }
 0x191   :  { %v6716_v11 = vpop.f32.mrb[88].mxu0 }
 0x192   :  { %12422 = vst [vmem:[#allocation130_spill] sm:$0xff] %v6716_v11  ;;  %v6720_v45 = vpop.f32.mrb[89].mxu0  ;;  %v2149_v62 = vadd.f32 %v2148_v59, %v2147_v9  ;;  %v2154_v29 = vsel %vm1974_vm1, %v6716_v11, 0.0  ;;  %v6736_v9 = vpop.f32.mrb[50].mxu1 }
 0x193   :  { %12424 = vst [vmem:[#allocation132_spill] sm:$0xff] %v6720_v45  ;;  %v2150_v57 = vsel %vm1974_vm1, %v6720_v45, 0.0  ;;  %v6724_v55 = vpop.f32.mrb[90].mxu0  ;;  %12429 = vst [vmem:[#allocation137_spill] sm:$0xff] %v6736_v9 }
 0x194   :  { %12425 = vst [vmem:[#allocation133_spill] sm:$0xff] %v6724_v55  ;;  %v2151_v56 = vadd.f32 %v2150_v57, %v2149_v62  ;;  %v6726_v41 = vpop.f32.mrb[91].mxu0  ;;  %v2156_v45 = vsel %vm1974_vm1, %v6724_v55, 0.0  ;;  %v6742_v57 = vpop.f32.mrb[51].mxu1 }
 0x195   :  { %12426 = vst [vmem:[#allocation134_spill] sm:$0xff] %v6726_v41  ;;  %v2152_v43 = vsel %vm1974_vm1, %v6726_v41, 0.0  ;;  %12431 = vst [vmem:[#allocation139_spill] sm:$0xff] %v6742_v57  ;;  %v6754_v55 = vpop.f32.mrb[52].mxu1 }
 0x196   :  { %v2153_v33 = vadd.f32 %v2152_v43, %v2151_v56  ;;  %12435 = vst [vmem:[#allocation143_spill] sm:$0xff] %v6754_v55  ;;  %v6758_v5 = vpop.f32.mrb[53].mxu1 }
 0x197   :  { %12436 = vst [vmem:[#allocation144_spill] sm:$0xff] %v6758_v5 }
 0x198   :  { %v2155_v59 = vadd.f32 %v2154_v29, %v2153_v33 }
 0x199   :  { %v6740_v62 = vpop.f32.mrb[92].mxu0 }
 0x19a   :  { %12430 = vst [vmem:[#allocation138_spill] sm:$0xff] %v6740_v62  ;;  %v6744_v30 = vpop.f32.mrb[93].mxu0  ;;  %v2157_v56 = vadd.f32 %v2156_v45, %v2155_v59  ;;  %v2162_v9 = vsel %vm1974_vm1, %v6740_v62, 0.0  ;;  %v6760_v59 = vpop.f32.mrb[54].mxu1 }
 0x19b   :  { %12432 = vst [vmem:[#allocation140_spill] sm:$0xff] %v6744_v30  ;;  %v2158_v43 = vsel %vm1974_vm1, %v6744_v30, 0.0  ;;  %v6748_v41 = vpop.f32.mrb[94].mxu0  ;;  %12437 = vst [vmem:[#allocation145_spill] sm:$0xff] %v6760_v59 }
 0x19c   :  { %12433 = vst [vmem:[#allocation141_spill] sm:$0xff] %v6748_v41  ;;  %v2159_v11 = vadd.f32 %v2158_v43, %v2157_v56  ;;  %v6750_v28 = vpop.f32.mrb[95].mxu0  ;;  %v2164_v30 = vsel %vm1974_vm1, %v6748_v41, 0.0  ;;  %v6766_v43 = vpop.f32.mrb[55].mxu1 }
 0x19d   :  { %12434 = vst [vmem:[#allocation142_spill] sm:$0xff] %v6750_v28  ;;  %v2160_v29 = vsel %vm1974_vm1, %v6750_v28, 0.0  ;;  %12439 = vst [vmem:[#allocation147_spill] sm:$0xff] %v6766_v43  ;;  %v6778_v41 = vpop.f32.mrb[56].mxu1 }
 0x19e   :  { %v2161_v33 = vadd.f32 %v2160_v29, %v2159_v11  ;;  %12443 = vst [vmem:[#allocation151_spill] sm:$0xff] %v6778_v41  ;;  %v6782_v43 = vpop.f32.mrb[57].mxu1 }
 0x19f   :  { %12444 = vst [vmem:[#allocation152_spill] sm:$0xff] %v6782_v43 }
 0x1a0   :  { %v2163_v45 = vadd.f32 %v2162_v9, %v2161_v33 }
 0x1a1   :  { %v6764_v56 = vpop.f32.mrb[96].mxu0 }
 0x1a2   :  { %12438 = vst [vmem:[#allocation146_spill] sm:$0xff] %v6764_v56  ;;  %v6768_v57 = vpop.f32.mrb[97].mxu0  ;;  %v2165_v11 = vadd.f32 %v2164_v30, %v2163_v45  ;;  %v2170_v59 = vsel %vm1974_vm1, %v6764_v56, 0.0  ;;  %v6784_v45 = vpop.f32.mrb[58].mxu1 }
 0x1a3   :  { %12440 = vst [vmem:[#allocation148_spill] sm:$0xff] %v6768_v57  ;;  %v2166_v29 = vsel %vm1974_vm1, %v6768_v57, 0.0  ;;  %v6772_v28 = vpop.f32.mrb[98].mxu0  ;;  %12445 = vst [vmem:[#allocation153_spill] sm:$0xff] %v6784_v45 }
 0x1a4   :  { %12441 = vst [vmem:[#allocation149_spill] sm:$0xff] %v6772_v28  ;;  %v2167_v62 = vadd.f32 %v2166_v29, %v2165_v11  ;;  %v6774_v55 = vpop.f32.mrb[99].mxu0  ;;  %v2172_v57 = vsel %vm1974_vm1, %v6772_v28, 0.0  ;;  %v6790_v29 = vpop.f32.mrb[59].mxu1 }
 0x1a5   :  { %12442 = vst [vmem:[#allocation150_spill] sm:$0xff] %v6774_v55  ;;  %v2168_v9 = vsel %vm1974_vm1, %v6774_v55, 0.0  ;;  %12447 = vst [vmem:[#allocation155_spill] sm:$0xff] %v6790_v29  ;;  %v6802_v28 = vpop.f32.mrb[60].mxu1 }
 0x1a6   :  { %v2169_v33 = vadd.f32 %v2168_v9, %v2167_v62  ;;  %12451 = vst [vmem:[#allocation159_spill] sm:$0xff] %v6802_v28  ;;  %v6806_v29 = vpop.f32.mrb[61].mxu1 }
 0x1a8   :  { %v2171_v30 = vadd.f32 %v2170_v59, %v2169_v33 }
 0x1a9   :  { %v6788_v11 = vpop.f32.mrb[100].mxu0 }
 0x1aa   :  { %12446 = vst [vmem:[#allocation154_spill] sm:$0xff] %v6788_v11  ;;  %v6792_v5 = vpop.f32.mrb[101].mxu0  ;;  %v2173_v62 = vadd.f32 %v2172_v57, %v2171_v30  ;;  %v2178_v45 = vsel %vm1974_vm1, %v6788_v11, 0.0  ;;  %v6808_v30 = vpop.f32.mrb[62].mxu1 }
 0x1ab   :  { %12448 = vst [vmem:[#allocation156_spill] sm:$0xff] %v6792_v5  ;;  %v2174_v9 = vsel %vm1974_vm1, %v6792_v5, 0.0  ;;  %v6796_v55 = vpop.f32.mrb[102].mxu0  ;;  %12452 = vst [vmem:[#allocation160_spill] sm:$0xff] %v6808_v30 }
 0x1ac   :  { %12449 = vst [vmem:[#allocation157_spill] sm:$0xff] %v6796_v55  ;;  %v2175_v56 = vadd.f32 %v2174_v9, %v2173_v62  ;;  %v6798_v41 = vpop.f32.mrb[103].mxu0  ;;  %v2180_v5 = vsel %vm1974_vm1, %v6796_v55, 0.0  ;;  %v6814_v9 = vpop.f32.mrb[63].mxu1 }
 0x1ad   :  { %12450 = vst [vmem:[#allocation158_spill] sm:$0xff] %v6798_v41  ;;  %v2176_v59 = vsel %vm1974_vm1, %v6798_v41, 0.0  ;;  %12454 = vst [vmem:[#allocation162_spill] sm:$0xff] %v6814_v9  ;;  %v6826_v55 = vpop.f32.mrb[64].mxu1 }
 0x1ae   :  { %v2177_v33 = vadd.f32 %v2176_v59, %v2175_v56  ;;  %12458 = vst [vmem:[#allocation166_spill] sm:$0xff] %v6826_v55  ;;  %v6830_v9 = vpop.f32.mrb[65].mxu1 }
 0x1b0   :  { %v2179_v57 = vadd.f32 %v2178_v45, %v2177_v33 }
 0x1b1   :  { %v6812_v62 = vpop.f32.mrb[104].mxu0 }
 0x1b2   :  { %12453 = vst [vmem:[#allocation161_spill] sm:$0xff] %v6812_v62  ;;  %v6816_v43 = vpop.f32.mrb[105].mxu0  ;;  %v2181_v56 = vadd.f32 %v2180_v5, %v2179_v57  ;;  %v2186_v30 = vsel %vm1974_vm1, %v6812_v62, 0.0  ;;  %v6832_v57 = vpop.f32.mrb[66].mxu1 }
 0x1b3   :  { %12455 = vst [vmem:[#allocation163_spill] sm:$0xff] %v6816_v43  ;;  %v2182_v59 = vsel %vm1974_vm1, %v6816_v43, 0.0  ;;  %v6820_v41 = vpop.f32.mrb[106].mxu0  ;;  %12459 = vst [vmem:[#allocation167_spill] sm:$0xff] %v6832_v57 }
 0x1b4   :  { %12456 = vst [vmem:[#allocation164_spill] sm:$0xff] %v6820_v41  ;;  %v2183_v11 = vadd.f32 %v2182_v59, %v2181_v56  ;;  %v6822_v28 = vpop.f32.mrb[107].mxu0  ;;  %v2188_v43 = vsel %vm1974_vm1, %v6820_v41, 0.0  ;;  %v2190_v56 = vsel %vm1974_vm1, %v6446_v50, 0.0  ;;  %v6838_v59 = vpop.f32.mrb[67].mxu1  ;;  %v2196_v50 = vsel %vm1974_vm1, %v6448_v54, 0.0 }
 0x1b5   :  { %12457 = vst [vmem:[#allocation165_spill] sm:$0xff] %v6822_v28  ;;  %v2184_v45 = vsel %vm1974_vm1, %v6822_v28, 0.0  ;;  %v6842_v62 = vpop.f32.mrb[68].mxu1 }
 0x1b6   :  { %v2185_v33 = vadd.f32 %v2184_v45, %v2183_v11  ;;  %v2192_v45 = vsel %vm1974_vm1, %v6454_v0, 0.0 }
 0x1b8   :  { %v2187_v5 = vadd.f32 %v2186_v30, %v2185_v33  ;;  %v2194_v30 = vsel %vm1974_vm1, %v6442_v48, 0.0  ;;  %v6846_v33 = vpop.f32.mrb[69].mxu1 }
 0x1b9   :  { %v6848_v41 = vpop.f32.mrb[70].mxu1 }
 0x1ba   :  { %v2189_v28 = vadd.f32 %v2188_v43, %v2187_v5  ;;  %v6854_v43 = vpop.f32.mrb[71].mxu1 }
 0x1bb   :  { %v6858_v48 = vpop.f32.mrb[72].mxu1 }
 0x1bc   :  { %v2191_v11 = vadd.f32 %v2190_v56, %v2189_v28  ;;  %v2198_v28 = vsel %vm1974_vm1, %v6470_v39, 0.0  ;;  %v2204_v39 = vsel %vm1974_vm1, %v6472_v49, 0.0 }
 0x1be   :  { %v2193_v55 = vadd.f32 %v2192_v45, %v2191_v11  ;;  %v2200_v11 = vsel %vm1974_vm1, %v6478_v3, 0.0 }
 0x1c0   :  { %v2195_v57 = vadd.f32 %v2194_v30, %v2193_v55  ;;  %v2202_v55 = vsel %vm1974_vm1, %v6466_v27, 0.0  ;;  %v6862_v30 = vpop.f32.mrb[73].mxu1 }
 0x1c1   :  { %v6864_v54 = vpop.f32.mrb[74].mxu1 }
 0x1c2   :  { %v2197_v5 = vadd.f32 %v2196_v50, %v2195_v57  ;;  %v2206_v50 = vsel %vm1974_vm1, %v6494_v46, 0.0  ;;  %v6870_v57 = vpop.f32.mrb[75].mxu1  ;;  %v2212_v46 = vsel %vm1974_vm1, %v6496_v22, 0.0 }
 0x1c3   :  { %v6874_v27 = vpop.f32.mrb[76].mxu1 }
 0x1c4   :  { %v2199_v56 = vadd.f32 %v2198_v28, %v2197_v5 }
 0x1c6   :  { %v2201_v45 = vadd.f32 %v2200_v11, %v2199_v56  ;;  %v2208_v56 = vsel %vm1974_vm1, %v6502_v14, 0.0 }
 0x1c8   :  { %v2203_v0 = vadd.f32 %v2202_v55, %v2201_v45  ;;  %v2210_v45 = vsel %vm1974_vm1, %v6490_v12, 0.0  ;;  %v6878_v55 = vpop.f32.mrb[77].mxu1 }
 0x1c9   :  { %v6880_v49 = vpop.f32.mrb[78].mxu1 }
 0x1ca   :  { %v2205_v28 = vadd.f32 %v2204_v39, %v2203_v0  ;;  %v2214_v0 = vsel %vm1974_vm1, %v6518_v60, 0.0  ;;  %v6886_v39 = vpop.f32.mrb[79].mxu1  ;;  %v2220_v60 = vsel %vm1974_vm1, %v6520_v51, 0.0 }
 0x1cb   :  { %v6890_v12 = vpop.f32.mrb[80].mxu1 }
 0x1cc   :  { %v2207_v5 = vadd.f32 %v2206_v50, %v2205_v28 }
 0x1ce   :  { %v2209_v11 = vadd.f32 %v2208_v56, %v2207_v5  ;;  %v2216_v5 = vsel %vm1974_vm1, %v6526_v24, 0.0 }
 0x1d0   :  { %v2211_v3 = vadd.f32 %v2210_v45, %v2209_v11  ;;  %v2218_v11 = vsel %vm1974_vm1, %v6514_v20, 0.0  ;;  %v6894_v45 = vpop.f32.mrb[81].mxu1 }
 0x1d1   :  { %v6896_v22 = vpop.f32.mrb[82].mxu1 }
 0x1d2   :  { %v2213_v50 = vadd.f32 %v2212_v46, %v2211_v3  ;;  %v2222_v3 = vsel %vm1974_vm1, %v6542_v32, 0.0  ;;  %v6902_v46 = vpop.f32.mrb[83].mxu1  ;;  %v2228_v32 = vsel %vm1974_vm1, %v6544_v17, 0.0 }
 0x1d3   :  { %v6906_v20 = vpop.f32.mrb[84].mxu1 }
 0x1d4   :  { %v2215_v28 = vadd.f32 %v2214_v0, %v2213_v50 }
 0x1d6   :  { %v2217_v56 = vadd.f32 %v2216_v5, %v2215_v28  ;;  %v2224_v28 = vsel %vm1974_vm1, %v6550_v31, 0.0 }
 0x1d8   :  { %v2219_v14 = vadd.f32 %v2218_v11, %v2217_v56  ;;  %v2226_v56 = vsel %vm1974_vm1, %v6538_v6, 0.0  ;;  %v6910_v11 = vpop.f32.mrb[85].mxu1 }
 0x1d9   :  { %v6912_v51 = vpop.f32.mrb[86].mxu1 }
 0x1da   :  { %v2221_v0 = vadd.f32 %v2220_v60, %v2219_v14  ;;  %v2230_v60 = vsel %vm1974_vm1, %v6566_v10, 0.0  ;;  %v6918_v14 = vpop.f32.mrb[87].mxu1  ;;  %v2236_v10 = vsel %vm1974_vm1, %v6568_v35, 0.0 }
 0x1db   :  { %v6922_v6 = vpop.f32.mrb[88].mxu1 }
 0x1dc   :  { %v2223_v50 = vadd.f32 %v2222_v3, %v2221_v0 }
 0x1de   :  { %v2225_v5 = vadd.f32 %v2224_v28, %v2223_v50  ;;  %v2232_v50 = vsel %vm1974_vm1, %v6574_v4, 0.0 }
 0x1e0   :  { %v2227_v24 = vadd.f32 %v2226_v56, %v2225_v5  ;;  %v2234_v5 = vsel %vm1974_vm1, %v6562_v25, 0.0  ;;  %v6926_v56 = vpop.f32.mrb[89].mxu1 }
 0x1e1   :  { %v6928_v17 = vpop.f32.mrb[90].mxu1 }
 0x1e2   :  { %v2229_v3 = vadd.f32 %v2228_v32, %v2227_v24  ;;  %v2238_v32 = vsel %vm1974_vm1, %v6590_v53, 0.0  ;;  %v6934_v24 = vpop.f32.mrb[91].mxu1  ;;  %v2244_v53 = vsel %vm1974_vm1, %v6592_v8, 0.0 }
 0x1e3   :  { %v6938_v25 = vpop.f32.mrb[92].mxu1 }
 0x1e4   :  { %v2231_v0 = vadd.f32 %v2230_v60, %v2229_v3 }
 0x1e6   :  { %v2233_v28 = vadd.f32 %v2232_v50, %v2231_v0  ;;  %v2240_v0 = vsel %vm1974_vm1, %v6598_v42, 0.0 }
 0x1e8   :  { %v2235_v31 = vadd.f32 %v2234_v5, %v2233_v28  ;;  %v2242_v28 = vsel %vm1974_vm1, %v6586_v1, 0.0  ;;  %v6942_v5 = vpop.f32.mrb[93].mxu1 }
 0x1e9   :  { %v6944_v35 = vpop.f32.mrb[94].mxu1 }
 0x1ea   :  { %v2237_v60 = vadd.f32 %v2236_v10, %v2235_v31  ;;  %v2246_v10 = vsel %vm1974_vm1, %v6614_v34, 0.0  ;;  %v6950_v31 = vpop.f32.mrb[95].mxu1  ;;  %v2252_v34 = vsel %vm1974_vm1, %v6616_v47, 0.0 }
 0x1eb   :  { %v6954_v1 = vpop.f32.mrb[96].mxu1 }
 0x1ec   :  { %v2239_v3 = vadd.f32 %v2238_v32, %v2237_v60  ;;  %12460 = vst [vmem:[#allocation168_spill] sm:$0xff] %v6954_v1 }
 0x1ee   :  { %v2241_v50 = vadd.f32 %v2240_v0, %v2239_v3  ;;  %v2248_v3 = vsel %vm1974_vm1, %v6622_v15, 0.0 }
 0x1f0   :  { %v2243_v4 = vadd.f32 %v2242_v28, %v2241_v50  ;;  %v2250_v50 = vsel %vm1974_vm1, %v6610_v36, 0.0  ;;  %v6958_v28 = vpop.f32.mrb[97].mxu1 }
 0x1f1   :  { %v6960_v8 = vpop.f32.mrb[98].mxu1 }
 0x1f2   :  { %v2245_v32 = vadd.f32 %v2244_v53, %v2243_v4  ;;  %12461 = vst [vmem:[#allocation169_spill] sm:$0xff] %v6960_v8  ;;  %v2254_v53 = vsel %vm1974_vm1, %v6638_v16, 0.0  ;;  %v6966_v4 = vpop.f32.mrb[99].mxu1  ;;  %v2260_v16 = vsel %vm1974_vm1, %v6640_v18, 0.0 }
 0x1f3   :  { %12462 = vst [vmem:[#allocation170_spill] sm:$0xff] %v6966_v4  ;;  %v6970_v36 = vpop.f32.mrb[100].mxu1 }
 0x1f4   :  { %v2247_v60 = vadd.f32 %v2246_v10, %v2245_v32 }
 0x1f6   :  { %v2249_v0 = vadd.f32 %v2248_v3, %v2247_v60  ;;  %v2256_v60 = vsel %vm1974_vm1, %v6646_v61, 0.0 }
 0x1f8   :  { %v2251_v42 = vadd.f32 %v2250_v50, %v2249_v0  ;;  %v2258_v0 = vsel %vm1974_vm1, %v6634_v13, 0.0  ;;  %v6974_v50 = vpop.f32.mrb[101].mxu1  ;;  %v2266_v13 = vsel %vm1974_vm1, %v6658_v58, 0.0 }
 0x1f9   :  { %v5704_v47 = vpop.f32.mrb[102].mxu1 }
 0x1fa   :  { %v2253_v10 = vadd.f32 %v2252_v34, %v2251_v42  ;;  %v2262_v34 = vsel %vm1974_vm1, %v6662_v2, 0.0  ;;  %v6980_v42 = vpop.f32.mrb[103].mxu1  ;;  %v2268_v47 = vsel %vm1974_vm1, %v6664_v63, 0.0 }
 0x1fc   :  { %v2255_v32 = vadd.f32 %v2254_v53, %v2253_v10 }
 0x1fe   :  { %v2257_v3 = vadd.f32 %v2256_v60, %v2255_v32  ;;  %v2264_v32 = vsel %vm1974_vm1, %v6670_v40, 0.0 }
 0x200   :  { %v2259_v15 = vadd.f32 %v2258_v0, %v2257_v3  ;;  %v2270_v3 = vsel %vm1974_vm1, %v6686_v52, 0.0 }
 0x202   :  { %v2261_v53 = vadd.f32 %v2260_v16, %v2259_v15  ;;  %v2272_v16 = vsel %vm1974_vm1, %v6694_v21, 0.0 }
 0x204   :  { %v2263_v10 = vadd.f32 %v2262_v34, %v2261_v53  ;;  %v2274_v34 = vsel %vm1974_vm1, %v6682_v37, 0.0 }
 0x206   :  { %v2265_v60 = vadd.f32 %v2264_v32, %v2263_v10  ;;  %v2276_v10 = vsel %vm1974_vm1, %v6688_v44, 0.0  ;;  %v12463_v44 = vld [vmem:[#allocation139_spill] sm:$0xff] }
 0x208   :  { %v2267_v61 = vadd.f32 %v2266_v13, %v2265_v60  ;;  %v2278_v13 = vsel %vm1974_vm1, %v6710_v38, 0.0  ;;  %v12467_v38 = vld [vmem:[#allocation147_spill] sm:$0xff] }
 0x20a   :  { %v2269_v0 = vadd.f32 %v2268_v47, %v2267_v61  ;;  %v2280_v61 = vsel %vm1974_vm1, %v6718_v7, 0.0 }
 0x20c   :  { %v2271_v2 = vadd.f32 %v2270_v3, %v2269_v0  ;;  %v2282_v3 = vsel %vm1974_vm1, %v6706_v19, 0.0  ;;  %v2284_v0 = vsel %vm1974_vm1, %v6712_v23, 0.0 }
 0x20e   :  { %v2273_v15 = vadd.f32 %v2272_v16, %v2271_v2  ;;  %v2286_v16 = vsel %vm1974_vm1, %v6734_v26, 0.0  ;;  %v12471_v26 = vld [vmem:[#allocation155_spill] sm:$0xff] }
 0x210   :  { %v2275_v53 = vadd.f32 %v2274_v34, %v2273_v15 }
 0x212   :  { %v2277_v32 = vadd.f32 %v2276_v10, %v2275_v53  ;;  %v2288_v53 = vsel %vm1974_vm1, %v12463_v44, 0.0 }
 0x214   :  { %v2279_v60 = vadd.f32 %v2278_v13, %v2277_v32  ;;  %v12464_v13 = vld [vmem:[#allocation135_spill] sm:$0xff] }
 0x215   :  { %v2290_v32 = vsel %vm1974_vm1, %v12464_v13, 0.0 }
 0x216   :  { %v2281_v47 = vadd.f32 %v2280_v61, %v2279_v60  ;;  %v12465_v61 = vld [vmem:[#allocation137_spill] sm:$0xff] }
 0x217   :  { %v2292_v19 = vsel %vm1974_vm1, %v12465_v61, 0.0 }
 0x218   :  { %v2283_v2 = vadd.f32 %v2282_v3, %v2281_v47  ;;  %v12466_v47 = vld [vmem:[#allocation144_spill] sm:$0xff] }
 0x219   :  { %v2294_v3 = vsel %vm1974_vm1, %v12466_v47, 0.0 }
 0x21a   :  { %v2285_v15 = vadd.f32 %v2284_v0, %v2283_v2  ;;  %v2296_v2 = vsel %vm1974_vm1, %v12467_v38, 0.0  ;;  %v12474_v38 = vld [vmem:[#allocation162_spill] sm:$0xff] }
 0x21c   :  { %v2287_v34 = vadd.f32 %v2286_v16, %v2285_v15  ;;  %v12468_v16 = vld [vmem:[#allocation143_spill] sm:$0xff] }
 0x21d   :  { %v2298_v15 = vsel %vm1974_vm1, %v12468_v16, 0.0 }
 0x21e   :  { %v2289_v10 = vadd.f32 %v2288_v53, %v2287_v34  ;;  %v12469_v53 = vld [vmem:[#allocation145_spill] sm:$0xff] }
 0x21f   :  { %v2300_v13 = vsel %vm1974_vm1, %v12469_v53, 0.0 }
 0x220   :  { %v2291_v60 = vadd.f32 %v2290_v32, %v2289_v10  ;;  %v12470_v10 = vld [vmem:[#allocation152_spill] sm:$0xff] }
 0x221   :  { %v2302_v32 = vsel %vm1974_vm1, %v12470_v10, 0.0 }
 0x222   :  { %v2293_v23 = vadd.f32 %v2292_v19, %v2291_v60  ;;  %v2304_v19 = vsel %vm1974_vm1, %v12471_v26, 0.0  ;;  %v12472_v60 = vld [vmem:[#allocation151_spill] sm:$0xff] }
 0x224   :  { %v2295_v7 = vadd.f32 %v2294_v3, %v2293_v23  ;;  %v2306_v3 = vsel %vm1974_vm1, %v12472_v60, 0.0 }
 0x226   :  { %v2297_v0 = vadd.f32 %v2296_v2, %v2295_v7  ;;  %v12473_v2 = vld [vmem:[#allocation153_spill] sm:$0xff] }
 0x227   :  { %v2308_v16 = vsel %vm1974_vm1, %v12473_v2, 0.0 }
 0x228   :  { %v2299_v34 = vadd.f32 %v2298_v15, %v2297_v0  ;;  %v2310_v0 = vsel %vm1974_vm1, %v6806_v29, 0.0 }
 0x22a   :  { %v2301_v61 = vadd.f32 %v2300_v13, %v2299_v34  ;;  %v2312_v13 = vsel %vm1974_vm1, %v12474_v38, 0.0  ;;  %v12475_v34 = vld [vmem:[#allocation159_spill] sm:$0xff] }
 0x22c   :  { %v2303_v44 = vadd.f32 %v2302_v32, %v2301_v61  ;;  %v2314_v32 = vsel %vm1974_vm1, %v12475_v34, 0.0 }
 0x22e   :  { %v2305_v23 = vadd.f32 %v2304_v19, %v2303_v44  ;;  %v12476_v19 = vld [vmem:[#allocation160_spill] sm:$0xff] }
 0x22f   :  { %v2316_v60 = vsel %vm1974_vm1, %v12476_v19, 0.0 }
 0x230   :  { %v2307_v7 = vadd.f32 %v2306_v3, %v2305_v23  ;;  %v2318_v23 = vsel %vm1974_vm1, %v6830_v9, 0.0 }
 0x232   :  { %v2309_v15 = vadd.f32 %v2308_v16, %v2307_v7  ;;  %v2320_v16 = vsel %vm1974_vm1, %v6838_v59, 0.0 }
 0x234   :  { %v2311_v53 = vadd.f32 %v2310_v0, %v2309_v15  ;;  %v12477_v0 = vld [vmem:[#allocation166_spill] sm:$0xff] }
 0x235   :  { %v2322_v15 = vsel %vm1974_vm1, %v12477_v0, 0.0 }
 0x236   :  { %v2313_v61 = vadd.f32 %v2312_v13, %v2311_v53  ;;  %v12478_v13 = vld [vmem:[#allocation167_spill] sm:$0xff] }
 0x237   :  { %v2324_v34 = vsel %vm1974_vm1, %v12478_v13, 0.0 }
 0x238   :  { %v2315_v44 = vadd.f32 %v2314_v32, %v2313_v61  ;;  %v2326_v61 = vsel %vm1974_vm1, %v6846_v33, 0.0 }
 0x23a   :  { %v2317_v3 = vadd.f32 %v2316_v60, %v2315_v44  ;;  %v2328_v60 = vsel %vm1974_vm1, %v6854_v43, 0.0 }
 0x23c   :  { %v2319_v2 = vadd.f32 %v2318_v23, %v2317_v3  ;;  %v2330_v23 = vsel %vm1974_vm1, %v6842_v62, 0.0  ;;  %v2332_v3 = vsel %vm1974_vm1, %v6848_v41, 0.0 }
 0x23e   :  { %v2321_v7 = vadd.f32 %v2320_v16, %v2319_v2  ;;  %v2334_v16 = vsel %vm1974_vm1, %v6862_v30, 0.0 }
 0x240   :  { %v2323_v53 = vadd.f32 %v2322_v15, %v2321_v7 }
 0x242   :  { %v2325_v32 = vadd.f32 %v2324_v34, %v2323_v53  ;;  %v2336_v34 = vsel %vm1974_vm1, %v6870_v57, 0.0 }
 0x244   :  { %v2327_v19 = vadd.f32 %v2326_v61, %v2325_v32  ;;  %v2338_v61 = vsel %vm1974_vm1, %v6858_v48, 0.0  ;;  %v2340_v32 = vsel %vm1974_vm1, %v6864_v54, 0.0 }
 0x246   :  { %v2329_v44 = vadd.f32 %v2328_v60, %v2327_v19  ;;  %v2342_v60 = vsel %vm1974_vm1, %v6878_v55, 0.0 }
 0x248   :  { %v2331_v2 = vadd.f32 %v2330_v23, %v2329_v44 }
 0x24a   :  { %v2333_v7 = vadd.f32 %v2332_v3, %v2331_v2  ;;  %v2344_v2 = vsel %vm1974_vm1, %v6886_v39, 0.0 }
 0x24c   :  { %v2335_v15 = vadd.f32 %v2334_v16, %v2333_v7  ;;  %v2346_v16 = vsel %vm1974_vm1, %v6874_v27, 0.0 }
 0x24e   :  { %v2337_v53 = vadd.f32 %v2336_v34, %v2335_v15  ;;  %v2348_v15 = vsel %vm1974_vm1, %v6880_v49, 0.0  ;;  %v2350_v34 = vsel %vm1974_vm1, %v6894_v45, 0.0 }
 0x250   :  { %v2339_v19 = vadd.f32 %v2338_v61, %v2337_v53 }
 0x252   :  { %v2341_v44 = vadd.f32 %v2340_v32, %v2339_v19  ;;  %v2352_v19 = vsel %vm1974_vm1, %v6902_v46, 0.0 }
 0x254   :  { %v2343_v23 = vadd.f32 %v2342_v60, %v2341_v44  ;;  %v2354_v60 = vsel %vm1974_vm1, %v6890_v12, 0.0 }
 0x256   :  { %v2345_v3 = vadd.f32 %v2344_v2, %v2343_v23  ;;  %v2356_v23 = vsel %vm1974_vm1, %v6896_v22, 0.0  ;;  %v2358_v2 = vsel %vm1974_vm1, %v6910_v11, 0.0 }
 0x258   :  { %v2347_v7 = vadd.f32 %v2346_v16, %v2345_v3 }
 0x25a   :  { %v2349_v53 = vadd.f32 %v2348_v15, %v2347_v7  ;;  %v2360_v7 = vsel %vm1974_vm1, %v6918_v14, 0.0 }
 0x25c   :  { %v2351_v61 = vadd.f32 %v2350_v34, %v2349_v53  ;;  %v2362_v34 = vsel %vm1974_vm1, %v6906_v20, 0.0 }
 0x25e   :  { %v2353_v32 = vadd.f32 %v2352_v19, %v2351_v61  ;;  %v2364_v61 = vsel %vm1974_vm1, %v6912_v51, 0.0  ;;  %v2366_v19 = vsel %vm1974_vm1, %v6926_v56, 0.0 }
 0x260   :  { %v2355_v44 = vadd.f32 %v2354_v60, %v2353_v32 }
 0x262   :  { %v2357_v3 = vadd.f32 %v2356_v23, %v2355_v44  ;;  %v2368_v44 = vsel %vm1974_vm1, %v6934_v24, 0.0 }
 0x264   :  { %v2359_v16 = vadd.f32 %v2358_v2, %v2357_v3  ;;  %v2370_v2 = vsel %vm1974_vm1, %v6922_v6, 0.0 }
 0x266   :  { %v2361_v15 = vadd.f32 %v2360_v7, %v2359_v16  ;;  %v2372_v16 = vsel %vm1974_vm1, %v6928_v17, 0.0  ;;  %v2374_v7 = vsel %vm1974_vm1, %v6942_v5, 0.0 }
 0x268   :  { %v2363_v53 = vadd.f32 %v2362_v34, %v2361_v15 }
 0x26a   :  { %v2365_v32 = vadd.f32 %v2364_v61, %v2363_v53  ;;  %v2376_v53 = vsel %vm1974_vm1, %v6950_v31, 0.0 }
 0x26c   :  { %v2367_v60 = vadd.f32 %v2366_v19, %v2365_v32  ;;  %v2378_v19 = vsel %vm1974_vm1, %v6938_v25, 0.0 }
 0x26e   :  { %v2369_v23 = vadd.f32 %v2368_v44, %v2367_v60  ;;  %v2380_v60 = vsel %vm1974_vm1, %v6944_v35, 0.0  ;;  %v2382_v44 = vsel %vm1974_vm1, %v6958_v28, 0.0 }
 0x270   :  { %v2371_v3 = vadd.f32 %v2370_v2, %v2369_v23 }
 0x272   :  { %v2373_v15 = vadd.f32 %v2372_v16, %v2371_v3  ;;  %v2384_v3 = vsel %vm1974_vm1, %v6966_v4, 0.0 }
 0x274   :  { %v2375_v34 = vadd.f32 %v2374_v7, %v2373_v15  ;;  %v2386_v7 = vsel %vm1974_vm1, %v6954_v1, 0.0 }
 0x276   :  { %v2377_v61 = vadd.f32 %v2376_v53, %v2375_v34  ;;  %v2388_v34 = vsel %vm1974_vm1, %v6960_v8, 0.0  ;;  %v2390_v53 = vsel %vm1974_vm1, %v6974_v50, 0.0 }
 0x278   :  { %v2379_v32 = vadd.f32 %v2378_v19, %v2377_v61 }
 0x27a   :  { %v2381_v23 = vadd.f32 %v2380_v60, %v2379_v32  ;;  %v2392_v32 = vsel %vm1974_vm1, %v6980_v42, 0.0 }
 0x27c   :  { %v2383_v2 = vadd.f32 %v2382_v44, %v2381_v23  ;;  %v2395_v44 = vsel %vm2394_vm2, %v6970_v36, 0.0 }
 0x27e   :  { %v2385_v16 = vadd.f32 %v2384_v3, %v2383_v2 }
 0x280   :  { %v2387_v15 = vadd.f32 %v2386_v7, %v2385_v16 }
 0x282   :  { %v2389_v61 = vadd.f32 %v2388_v34, %v2387_v15  ;;  %v12479_v15 = vld [vmem:[#allocation3_spill] sm:$0xff] }
 0x284   :  { %v2391_v19 = vadd.f32 %v2390_v53, %v2389_v61  ;;  %v12481_v53 = vld [vmem:[#allocation5_spill] sm:$0xff] }
 0x286   :  { %v2393_v60 = vadd.f32 %v2392_v32, %v2391_v19  ;;  %v12483_v19 = vld [vmem:[#allocation2_spill] sm:$0xff] }
 0x288   :  { %v2396_v23 = vadd.f32 %v2395_v44, %v2393_v60  ;;  %v12485_v60 = vld [vmem:[#allocation4_spill] sm:$0xff] }
 0x28a   :  { %v2397_v2 = vrot.slane %v2396_v23, 4 }
 0x28c   :  { %v2398_v3 = vadd.f32 %v2397_v2, %v2396_v23  ;;  %v12489_v23 = vld [vmem:[#allocation9_spill] sm:$0xff] }
 0x28e   :  { %v2399_v16 = vrot.slane %v2398_v3, 2 }
 0x290   :  { %v2400_v7 = vadd.f32 %v2399_v16, %v2398_v3  ;;  %v12491_v3 = vld [vmem:[#allocation6_spill] sm:$0xff] }
 0x292   :  { %v2401_v1 = vrot.slane %v2400_v7, 1 }
 0x294   :  { %v2402_v8 = vadd.f32 %v2401_v1, %v2400_v7  ;;  %v12487_v1 = vld [vmem:[#allocation7_spill] sm:$0xff]  ;;  %v12493_v7 = vld [vmem:[#allocation8_spill] sm:$0xff] }
 0x296   :  { %v7114_v4 = vmul.f32 0.0005945303, %v2402_v8 }
 0x298   :  { %v7118_v34 = vsub.f32 %v12479_v15, %v7114_v4  ;;  %v7122_v61 = vsub.f32 %v12481_v53, %v7114_v4  ;;  %v7126_v32 = vsub.f32 %v12483_v19, %v7114_v4  ;;  %v7130_v44 = vsub.f32 %v12485_v60, %v7114_v4  ;;  %v12495_v53 = vld [vmem:[#allocation11_spill] sm:$0xff]  ;;  %v12497_v60 = vld [vmem:[#allocation13_spill] sm:$0xff] }
 0x299   :  { %v7134_v8 = vsub.f32 %v12487_v1, %v7114_v4  ;;  %v7138_v2 = vsub.f32 %v12489_v23, %v7114_v4  ;;  %v7142_v16 = vsub.f32 %v12491_v3, %v7114_v4  ;;  %v7146_v15 = vsub.f32 %v12493_v7, %v7114_v4 }
 0x29a   :  { %12480 = vst [vmem:[#allocation144_spill] sm:$0xff] %v7118_v34  ;;  %12482 = vst [vmem:[#allocation152_spill] sm:$0xff] %v7122_v61  ;;  %v7150_v19 = vsub.f32 %v12495_v53, %v7114_v4  ;;  %v7154_v1 = vsub.f32 %v12497_v60, %v7114_v4 }
 0x29b   :  { %12484 = vst [vmem:[#allocation155_spill] sm:$0xff] %v7126_v32  ;;  %12486 = vst [vmem:[#allocation162_spill] sm:$0xff] %v7130_v44 }
 0x29c   :  { %12488 = vst [vmem:[#allocation166_spill] sm:$0xff] %v7134_v8  ;;  %12490 = vst [vmem:[#allocation167_spill] sm:$0xff] %v7138_v2  ;;  %v12499_v8 = vld [vmem:[#allocation10_spill] sm:$0xff]  ;;  %v12501_v2 = vld [vmem:[#allocation12_spill] sm:$0xff] }
 0x29d   :  { %12492 = vst [vmem:[#allocation3_spill] sm:$0xff] %v7142_v16  ;;  %12494 = vst [vmem:[#allocation5_spill] sm:$0xff] %v7146_v15  ;;  %v7158_v23 = vsub.f32 %v12499_v8, %v7114_v4  ;;  %v7162_v3 = vsub.f32 %v12501_v2, %v7114_v4  ;;  %v12503_v16 = vld [vmem:[#allocation15_spill] sm:$0xff]  ;;  %v12505_v15 = vld [vmem:[#allocation17_spill] sm:$0xff] }
 0x29e   :  { %12496 = vst [vmem:[#allocation2_spill] sm:$0xff] %v7150_v19  ;;  %12498 = vst [vmem:[#allocation4_spill] sm:$0xff] %v7154_v1  ;;  %v7166_v7 = vsub.f32 %v12503_v16, %v7114_v4  ;;  %v7170_v53 = vsub.f32 %v12505_v15, %v7114_v4  ;;  %v12507_v19 = vld [vmem:[#allocation14_spill] sm:$0xff]  ;;  %v12509_v1 = vld [vmem:[#allocation16_spill] sm:$0xff] }
 0x29f   :  { %12500 = vst [vmem:[#allocation7_spill] sm:$0xff] %v7158_v23  ;;  %12502 = vst [vmem:[#allocation9_spill] sm:$0xff] %v7162_v3  ;;  %v7174_v60 = vsub.f32 %v12507_v19, %v7114_v4  ;;  %v7178_v8 = vsub.f32 %v12509_v1, %v7114_v4  ;;  %v12511_v23 = vld [vmem:[#allocation19_spill] sm:$0xff]  ;;  %v12513_v3 = vld [vmem:[#allocation21_spill] sm:$0xff] }
 0x2a0   :  { %12504 = vst [vmem:[#allocation6_spill] sm:$0xff] %v7166_v7  ;;  %12506 = vst [vmem:[#allocation8_spill] sm:$0xff] %v7170_v53  ;;  %v7182_v2 = vsub.f32 %v12511_v23, %v7114_v4  ;;  %v7186_v16 = vsub.f32 %v12513_v3, %v7114_v4  ;;  %v12515_v7 = vld [vmem:[#allocation18_spill] sm:$0xff]  ;;  %v12517_v53 = vld [vmem:[#allocation20_spill] sm:$0xff] }
 0x2a1   :  { %12508 = vst [vmem:[#allocation11_spill] sm:$0xff] %v7174_v60  ;;  %12510 = vst [vmem:[#allocation13_spill] sm:$0xff] %v7178_v8  ;;  %v7190_v15 = vsub.f32 %v12515_v7, %v7114_v4  ;;  %v7194_v19 = vsub.f32 %v12517_v53, %v7114_v4  ;;  %v12519_v60 = vld [vmem:[#allocation23_spill] sm:$0xff]  ;;  %v12521_v8 = vld [vmem:[#allocation25_spill] sm:$0xff] }
 0x2a2   :  { %12512 = vst [vmem:[#allocation10_spill] sm:$0xff] %v7182_v2  ;;  %12514 = vst [vmem:[#allocation12_spill] sm:$0xff] %v7186_v16  ;;  %v7198_v1 = vsub.f32 %v12519_v60, %v7114_v4  ;;  %v7202_v23 = vsub.f32 %v12521_v8, %v7114_v4  ;;  %v12523_v2 = vld [vmem:[#allocation22_spill] sm:$0xff]  ;;  %v12525_v16 = vld [vmem:[#allocation24_spill] sm:$0xff] }
 0x2a3   :  { %12516 = vst [vmem:[#allocation15_spill] sm:$0xff] %v7190_v15  ;;  %12518 = vst [vmem:[#allocation17_spill] sm:$0xff] %v7194_v19  ;;  %v7206_v3 = vsub.f32 %v12523_v2, %v7114_v4  ;;  %v7210_v7 = vsub.f32 %v12525_v16, %v7114_v4  ;;  %v12527_v15 = vld [vmem:[#allocation27_spill] sm:$0xff]  ;;  %v12529_v19 = vld [vmem:[#allocation29_spill] sm:$0xff] }
 0x2a4   :  { %12520 = vst [vmem:[#allocation14_spill] sm:$0xff] %v7198_v1  ;;  %12522 = vst [vmem:[#allocation16_spill] sm:$0xff] %v7202_v23  ;;  %v7214_v53 = vsub.f32 %v12527_v15, %v7114_v4  ;;  %v7218_v60 = vsub.f32 %v12529_v19, %v7114_v4  ;;  %v12531_v1 = vld [vmem:[#allocation26_spill] sm:$0xff]  ;;  %v12533_v23 = vld [vmem:[#allocation28_spill] sm:$0xff] }
 0x2a5   :  { %12524 = vst [vmem:[#allocation19_spill] sm:$0xff] %v7206_v3  ;;  %12526 = vst [vmem:[#allocation21_spill] sm:$0xff] %v7210_v7  ;;  %v7222_v8 = vsub.f32 %v12531_v1, %v7114_v4  ;;  %v7226_v2 = vsub.f32 %v12533_v23, %v7114_v4  ;;  %v12535_v3 = vld [vmem:[#allocation31_spill] sm:$0xff]  ;;  %v12537_v7 = vld [vmem:[#allocation33_spill] sm:$0xff] }
 0x2a6   :  { %12528 = vst [vmem:[#allocation18_spill] sm:$0xff] %v7214_v53  ;;  %12530 = vst [vmem:[#allocation20_spill] sm:$0xff] %v7218_v60  ;;  %v7230_v16 = vsub.f32 %v12535_v3, %v7114_v4  ;;  %v7234_v15 = vsub.f32 %v12537_v7, %v7114_v4  ;;  %v12539_v53 = vld [vmem:[#allocation30_spill] sm:$0xff]  ;;  %v12541_v60 = vld [vmem:[#allocation32_spill] sm:$0xff] }
 0x2a7   :  { %12532 = vst [vmem:[#allocation23_spill] sm:$0xff] %v7222_v8  ;;  %12534 = vst [vmem:[#allocation25_spill] sm:$0xff] %v7226_v2  ;;  %v7238_v19 = vsub.f32 %v12539_v53, %v7114_v4  ;;  %v7242_v1 = vsub.f32 %v12541_v60, %v7114_v4  ;;  %v12543_v8 = vld [vmem:[#allocation35_spill] sm:$0xff]  ;;  %v12545_v2 = vld [vmem:[#allocation37_spill] sm:$0xff] }
 0x2a8   :  { %12536 = vst [vmem:[#allocation22_spill] sm:$0xff] %v7230_v16  ;;  %12538 = vst [vmem:[#allocation24_spill] sm:$0xff] %v7234_v15  ;;  %v7246_v23 = vsub.f32 %v12543_v8, %v7114_v4  ;;  %v7250_v3 = vsub.f32 %v12545_v2, %v7114_v4  ;;  %v12547_v16 = vld [vmem:[#allocation34_spill] sm:$0xff]  ;;  %v12549_v15 = vld [vmem:[#allocation36_spill] sm:$0xff] }
 0x2a9   :  { %12540 = vst [vmem:[#allocation27_spill] sm:$0xff] %v7238_v19  ;;  %12542 = vst [vmem:[#allocation29_spill] sm:$0xff] %v7242_v1  ;;  %v7254_v7 = vsub.f32 %v12547_v16, %v7114_v4  ;;  %v7258_v53 = vsub.f32 %v12549_v15, %v7114_v4  ;;  %v12551_v19 = vld [vmem:[#allocation39_spill] sm:$0xff]  ;;  %v12553_v1 = vld [vmem:[#allocation41_spill] sm:$0xff] }
 0x2aa   :  { %12544 = vst [vmem:[#allocation26_spill] sm:$0xff] %v7246_v23  ;;  %12546 = vst [vmem:[#allocation28_spill] sm:$0xff] %v7250_v3  ;;  %v7262_v60 = vsub.f32 %v12551_v19, %v7114_v4  ;;  %v7266_v8 = vsub.f32 %v12553_v1, %v7114_v4  ;;  %v12555_v23 = vld [vmem:[#allocation38_spill] sm:$0xff]  ;;  %v12557_v3 = vld [vmem:[#allocation40_spill] sm:$0xff] }
 0x2ab   :  { %12548 = vst [vmem:[#allocation31_spill] sm:$0xff] %v7254_v7  ;;  %12550 = vst [vmem:[#allocation33_spill] sm:$0xff] %v7258_v53  ;;  %v7270_v2 = vsub.f32 %v12555_v23, %v7114_v4  ;;  %v7274_v16 = vsub.f32 %v12557_v3, %v7114_v4  ;;  %v12559_v7 = vld [vmem:[#allocation43_spill] sm:$0xff]  ;;  %v12561_v53 = vld [vmem:[#allocation45_spill] sm:$0xff] }
 0x2ac   :  { %12552 = vst [vmem:[#allocation30_spill] sm:$0xff] %v7262_v60  ;;  %12554 = vst [vmem:[#allocation32_spill] sm:$0xff] %v7266_v8  ;;  %v7278_v15 = vsub.f32 %v12559_v7, %v7114_v4  ;;  %v7282_v19 = vsub.f32 %v12561_v53, %v7114_v4  ;;  %v12563_v60 = vld [vmem:[#allocation42_spill] sm:$0xff]  ;;  %v12565_v8 = vld [vmem:[#allocation44_spill] sm:$0xff] }
 0x2ad   :  { %12556 = vst [vmem:[#allocation35_spill] sm:$0xff] %v7270_v2  ;;  %12558 = vst [vmem:[#allocation37_spill] sm:$0xff] %v7274_v16  ;;  %v7286_v1 = vsub.f32 %v12563_v60, %v7114_v4  ;;  %v7290_v23 = vsub.f32 %v12565_v8, %v7114_v4  ;;  %v12567_v2 = vld [vmem:[#allocation51_spill] sm:$0xff]  ;;  %v12569_v16 = vld [vmem:[#allocation53_spill] sm:$0xff] }
 0x2ae   :  { %12560 = vst [vmem:[#allocation34_spill] sm:$0xff] %v7278_v15  ;;  %12562 = vst [vmem:[#allocation36_spill] sm:$0xff] %v7282_v19  ;;  %v7294_v3 = vsub.f32 %v12567_v2, %v7114_v4  ;;  %v7298_v7 = vsub.f32 %v12569_v16, %v7114_v4  ;;  %v12571_v15 = vld [vmem:[#allocation49_spill] sm:$0xff]  ;;  %v12573_v19 = vld [vmem:[#allocation52_spill] sm:$0xff] }
 0x2af   :  { %12564 = vst [vmem:[#allocation39_spill] sm:$0xff] %v7286_v1  ;;  %12566 = vst [vmem:[#allocation41_spill] sm:$0xff] %v7290_v23  ;;  %v7302_v53 = vsub.f32 %v12571_v15, %v7114_v4  ;;  %v7306_v60 = vsub.f32 %v12573_v19, %v7114_v4  ;;  %v12575_v1 = vld [vmem:[#allocation59_spill] sm:$0xff]  ;;  %v12577_v23 = vld [vmem:[#allocation61_spill] sm:$0xff] }
 0x2b0   :  { %12568 = vst [vmem:[#allocation38_spill] sm:$0xff] %v7294_v3  ;;  %12570 = vst [vmem:[#allocation40_spill] sm:$0xff] %v7298_v7  ;;  %v7310_v8 = vsub.f32 %v12575_v1, %v7114_v4  ;;  %v7314_v2 = vsub.f32 %v12577_v23, %v7114_v4  ;;  %v12579_v3 = vld [vmem:[#allocation57_spill] sm:$0xff]  ;;  %v12581_v7 = vld [vmem:[#allocation60_spill] sm:$0xff] }
 0x2b1   :  { %12572 = vst [vmem:[#allocation43_spill] sm:$0xff] %v7302_v53  ;;  %12574 = vst [vmem:[#allocation45_spill] sm:$0xff] %v7306_v60  ;;  %v7318_v16 = vsub.f32 %v12579_v3, %v7114_v4  ;;  %v7322_v15 = vsub.f32 %v12581_v7, %v7114_v4  ;;  %v12583_v53 = vld [vmem:[#allocation67_spill] sm:$0xff]  ;;  %v12585_v60 = vld [vmem:[#allocation69_spill] sm:$0xff] }
 0x2b2   :  { %12576 = vst [vmem:[#allocation42_spill] sm:$0xff] %v7310_v8  ;;  %12578 = vst [vmem:[#allocation44_spill] sm:$0xff] %v7314_v2  ;;  %v7326_v19 = vsub.f32 %v12583_v53, %v7114_v4  ;;  %v7330_v1 = vsub.f32 %v12585_v60, %v7114_v4  ;;  %v12587_v8 = vld [vmem:[#allocation65_spill] sm:$0xff]  ;;  %v12589_v2 = vld [vmem:[#allocation68_spill] sm:$0xff] }
 0x2b3   :  { %12580 = vst [vmem:[#allocation51_spill] sm:$0xff] %v7318_v16  ;;  %12582 = vst [vmem:[#allocation53_spill] sm:$0xff] %v7322_v15  ;;  %v7334_v23 = vsub.f32 %v12587_v8, %v7114_v4  ;;  %v7338_v3 = vsub.f32 %v12589_v2, %v7114_v4  ;;  %v12591_v16 = vld [vmem:[#allocation75_spill] sm:$0xff]  ;;  %v12593_v15 = vld [vmem:[#allocation77_spill] sm:$0xff] }
 0x2b4   :  { %12584 = vst [vmem:[#allocation49_spill] sm:$0xff] %v7326_v19  ;;  %12586 = vst [vmem:[#allocation52_spill] sm:$0xff] %v7330_v1  ;;  %v7342_v7 = vsub.f32 %v12591_v16, %v7114_v4  ;;  %v7346_v53 = vsub.f32 %v12593_v15, %v7114_v4  ;;  %v12595_v19 = vld [vmem:[#allocation73_spill] sm:$0xff]  ;;  %v12597_v1 = vld [vmem:[#allocation76_spill] sm:$0xff] }
 0x2b5   :  { %12588 = vst [vmem:[#allocation59_spill] sm:$0xff] %v7334_v23  ;;  %12590 = vst [vmem:[#allocation61_spill] sm:$0xff] %v7338_v3  ;;  %v7350_v60 = vsub.f32 %v12595_v19, %v7114_v4  ;;  %v7354_v8 = vsub.f32 %v12597_v1, %v7114_v4  ;;  %v12599_v23 = vld [vmem:[#allocation83_spill] sm:$0xff]  ;;  %v12601_v3 = vld [vmem:[#allocation85_spill] sm:$0xff] }
 0x2b6   :  { %12592 = vst [vmem:[#allocation57_spill] sm:$0xff] %v7342_v7  ;;  %12594 = vst [vmem:[#allocation60_spill] sm:$0xff] %v7346_v53  ;;  %v7358_v2 = vsub.f32 %v12599_v23, %v7114_v4  ;;  %v7362_v16 = vsub.f32 %v12601_v3, %v7114_v4  ;;  %v12603_v7 = vld [vmem:[#allocation81_spill] sm:$0xff]  ;;  %v12605_v53 = vld [vmem:[#allocation84_spill] sm:$0xff] }
 0x2b7   :  { %12596 = vst [vmem:[#allocation67_spill] sm:$0xff] %v7350_v60  ;;  %12598 = vst [vmem:[#allocation69_spill] sm:$0xff] %v7354_v8  ;;  %v7366_v15 = vsub.f32 %v12603_v7, %v7114_v4  ;;  %v7370_v19 = vsub.f32 %v12605_v53, %v7114_v4  ;;  %v12607_v60 = vld [vmem:[#allocation91_spill] sm:$0xff]  ;;  %v12609_v8 = vld [vmem:[#allocation93_spill] sm:$0xff] }
 0x2b8   :  { %12600 = vst [vmem:[#allocation65_spill] sm:$0xff] %v7358_v2  ;;  %12602 = vst [vmem:[#allocation68_spill] sm:$0xff] %v7362_v16  ;;  %v7374_v1 = vsub.f32 %v12607_v60, %v7114_v4  ;;  %v7378_v23 = vsub.f32 %v12609_v8, %v7114_v4  ;;  %v12611_v2 = vld [vmem:[#allocation89_spill] sm:$0xff]  ;;  %v12613_v16 = vld [vmem:[#allocation92_spill] sm:$0xff] }
 0x2b9   :  { %12604 = vst [vmem:[#allocation75_spill] sm:$0xff] %v7366_v15  ;;  %12606 = vst [vmem:[#allocation77_spill] sm:$0xff] %v7370_v19  ;;  %v7382_v3 = vsub.f32 %v12611_v2, %v7114_v4  ;;  %v7386_v7 = vsub.f32 %v12613_v16, %v7114_v4  ;;  %v12615_v15 = vld [vmem:[#allocation99_spill] sm:$0xff]  ;;  %v12617_v19 = vld [vmem:[#allocation101_spill] sm:$0xff] }
 0x2ba   :  { %12608 = vst [vmem:[#allocation73_spill] sm:$0xff] %v7374_v1  ;;  %12610 = vst [vmem:[#allocation76_spill] sm:$0xff] %v7378_v23  ;;  %v7390_v53 = vsub.f32 %v12615_v15, %v7114_v4  ;;  %v7394_v60 = vsub.f32 %v12617_v19, %v7114_v4  ;;  %v12619_v1 = vld [vmem:[#allocation97_spill] sm:$0xff]  ;;  %v12621_v23 = vld [vmem:[#allocation100_spill] sm:$0xff] }
 0x2bb   :  { %12612 = vst [vmem:[#allocation83_spill] sm:$0xff] %v7382_v3  ;;  %12614 = vst [vmem:[#allocation85_spill] sm:$0xff] %v7386_v7  ;;  %v7398_v8 = vsub.f32 %v12619_v1, %v7114_v4  ;;  %v7402_v2 = vsub.f32 %v12621_v23, %v7114_v4  ;;  %v12623_v3 = vld [vmem:[#allocation107_spill] sm:$0xff]  ;;  %v12625_v7 = vld [vmem:[#allocation109_spill] sm:$0xff] }
 0x2bc   :  { %12616 = vst [vmem:[#allocation81_spill] sm:$0xff] %v7390_v53  ;;  %12618 = vst [vmem:[#allocation84_spill] sm:$0xff] %v7394_v60  ;;  %v7406_v16 = vsub.f32 %v12623_v3, %v7114_v4  ;;  %v7410_v15 = vsub.f32 %v12625_v7, %v7114_v4  ;;  %v12627_v53 = vld [vmem:[#allocation105_spill] sm:$0xff]  ;;  %v12629_v60 = vld [vmem:[#allocation108_spill] sm:$0xff] }
 0x2bd   :  { %12620 = vst [vmem:[#allocation91_spill] sm:$0xff] %v7398_v8  ;;  %12622 = vst [vmem:[#allocation93_spill] sm:$0xff] %v7402_v2  ;;  %v7414_v19 = vsub.f32 %v12627_v53, %v7114_v4  ;;  %v7418_v1 = vsub.f32 %v12629_v60, %v7114_v4  ;;  %v12631_v8 = vld [vmem:[#allocation114_spill] sm:$0xff]  ;;  %v12633_v2 = vld [vmem:[#allocation116_spill] sm:$0xff] }
 0x2be   :  { %12624 = vst [vmem:[#allocation89_spill] sm:$0xff] %v7406_v16  ;;  %12626 = vst [vmem:[#allocation92_spill] sm:$0xff] %v7410_v15  ;;  %v7422_v23 = vsub.f32 %v12631_v8, %v7114_v4  ;;  %v7426_v3 = vsub.f32 %v12633_v2, %v7114_v4  ;;  %v12635_v16 = vld [vmem:[#allocation112_spill] sm:$0xff]  ;;  %v12637_v15 = vld [vmem:[#allocation115_spill] sm:$0xff] }
 0x2bf   :  { %12628 = vst [vmem:[#allocation99_spill] sm:$0xff] %v7414_v19  ;;  %12630 = vst [vmem:[#allocation101_spill] sm:$0xff] %v7418_v1  ;;  %v7430_v7 = vsub.f32 %v12635_v16, %v7114_v4  ;;  %v7434_v53 = vsub.f32 %v12637_v15, %v7114_v4  ;;  %v12639_v19 = vld [vmem:[#allocation119_spill] sm:$0xff]  ;;  %v12641_v1 = vld [vmem:[#allocation121_spill] sm:$0xff] }
 0x2c0   :  { %12632 = vst [vmem:[#allocation97_spill] sm:$0xff] %v7422_v23  ;;  %12634 = vst [vmem:[#allocation100_spill] sm:$0xff] %v7426_v3  ;;  %v7438_v60 = vsub.f32 %v12639_v19, %v7114_v4  ;;  %v7442_v8 = vsub.f32 %v12641_v1, %v7114_v4  ;;  %v12643_v23 = vld [vmem:[#allocation118_spill] sm:$0xff]  ;;  %v12645_v3 = vld [vmem:[#allocation120_spill] sm:$0xff] }
 0x2c1   :  { %12636 = vst [vmem:[#allocation107_spill] sm:$0xff] %v7430_v7  ;;  %12638 = vst [vmem:[#allocation109_spill] sm:$0xff] %v7434_v53  ;;  %v7446_v2 = vsub.f32 %v12643_v23, %v7114_v4  ;;  %v7450_v16 = vsub.f32 %v12645_v3, %v7114_v4  ;;  %v12647_v7 = vld [vmem:[#allocation124_spill] sm:$0xff]  ;;  %v12649_v53 = vld [vmem:[#allocation126_spill] sm:$0xff] }
 0x2c2   :  { %12640 = vst [vmem:[#allocation105_spill] sm:$0xff] %v7438_v60  ;;  %12642 = vst [vmem:[#allocation108_spill] sm:$0xff] %v7442_v8  ;;  %v7454_v15 = vsub.f32 %v12647_v7, %v7114_v4  ;;  %v7458_v19 = vsub.f32 %v12649_v53, %v7114_v4  ;;  %v12651_v60 = vld [vmem:[#allocation123_spill] sm:$0xff]  ;;  %v12653_v8 = vld [vmem:[#allocation125_spill] sm:$0xff] }
 0x2c3   :  { %12644 = vst [vmem:[#allocation114_spill] sm:$0xff] %v7446_v2  ;;  %12646 = vst [vmem:[#allocation116_spill] sm:$0xff] %v7450_v16  ;;  %v7462_v1 = vsub.f32 %v12651_v60, %v7114_v4  ;;  %v7466_v23 = vsub.f32 %v12653_v8, %v7114_v4  ;;  %v12655_v2 = vld [vmem:[#allocation132_spill] sm:$0xff]  ;;  %v12657_v16 = vld [vmem:[#allocation134_spill] sm:$0xff] }
 0x2c4   :  { %12648 = vst [vmem:[#allocation112_spill] sm:$0xff] %v7454_v15  ;;  %12650 = vst [vmem:[#allocation115_spill] sm:$0xff] %v7458_v19  ;;  %v7470_v3 = vsub.f32 %v12655_v2, %v7114_v4  ;;  %v7474_v7 = vsub.f32 %v12657_v16, %v7114_v4  ;;  %v12659_v15 = vld [vmem:[#allocation130_spill] sm:$0xff]  ;;  %v12661_v19 = vld [vmem:[#allocation133_spill] sm:$0xff] }
 0x2c5   :  { %12652 = vst [vmem:[#allocation119_spill] sm:$0xff] %v7462_v1  ;;  %12654 = vst [vmem:[#allocation121_spill] sm:$0xff] %v7466_v23  ;;  %v7478_v53 = vsub.f32 %v12659_v15, %v7114_v4  ;;  %v7482_v60 = vsub.f32 %v12661_v19, %v7114_v4  ;;  %v12663_v1 = vld [vmem:[#allocation140_spill] sm:$0xff]  ;;  %v12665_v23 = vld [vmem:[#allocation142_spill] sm:$0xff] }
 0x2c6   :  { %12656 = vst [vmem:[#allocation118_spill] sm:$0xff] %v7470_v3  ;;  %12658 = vst [vmem:[#allocation120_spill] sm:$0xff] %v7474_v7  ;;  %v7486_v8 = vsub.f32 %v12663_v1, %v7114_v4  ;;  %v7490_v2 = vsub.f32 %v12665_v23, %v7114_v4  ;;  %v12667_v3 = vld [vmem:[#allocation138_spill] sm:$0xff]  ;;  %v12669_v7 = vld [vmem:[#allocation141_spill] sm:$0xff] }
 0x2c7   :  { %12660 = vst [vmem:[#allocation124_spill] sm:$0xff] %v7478_v53  ;;  %12662 = vst [vmem:[#allocation126_spill] sm:$0xff] %v7482_v60  ;;  %v7494_v16 = vsub.f32 %v12667_v3, %v7114_v4  ;;  %v7498_v15 = vsub.f32 %v12669_v7, %v7114_v4  ;;  %v12671_v53 = vld [vmem:[#allocation148_spill] sm:$0xff]  ;;  %v12673_v60 = vld [vmem:[#allocation150_spill] sm:$0xff] }
 0x2c8   :  { %12664 = vst [vmem:[#allocation123_spill] sm:$0xff] %v7486_v8  ;;  %12666 = vst [vmem:[#allocation125_spill] sm:$0xff] %v7490_v2  ;;  %v7502_v19 = vsub.f32 %v12671_v53, %v7114_v4  ;;  %v7506_v1 = vsub.f32 %v12673_v60, %v7114_v4  ;;  %v12675_v8 = vld [vmem:[#allocation146_spill] sm:$0xff]  ;;  %v12677_v2 = vld [vmem:[#allocation149_spill] sm:$0xff] }
 0x2c9   :  { %12668 = vst [vmem:[#allocation132_spill] sm:$0xff] %v7494_v16  ;;  %12670 = vst [vmem:[#allocation134_spill] sm:$0xff] %v7498_v15  ;;  %v7510_v23 = vsub.f32 %v12675_v8, %v7114_v4  ;;  %v7514_v3 = vsub.f32 %v12677_v2, %v7114_v4  ;;  %v12679_v16 = vld [vmem:[#allocation156_spill] sm:$0xff]  ;;  %v12681_v15 = vld [vmem:[#allocation158_spill] sm:$0xff] }
 0x2ca   :  { %12672 = vst [vmem:[#allocation130_spill] sm:$0xff] %v7502_v19  ;;  %12674 = vst [vmem:[#allocation133_spill] sm:$0xff] %v7506_v1  ;;  %v7518_v7 = vsub.f32 %v12679_v16, %v7114_v4  ;;  %v7522_v53 = vsub.f32 %v12681_v15, %v7114_v4  ;;  %v12683_v19 = vld [vmem:[#allocation154_spill] sm:$0xff]  ;;  %v12685_v1 = vld [vmem:[#allocation157_spill] sm:$0xff] }
 0x2cb   :  { %12676 = vst [vmem:[#allocation140_spill] sm:$0xff] %v7510_v23  ;;  %12678 = vst [vmem:[#allocation142_spill] sm:$0xff] %v7514_v3  ;;  %v7526_v60 = vsub.f32 %v12683_v19, %v7114_v4  ;;  %v7530_v8 = vsub.f32 %v12685_v1, %v7114_v4  ;;  %v12687_v23 = vld [vmem:[#allocation163_spill] sm:$0xff]  ;;  %v12689_v3 = vld [vmem:[#allocation165_spill] sm:$0xff] }
 0x2cc   :  { %12680 = vst [vmem:[#allocation138_spill] sm:$0xff] %v7518_v7  ;;  %12682 = vst [vmem:[#allocation141_spill] sm:$0xff] %v7522_v53  ;;  %v7534_v2 = vsub.f32 %v12687_v23, %v7114_v4  ;;  %v7538_v16 = vsub.f32 %v12689_v3, %v7114_v4  ;;  %v12691_v7 = vld [vmem:[#allocation161_spill] sm:$0xff]  ;;  %v12693_v53 = vld [vmem:[#allocation164_spill] sm:$0xff] }
 0x2cd   :  { %12684 = vst [vmem:[#allocation148_spill] sm:$0xff] %v7526_v60  ;;  %12686 = vst [vmem:[#allocation150_spill] sm:$0xff] %v7530_v8  ;;  %v7542_v15 = vsub.f32 %v12691_v7, %v7114_v4  ;;  %v7546_v19 = vsub.f32 %v12693_v53, %v7114_v4  ;;  %v12695_v60 = vld [vmem:[#allocation47_spill] sm:$0xff]  ;;  %v12697_v8 = vld [vmem:[#allocation50_spill] sm:$0xff] }
 0x2ce   :  { %12688 = vst [vmem:[#allocation146_spill] sm:$0xff] %v7534_v2  ;;  %12690 = vst [vmem:[#allocation149_spill] sm:$0xff] %v7538_v16  ;;  %v7550_v1 = vsub.f32 %v12695_v60, %v7114_v4  ;;  %v7554_v23 = vsub.f32 %v12697_v8, %v7114_v4  ;;  %v12699_v2 = vld [vmem:[#allocation46_spill] sm:$0xff]  ;;  %v12701_v16 = vld [vmem:[#allocation48_spill] sm:$0xff] }
 0x2cf   :  { %12692 = vst [vmem:[#allocation156_spill] sm:$0xff] %v7542_v15  ;;  %12694 = vst [vmem:[#allocation158_spill] sm:$0xff] %v7546_v19  ;;  %v7558_v3 = vsub.f32 %v12699_v2, %v7114_v4  ;;  %v7562_v7 = vsub.f32 %v12701_v16, %v7114_v4  ;;  %v12703_v15 = vld [vmem:[#allocation55_spill] sm:$0xff]  ;;  %v12705_v19 = vld [vmem:[#allocation58_spill] sm:$0xff] }
 0x2d0   :  { %12696 = vst [vmem:[#allocation154_spill] sm:$0xff] %v7550_v1  ;;  %12698 = vst [vmem:[#allocation157_spill] sm:$0xff] %v7554_v23  ;;  %v7566_v53 = vsub.f32 %v12703_v15, %v7114_v4  ;;  %v7570_v60 = vsub.f32 %v12705_v19, %v7114_v4  ;;  %v12707_v1 = vld [vmem:[#allocation54_spill] sm:$0xff]  ;;  %v12709_v23 = vld [vmem:[#allocation56_spill] sm:$0xff] }
 0x2d1   :  { %12700 = vst [vmem:[#allocation163_spill] sm:$0xff] %v7558_v3  ;;  %12702 = vst [vmem:[#allocation165_spill] sm:$0xff] %v7562_v7  ;;  %v7574_v8 = vsub.f32 %v12707_v1, %v7114_v4  ;;  %v7578_v2 = vsub.f32 %v12709_v23, %v7114_v4  ;;  %v12711_v3 = vld [vmem:[#allocation63_spill] sm:$0xff]  ;;  %v12713_v7 = vld [vmem:[#allocation66_spill] sm:$0xff] }
 0x2d2   :  { %12704 = vst [vmem:[#allocation161_spill] sm:$0xff] %v7566_v53  ;;  %12706 = vst [vmem:[#allocation164_spill] sm:$0xff] %v7570_v60  ;;  %v7582_v16 = vsub.f32 %v12711_v3, %v7114_v4  ;;  %v7586_v15 = vsub.f32 %v12713_v7, %v7114_v4  ;;  %v12715_v53 = vld [vmem:[#allocation62_spill] sm:$0xff]  ;;  %v12717_v60 = vld [vmem:[#allocation64_spill] sm:$0xff] }
 0x2d3   :  { %12708 = vst [vmem:[#allocation47_spill] sm:$0xff] %v7574_v8  ;;  %12710 = vst [vmem:[#allocation50_spill] sm:$0xff] %v7578_v2  ;;  %v7590_v19 = vsub.f32 %v12715_v53, %v7114_v4  ;;  %v7594_v1 = vsub.f32 %v12717_v60, %v7114_v4  ;;  %v12719_v8 = vld [vmem:[#allocation71_spill] sm:$0xff]  ;;  %v12721_v2 = vld [vmem:[#allocation74_spill] sm:$0xff] }
 0x2d4   :  { %12712 = vst [vmem:[#allocation46_spill] sm:$0xff] %v7582_v16  ;;  %12714 = vst [vmem:[#allocation48_spill] sm:$0xff] %v7586_v15  ;;  %v7598_v23 = vsub.f32 %v12719_v8, %v7114_v4  ;;  %v7602_v3 = vsub.f32 %v12721_v2, %v7114_v4  ;;  %v12723_v16 = vld [vmem:[#allocation70_spill] sm:$0xff]  ;;  %v12725_v15 = vld [vmem:[#allocation72_spill] sm:$0xff] }
 0x2d5   :  { %12716 = vst [vmem:[#allocation55_spill] sm:$0xff] %v7590_v19  ;;  %12718 = vst [vmem:[#allocation58_spill] sm:$0xff] %v7594_v1  ;;  %v7606_v7 = vsub.f32 %v12723_v16, %v7114_v4  ;;  %v7610_v53 = vsub.f32 %v12725_v15, %v7114_v4  ;;  %v12727_v19 = vld [vmem:[#allocation79_spill] sm:$0xff]  ;;  %v12729_v1 = vld [vmem:[#allocation82_spill] sm:$0xff] }
 0x2d6   :  { %12720 = vst [vmem:[#allocation54_spill] sm:$0xff] %v7598_v23  ;;  %12722 = vst [vmem:[#allocation56_spill] sm:$0xff] %v7602_v3  ;;  %v7614_v60 = vsub.f32 %v12727_v19, %v7114_v4  ;;  %v7618_v8 = vsub.f32 %v12729_v1, %v7114_v4  ;;  %v12731_v23 = vld [vmem:[#allocation78_spill] sm:$0xff]  ;;  %v12733_v3 = vld [vmem:[#allocation80_spill] sm:$0xff] }
 0x2d7   :  { %12724 = vst [vmem:[#allocation63_spill] sm:$0xff] %v7606_v7  ;;  %12726 = vst [vmem:[#allocation66_spill] sm:$0xff] %v7610_v53  ;;  %v7622_v2 = vsub.f32 %v12731_v23, %v7114_v4  ;;  %v7626_v16 = vsub.f32 %v12733_v3, %v7114_v4  ;;  %v12735_v7 = vld [vmem:[#allocation87_spill] sm:$0xff]  ;;  %v12737_v53 = vld [vmem:[#allocation90_spill] sm:$0xff] }
 0x2d8   :  { %12728 = vst [vmem:[#allocation62_spill] sm:$0xff] %v7614_v60  ;;  %12730 = vst [vmem:[#allocation64_spill] sm:$0xff] %v7618_v8  ;;  %v7630_v15 = vsub.f32 %v12735_v7, %v7114_v4  ;;  %v7634_v19 = vsub.f32 %v12737_v53, %v7114_v4  ;;  %v12739_v60 = vld [vmem:[#allocation86_spill] sm:$0xff]  ;;  %v12741_v8 = vld [vmem:[#allocation88_spill] sm:$0xff] }
 0x2d9   :  { %12732 = vst [vmem:[#allocation71_spill] sm:$0xff] %v7622_v2  ;;  %12734 = vst [vmem:[#allocation74_spill] sm:$0xff] %v7626_v16  ;;  %v7638_v1 = vsub.f32 %v12739_v60, %v7114_v4  ;;  %v7642_v23 = vsub.f32 %v12741_v8, %v7114_v4  ;;  %v12743_v2 = vld [vmem:[#allocation95_spill] sm:$0xff]  ;;  %v12745_v16 = vld [vmem:[#allocation98_spill] sm:$0xff] }
 0x2da   :  { %12736 = vst [vmem:[#allocation70_spill] sm:$0xff] %v7630_v15  ;;  %12738 = vst [vmem:[#allocation72_spill] sm:$0xff] %v7634_v19  ;;  %v7646_v3 = vsub.f32 %v12743_v2, %v7114_v4  ;;  %v7650_v7 = vsub.f32 %v12745_v16, %v7114_v4  ;;  %v12747_v15 = vld [vmem:[#allocation94_spill] sm:$0xff]  ;;  %v12749_v19 = vld [vmem:[#allocation96_spill] sm:$0xff] }
 0x2db   :  { %12740 = vst [vmem:[#allocation79_spill] sm:$0xff] %v7638_v1  ;;  %12742 = vst [vmem:[#allocation82_spill] sm:$0xff] %v7642_v23  ;;  %v7654_v53 = vsub.f32 %v12747_v15, %v7114_v4  ;;  %v7658_v60 = vsub.f32 %v12749_v19, %v7114_v4  ;;  %v12751_v1 = vld [vmem:[#allocation103_spill] sm:$0xff]  ;;  %v12753_v23 = vld [vmem:[#allocation106_spill] sm:$0xff] }
 0x2dc   :  { %12744 = vst [vmem:[#allocation78_spill] sm:$0xff] %v7646_v3  ;;  %12746 = vst [vmem:[#allocation80_spill] sm:$0xff] %v7650_v7  ;;  %v7662_v8 = vsub.f32 %v12751_v1, %v7114_v4  ;;  %v7666_v2 = vsub.f32 %v12753_v23, %v7114_v4  ;;  %v12754_v3 = vld [vmem:[#allocation102_spill] sm:$0xff]  ;;  %v12756_v7 = vld [vmem:[#allocation104_spill] sm:$0xff] }
 0x2dd   :  { %12748 = vst [vmem:[#allocation87_spill] sm:$0xff] %v7654_v53  ;;  %12750 = vst [vmem:[#allocation90_spill] sm:$0xff] %v7658_v60  ;;  %v7670_v16 = vsub.f32 %v12754_v3, %v7114_v4  ;;  %v7674_v15 = vsub.f32 %v12756_v7, %v7114_v4  ;;  %v12757_v53 = vld [vmem:[#allocation111_spill] sm:$0xff]  ;;  %v12758_v60 = vld [vmem:[#allocation113_spill] sm:$0xff]  ;;  %v7690_v3 = vsub.f32 %v6640_v18, %v7114_v4 }
 0x2de   :  { %12752 = vst [vmem:[#allocation86_spill] sm:$0xff] %v7662_v8  ;;  %v7678_v19 = vsub.f32 %v12757_v53, %v7114_v4  ;;  %v7682_v1 = vsub.f32 %v12758_v60, %v7114_v4  ;;  %v12759_v8 = vld [vmem:[#allocation110_spill] sm:$0xff]  ;;  %v7698_v53 = vsub.f32 %v6670_v40, %v7114_v4  ;;  %v7702_v60 = vsub.f32 %v6658_v58, %v7114_v4 }
 0x2df   :  { %12755 = vst [vmem:[#allocation88_spill] sm:$0xff] %v7670_v16  ;;  %v7686_v23 = vsub.f32 %v12759_v8, %v7114_v4  ;;  %12761 = vst [vmem:[#allocation98_spill] sm:$0xff] %v7690_v3  ;;  %v12762_v16 = vld [vmem:[#allocation117_spill] sm:$0xff]  ;;  %v7706_v8 = vsub.f32 %v6664_v63, %v7114_v4  ;;  %v7710_v18 = vsub.f32 %v6686_v52, %v7114_v4 }
 0x2e0   :  { %v7694_v7 = vsub.f32 %v12762_v16, %v7114_v4  ;;  %12764 = vst [vmem:[#allocation96_spill] sm:$0xff] %v7698_v53  ;;  %12765 = vst [vmem:[#allocation103_spill] sm:$0xff] %v7702_v60  ;;  %v7714_v16 = vsub.f32 %v6694_v21, %v7114_v4  ;;  %v7718_v40 = vsub.f32 %v6682_v37, %v7114_v4  ;;  %v12770_v53 = vld [vmem:[#allocation122_spill] sm:$0xff]  ;;  %v12772_v60 = vld [vmem:[#allocation128_spill] sm:$0xff] }
 0x2e1   :  { %12760 = vst [vmem:[#allocation95_spill] sm:$0xff] %v7686_v23  ;;  %12766 = vst [vmem:[#allocation106_spill] sm:$0xff] %v7706_v8  ;;  %v7722_v58 = vsub.f32 %v12770_v53, %v7114_v4  ;;  %v7726_v63 = vsub.f32 %v12772_v60, %v7114_v4  ;;  %v12774_v8 = vld [vmem:[#allocation131_spill] sm:$0xff] }
 0x2e2   :  { %12763 = vst [vmem:[#allocation94_spill] sm:$0xff] %v7694_v7  ;;  %12767 = vst [vmem:[#allocation102_spill] sm:$0xff] %v7710_v18  ;;  %v7730_v52 = vsub.f32 %v12774_v8, %v7114_v4  ;;  %v12776_v18 = vld [vmem:[#allocation127_spill] sm:$0xff] }
 0x2e3   :  { %12768 = vst [vmem:[#allocation104_spill] sm:$0xff] %v7714_v16  ;;  %12769 = vst [vmem:[#allocation111_spill] sm:$0xff] %v7718_v40  ;;  %v7734_v21 = vsub.f32 %v12776_v18, %v7114_v4  ;;  %v12778_v16 = vld [vmem:[#allocation129_spill] sm:$0xff]  ;;  %v12780_v40 = vld [vmem:[#allocation136_spill] sm:$0xff] }
 0x2e4   :  { %12771 = vst [vmem:[#allocation113_spill] sm:$0xff] %v7722_v58  ;;  %12773 = vst [vmem:[#allocation110_spill] sm:$0xff] %v7726_v63  ;;  %v7738_v37 = vsub.f32 %v12778_v16, %v7114_v4  ;;  %v7742_v53 = vsub.f32 %v12780_v40, %v7114_v4  ;;  %v12782_v58 = vld [vmem:[#allocation139_spill] sm:$0xff]  ;;  %v7758_v16 = vsub.f32 %v12466_v47, %v7114_v4 }
 0x2e5   :  { %12775 = vst [vmem:[#allocation117_spill] sm:$0xff] %v7730_v52  ;;  %12777 = vst [vmem:[#allocation122_spill] sm:$0xff] %v7734_v21  ;;  %v7746_v60 = vsub.f32 %v12782_v58, %v7114_v4  ;;  %v12784_v63 = vld [vmem:[#allocation135_spill] sm:$0xff]  ;;  %v12786_v52 = vld [vmem:[#allocation137_spill] sm:$0xff]  ;;  %v7778_v47 = vsub.f32 %v12471_v26, %v7114_v4 }
 0x2e6   :  { %12779 = vst [vmem:[#allocation128_spill] sm:$0xff] %v7738_v37  ;;  %12781 = vst [vmem:[#allocation131_spill] sm:$0xff] %v7742_v53  ;;  %v7750_v8 = vsub.f32 %v12784_v63, %v7114_v4  ;;  %v7754_v18 = vsub.f32 %v12786_v52, %v7114_v4  ;;  %v12788_v37 = vld [vmem:[#allocation147_spill] sm:$0xff]  ;;  %v7774_v52 = vsub.f32 %v12470_v10, %v7114_v4 }
 0x2e7   :  { %12783 = vst [vmem:[#allocation127_spill] sm:$0xff] %v7746_v60  ;;  %12787 = vst [vmem:[#allocation136_spill] sm:$0xff] %v7758_v16  ;;  %v7762_v40 = vsub.f32 %v12788_v37, %v7114_v4  ;;  %v12790_v53 = vld [vmem:[#allocation143_spill] sm:$0xff]  ;;  %v12792_v60 = vld [vmem:[#allocation145_spill] sm:$0xff]  ;;  %v7794_v10 = vsub.f32 %v12474_v38, %v7114_v4  ;;  %v7814_v38 = vsub.f32 %v12477_v0, %v7114_v4 }
 0x2e8   :  { %12785 = vst [vmem:[#allocation129_spill] sm:$0xff] %v7750_v8  ;;  %v7766_v58 = vsub.f32 %v12790_v53, %v7114_v4  ;;  %v7770_v63 = vsub.f32 %v12792_v60, %v7114_v4  ;;  %12793 = vst [vmem:[#allocation137_spill] sm:$0xff] %v7774_v52  ;;  %v12795_v16 = vld [vmem:[#allocation151_spill] sm:$0xff]  ;;  %v7790_v60 = vsub.f32 %v6806_v29, %v7114_v4 }
 0x2e9   :  { %12789 = vst [vmem:[#allocation139_spill] sm:$0xff] %v7762_v40  ;;  %12794 = vst [vmem:[#allocation147_spill] sm:$0xff] %v7778_v47  ;;  %v7782_v37 = vsub.f32 %v12795_v16, %v7114_v4  ;;  %v12796_v40 = vld [vmem:[#allocation153_spill] sm:$0xff]  ;;  %v12797_v52 = vld [vmem:[#allocation159_spill] sm:$0xff]  ;;  %v7810_v29 = vsub.f32 %v6838_v59, %v7114_v4  ;;  %v7830_v59 = vsub.f32 %v6842_v62, %v7114_v4 }
 0x2ea   :  { %12791 = vst [vmem:[#allocation135_spill] sm:$0xff] %v7766_v58  ;;  %v7786_v53 = vsub.f32 %v12796_v40, %v7114_v4  ;;  %v7798_v26 = vsub.f32 %v12797_v52, %v7114_v4  ;;  %v12798_v47 = vld [vmem:[#allocation160_spill] sm:$0xff]  ;;  %v7806_v40 = vsub.f32 %v6830_v9, %v7114_v4  ;;  %v7818_v52 = vsub.f32 %v12478_v13, %v7114_v4 }
 0x2eb   :  { %v7802_v16 = vsub.f32 %v12798_v47, %v7114_v4  ;;  %v7822_v47 = vsub.f32 %v6846_v33, %v7114_v4  ;;  %v7826_v9 = vsub.f32 %v6854_v43, %v7114_v4  ;;  %v7834_v0 = vsub.f32 %v6848_v41, %v7114_v4 }
 0x2ec   :  { %v7838_v13 = vsub.f32 %v6862_v30, %v7114_v4  ;;  %v7842_v33 = vsub.f32 %v6870_v57, %v7114_v4  ;;  %v7846_v43 = vsub.f32 %v6858_v48, %v7114_v4  ;;  %v7850_v62 = vsub.f32 %v6864_v54, %v7114_v4 }
 0x2ed   :  { %v7854_v41 = vsub.f32 %v6878_v55, %v7114_v4  ;;  %v7858_v30 = vsub.f32 %v6886_v39, %v7114_v4  ;;  %v7862_v57 = vsub.f32 %v6874_v27, %v7114_v4  ;;  %v7866_v48 = vsub.f32 %v6880_v49, %v7114_v4 }
 0x2ee   :  { %v7870_v54 = vsub.f32 %v6894_v45, %v7114_v4  ;;  %v7874_v55 = vsub.f32 %v6902_v46, %v7114_v4  ;;  %v7878_v39 = vsub.f32 %v6890_v12, %v7114_v4  ;;  %v7882_v27 = vsub.f32 %v6896_v22, %v7114_v4 }
 0x2ef   :  { %v7886_v49 = vsub.f32 %v6910_v11, %v7114_v4  ;;  %v7890_v45 = vsub.f32 %v6918_v14, %v7114_v4  ;;  %v7894_v46 = vsub.f32 %v6906_v20, %v7114_v4  ;;  %v7898_v12 = vsub.f32 %v6912_v51, %v7114_v4 }
 0x2f0   :  { %v7902_v22 = vsub.f32 %v6926_v56, %v7114_v4  ;;  %v7906_v11 = vsub.f32 %v6934_v24, %v7114_v4  ;;  %v7910_v14 = vsub.f32 %v6922_v6, %v7114_v4  ;;  %v7914_v20 = vsub.f32 %v6928_v17, %v7114_v4 }
 0x2f1   :  { %12799 = vst [vmem:[#allocation143_spill] sm:$0xff] %v7898_v12  ;;  %v7918_v51 = vsub.f32 %v6942_v5, %v7114_v4  ;;  %v7922_v56 = vsub.f32 %v6950_v31, %v7114_v4  ;;  %v7926_v24 = vsub.f32 %v6938_v25, %v7114_v4  ;;  %v7930_v6 = vsub.f32 %v6944_v35, %v7114_v4 }
 0x2f2   :  { %12800 = vst [vmem:[#allocation145_spill] sm:$0xff] %v7902_v22  ;;  %12801 = vst [vmem:[#allocation151_spill] sm:$0xff] %v7906_v11  ;;  %v7934_v17 = vsub.f32 %v6958_v28, %v7114_v4  ;;  %v7950_v35 = vsub.f32 %v6974_v50, %v7114_v4  ;;  %v7954_v28 = vsub.f32 %v6980_v42, %v7114_v4 }
 0x2f3   :  { %12802 = vst [vmem:[#allocation153_spill] sm:$0xff] %v7910_v14  ;;  %12803 = vst [vmem:[#allocation159_spill] sm:$0xff] %v7914_v20  ;;  %v12809_v20 = vld [vmem:[#allocation170_spill] sm:$0xff]  ;;  %v2619_v50 = vmul.f32 %v7130_v44, %v7130_v44 }
 0x2f4   :  { %12804 = vst [vmem:[#allocation160_spill] sm:$0xff] %v7918_v51  ;;  %12805 = vst [vmem:[#allocation171_spill] sm:$0xff] %v7922_v56  ;;  %v7938_v5 = vsub.f32 %v12809_v20, %v7114_v4  ;;  %v12811_v51 = vld [vmem:[#allocation168_spill] sm:$0xff]  ;;  %v12813_v56 = vld [vmem:[#allocation169_spill] sm:$0xff]  ;;  %v7958_v20 = vsub.f32 %v6970_v36, %v7114_v4 }
 0x2f5   :  { %12806 = vst [vmem:[#allocation172_spill] sm:$0xff] %v7926_v24  ;;  %12807 = vst [vmem:[#allocation173_spill] sm:$0xff] %v7930_v6  ;;  %v7942_v31 = vsub.f32 %v12811_v51, %v7114_v4  ;;  %v7946_v25 = vsub.f32 %v12813_v56, %v7114_v4  ;;  %v2616_v51 = vmul.f32 %v7118_v34, %v7118_v34 }
 0x2f6   :  { %12808 = vst [vmem:[#allocation174_spill] sm:$0xff] %v7934_v17  ;;  %12810 = vst [vmem:[#allocation170_spill] sm:$0xff] %v7938_v5  ;;  %v2618_v56 = vmul.f32 %v7126_v32, %v7126_v32  ;;  %v2832_v5 = vsel %vm1974_vm1, %v2619_v50, 0.0  ;;  %v12820_v17 = vld [vmem:[#allocation3_spill] sm:$0xff]  ;;  %v12823_v50 = vld [vmem:[#allocation4_spill] sm:$0xff] }
 0x2f7   :  { %12812 = vst [vmem:[#allocation168_spill] sm:$0xff] %v7942_v31  ;;  %12814 = vst [vmem:[#allocation169_spill] sm:$0xff] %v7946_v25  ;;  %v2617_v31 = vmul.f32 %v7122_v61, %v7122_v61  ;;  %v12818_v25 = vld [vmem:[#allocation166_spill] sm:$0xff]  ;;  %v2622_v44 = vmul.f32 %v12820_v17, %v12820_v17 }
 0x2f8   :  { %12815 = vst [vmem:[#allocation175_spill] sm:$0xff] %v7950_v35  ;;  %12816 = vst [vmem:[#allocation176_spill] sm:$0xff] %v7954_v28  ;;  %v2827_v35 = vsel %vm1974_vm1, %v2616_v51, 0.0  ;;  %v2620_v36 = vmul.f32 %v12818_v25, %v12818_v25  ;;  %v2830_v4 = vsel %vm1974_vm1, %v2618_v56, 0.0  ;;  %v12822_v56 = vld [vmem:[#allocation2_spill] sm:$0xff] }
 0x2f9   :  { %12817 = vst [vmem:[#allocation177_spill] sm:$0xff] %v7958_v20  ;;  %v2828_v42 = vsel %vm1974_vm1, %v2617_v31, 0.0  ;;  %v12819_v20 = vld [vmem:[#allocation167_spill] sm:$0xff]  ;;  %v12821_v31 = vld [vmem:[#allocation5_spill] sm:$0xff] }
 0x2fa   :  { %v2829_v28 = vadd.f32 %v2828_v42, %v2827_v35  ;;  %v2621_v61 = vmul.f32 %v12819_v20, %v12819_v20  ;;  %v2834_v51 = vsel %vm1974_vm1, %v2620_v36, 0.0  ;;  %v2623_v35 = vmul.f32 %v12821_v31, %v12821_v31  ;;  %v12824_v36 = vld [vmem:[#allocation7_spill] sm:$0xff] }
 0x2fc   :  { %v2831_v34 = vadd.f32 %v2830_v4, %v2829_v28  ;;  %v2836_v42 = vsel %vm1974_vm1, %v2621_v61, 0.0  ;;  %v2624_v28 = vmul.f32 %v12822_v56, %v12822_v56  ;;  %v2838_v4 = vsel %vm1974_vm1, %v2622_v44, 0.0  ;;  %v12825_v61 = vld [vmem:[#allocation9_spill] sm:$0xff]  ;;  %v12826_v44 = vld [vmem:[#allocation6_spill] sm:$0xff] }
 0x2fe   :  { %v2833_v32 = vadd.f32 %v2832_v5, %v2831_v34  ;;  %v2625_v34 = vmul.f32 %v12823_v50, %v12823_v50  ;;  %v2840_v5 = vsel %vm1974_vm1, %v2623_v35, 0.0  ;;  %v12827_v35 = vld [vmem:[#allocation8_spill] sm:$0xff] }
 0x300   :  { %v2835_v6 = vadd.f32 %v2834_v51, %v2833_v32  ;;  %v2626_v32 = vmul.f32 %v12824_v36, %v12824_v36  ;;  %v2842_v51 = vsel %vm1974_vm1, %v2624_v28, 0.0  ;;  %v12828_v28 = vld [vmem:[#allocation11_spill] sm:$0xff] }
 0x302   :  { %v2837_v25 = vadd.f32 %v2836_v42, %v2835_v6  ;;  %v2627_v6 = vmul.f32 %v12825_v61, %v12825_v61  ;;  %v2844_v42 = vsel %vm1974_vm1, %v2625_v34, 0.0  ;;  %v12829_v34 = vld [vmem:[#allocation13_spill] sm:$0xff] }
 0x304   :  { %v2839_v20 = vadd.f32 %v2838_v4, %v2837_v25  ;;  %v2628_v25 = vmul.f32 %v12826_v44, %v12826_v44  ;;  %v2846_v4 = vsel %vm1974_vm1, %v2626_v32, 0.0  ;;  %v12830_v32 = vld [vmem:[#allocation10_spill] sm:$0xff] }
 0x306   :  { %v2841_v17 = vadd.f32 %v2840_v5, %v2839_v20  ;;  %v2629_v20 = vmul.f32 %v12827_v35, %v12827_v35  ;;  %v2848_v5 = vsel %vm1974_vm1, %v2627_v6, 0.0  ;;  %v12831_v6 = vld [vmem:[#allocation12_spill] sm:$0xff] }
 0x308   :  { %v2843_v31 = vadd.f32 %v2842_v51, %v2841_v17  ;;  %v2630_v17 = vmul.f32 %v12828_v28, %v12828_v28  ;;  %v2850_v51 = vsel %vm1974_vm1, %v2628_v25, 0.0  ;;  %v12832_v25 = vld [vmem:[#allocation15_spill] sm:$0xff] }
 0x30a   :  { %v2845_v56 = vadd.f32 %v2844_v42, %v2843_v31  ;;  %v2631_v31 = vmul.f32 %v12829_v34, %v12829_v34  ;;  %v2852_v42 = vsel %vm1974_vm1, %v2629_v20, 0.0  ;;  %v12833_v20 = vld [vmem:[#allocation17_spill] sm:$0xff] }
 0x30c   :  { %v2847_v50 = vadd.f32 %v2846_v4, %v2845_v56  ;;  %v2632_v56 = vmul.f32 %v12830_v32, %v12830_v32  ;;  %v2854_v4 = vsel %vm1974_vm1, %v2630_v17, 0.0  ;;  %v12834_v17 = vld [vmem:[#allocation14_spill] sm:$0xff] }
 0x30e   :  { %v2849_v36 = vadd.f32 %v2848_v5, %v2847_v50  ;;  %v2633_v50 = vmul.f32 %v12831_v6, %v12831_v6  ;;  %v2856_v5 = vsel %vm1974_vm1, %v2631_v31, 0.0  ;;  %v12835_v31 = vld [vmem:[#allocation16_spill] sm:$0xff] }
 0x310   :  { %v2851_v61 = vadd.f32 %v2850_v51, %v2849_v36  ;;  %v2634_v36 = vmul.f32 %v12832_v25, %v12832_v25  ;;  %v2858_v51 = vsel %vm1974_vm1, %v2632_v56, 0.0  ;;  %v12836_v56 = vld [vmem:[#allocation19_spill] sm:$0xff] }
 0x312   :  { %v2853_v44 = vadd.f32 %v2852_v42, %v2851_v61  ;;  %v2635_v61 = vmul.f32 %v12833_v20, %v12833_v20  ;;  %v2860_v42 = vsel %vm1974_vm1, %v2633_v50, 0.0  ;;  %v12837_v50 = vld [vmem:[#allocation21_spill] sm:$0xff] }
 0x314   :  { %v2855_v35 = vadd.f32 %v2854_v4, %v2853_v44  ;;  %v2636_v44 = vmul.f32 %v12834_v17, %v12834_v17  ;;  %v2862_v4 = vsel %vm1974_vm1, %v2634_v36, 0.0  ;;  %v12838_v36 = vld [vmem:[#allocation18_spill] sm:$0xff] }
 0x316   :  { %v2857_v28 = vadd.f32 %v2856_v5, %v2855_v35  ;;  %v2637_v35 = vmul.f32 %v12835_v31, %v12835_v31  ;;  %v2864_v5 = vsel %vm1974_vm1, %v2635_v61, 0.0  ;;  %v12839_v61 = vld [vmem:[#allocation20_spill] sm:$0xff] }
 0x318   :  { %v2859_v34 = vadd.f32 %v2858_v51, %v2857_v28  ;;  %v2638_v28 = vmul.f32 %v12836_v56, %v12836_v56  ;;  %v2866_v51 = vsel %vm1974_vm1, %v2636_v44, 0.0  ;;  %v12840_v44 = vld [vmem:[#allocation23_spill] sm:$0xff] }
 0x31a   :  { %v2861_v32 = vadd.f32 %v2860_v42, %v2859_v34  ;;  %v2639_v34 = vmul.f32 %v12837_v50, %v12837_v50  ;;  %v2868_v42 = vsel %vm1974_vm1, %v2637_v35, 0.0  ;;  %v12841_v35 = vld [vmem:[#allocation25_spill] sm:$0xff] }
 0x31c   :  { %v2863_v6 = vadd.f32 %v2862_v4, %v2861_v32  ;;  %v2640_v32 = vmul.f32 %v12838_v36, %v12838_v36  ;;  %v2870_v4 = vsel %vm1974_vm1, %v2638_v28, 0.0  ;;  %v12842_v28 = vld [vmem:[#allocation22_spill] sm:$0xff] }
 0x31e   :  { %v2865_v25 = vadd.f32 %v2864_v5, %v2863_v6  ;;  %v2641_v6 = vmul.f32 %v12839_v61, %v12839_v61  ;;  %v2872_v5 = vsel %vm1974_vm1, %v2639_v34, 0.0  ;;  %v12843_v34 = vld [vmem:[#allocation24_spill] sm:$0xff] }
 0x320   :  { %v2867_v20 = vadd.f32 %v2866_v51, %v2865_v25  ;;  %v2642_v25 = vmul.f32 %v12840_v44, %v12840_v44  ;;  %v2874_v51 = vsel %vm1974_vm1, %v2640_v32, 0.0  ;;  %v12844_v32 = vld [vmem:[#allocation27_spill] sm:$0xff] }
 0x322   :  { %v2869_v17 = vadd.f32 %v2868_v42, %v2867_v20  ;;  %v2643_v20 = vmul.f32 %v12841_v35, %v12841_v35  ;;  %v2876_v42 = vsel %vm1974_vm1, %v2641_v6, 0.0  ;;  %v12845_v6 = vld [vmem:[#allocation29_spill] sm:$0xff] }
 0x324   :  { %v2871_v31 = vadd.f32 %v2870_v4, %v2869_v17  ;;  %v2644_v17 = vmul.f32 %v12842_v28, %v12842_v28  ;;  %v2878_v4 = vsel %vm1974_vm1, %v2642_v25, 0.0  ;;  %v12846_v25 = vld [vmem:[#allocation26_spill] sm:$0xff] }
 0x326   :  { %v2873_v56 = vadd.f32 %v2872_v5, %v2871_v31  ;;  %v2645_v31 = vmul.f32 %v12843_v34, %v12843_v34  ;;  %v2880_v5 = vsel %vm1974_vm1, %v2643_v20, 0.0  ;;  %v12847_v20 = vld [vmem:[#allocation28_spill] sm:$0xff] }
 0x328   :  { %v2875_v50 = vadd.f32 %v2874_v51, %v2873_v56  ;;  %v2646_v56 = vmul.f32 %v12844_v32, %v12844_v32  ;;  %v2882_v51 = vsel %vm1974_vm1, %v2644_v17, 0.0  ;;  %v12848_v17 = vld [vmem:[#allocation31_spill] sm:$0xff] }
 0x32a   :  { %v2877_v36 = vadd.f32 %v2876_v42, %v2875_v50  ;;  %v2647_v50 = vmul.f32 %v12845_v6, %v12845_v6  ;;  %v2884_v42 = vsel %vm1974_vm1, %v2645_v31, 0.0  ;;  %v12849_v31 = vld [vmem:[#allocation33_spill] sm:$0xff] }
 0x32c   :  { %v2879_v61 = vadd.f32 %v2878_v4, %v2877_v36  ;;  %v2648_v36 = vmul.f32 %v12846_v25, %v12846_v25  ;;  %v2886_v4 = vsel %vm1974_vm1, %v2646_v56, 0.0  ;;  %v12850_v56 = vld [vmem:[#allocation30_spill] sm:$0xff] }
 0x32e   :  { %v2881_v44 = vadd.f32 %v2880_v5, %v2879_v61  ;;  %v2649_v61 = vmul.f32 %v12847_v20, %v12847_v20  ;;  %v2888_v5 = vsel %vm1974_vm1, %v2647_v50, 0.0  ;;  %v12851_v50 = vld [vmem:[#allocation32_spill] sm:$0xff] }
 0x330   :  { %v2883_v35 = vadd.f32 %v2882_v51, %v2881_v44  ;;  %v2650_v44 = vmul.f32 %v12848_v17, %v12848_v17  ;;  %v2890_v51 = vsel %vm1974_vm1, %v2648_v36, 0.0  ;;  %v12852_v36 = vld [vmem:[#allocation35_spill] sm:$0xff] }
 0x332   :  { %v2885_v28 = vadd.f32 %v2884_v42, %v2883_v35  ;;  %v2651_v35 = vmul.f32 %v12849_v31, %v12849_v31  ;;  %v2892_v42 = vsel %vm1974_vm1, %v2649_v61, 0.0  ;;  %v12853_v61 = vld [vmem:[#allocation37_spill] sm:$0xff] }
 0x334   :  { %v2887_v34 = vadd.f32 %v2886_v4, %v2885_v28  ;;  %v2652_v28 = vmul.f32 %v12850_v56, %v12850_v56  ;;  %v2894_v4 = vsel %vm1974_vm1, %v2650_v44, 0.0  ;;  %v12854_v44 = vld [vmem:[#allocation34_spill] sm:$0xff] }
 0x336   :  { %v2889_v32 = vadd.f32 %v2888_v5, %v2887_v34  ;;  %v2653_v34 = vmul.f32 %v12851_v50, %v12851_v50  ;;  %v2896_v5 = vsel %vm1974_vm1, %v2651_v35, 0.0  ;;  %v12855_v35 = vld [vmem:[#allocation36_spill] sm:$0xff] }
 0x338   :  { %v2891_v6 = vadd.f32 %v2890_v51, %v2889_v32  ;;  %v2654_v32 = vmul.f32 %v12852_v36, %v12852_v36  ;;  %v2898_v51 = vsel %vm1974_vm1, %v2652_v28, 0.0  ;;  %v12856_v28 = vld [vmem:[#allocation39_spill] sm:$0xff] }
 0x33a   :  { %v2893_v25 = vadd.f32 %v2892_v42, %v2891_v6  ;;  %v2655_v6 = vmul.f32 %v12853_v61, %v12853_v61  ;;  %v2900_v42 = vsel %vm1974_vm1, %v2653_v34, 0.0  ;;  %v12857_v34 = vld [vmem:[#allocation41_spill] sm:$0xff] }
 0x33c   :  { %v2895_v20 = vadd.f32 %v2894_v4, %v2893_v25  ;;  %v2656_v25 = vmul.f32 %v12854_v44, %v12854_v44  ;;  %v2902_v4 = vsel %vm1974_vm1, %v2654_v32, 0.0  ;;  %v12858_v32 = vld [vmem:[#allocation38_spill] sm:$0xff] }
 0x33e   :  { %v2897_v17 = vadd.f32 %v2896_v5, %v2895_v20  ;;  %v2657_v20 = vmul.f32 %v12855_v35, %v12855_v35  ;;  %v2904_v5 = vsel %vm1974_vm1, %v2655_v6, 0.0  ;;  %v12859_v6 = vld [vmem:[#allocation40_spill] sm:$0xff] }
 0x340   :  { %v2899_v31 = vadd.f32 %v2898_v51, %v2897_v17  ;;  %v2658_v17 = vmul.f32 %v12856_v28, %v12856_v28  ;;  %v2906_v51 = vsel %vm1974_vm1, %v2656_v25, 0.0  ;;  %v12860_v25 = vld [vmem:[#allocation43_spill] sm:$0xff] }
 0x342   :  { %v2901_v56 = vadd.f32 %v2900_v42, %v2899_v31  ;;  %v2659_v31 = vmul.f32 %v12857_v34, %v12857_v34  ;;  %v2908_v42 = vsel %vm1974_vm1, %v2657_v20, 0.0  ;;  %v12861_v20 = vld [vmem:[#allocation45_spill] sm:$0xff] }
 0x344   :  { %v2903_v50 = vadd.f32 %v2902_v4, %v2901_v56  ;;  %v2660_v56 = vmul.f32 %v12858_v32, %v12858_v32  ;;  %v2910_v4 = vsel %vm1974_vm1, %v2658_v17, 0.0  ;;  %v12862_v17 = vld [vmem:[#allocation42_spill] sm:$0xff] }
 0x346   :  { %v2905_v36 = vadd.f32 %v2904_v5, %v2903_v50  ;;  %v2661_v50 = vmul.f32 %v12859_v6, %v12859_v6  ;;  %v2912_v5 = vsel %vm1974_vm1, %v2659_v31, 0.0  ;;  %v12863_v31 = vld [vmem:[#allocation44_spill] sm:$0xff] }
 0x348   :  { %v2907_v61 = vadd.f32 %v2906_v51, %v2905_v36  ;;  %v2662_v36 = vmul.f32 %v12860_v25, %v12860_v25  ;;  %v2914_v51 = vsel %vm1974_vm1, %v2660_v56, 0.0  ;;  %v12864_v56 = vld [vmem:[#allocation51_spill] sm:$0xff] }
 0x34a   :  { %v2909_v44 = vadd.f32 %v2908_v42, %v2907_v61  ;;  %v2663_v61 = vmul.f32 %v12861_v20, %v12861_v20  ;;  %v2916_v42 = vsel %vm1974_vm1, %v2661_v50, 0.0  ;;  %v12865_v50 = vld [vmem:[#allocation53_spill] sm:$0xff] }
 0x34c   :  { %v2911_v35 = vadd.f32 %v2910_v4, %v2909_v44  ;;  %v2664_v44 = vmul.f32 %v12862_v17, %v12862_v17  ;;  %v2918_v4 = vsel %vm1974_vm1, %v2662_v36, 0.0  ;;  %v12866_v36 = vld [vmem:[#allocation49_spill] sm:$0xff] }
 0x34e   :  { %v2913_v28 = vadd.f32 %v2912_v5, %v2911_v35  ;;  %v2665_v35 = vmul.f32 %v12863_v31, %v12863_v31  ;;  %v2920_v5 = vsel %vm1974_vm1, %v2663_v61, 0.0  ;;  %v12867_v61 = vld [vmem:[#allocation52_spill] sm:$0xff] }
 0x350   :  { %v2915_v34 = vadd.f32 %v2914_v51, %v2913_v28  ;;  %v2666_v28 = vmul.f32 %v12864_v56, %v12864_v56  ;;  %v2922_v51 = vsel %vm1974_vm1, %v2664_v44, 0.0  ;;  %v12868_v44 = vld [vmem:[#allocation59_spill] sm:$0xff] }
 0x352   :  { %v2917_v32 = vadd.f32 %v2916_v42, %v2915_v34  ;;  %v2667_v34 = vmul.f32 %v12865_v50, %v12865_v50  ;;  %v2924_v42 = vsel %vm1974_vm1, %v2665_v35, 0.0  ;;  %v12869_v35 = vld [vmem:[#allocation61_spill] sm:$0xff] }
 0x354   :  { %v2919_v6 = vadd.f32 %v2918_v4, %v2917_v32  ;;  %v2668_v32 = vmul.f32 %v12866_v36, %v12866_v36  ;;  %v2926_v4 = vsel %vm1974_vm1, %v2666_v28, 0.0  ;;  %v12870_v28 = vld [vmem:[#allocation57_spill] sm:$0xff] }
 0x356   :  { %v2921_v25 = vadd.f32 %v2920_v5, %v2919_v6  ;;  %v2669_v6 = vmul.f32 %v12867_v61, %v12867_v61  ;;  %v2928_v5 = vsel %vm1974_vm1, %v2667_v34, 0.0  ;;  %v12871_v34 = vld [vmem:[#allocation60_spill] sm:$0xff] }
 0x358   :  { %v2923_v20 = vadd.f32 %v2922_v51, %v2921_v25  ;;  %v2670_v25 = vmul.f32 %v12868_v44, %v12868_v44  ;;  %v2930_v51 = vsel %vm1974_vm1, %v2668_v32, 0.0  ;;  %v12872_v32 = vld [vmem:[#allocation67_spill] sm:$0xff] }
 0x35a   :  { %v2925_v17 = vadd.f32 %v2924_v42, %v2923_v20  ;;  %v2671_v20 = vmul.f32 %v12869_v35, %v12869_v35  ;;  %v2932_v42 = vsel %vm1974_vm1, %v2669_v6, 0.0  ;;  %v12873_v6 = vld [vmem:[#allocation69_spill] sm:$0xff] }
 0x35c   :  { %v2927_v31 = vadd.f32 %v2926_v4, %v2925_v17  ;;  %v2672_v17 = vmul.f32 %v12870_v28, %v12870_v28  ;;  %v2934_v4 = vsel %vm1974_vm1, %v2670_v25, 0.0  ;;  %v12874_v25 = vld [vmem:[#allocation65_spill] sm:$0xff] }
 0x35e   :  { %v2929_v56 = vadd.f32 %v2928_v5, %v2927_v31  ;;  %v2673_v31 = vmul.f32 %v12871_v34, %v12871_v34  ;;  %v2936_v5 = vsel %vm1974_vm1, %v2671_v20, 0.0  ;;  %v12875_v20 = vld [vmem:[#allocation68_spill] sm:$0xff] }
 0x360   :  { %v2931_v50 = vadd.f32 %v2930_v51, %v2929_v56  ;;  %v2674_v56 = vmul.f32 %v12872_v32, %v12872_v32  ;;  %v2938_v51 = vsel %vm1974_vm1, %v2672_v17, 0.0  ;;  %v12876_v17 = vld [vmem:[#allocation75_spill] sm:$0xff] }
 0x362   :  { %v2933_v36 = vadd.f32 %v2932_v42, %v2931_v50  ;;  %v2675_v50 = vmul.f32 %v12873_v6, %v12873_v6  ;;  %v2940_v42 = vsel %vm1974_vm1, %v2673_v31, 0.0  ;;  %v12877_v31 = vld [vmem:[#allocation77_spill] sm:$0xff] }
 0x364   :  { %v2935_v61 = vadd.f32 %v2934_v4, %v2933_v36  ;;  %v2676_v36 = vmul.f32 %v12874_v25, %v12874_v25  ;;  %v2942_v4 = vsel %vm1974_vm1, %v2674_v56, 0.0  ;;  %v12878_v56 = vld [vmem:[#allocation73_spill] sm:$0xff] }
 0x366   :  { %v2937_v44 = vadd.f32 %v2936_v5, %v2935_v61  ;;  %v2677_v61 = vmul.f32 %v12875_v20, %v12875_v20  ;;  %v2944_v5 = vsel %vm1974_vm1, %v2675_v50, 0.0  ;;  %v12879_v50 = vld [vmem:[#allocation76_spill] sm:$0xff] }
 0x368   :  { %v2939_v35 = vadd.f32 %v2938_v51, %v2937_v44  ;;  %v2678_v44 = vmul.f32 %v12876_v17, %v12876_v17  ;;  %v2946_v51 = vsel %vm1974_vm1, %v2676_v36, 0.0  ;;  %v12880_v36 = vld [vmem:[#allocation83_spill] sm:$0xff] }
 0x36a   :  { %v2941_v28 = vadd.f32 %v2940_v42, %v2939_v35  ;;  %v2679_v35 = vmul.f32 %v12877_v31, %v12877_v31  ;;  %v2948_v42 = vsel %vm1974_vm1, %v2677_v61, 0.0  ;;  %v12881_v61 = vld [vmem:[#allocation85_spill] sm:$0xff] }
 0x36c   :  { %v2943_v34 = vadd.f32 %v2942_v4, %v2941_v28  ;;  %v2680_v28 = vmul.f32 %v12878_v56, %v12878_v56  ;;  %v2950_v4 = vsel %vm1974_vm1, %v2678_v44, 0.0  ;;  %v12882_v44 = vld [vmem:[#allocation81_spill] sm:$0xff] }
 0x36e   :  { %v2945_v32 = vadd.f32 %v2944_v5, %v2943_v34  ;;  %v2681_v34 = vmul.f32 %v12879_v50, %v12879_v50  ;;  %v2952_v5 = vsel %vm1974_vm1, %v2679_v35, 0.0  ;;  %v12883_v35 = vld [vmem:[#allocation84_spill] sm:$0xff] }
 0x370   :  { %v2947_v6 = vadd.f32 %v2946_v51, %v2945_v32  ;;  %v2682_v32 = vmul.f32 %v12880_v36, %v12880_v36  ;;  %v2954_v51 = vsel %vm1974_vm1, %v2680_v28, 0.0  ;;  %v12884_v28 = vld [vmem:[#allocation91_spill] sm:$0xff] }
 0x372   :  { %v2949_v25 = vadd.f32 %v2948_v42, %v2947_v6  ;;  %v2683_v6 = vmul.f32 %v12881_v61, %v12881_v61  ;;  %v2956_v42 = vsel %vm1974_vm1, %v2681_v34, 0.0  ;;  %v12885_v34 = vld [vmem:[#allocation93_spill] sm:$0xff] }
 0x374   :  { %v2951_v20 = vadd.f32 %v2950_v4, %v2949_v25  ;;  %v2684_v25 = vmul.f32 %v12882_v44, %v12882_v44  ;;  %v2958_v4 = vsel %vm1974_vm1, %v2682_v32, 0.0  ;;  %v12886_v32 = vld [vmem:[#allocation89_spill] sm:$0xff] }
 0x376   :  { %v2953_v17 = vadd.f32 %v2952_v5, %v2951_v20  ;;  %v2685_v20 = vmul.f32 %v12883_v35, %v12883_v35  ;;  %v2960_v5 = vsel %vm1974_vm1, %v2683_v6, 0.0  ;;  %v12887_v6 = vld [vmem:[#allocation92_spill] sm:$0xff] }
 0x378   :  { %v2955_v31 = vadd.f32 %v2954_v51, %v2953_v17  ;;  %v2686_v17 = vmul.f32 %v12884_v28, %v12884_v28  ;;  %v2962_v51 = vsel %vm1974_vm1, %v2684_v25, 0.0  ;;  %v12888_v25 = vld [vmem:[#allocation99_spill] sm:$0xff] }
 0x37a   :  { %v2957_v56 = vadd.f32 %v2956_v42, %v2955_v31  ;;  %v2687_v31 = vmul.f32 %v12885_v34, %v12885_v34  ;;  %v2964_v42 = vsel %vm1974_vm1, %v2685_v20, 0.0  ;;  %v12889_v20 = vld [vmem:[#allocation101_spill] sm:$0xff] }
 0x37c   :  { %v2959_v50 = vadd.f32 %v2958_v4, %v2957_v56  ;;  %v2688_v56 = vmul.f32 %v12886_v32, %v12886_v32  ;;  %v2966_v4 = vsel %vm1974_vm1, %v2686_v17, 0.0  ;;  %v12890_v17 = vld [vmem:[#allocation97_spill] sm:$0xff] }
 0x37e   :  { %v2961_v36 = vadd.f32 %v2960_v5, %v2959_v50  ;;  %v2689_v50 = vmul.f32 %v12887_v6, %v12887_v6  ;;  %v2968_v5 = vsel %vm1974_vm1, %v2687_v31, 0.0  ;;  %v12891_v31 = vld [vmem:[#allocation100_spill] sm:$0xff] }
 0x380   :  { %v2963_v61 = vadd.f32 %v2962_v51, %v2961_v36  ;;  %v2690_v36 = vmul.f32 %v12888_v25, %v12888_v25  ;;  %v2970_v51 = vsel %vm1974_vm1, %v2688_v56, 0.0  ;;  %v12892_v56 = vld [vmem:[#allocation107_spill] sm:$0xff] }
 0x382   :  { %v2965_v44 = vadd.f32 %v2964_v42, %v2963_v61  ;;  %v2691_v61 = vmul.f32 %v12889_v20, %v12889_v20  ;;  %v2972_v42 = vsel %vm1974_vm1, %v2689_v50, 0.0  ;;  %v12893_v50 = vld [vmem:[#allocation109_spill] sm:$0xff] }
 0x384   :  { %v2967_v35 = vadd.f32 %v2966_v4, %v2965_v44  ;;  %v2692_v44 = vmul.f32 %v12890_v17, %v12890_v17  ;;  %v2974_v4 = vsel %vm1974_vm1, %v2690_v36, 0.0  ;;  %v12894_v36 = vld [vmem:[#allocation105_spill] sm:$0xff] }
 0x386   :  { %v2969_v28 = vadd.f32 %v2968_v5, %v2967_v35  ;;  %v2693_v35 = vmul.f32 %v12891_v31, %v12891_v31  ;;  %v2976_v5 = vsel %vm1974_vm1, %v2691_v61, 0.0  ;;  %v12895_v61 = vld [vmem:[#allocation108_spill] sm:$0xff] }
 0x388   :  { %v2971_v34 = vadd.f32 %v2970_v51, %v2969_v28  ;;  %v2694_v28 = vmul.f32 %v12892_v56, %v12892_v56  ;;  %v2978_v51 = vsel %vm1974_vm1, %v2692_v44, 0.0  ;;  %v12896_v44 = vld [vmem:[#allocation114_spill] sm:$0xff] }
 0x38a   :  { %v2973_v32 = vadd.f32 %v2972_v42, %v2971_v34  ;;  %v2695_v34 = vmul.f32 %v12893_v50, %v12893_v50  ;;  %v2980_v42 = vsel %vm1974_vm1, %v2693_v35, 0.0  ;;  %v12897_v35 = vld [vmem:[#allocation116_spill] sm:$0xff] }
 0x38c   :  { %v2975_v6 = vadd.f32 %v2974_v4, %v2973_v32  ;;  %v2696_v32 = vmul.f32 %v12894_v36, %v12894_v36  ;;  %v2982_v4 = vsel %vm1974_vm1, %v2694_v28, 0.0  ;;  %v12898_v28 = vld [vmem:[#allocation112_spill] sm:$0xff] }
 0x38e   :  { %v2977_v25 = vadd.f32 %v2976_v5, %v2975_v6  ;;  %v2697_v6 = vmul.f32 %v12895_v61, %v12895_v61  ;;  %v2984_v5 = vsel %vm1974_vm1, %v2695_v34, 0.0  ;;  %v12899_v34 = vld [vmem:[#allocation115_spill] sm:$0xff] }
 0x390   :  { %v2979_v20 = vadd.f32 %v2978_v51, %v2977_v25  ;;  %v2698_v25 = vmul.f32 %v12896_v44, %v12896_v44  ;;  %v2986_v51 = vsel %vm1974_vm1, %v2696_v32, 0.0  ;;  %v12900_v32 = vld [vmem:[#allocation119_spill] sm:$0xff] }
 0x392   :  { %v2981_v17 = vadd.f32 %v2980_v42, %v2979_v20  ;;  %v2699_v20 = vmul.f32 %v12897_v35, %v12897_v35  ;;  %v2988_v42 = vsel %vm1974_vm1, %v2697_v6, 0.0  ;;  %v12901_v6 = vld [vmem:[#allocation121_spill] sm:$0xff] }
 0x394   :  { %v2983_v31 = vadd.f32 %v2982_v4, %v2981_v17  ;;  %v2700_v17 = vmul.f32 %v12898_v28, %v12898_v28  ;;  %v2990_v4 = vsel %vm1974_vm1, %v2698_v25, 0.0  ;;  %v12902_v25 = vld [vmem:[#allocation118_spill] sm:$0xff] }
 0x396   :  { %v2985_v56 = vadd.f32 %v2984_v5, %v2983_v31  ;;  %v2701_v31 = vmul.f32 %v12899_v34, %v12899_v34  ;;  %v2992_v5 = vsel %vm1974_vm1, %v2699_v20, 0.0  ;;  %v12903_v20 = vld [vmem:[#allocation120_spill] sm:$0xff] }
 0x398   :  { %v2987_v50 = vadd.f32 %v2986_v51, %v2985_v56  ;;  %v2702_v56 = vmul.f32 %v12900_v32, %v12900_v32  ;;  %v2994_v51 = vsel %vm1974_vm1, %v2700_v17, 0.0  ;;  %v12904_v17 = vld [vmem:[#allocation124_spill] sm:$0xff] }
 0x39a   :  { %v2989_v36 = vadd.f32 %v2988_v42, %v2987_v50  ;;  %v2703_v50 = vmul.f32 %v12901_v6, %v12901_v6  ;;  %v2996_v42 = vsel %vm1974_vm1, %v2701_v31, 0.0  ;;  %v12905_v31 = vld [vmem:[#allocation126_spill] sm:$0xff] }
 0x39c   :  { %v2991_v61 = vadd.f32 %v2990_v4, %v2989_v36  ;;  %v2704_v36 = vmul.f32 %v12902_v25, %v12902_v25  ;;  %v2998_v4 = vsel %vm1974_vm1, %v2702_v56, 0.0  ;;  %v12906_v56 = vld [vmem:[#allocation123_spill] sm:$0xff] }
 0x39e   :  { %v2993_v44 = vadd.f32 %v2992_v5, %v2991_v61  ;;  %v2705_v61 = vmul.f32 %v12903_v20, %v12903_v20  ;;  %v3000_v5 = vsel %vm1974_vm1, %v2703_v50, 0.0  ;;  %v12907_v50 = vld [vmem:[#allocation125_spill] sm:$0xff] }
 0x3a0   :  { %v2995_v35 = vadd.f32 %v2994_v51, %v2993_v44  ;;  %v2706_v44 = vmul.f32 %v12904_v17, %v12904_v17  ;;  %v3002_v51 = vsel %vm1974_vm1, %v2704_v36, 0.0  ;;  %v12908_v36 = vld [vmem:[#allocation132_spill] sm:$0xff] }
 0x3a2   :  { %v2997_v28 = vadd.f32 %v2996_v42, %v2995_v35  ;;  %v2707_v35 = vmul.f32 %v12905_v31, %v12905_v31  ;;  %v3004_v42 = vsel %vm1974_vm1, %v2705_v61, 0.0  ;;  %v12909_v61 = vld [vmem:[#allocation134_spill] sm:$0xff] }
 0x3a4   :  { %v2999_v34 = vadd.f32 %v2998_v4, %v2997_v28  ;;  %v2708_v28 = vmul.f32 %v12906_v56, %v12906_v56  ;;  %v3006_v4 = vsel %vm1974_vm1, %v2706_v44, 0.0  ;;  %v12910_v44 = vld [vmem:[#allocation130_spill] sm:$0xff] }
 0x3a6   :  { %v3001_v32 = vadd.f32 %v3000_v5, %v2999_v34  ;;  %v2709_v34 = vmul.f32 %v12907_v50, %v12907_v50  ;;  %v3008_v5 = vsel %vm1974_vm1, %v2707_v35, 0.0  ;;  %v12911_v35 = vld [vmem:[#allocation133_spill] sm:$0xff] }
 0x3a8   :  { %v3003_v6 = vadd.f32 %v3002_v51, %v3001_v32  ;;  %v2710_v32 = vmul.f32 %v12908_v36, %v12908_v36  ;;  %v3010_v51 = vsel %vm1974_vm1, %v2708_v28, 0.0  ;;  %v12912_v28 = vld [vmem:[#allocation140_spill] sm:$0xff] }
 0x3aa   :  { %v3005_v25 = vadd.f32 %v3004_v42, %v3003_v6  ;;  %v2711_v6 = vmul.f32 %v12909_v61, %v12909_v61  ;;  %v3012_v42 = vsel %vm1974_vm1, %v2709_v34, 0.0  ;;  %v12913_v34 = vld [vmem:[#allocation142_spill] sm:$0xff] }
 0x3ac   :  { %v3007_v20 = vadd.f32 %v3006_v4, %v3005_v25  ;;  %v2712_v25 = vmul.f32 %v12910_v44, %v12910_v44  ;;  %v3014_v4 = vsel %vm1974_vm1, %v2710_v32, 0.0  ;;  %v12914_v32 = vld [vmem:[#allocation138_spill] sm:$0xff] }
 0x3ae   :  { %v3009_v17 = vadd.f32 %v3008_v5, %v3007_v20  ;;  %v2713_v20 = vmul.f32 %v12911_v35, %v12911_v35  ;;  %v3016_v5 = vsel %vm1974_vm1, %v2711_v6, 0.0  ;;  %v12915_v6 = vld [vmem:[#allocation141_spill] sm:$0xff] }
 0x3b0   :  { %v3011_v31 = vadd.f32 %v3010_v51, %v3009_v17  ;;  %v2714_v17 = vmul.f32 %v12912_v28, %v12912_v28  ;;  %v3018_v51 = vsel %vm1974_vm1, %v2712_v25, 0.0  ;;  %v12916_v25 = vld [vmem:[#allocation148_spill] sm:$0xff] }
 0x3b2   :  { %v3013_v56 = vadd.f32 %v3012_v42, %v3011_v31  ;;  %v2715_v31 = vmul.f32 %v12913_v34, %v12913_v34  ;;  %v3020_v42 = vsel %vm1974_vm1, %v2713_v20, 0.0  ;;  %v12917_v20 = vld [vmem:[#allocation150_spill] sm:$0xff] }
 0x3b4   :  { %v3015_v50 = vadd.f32 %v3014_v4, %v3013_v56  ;;  %v2716_v56 = vmul.f32 %v12914_v32, %v12914_v32  ;;  %v3022_v4 = vsel %vm1974_vm1, %v2714_v17, 0.0  ;;  %v12918_v17 = vld [vmem:[#allocation146_spill] sm:$0xff] }
 0x3b6   :  { %v3017_v36 = vadd.f32 %v3016_v5, %v3015_v50  ;;  %v2717_v50 = vmul.f32 %v12915_v6, %v12915_v6  ;;  %v3024_v5 = vsel %vm1974_vm1, %v2715_v31, 0.0  ;;  %v12919_v31 = vld [vmem:[#allocation149_spill] sm:$0xff] }
 0x3b8   :  { %v3019_v61 = vadd.f32 %v3018_v51, %v3017_v36  ;;  %v2718_v36 = vmul.f32 %v12916_v25, %v12916_v25  ;;  %v3026_v51 = vsel %vm1974_vm1, %v2716_v56, 0.0  ;;  %v12920_v56 = vld [vmem:[#allocation156_spill] sm:$0xff] }
 0x3ba   :  { %v3021_v44 = vadd.f32 %v3020_v42, %v3019_v61  ;;  %v2719_v61 = vmul.f32 %v12917_v20, %v12917_v20  ;;  %v3028_v42 = vsel %vm1974_vm1, %v2717_v50, 0.0  ;;  %v12921_v50 = vld [vmem:[#allocation158_spill] sm:$0xff] }
 0x3bc   :  { %v3023_v35 = vadd.f32 %v3022_v4, %v3021_v44  ;;  %v2720_v44 = vmul.f32 %v12918_v17, %v12918_v17  ;;  %v3030_v4 = vsel %vm1974_vm1, %v2718_v36, 0.0  ;;  %v12922_v36 = vld [vmem:[#allocation154_spill] sm:$0xff] }
 0x3be   :  { %v3025_v28 = vadd.f32 %v3024_v5, %v3023_v35  ;;  %v2721_v35 = vmul.f32 %v12919_v31, %v12919_v31  ;;  %v3032_v5 = vsel %vm1974_vm1, %v2719_v61, 0.0  ;;  %v12923_v61 = vld [vmem:[#allocation157_spill] sm:$0xff] }
 0x3c0   :  { %v3027_v34 = vadd.f32 %v3026_v51, %v3025_v28  ;;  %v2722_v28 = vmul.f32 %v12920_v56, %v12920_v56  ;;  %v3034_v51 = vsel %vm1974_vm1, %v2720_v44, 0.0  ;;  %v12924_v44 = vld [vmem:[#allocation163_spill] sm:$0xff] }
 0x3c2   :  { %v3029_v32 = vadd.f32 %v3028_v42, %v3027_v34  ;;  %v2723_v34 = vmul.f32 %v12921_v50, %v12921_v50  ;;  %v3036_v42 = vsel %vm1974_vm1, %v2721_v35, 0.0  ;;  %v12925_v35 = vld [vmem:[#allocation165_spill] sm:$0xff] }
 0x3c4   :  { %v3031_v6 = vadd.f32 %v3030_v4, %v3029_v32  ;;  %v2724_v32 = vmul.f32 %v12922_v36, %v12922_v36  ;;  %v3038_v4 = vsel %vm1974_vm1, %v2722_v28, 0.0  ;;  %v12926_v28 = vld [vmem:[#allocation161_spill] sm:$0xff] }
 0x3c6   :  { %v3033_v25 = vadd.f32 %v3032_v5, %v3031_v6  ;;  %v2725_v6 = vmul.f32 %v12923_v61, %v12923_v61  ;;  %v3040_v5 = vsel %vm1974_vm1, %v2723_v34, 0.0  ;;  %v12927_v34 = vld [vmem:[#allocation164_spill] sm:$0xff] }
 0x3c8   :  { %v3035_v20 = vadd.f32 %v3034_v51, %v3033_v25  ;;  %v2726_v25 = vmul.f32 %v12924_v44, %v12924_v44  ;;  %v3042_v51 = vsel %vm1974_vm1, %v2724_v32, 0.0  ;;  %v12928_v32 = vld [vmem:[#allocation47_spill] sm:$0xff] }
 0x3ca   :  { %v3037_v17 = vadd.f32 %v3036_v42, %v3035_v20  ;;  %v2727_v20 = vmul.f32 %v12925_v35, %v12925_v35  ;;  %v3044_v42 = vsel %vm1974_vm1, %v2725_v6, 0.0  ;;  %v12929_v6 = vld [vmem:[#allocation50_spill] sm:$0xff] }
 0x3cc   :  { %v3039_v31 = vadd.f32 %v3038_v4, %v3037_v17  ;;  %v2728_v17 = vmul.f32 %v12926_v28, %v12926_v28  ;;  %v3046_v4 = vsel %vm1974_vm1, %v2726_v25, 0.0  ;;  %v12930_v25 = vld [vmem:[#allocation46_spill] sm:$0xff] }
 0x3ce   :  { %v3041_v56 = vadd.f32 %v3040_v5, %v3039_v31  ;;  %v2729_v31 = vmul.f32 %v12927_v34, %v12927_v34  ;;  %v3048_v5 = vsel %vm1974_vm1, %v2727_v20, 0.0  ;;  %v12931_v20 = vld [vmem:[#allocation48_spill] sm:$0xff] }
 0x3d0   :  { %v3043_v50 = vadd.f32 %v3042_v51, %v3041_v56  ;;  %v2730_v56 = vmul.f32 %v12928_v32, %v12928_v32  ;;  %v3050_v51 = vsel %vm1974_vm1, %v2728_v17, 0.0  ;;  %v12932_v17 = vld [vmem:[#allocation55_spill] sm:$0xff] }
 0x3d2   :  { %v3045_v36 = vadd.f32 %v3044_v42, %v3043_v50  ;;  %v2731_v50 = vmul.f32 %v12929_v6, %v12929_v6  ;;  %v3052_v42 = vsel %vm1974_vm1, %v2729_v31, 0.0  ;;  %v12933_v31 = vld [vmem:[#allocation58_spill] sm:$0xff] }
 0x3d4   :  { %v3047_v61 = vadd.f32 %v3046_v4, %v3045_v36  ;;  %v2732_v36 = vmul.f32 %v12930_v25, %v12930_v25  ;;  %v3054_v4 = vsel %vm1974_vm1, %v2730_v56, 0.0  ;;  %v12934_v56 = vld [vmem:[#allocation54_spill] sm:$0xff] }
 0x3d6   :  { %v3049_v44 = vadd.f32 %v3048_v5, %v3047_v61  ;;  %v2733_v61 = vmul.f32 %v12931_v20, %v12931_v20  ;;  %v3056_v5 = vsel %vm1974_vm1, %v2731_v50, 0.0  ;;  %v12935_v50 = vld [vmem:[#allocation56_spill] sm:$0xff] }
 0x3d8   :  { %v3051_v35 = vadd.f32 %v3050_v51, %v3049_v44  ;;  %v2734_v44 = vmul.f32 %v12932_v17, %v12932_v17  ;;  %v3058_v51 = vsel %vm1974_vm1, %v2732_v36, 0.0  ;;  %v12936_v36 = vld [vmem:[#allocation63_spill] sm:$0xff] }
 0x3da   :  { %v3053_v28 = vadd.f32 %v3052_v42, %v3051_v35  ;;  %v2735_v35 = vmul.f32 %v12933_v31, %v12933_v31  ;;  %v3060_v42 = vsel %vm1974_vm1, %v2733_v61, 0.0  ;;  %v12937_v61 = vld [vmem:[#allocation66_spill] sm:$0xff] }
 0x3dc   :  { %v3055_v34 = vadd.f32 %v3054_v4, %v3053_v28  ;;  %v2736_v28 = vmul.f32 %v12934_v56, %v12934_v56  ;;  %v3062_v4 = vsel %vm1974_vm1, %v2734_v44, 0.0  ;;  %v12938_v44 = vld [vmem:[#allocation62_spill] sm:$0xff] }
 0x3de   :  { %v3057_v32 = vadd.f32 %v3056_v5, %v3055_v34  ;;  %v2737_v34 = vmul.f32 %v12935_v50, %v12935_v50  ;;  %v3064_v5 = vsel %vm1974_vm1, %v2735_v35, 0.0  ;;  %v12939_v35 = vld [vmem:[#allocation64_spill] sm:$0xff] }
 0x3e0   :  { %v3059_v6 = vadd.f32 %v3058_v51, %v3057_v32  ;;  %v2738_v32 = vmul.f32 %v12936_v36, %v12936_v36  ;;  %v3066_v51 = vsel %vm1974_vm1, %v2736_v28, 0.0  ;;  %v12940_v28 = vld [vmem:[#allocation71_spill] sm:$0xff] }
 0x3e2   :  { %v3061_v25 = vadd.f32 %v3060_v42, %v3059_v6  ;;  %v2739_v6 = vmul.f32 %v12937_v61, %v12937_v61  ;;  %v3068_v42 = vsel %vm1974_vm1, %v2737_v34, 0.0  ;;  %v12941_v34 = vld [vmem:[#allocation74_spill] sm:$0xff] }
 0x3e4   :  { %v3063_v20 = vadd.f32 %v3062_v4, %v3061_v25  ;;  %v2740_v25 = vmul.f32 %v12938_v44, %v12938_v44  ;;  %v3070_v4 = vsel %vm1974_vm1, %v2738_v32, 0.0  ;;  %v12942_v32 = vld [vmem:[#allocation70_spill] sm:$0xff] }
 0x3e6   :  { %v3065_v17 = vadd.f32 %v3064_v5, %v3063_v20  ;;  %v2741_v20 = vmul.f32 %v12939_v35, %v12939_v35  ;;  %v3072_v5 = vsel %vm1974_vm1, %v2739_v6, 0.0  ;;  %v12943_v6 = vld [vmem:[#allocation72_spill] sm:$0xff] }
 0x3e8   :  { %v3067_v31 = vadd.f32 %v3066_v51, %v3065_v17  ;;  %v2742_v17 = vmul.f32 %v12940_v28, %v12940_v28  ;;  %v3074_v51 = vsel %vm1974_vm1, %v2740_v25, 0.0  ;;  %v12944_v25 = vld [vmem:[#allocation79_spill] sm:$0xff] }
 0x3ea   :  { %v3069_v56 = vadd.f32 %v3068_v42, %v3067_v31  ;;  %v2743_v31 = vmul.f32 %v12941_v34, %v12941_v34  ;;  %v3076_v42 = vsel %vm1974_vm1, %v2741_v20, 0.0  ;;  %v12945_v20 = vld [vmem:[#allocation82_spill] sm:$0xff] }
 0x3ec   :  { %v3071_v50 = vadd.f32 %v3070_v4, %v3069_v56  ;;  %v2744_v56 = vmul.f32 %v12942_v32, %v12942_v32  ;;  %v3078_v4 = vsel %vm1974_vm1, %v2742_v17, 0.0  ;;  %v12946_v17 = vld [vmem:[#allocation78_spill] sm:$0xff] }
 0x3ee   :  { %v3073_v36 = vadd.f32 %v3072_v5, %v3071_v50  ;;  %v2745_v50 = vmul.f32 %v12943_v6, %v12943_v6  ;;  %v3080_v5 = vsel %vm1974_vm1, %v2743_v31, 0.0  ;;  %v12947_v31 = vld [vmem:[#allocation80_spill] sm:$0xff] }
 0x3f0   :  { %v3075_v61 = vadd.f32 %v3074_v51, %v3073_v36  ;;  %v2746_v36 = vmul.f32 %v12944_v25, %v12944_v25  ;;  %v3082_v51 = vsel %vm1974_vm1, %v2744_v56, 0.0  ;;  %v12948_v56 = vld [vmem:[#allocation87_spill] sm:$0xff] }
 0x3f2   :  { %v3077_v44 = vadd.f32 %v3076_v42, %v3075_v61  ;;  %v2747_v61 = vmul.f32 %v12945_v20, %v12945_v20  ;;  %v3084_v42 = vsel %vm1974_vm1, %v2745_v50, 0.0  ;;  %v12949_v50 = vld [vmem:[#allocation90_spill] sm:$0xff] }
 0x3f4   :  { %v3079_v35 = vadd.f32 %v3078_v4, %v3077_v44  ;;  %v2748_v44 = vmul.f32 %v12946_v17, %v12946_v17  ;;  %v3086_v4 = vsel %vm1974_vm1, %v2746_v36, 0.0  ;;  %v12950_v36 = vld [vmem:[#allocation86_spill] sm:$0xff] }
 0x3f6   :  { %v3081_v28 = vadd.f32 %v3080_v5, %v3079_v35  ;;  %v2749_v35 = vmul.f32 %v12947_v31, %v12947_v31  ;;  %v3088_v5 = vsel %vm1974_vm1, %v2747_v61, 0.0 }
 0x3f8   :  { %v3083_v34 = vadd.f32 %v3082_v51, %v3081_v28  ;;  %v2750_v28 = vmul.f32 %v12948_v56, %v12948_v56  ;;  %v3090_v51 = vsel %vm1974_vm1, %v2748_v44, 0.0  ;;  %v12951_v44 = vld [vmem:[#allocation88_spill] sm:$0xff] }
 0x3fa   :  { %v3085_v32 = vadd.f32 %v3084_v42, %v3083_v34  ;;  %v2751_v34 = vmul.f32 %v12949_v50, %v12949_v50  ;;  %v3092_v42 = vsel %vm1974_vm1, %v2749_v35, 0.0 }
 0x3fc   :  { %v3087_v6 = vadd.f32 %v3086_v4, %v3085_v32  ;;  %v2752_v32 = vmul.f32 %v12950_v36, %v12950_v36  ;;  %v3094_v4 = vsel %vm1974_vm1, %v2750_v28, 0.0  ;;  %v3096_v61 = vsel %vm1974_vm1, %v2751_v34, 0.0 }
 0x3fe   :  { %v3089_v25 = vadd.f32 %v3088_v5, %v3087_v6  ;;  %v2753_v6 = vmul.f32 %v7666_v2, %v7666_v2 }
 0x400   :  { %v3091_v20 = vadd.f32 %v3090_v51, %v3089_v25  ;;  %v2754_v25 = vmul.f32 %v12951_v44, %v12951_v44  ;;  %v3098_v51 = vsel %vm1974_vm1, %v2752_v32, 0.0  ;;  %v3100_v35 = vsel %vm1974_vm1, %v2753_v6, 0.0 }
 0x401   :  { %v2758_v32 = vmul.f32 %v7686_v23, %v7686_v23 }
 0x402   :  { %v3093_v17 = vadd.f32 %v3092_v42, %v3091_v20  ;;  %v2755_v20 = vmul.f32 %v7674_v15, %v7674_v15  ;;  %v3102_v28 = vsel %vm1974_vm1, %v2754_v25, 0.0  ;;  %v2760_v25 = vmul.f32 %v7694_v7, %v7694_v7 }
 0x404   :  { %v3095_v31 = vadd.f32 %v3094_v4, %v3093_v17  ;;  %v2756_v17 = vmul.f32 %v7678_v19, %v7678_v19  ;;  %v3104_v34 = vsel %vm1974_vm1, %v2755_v20, 0.0  ;;  %v12952_v20 = vld [vmem:[#allocation96_spill] sm:$0xff] }
 0x406   :  { %v3097_v5 = vadd.f32 %v3096_v61, %v3095_v31  ;;  %v2757_v31 = vmul.f32 %v7682_v1, %v7682_v1 }
 0x408   :  { %v3099_v50 = vadd.f32 %v3098_v51, %v3097_v5  ;;  %v3106_v5 = vsel %vm1974_vm1, %v2756_v17, 0.0  ;;  %v3108_v6 = vsel %vm1974_vm1, %v2757_v31, 0.0  ;;  %v12953_v17 = vld [vmem:[#allocation103_spill] sm:$0xff]  ;;  %v12954_v31 = vld [vmem:[#allocation106_spill] sm:$0xff] }
 0x40a   :  { %v3101_v42 = vadd.f32 %v3100_v35, %v3099_v50  ;;  %v2759_v50 = vmul.f32 %v7690_v3, %v7690_v3 }
 0x40c   :  { %v3103_v4 = vadd.f32 %v3102_v28, %v3101_v42  ;;  %v3110_v42 = vsel %vm1974_vm1, %v2758_v32, 0.0  ;;  %v12955_v32 = vld [vmem:[#allocation102_spill] sm:$0xff] }
 0x40e   :  { %v3105_v61 = vadd.f32 %v3104_v34, %v3103_v4  ;;  %v2761_v4 = vmul.f32 %v12952_v20, %v12952_v20  ;;  %v3112_v34 = vsel %vm1974_vm1, %v2759_v50, 0.0  ;;  %v12956_v50 = vld [vmem:[#allocation104_spill] sm:$0xff] }
 0x410   :  { %v3107_v51 = vadd.f32 %v3106_v5, %v3105_v61  ;;  %v2762_v61 = vmul.f32 %v12953_v17, %v12953_v17  ;;  %v3114_v5 = vsel %vm1974_vm1, %v2760_v25, 0.0  ;;  %v12957_v25 = vld [vmem:[#allocation111_spill] sm:$0xff] }
 0x412   :  { %v3109_v35 = vadd.f32 %v3108_v6, %v3107_v51  ;;  %v2763_v51 = vmul.f32 %v12954_v31, %v12954_v31  ;;  %v3116_v6 = vsel %vm1974_vm1, %v2761_v4, 0.0  ;;  %v12958_v4 = vld [vmem:[#allocation113_spill] sm:$0xff] }
 0x414   :  { %v3111_v28 = vadd.f32 %v3110_v42, %v3109_v35  ;;  %v2764_v35 = vmul.f32 %v12955_v32, %v12955_v32  ;;  %v3118_v42 = vsel %vm1974_vm1, %v2762_v61, 0.0  ;;  %v12959_v61 = vld [vmem:[#allocation110_spill] sm:$0xff] }
 0x416   :  { %v3113_v23 = vadd.f32 %v3112_v34, %v3111_v28  ;;  %v2765_v28 = vmul.f32 %v12956_v50, %v12956_v50  ;;  %v3120_v34 = vsel %vm1974_vm1, %v2763_v51, 0.0  ;;  %v12960_v51 = vld [vmem:[#allocation117_spill] sm:$0xff] }
 0x418   :  { %v3115_v3 = vadd.f32 %v3114_v5, %v3113_v23  ;;  %v2766_v23 = vmul.f32 %v12957_v25, %v12957_v25  ;;  %v3122_v5 = vsel %vm1974_vm1, %v2764_v35, 0.0 }
 0x41a   :  { %v3117_v7 = vadd.f32 %v3116_v6, %v3115_v3  ;;  %v2767_v3 = vmul.f32 %v12958_v4, %v12958_v4  ;;  %v3124_v6 = vsel %vm1974_vm1, %v2765_v28, 0.0  ;;  %v12961_v28 = vld [vmem:[#allocation128_spill] sm:$0xff] }
 0x41c   :  { %v3119_v20 = vadd.f32 %v3118_v42, %v3117_v7  ;;  %v2768_v7 = vmul.f32 %v12959_v61, %v12959_v61  ;;  %v3126_v42 = vsel %vm1974_vm1, %v2766_v23, 0.0  ;;  %v12962_v23 = vld [vmem:[#allocation131_spill] sm:$0xff] }
 0x41e   :  { %v3121_v17 = vadd.f32 %v3120_v34, %v3119_v20  ;;  %v2769_v20 = vmul.f32 %v12960_v51, %v12960_v51  ;;  %v3128_v34 = vsel %vm1974_vm1, %v2767_v3, 0.0  ;;  %v3130_v35 = vsel %vm1974_vm1, %v2768_v7, 0.0  ;;  %v12963_v3 = vld [vmem:[#allocation127_spill] sm:$0xff] }
 0x420   :  { %v3123_v31 = vadd.f32 %v3122_v5, %v3121_v17  ;;  %v2770_v17 = vmul.f32 %v7734_v21, %v7734_v21 }
 0x422   :  { %v3125_v32 = vadd.f32 %v3124_v6, %v3123_v31  ;;  %v2771_v31 = vmul.f32 %v12961_v28, %v12961_v28  ;;  %v3132_v6 = vsel %vm1974_vm1, %v2769_v20, 0.0  ;;  %v2775_v20 = vmul.f32 %v7754_v18, %v7754_v18 }
 0x424   :  { %v3127_v50 = vadd.f32 %v3126_v42, %v3125_v32  ;;  %v2772_v32 = vmul.f32 %v12962_v23, %v12962_v23  ;;  %v3134_v42 = vsel %vm1974_vm1, %v2770_v17, 0.0  ;;  %v12964_v17 = vld [vmem:[#allocation136_spill] sm:$0xff] }
 0x426   :  { %v3129_v25 = vadd.f32 %v3128_v34, %v3127_v50  ;;  %v2773_v50 = vmul.f32 %v12963_v3, %v12963_v3  ;;  %v3136_v34 = vsel %vm1974_vm1, %v2771_v31, 0.0  ;;  %v3138_v7 = vsel %vm1974_vm1, %v2772_v32, 0.0  ;;  %v12965_v31 = vld [vmem:[#allocation139_spill] sm:$0xff] }
 0x428   :  { %v3131_v5 = vadd.f32 %v3130_v35, %v3129_v25  ;;  %v2774_v25 = vmul.f32 %v7750_v8, %v7750_v8 }
 0x42a   :  { %v3133_v61 = vadd.f32 %v3132_v6, %v3131_v5  ;;  %v3140_v5 = vsel %vm1974_vm1, %v2773_v50, 0.0  ;;  %v2779_v50 = vmul.f32 %v7770_v63, %v7770_v63 }
 0x42c   :  { %v3135_v51 = vadd.f32 %v3134_v42, %v3133_v61  ;;  %v2776_v61 = vmul.f32 %v12964_v17, %v12964_v17  ;;  %v3142_v42 = vsel %vm1974_vm1, %v2774_v25, 0.0  ;;  %v12966_v25 = vld [vmem:[#allocation137_spill] sm:$0xff] }
 0x42e   :  { %v3137_v21 = vadd.f32 %v3136_v34, %v3135_v51  ;;  %v2777_v51 = vmul.f32 %v12965_v31, %v12965_v31  ;;  %v3144_v34 = vsel %vm1974_vm1, %v2775_v20, 0.0  ;;  %v3146_v32 = vsel %vm1974_vm1, %v2776_v61, 0.0  ;;  %v12967_v20 = vld [vmem:[#allocation147_spill] sm:$0xff] }
 0x430   :  { %v3139_v35 = vadd.f32 %v3138_v7, %v3137_v21  ;;  %v2778_v21 = vmul.f32 %v7766_v58, %v7766_v58 }
 0x432   :  { %v3141_v6 = vadd.f32 %v3140_v5, %v3139_v35  ;;  %v3148_v35 = vsel %vm1974_vm1, %v2777_v51, 0.0  ;;  %v2783_v51 = vmul.f32 %v7786_v53, %v7786_v53 }
 0x434   :  { %v3143_v3 = vadd.f32 %v3142_v42, %v3141_v6  ;;  %v2780_v6 = vmul.f32 %v12966_v25, %v12966_v25  ;;  %v3150_v42 = vsel %vm1974_vm1, %v2778_v21, 0.0  ;;  %v2784_v21 = vmul.f32 %v7790_v60, %v7790_v60 }
 0x436   :  { %v3145_v8 = vadd.f32 %v3144_v34, %v3143_v3  ;;  %v2781_v3 = vmul.f32 %v12967_v20, %v12967_v20  ;;  %v3152_v34 = vsel %vm1974_vm1, %v2779_v50, 0.0  ;;  %v3154_v61 = vsel %vm1974_vm1, %v2780_v6, 0.0 }
 0x437   :  { %v3160_v50 = vsel %vm1974_vm1, %v2783_v51, 0.0  ;;  %v3162_v6 = vsel %vm1974_vm1, %v2784_v21, 0.0  ;;  %v2789_v51 = vmul.f32 %v7810_v29, %v7810_v29  ;;  %v2790_v21 = vmul.f32 %v7814_v38, %v7814_v38 }
 0x438   :  { %v3147_v7 = vadd.f32 %v3146_v32, %v3145_v8  ;;  %v2782_v8 = vmul.f32 %v7782_v37, %v7782_v37 }
 0x43a   :  { %v3149_v5 = vadd.f32 %v3148_v35, %v3147_v7  ;;  %v3156_v7 = vsel %vm1974_vm1, %v2781_v3, 0.0  ;;  %v2787_v3 = vmul.f32 %v7802_v16, %v7802_v16 }
 0x43c   :  { %v3151_v31 = vadd.f32 %v3150_v42, %v3149_v5  ;;  %v3158_v5 = vsel %vm1974_vm1, %v2782_v8, 0.0  ;;  %v2788_v8 = vmul.f32 %v7806_v40, %v7806_v40 }
 0x43e   :  { %v3153_v58 = vadd.f32 %v3152_v34, %v3151_v31  ;;  %v2785_v31 = vmul.f32 %v7794_v10, %v7794_v10 }
 0x440   :  { %v3155_v32 = vadd.f32 %v3154_v61, %v3153_v58  ;;  %v2786_v58 = vmul.f32 %v7798_v26, %v7798_v26 }
 0x442   :  { %v3157_v35 = vadd.f32 %v3156_v7, %v3155_v32  ;;  %v3164_v32 = vsel %vm1974_vm1, %v2785_v31, 0.0  ;;  %v2791_v31 = vmul.f32 %v7818_v52, %v7818_v52 }
 0x444   :  { %v3159_v42 = vadd.f32 %v3158_v5, %v3157_v35  ;;  %v3166_v35 = vsel %vm1974_vm1, %v2786_v58, 0.0  ;;  %v2792_v58 = vmul.f32 %v7822_v47, %v7822_v47 }
 0x446   :  { %v3161_v34 = vadd.f32 %v3160_v50, %v3159_v42  ;;  %v3168_v42 = vsel %vm1974_vm1, %v2787_v3, 0.0  ;;  %v2793_v3 = vmul.f32 %v7826_v9, %v7826_v9 }
 0x448   :  { %v3163_v61 = vadd.f32 %v3162_v6, %v3161_v34  ;;  %v3170_v34 = vsel %vm1974_vm1, %v2788_v8, 0.0  ;;  %v2794_v8 = vmul.f32 %v7830_v59, %v7830_v59 }
 0x44a   :  { %v3165_v7 = vadd.f32 %v3164_v32, %v3163_v61  ;;  %v3172_v61 = vsel %vm1974_vm1, %v2789_v51, 0.0  ;;  %v2795_v51 = vmul.f32 %v7834_v0, %v7834_v0 }
 0x44c   :  { %v3167_v5 = vadd.f32 %v3166_v35, %v3165_v7  ;;  %v3174_v7 = vsel %vm1974_vm1, %v2790_v21, 0.0  ;;  %v2796_v21 = vmul.f32 %v7838_v13, %v7838_v13 }
 0x44e   :  { %v3169_v50 = vadd.f32 %v3168_v42, %v3167_v5  ;;  %v3176_v5 = vsel %vm1974_vm1, %v2791_v31, 0.0  ;;  %v2797_v31 = vmul.f32 %v7842_v33, %v7842_v33 }
 0x450   :  { %v3171_v6 = vadd.f32 %v3170_v34, %v3169_v50  ;;  %v3178_v50 = vsel %vm1974_vm1, %v2792_v58, 0.0  ;;  %v2798_v58 = vmul.f32 %v7846_v43, %v7846_v43 }
 0x452   :  { %v3173_v32 = vadd.f32 %v3172_v61, %v3171_v6  ;;  %v3180_v6 = vsel %vm1974_vm1, %v2793_v3, 0.0  ;;  %v2799_v3 = vmul.f32 %v7850_v62, %v7850_v62 }
 0x454   :  { %v3175_v35 = vadd.f32 %v3174_v7, %v3173_v32  ;;  %v3182_v32 = vsel %vm1974_vm1, %v2794_v8, 0.0  ;;  %v2800_v8 = vmul.f32 %v7854_v41, %v7854_v41 }
 0x456   :  { %v3177_v42 = vadd.f32 %v3176_v5, %v3175_v35  ;;  %v3184_v35 = vsel %vm1974_vm1, %v2795_v51, 0.0  ;;  %v2801_v51 = vmul.f32 %v7858_v30, %v7858_v30 }
 0x458   :  { %v3179_v34 = vadd.f32 %v3178_v50, %v3177_v42  ;;  %v3186_v42 = vsel %vm1974_vm1, %v2796_v21, 0.0  ;;  %v2802_v21 = vmul.f32 %v7862_v57, %v7862_v57 }
 0x45a   :  { %v3181_v61 = vadd.f32 %v3180_v6, %v3179_v34  ;;  %v3188_v34 = vsel %vm1974_vm1, %v2797_v31, 0.0  ;;  %v2803_v31 = vmul.f32 %v7866_v48, %v7866_v48 }
 0x45c   :  { %v3183_v7 = vadd.f32 %v3182_v32, %v3181_v61  ;;  %v3190_v61 = vsel %vm1974_vm1, %v2798_v58, 0.0  ;;  %v2804_v58 = vmul.f32 %v7870_v54, %v7870_v54 }
 0x45e   :  { %v3185_v5 = vadd.f32 %v3184_v35, %v3183_v7  ;;  %v3192_v7 = vsel %vm1974_vm1, %v2799_v3, 0.0  ;;  %v2805_v3 = vmul.f32 %v7874_v55, %v7874_v55 }
 0x460   :  { %v3187_v50 = vadd.f32 %v3186_v42, %v3185_v5  ;;  %v3194_v5 = vsel %vm1974_vm1, %v2800_v8, 0.0  ;;  %v2806_v8 = vmul.f32 %v7878_v39, %v7878_v39 }
 0x462   :  { %v3189_v6 = vadd.f32 %v3188_v34, %v3187_v50  ;;  %v3196_v50 = vsel %vm1974_vm1, %v2801_v51, 0.0  ;;  %v2807_v51 = vmul.f32 %v7882_v27, %v7882_v27 }
 0x464   :  { %v3191_v32 = vadd.f32 %v3190_v61, %v3189_v6  ;;  %v3198_v6 = vsel %vm1974_vm1, %v2802_v21, 0.0  ;;  %v2808_v21 = vmul.f32 %v7886_v49, %v7886_v49 }
 0x466   :  { %v3193_v35 = vadd.f32 %v3192_v7, %v3191_v32  ;;  %v3200_v32 = vsel %vm1974_vm1, %v2803_v31, 0.0  ;;  %v2809_v31 = vmul.f32 %v7890_v45, %v7890_v45 }
 0x468   :  { %v3195_v42 = vadd.f32 %v3194_v5, %v3193_v35  ;;  %v3202_v35 = vsel %vm1974_vm1, %v2804_v58, 0.0  ;;  %v2810_v58 = vmul.f32 %v7894_v46, %v7894_v46 }
 0x46a   :  { %v3197_v34 = vadd.f32 %v3196_v50, %v3195_v42  ;;  %v3204_v42 = vsel %vm1974_vm1, %v2805_v3, 0.0  ;;  %v2811_v3 = vmul.f32 %v7898_v12, %v7898_v12 }
 0x46c   :  { %v3199_v61 = vadd.f32 %v3198_v6, %v3197_v34  ;;  %v3206_v34 = vsel %vm1974_vm1, %v2806_v8, 0.0  ;;  %v2812_v8 = vmul.f32 %v7902_v22, %v7902_v22 }
 0x46e   :  { %v3201_v7 = vadd.f32 %v3200_v32, %v3199_v61  ;;  %v3208_v61 = vsel %vm1974_vm1, %v2807_v51, 0.0  ;;  %v2813_v51 = vmul.f32 %v7906_v11, %v7906_v11 }
 0x470   :  { %v3203_v5 = vadd.f32 %v3202_v35, %v3201_v7  ;;  %v3210_v7 = vsel %vm1974_vm1, %v2808_v21, 0.0  ;;  %v2814_v21 = vmul.f32 %v7910_v14, %v7910_v14 }
 0x472   :  { %v3205_v50 = vadd.f32 %v3204_v42, %v3203_v5  ;;  %v3212_v5 = vsel %vm1974_vm1, %v2809_v31, 0.0  ;;  %v12968_v31 = vld [vmem:[#allocation159_spill] sm:$0xff] }
 0x474   :  { %v3207_v6 = vadd.f32 %v3206_v34, %v3205_v50  ;;  %v3214_v50 = vsel %vm1974_vm1, %v2810_v58, 0.0  ;;  %v12969_v58 = vld [vmem:[#allocation160_spill] sm:$0xff] }
 0x476   :  { %v3209_v32 = vadd.f32 %v3208_v61, %v3207_v6  ;;  %v3216_v6 = vsel %vm1974_vm1, %v2811_v3, 0.0  ;;  %v12970_v3 = vld [vmem:[#allocation171_spill] sm:$0xff] }
 0x478   :  { %v3211_v35 = vadd.f32 %v3210_v7, %v3209_v32  ;;  %v3218_v32 = vsel %vm1974_vm1, %v2812_v8, 0.0  ;;  %v2818_v8 = vmul.f32 %v7926_v24, %v7926_v24 }
 0x47a   :  { %v3213_v42 = vadd.f32 %v3212_v5, %v3211_v35  ;;  %v2815_v35 = vmul.f32 %v12968_v31, %v12968_v31  ;;  %v3220_v5 = vsel %vm1974_vm1, %v2813_v51, 0.0  ;;  %v12971_v51 = vld [vmem:[#allocation173_spill] sm:$0xff] }
 0x47c   :  { %v3215_v34 = vadd.f32 %v3214_v50, %v3213_v42  ;;  %v2816_v42 = vmul.f32 %v12969_v58, %v12969_v58  ;;  %v3222_v50 = vsel %vm1974_vm1, %v2814_v21, 0.0  ;;  %v12972_v21 = vld [vmem:[#allocation174_spill] sm:$0xff] }
 0x47e   :  { %v3217_v61 = vadd.f32 %v3216_v6, %v3215_v34  ;;  %v2817_v34 = vmul.f32 %v12970_v3, %v12970_v3  ;;  %v3224_v6 = vsel %vm1974_vm1, %v2815_v35, 0.0  ;;  %v12973_v35 = vld [vmem:[#allocation170_spill] sm:$0xff] }
 0x480   :  { %v3219_v7 = vadd.f32 %v3218_v32, %v3217_v61  ;;  %v3226_v61 = vsel %vm1974_vm1, %v2816_v42, 0.0  ;;  %v12974_v42 = vld [vmem:[#allocation168_spill] sm:$0xff] }
 0x482   :  { %v3221_v22 = vadd.f32 %v3220_v5, %v3219_v7  ;;  %v2819_v7 = vmul.f32 %v12971_v51, %v12971_v51  ;;  %v3228_v5 = vsel %vm1974_vm1, %v2817_v34, 0.0  ;;  %v12975_v34 = vld [vmem:[#allocation169_spill] sm:$0xff] }
 0x484   :  { %v3223_v11 = vadd.f32 %v3222_v50, %v3221_v22  ;;  %v2820_v22 = vmul.f32 %v12972_v21, %v12972_v21  ;;  %v3230_v50 = vsel %vm1974_vm1, %v2818_v8, 0.0  ;;  %v12976_v8 = vld [vmem:[#allocation175_spill] sm:$0xff] }
 0x486   :  { %v3225_v14 = vadd.f32 %v3224_v6, %v3223_v11  ;;  %v2821_v11 = vmul.f32 %v12973_v35, %v12973_v35  ;;  %v3232_v6 = vsel %vm1974_vm1, %v2819_v7, 0.0  ;;  %v12977_v7 = vld [vmem:[#allocation176_spill] sm:$0xff] }
 0x488   :  { %v3227_v32 = vadd.f32 %v3226_v61, %v3225_v14  ;;  %v2822_v14 = vmul.f32 %v12974_v42, %v12974_v42  ;;  %v3234_v61 = vsel %vm1974_vm1, %v2820_v22, 0.0  ;;  %v12978_v22 = vld [vmem:[#allocation177_spill] sm:$0xff] }
 0x48a   :  { %v3229_v58 = vadd.f32 %v3228_v5, %v3227_v32  ;;  %v2823_v32 = vmul.f32 %v12975_v34, %v12975_v34  ;;  %v3236_v5 = vsel %vm1974_vm1, %v2821_v11, 0.0 }
 0x48c   :  { %v3231_v3 = vadd.f32 %v3230_v50, %v3229_v58  ;;  %v2824_v58 = vmul.f32 %v12976_v8, %v12976_v8  ;;  %v3238_v50 = vsel %vm1974_vm1, %v2822_v14, 0.0 }
 0x48e   :  { %v3233_v24 = vadd.f32 %v3232_v6, %v3231_v3  ;;  %v2825_v3 = vmul.f32 %v12977_v7, %v12977_v7  ;;  %v3240_v6 = vsel %vm1974_vm1, %v2823_v32, 0.0 }
 0x490   :  { %v3235_v51 = vadd.f32 %v3234_v61, %v3233_v24  ;;  %v2826_v24 = vmul.f32 %v12978_v22, %v12978_v22  ;;  %v3242_v61 = vsel %vm1974_vm1, %v2824_v58, 0.0  ;;  %v12979_v22 = vld [vmem:[#allocation144_spill] sm:$0xff] }
 0x491   :  { %v12981_v58 = vld [vmem:[#allocation152_spill] sm:$0xff] }
 0x492   :  { %v3237_v21 = vadd.f32 %v3236_v5, %v3235_v51  ;;  %v3244_v51 = vsel %vm1974_vm1, %v2825_v3, 0.0  ;;  %v3246_v5 = vsel %vm2394_vm2, %v2826_v24, 0.0  ;;  %v12983_v3 = vld [vmem:[#allocation155_spill] sm:$0xff]  ;;  %v12985_v24 = vld [vmem:[#allocation162_spill] sm:$0xff] }
 0x494   :  { %v3239_v35 = vadd.f32 %v3238_v50, %v3237_v21 }
 0x496   :  { %v3241_v42 = vadd.f32 %v3240_v6, %v3239_v35 }
 0x498   :  { %v3243_v34 = vadd.f32 %v3242_v61, %v3241_v42  ;;  %v12989_v61 = vld [vmem:[#allocation167_spill] sm:$0xff] }
 0x49a   :  { %v3245_v11 = vadd.f32 %v3244_v51, %v3243_v34  ;;  %v12991_v51 = vld [vmem:[#allocation3_spill] sm:$0xff] }
 0x49c   :  { %v3247_v8 = vadd.f32 %v3246_v5, %v3245_v11  ;;  %v12993_v5 = vld [vmem:[#allocation5_spill] sm:$0xff] }
 0x49e   :  { %v3248_v14 = vrot.slane %v3247_v8, 4 }
 0x4a0   :  { %v3249_v21 = vadd.f32 %v3248_v14, %v3247_v8 }
 0x4a2   :  { %v3250_v50 = vrot.slane %v3249_v21, 2 }
 0x4a4   :  { %v3251_v31 = vadd.f32 %v3250_v50, %v3249_v21  ;;  %v12995_v21 = vld [vmem:[#allocation2_spill] sm:$0xff] }
 0x4a6   :  { %v3252_v7 = vrot.slane %v3251_v31, 1 }
 0x4a8   :  { %v3253_v12 = vadd.f32 %v3252_v7, %v3251_v31 }
 0x4aa   :  { %v3254_v32 = vmul.f32 0.0005945303, %v3253_v12  ;;  %v12987_v12 = vld [vmem:[#allocation166_spill] sm:$0xff] }
 0x4ac   :  { %v3255_v35 = vadd.f32 1e-05, %v3254_v32  ;;  %v12997_v32 = vld [vmem:[#allocation4_spill] sm:$0xff] }
 0x4ae   :  { %5820 = vrsqrt.f32 %v3255_v35 }
 0x4b8   :  { %v8593_v6 = vpop.eup %5820 }
 0x4b9   :  { %v8597_v42 = vmul.f32 %v8593_v6, %v12979_v22  ;;  %v8601_v34 = vmul.f32 %v8593_v6, %v12981_v58  ;;  %v8605_v8 = vmul.f32 %v8593_v6, %v12983_v3  ;;  %v8609_v31 = vmul.f32 %v8593_v6, %v12985_v24  ;;  %v12999_v58 = vld [vmem:[#allocation7_spill] sm:$0xff]  ;;  %v13001_v24 = vld [vmem:[#allocation9_spill] sm:$0xff] }
 0x4ba   :  { %v8613_v7 = vmul.f32 %v8593_v6, %v12987_v12  ;;  %v8617_v22 = vmul.f32 %v8593_v6, %v12989_v61  ;;  %v8621_v11 = vmul.f32 %v8593_v6, %v12991_v51  ;;  %v8625_v14 = vmul.f32 %v8593_v6, %v12993_v5  ;;  %v13003_v61 = vld [vmem:[#allocation6_spill] sm:$0xff]  ;;  %v13005_v5 = vld [vmem:[#allocation8_spill] sm:$0xff] }
 0x4bb   :  { %12980 = vst [vmem:[#allocation87_spill] sm:$0xff] %v8597_v42  ;;  %12982 = vst [vmem:[#allocation86_spill] sm:$0xff] %v8601_v34  ;;  %v8629_v50 = vmul.f32 %v8593_v6, %v12995_v21  ;;  %v8633_v35 = vmul.f32 %v8593_v6, %v12997_v32  ;;  %v8637_v3 = vmul.f32 %v8593_v6, %v12999_v58 }
 0x4bc   :  { %12984 = vst [vmem:[#allocation88_spill] sm:$0xff] %v8605_v8  ;;  %12986 = vst [vmem:[#allocation113_spill] sm:$0xff] %v8609_v31  ;;  %v8641_v12 = vmul.f32 %v8593_v6, %v13001_v24  ;;  %v8645_v51 = vmul.f32 %v8593_v6, %v13003_v61  ;;  %v8649_v21 = vmul.f32 %v8593_v6, %v13005_v5 }
 0x4bd   :  { %12988 = vst [vmem:[#allocation128_spill] sm:$0xff] %v8613_v7  ;;  %12990 = vst [vmem:[#allocation131_spill] sm:$0xff] %v8617_v22 }
 0x4be   :  { %12992 = vst [vmem:[#allocation136_spill] sm:$0xff] %v8621_v11  ;;  %12994 = vst [vmem:[#allocation137_spill] sm:$0xff] %v8625_v14 }
 0x4bf   :  { %12996 = vst [vmem:[#allocation147_spill] sm:$0xff] %v8629_v50  ;;  %12998 = vst [vmem:[#allocation144_spill] sm:$0xff] %v8633_v35  ;;  %v13007_v50 = vld [vmem:[#allocation11_spill] sm:$0xff]  ;;  %v13009_v35 = vld [vmem:[#allocation13_spill] sm:$0xff] }
 0x4c0   :  { %13000 = vst [vmem:[#allocation152_spill] sm:$0xff] %v8637_v3  ;;  %13002 = vst [vmem:[#allocation155_spill] sm:$0xff] %v8641_v12  ;;  %v8653_v32 = vmul.f32 %v8593_v6, %v13007_v50  ;;  %v8657_v58 = vmul.f32 %v8593_v6, %v13009_v35  ;;  %v13011_v3 = vld [vmem:[#allocation10_spill] sm:$0xff]  ;;  %v13013_v12 = vld [vmem:[#allocation12_spill] sm:$0xff] }
 0x4c1   :  { %13004 = vst [vmem:[#allocation162_spill] sm:$0xff] %v8645_v51  ;;  %13006 = vst [vmem:[#allocation166_spill] sm:$0xff] %v8649_v21  ;;  %v8661_v24 = vmul.f32 %v8593_v6, %v13011_v3  ;;  %v8665_v61 = vmul.f32 %v8593_v6, %v13013_v12  ;;  %v13015_v51 = vld [vmem:[#allocation15_spill] sm:$0xff]  ;;  %v13017_v21 = vld [vmem:[#allocation17_spill] sm:$0xff] }
 0x4c2   :  { %13008 = vst [vmem:[#allocation167_spill] sm:$0xff] %v8653_v32  ;;  %13010 = vst [vmem:[#allocation3_spill] sm:$0xff] %v8657_v58  ;;  %v8669_v5 = vmul.f32 %v8593_v6, %v13015_v51  ;;  %v8673_v50 = vmul.f32 %v8593_v6, %v13017_v21  ;;  %v13019_v32 = vld [vmem:[#allocation14_spill] sm:$0xff]  ;;  %v13021_v58 = vld [vmem:[#allocation16_spill] sm:$0xff] }
 0x4c3   :  { %13012 = vst [vmem:[#allocation5_spill] sm:$0xff] %v8661_v24  ;;  %13014 = vst [vmem:[#allocation2_spill] sm:$0xff] %v8665_v61  ;;  %v8677_v35 = vmul.f32 %v8593_v6, %v13019_v32  ;;  %v8681_v3 = vmul.f32 %v8593_v6, %v13021_v58  ;;  %v13023_v24 = vld [vmem:[#allocation19_spill] sm:$0xff]  ;;  %v13025_v61 = vld [vmem:[#allocation21_spill] sm:$0xff] }
 0x4c4   :  { %13016 = vst [vmem:[#allocation4_spill] sm:$0xff] %v8669_v5  ;;  %13018 = vst [vmem:[#allocation7_spill] sm:$0xff] %v8673_v50  ;;  %v8685_v12 = vmul.f32 %v8593_v6, %v13023_v24  ;;  %v8689_v51 = vmul.f32 %v8593_v6, %v13025_v61  ;;  %v13027_v5 = vld [vmem:[#allocation18_spill] sm:$0xff]  ;;  %v13029_v50 = vld [vmem:[#allocation20_spill] sm:$0xff] }
 0x4c5   :  { %13020 = vst [vmem:[#allocation9_spill] sm:$0xff] %v8677_v35  ;;  %13022 = vst [vmem:[#allocation6_spill] sm:$0xff] %v8681_v3  ;;  %v8693_v21 = vmul.f32 %v8593_v6, %v13027_v5  ;;  %v8697_v32 = vmul.f32 %v8593_v6, %v13029_v50  ;;  %v13031_v35 = vld [vmem:[#allocation23_spill] sm:$0xff]  ;;  %v13033_v3 = vld [vmem:[#allocation25_spill] sm:$0xff] }
 0x4c6   :  { %13024 = vst [vmem:[#allocation8_spill] sm:$0xff] %v8685_v12  ;;  %13026 = vst [vmem:[#allocation11_spill] sm:$0xff] %v8689_v51  ;;  %v8701_v58 = vmul.f32 %v8593_v6, %v13031_v35  ;;  %v8705_v24 = vmul.f32 %v8593_v6, %v13033_v3  ;;  %v13035_v12 = vld [vmem:[#allocation22_spill] sm:$0xff]  ;;  %v13037_v51 = vld [vmem:[#allocation24_spill] sm:$0xff] }
 0x4c7   :  { %13028 = vst [vmem:[#allocation13_spill] sm:$0xff] %v8693_v21  ;;  %13030 = vst [vmem:[#allocation10_spill] sm:$0xff] %v8697_v32  ;;  %v8709_v61 = vmul.f32 %v8593_v6, %v13035_v12  ;;  %v8713_v5 = vmul.f32 %v8593_v6, %v13037_v51  ;;  %v13039_v21 = vld [vmem:[#allocation27_spill] sm:$0xff]  ;;  %v13041_v32 = vld [vmem:[#allocation29_spill] sm:$0xff] }
 0x4c8   :  { %13032 = vst [vmem:[#allocation12_spill] sm:$0xff] %v8701_v58  ;;  %13034 = vst [vmem:[#allocation15_spill] sm:$0xff] %v8705_v24  ;;  %v8717_v50 = vmul.f32 %v8593_v6, %v13039_v21  ;;  %v8721_v35 = vmul.f32 %v8593_v6, %v13041_v32  ;;  %v13043_v58 = vld [vmem:[#allocation26_spill] sm:$0xff]  ;;  %v13045_v24 = vld [vmem:[#allocation28_spill] sm:$0xff] }
 0x4c9   :  { %13036 = vst [vmem:[#allocation17_spill] sm:$0xff] %v8709_v61  ;;  %13038 = vst [vmem:[#allocation14_spill] sm:$0xff] %v8713_v5  ;;  %v8725_v3 = vmul.f32 %v8593_v6, %v13043_v58  ;;  %v8729_v12 = vmul.f32 %v8593_v6, %v13045_v24  ;;  %v13047_v61 = vld [vmem:[#allocation31_spill] sm:$0xff]  ;;  %v13049_v5 = vld [vmem:[#allocation33_spill] sm:$0xff] }
 0x4ca   :  { %13040 = vst [vmem:[#allocation16_spill] sm:$0xff] %v8717_v50  ;;  %13042 = vst [vmem:[#allocation19_spill] sm:$0xff] %v8721_v35  ;;  %v8733_v51 = vmul.f32 %v8593_v6, %v13047_v61  ;;  %v8737_v21 = vmul.f32 %v8593_v6, %v13049_v5  ;;  %v13051_v50 = vld [vmem:[#allocation30_spill] sm:$0xff]  ;;  %v13053_v35 = vld [vmem:[#allocation32_spill] sm:$0xff] }
 0x4cb   :  { %13044 = vst [vmem:[#allocation21_spill] sm:$0xff] %v8725_v3  ;;  %13046 = vst [vmem:[#allocation18_spill] sm:$0xff] %v8729_v12  ;;  %v8741_v32 = vmul.f32 %v8593_v6, %v13051_v50  ;;  %v8745_v58 = vmul.f32 %v8593_v6, %v13053_v35  ;;  %v13055_v3 = vld [vmem:[#allocation35_spill] sm:$0xff]  ;;  %v13057_v12 = vld [vmem:[#allocation37_spill] sm:$0xff] }
 0x4cc   :  { %13048 = vst [vmem:[#allocation20_spill] sm:$0xff] %v8733_v51  ;;  %13050 = vst [vmem:[#allocation23_spill] sm:$0xff] %v8737_v21  ;;  %v8749_v24 = vmul.f32 %v8593_v6, %v13055_v3  ;;  %v8753_v61 = vmul.f32 %v8593_v6, %v13057_v12  ;;  %v13059_v51 = vld [vmem:[#allocation34_spill] sm:$0xff]  ;;  %v13061_v21 = vld [vmem:[#allocation36_spill] sm:$0xff] }
 0x4cd   :  { %13052 = vst [vmem:[#allocation25_spill] sm:$0xff] %v8741_v32  ;;  %13054 = vst [vmem:[#allocation22_spill] sm:$0xff] %v8745_v58  ;;  %v8757_v5 = vmul.f32 %v8593_v6, %v13059_v51  ;;  %v8761_v50 = vmul.f32 %v8593_v6, %v13061_v21  ;;  %v13063_v32 = vld [vmem:[#allocation39_spill] sm:$0xff]  ;;  %v13065_v58 = vld [vmem:[#allocation41_spill] sm:$0xff] }
 0x4ce   :  { %13056 = vst [vmem:[#allocation24_spill] sm:$0xff] %v8749_v24  ;;  %13058 = vst [vmem:[#allocation27_spill] sm:$0xff] %v8753_v61  ;;  %v8765_v35 = vmul.f32 %v8593_v6, %v13063_v32  ;;  %v8769_v3 = vmul.f32 %v8593_v6, %v13065_v58  ;;  %v13067_v24 = vld [vmem:[#allocation38_spill] sm:$0xff]  ;;  %v13069_v61 = vld [vmem:[#allocation40_spill] sm:$0xff] }
 0x4cf   :  { %13060 = vst [vmem:[#allocation29_spill] sm:$0xff] %v8757_v5  ;;  %13062 = vst [vmem:[#allocation26_spill] sm:$0xff] %v8761_v50  ;;  %v8773_v12 = vmul.f32 %v8593_v6, %v13067_v24  ;;  %v8777_v51 = vmul.f32 %v8593_v6, %v13069_v61  ;;  %v13071_v5 = vld [vmem:[#allocation43_spill] sm:$0xff]  ;;  %v13073_v50 = vld [vmem:[#allocation45_spill] sm:$0xff] }
 0x4d0   :  { %13064 = vst [vmem:[#allocation28_spill] sm:$0xff] %v8765_v35  ;;  %13066 = vst [vmem:[#allocation31_spill] sm:$0xff] %v8769_v3  ;;  %v8781_v21 = vmul.f32 %v8593_v6, %v13071_v5  ;;  %v8785_v32 = vmul.f32 %v8593_v6, %v13073_v50  ;;  %v13075_v35 = vld [vmem:[#allocation42_spill] sm:$0xff]  ;;  %v13077_v3 = vld [vmem:[#allocation44_spill] sm:$0xff] }
 0x4d1   :  { %13068 = vst [vmem:[#allocation33_spill] sm:$0xff] %v8773_v12  ;;  %13070 = vst [vmem:[#allocation30_spill] sm:$0xff] %v8777_v51  ;;  %v8789_v58 = vmul.f32 %v8593_v6, %v13075_v35  ;;  %v8793_v24 = vmul.f32 %v8593_v6, %v13077_v3  ;;  %v13079_v12 = vld [vmem:[#allocation51_spill] sm:$0xff]  ;;  %v13081_v51 = vld [vmem:[#allocation53_spill] sm:$0xff] }
 0x4d2   :  { %13072 = vst [vmem:[#allocation32_spill] sm:$0xff] %v8781_v21  ;;  %13074 = vst [vmem:[#allocation35_spill] sm:$0xff] %v8785_v32  ;;  %v8797_v61 = vmul.f32 %v8593_v6, %v13079_v12  ;;  %v8801_v5 = vmul.f32 %v8593_v6, %v13081_v51  ;;  %v13083_v21 = vld [vmem:[#allocation49_spill] sm:$0xff]  ;;  %v13085_v32 = vld [vmem:[#allocation52_spill] sm:$0xff] }
 0x4d3   :  { %13076 = vst [vmem:[#allocation37_spill] sm:$0xff] %v8789_v58  ;;  %13078 = vst [vmem:[#allocation34_spill] sm:$0xff] %v8793_v24  ;;  %v8805_v50 = vmul.f32 %v8593_v6, %v13083_v21  ;;  %v8809_v35 = vmul.f32 %v8593_v6, %v13085_v32  ;;  %v13087_v58 = vld [vmem:[#allocation59_spill] sm:$0xff]  ;;  %v13089_v24 = vld [vmem:[#allocation61_spill] sm:$0xff] }
 0x4d4   :  { %13080 = vst [vmem:[#allocation36_spill] sm:$0xff] %v8797_v61  ;;  %13082 = vst [vmem:[#allocation39_spill] sm:$0xff] %v8801_v5  ;;  %v8813_v3 = vmul.f32 %v8593_v6, %v13087_v58  ;;  %v8817_v12 = vmul.f32 %v8593_v6, %v13089_v24  ;;  %v13091_v61 = vld [vmem:[#allocation57_spill] sm:$0xff]  ;;  %v13093_v5 = vld [vmem:[#allocation60_spill] sm:$0xff] }
 0x4d5   :  { %13084 = vst [vmem:[#allocation41_spill] sm:$0xff] %v8805_v50  ;;  %13086 = vst [vmem:[#allocation38_spill] sm:$0xff] %v8809_v35  ;;  %v8821_v51 = vmul.f32 %v8593_v6, %v13091_v61  ;;  %v8825_v21 = vmul.f32 %v8593_v6, %v13093_v5  ;;  %v13095_v50 = vld [vmem:[#allocation67_spill] sm:$0xff]  ;;  %v13097_v35 = vld [vmem:[#allocation69_spill] sm:$0xff] }
 0x4d6   :  { %13088 = vst [vmem:[#allocation40_spill] sm:$0xff] %v8813_v3  ;;  %13090 = vst [vmem:[#allocation43_spill] sm:$0xff] %v8817_v12  ;;  %v8829_v32 = vmul.f32 %v8593_v6, %v13095_v50  ;;  %v8833_v58 = vmul.f32 %v8593_v6, %v13097_v35  ;;  %v13099_v3 = vld [vmem:[#allocation65_spill] sm:$0xff]  ;;  %v13101_v12 = vld [vmem:[#allocation68_spill] sm:$0xff] }
 0x4d7   :  { %13092 = vst [vmem:[#allocation45_spill] sm:$0xff] %v8821_v51  ;;  %13094 = vst [vmem:[#allocation42_spill] sm:$0xff] %v8825_v21  ;;  %v8837_v24 = vmul.f32 %v8593_v6, %v13099_v3  ;;  %v8841_v61 = vmul.f32 %v8593_v6, %v13101_v12  ;;  %v13103_v51 = vld [vmem:[#allocation75_spill] sm:$0xff]  ;;  %v13105_v21 = vld [vmem:[#allocation77_spill] sm:$0xff] }
 0x4d8   :  { %13096 = vst [vmem:[#allocation44_spill] sm:$0xff] %v8829_v32  ;;  %13098 = vst [vmem:[#allocation51_spill] sm:$0xff] %v8833_v58  ;;  %v8845_v5 = vmul.f32 %v8593_v6, %v13103_v51  ;;  %v8849_v50 = vmul.f32 %v8593_v6, %v13105_v21  ;;  %v13107_v32 = vld [vmem:[#allocation73_spill] sm:$0xff]  ;;  %v13109_v58 = vld [vmem:[#allocation76_spill] sm:$0xff] }
 0x4d9   :  { %13100 = vst [vmem:[#allocation53_spill] sm:$0xff] %v8837_v24  ;;  %13102 = vst [vmem:[#allocation49_spill] sm:$0xff] %v8841_v61  ;;  %v8853_v35 = vmul.f32 %v8593_v6, %v13107_v32  ;;  %v8857_v3 = vmul.f32 %v8593_v6, %v13109_v58  ;;  %v13111_v24 = vld [vmem:[#allocation83_spill] sm:$0xff]  ;;  %v13113_v61 = vld [vmem:[#allocation85_spill] sm:$0xff] }
 0x4da   :  { %13104 = vst [vmem:[#allocation52_spill] sm:$0xff] %v8845_v5  ;;  %13106 = vst [vmem:[#allocation59_spill] sm:$0xff] %v8849_v50  ;;  %v8861_v12 = vmul.f32 %v8593_v6, %v13111_v24  ;;  %v8865_v51 = vmul.f32 %v8593_v6, %v13113_v61  ;;  %v13115_v5 = vld [vmem:[#allocation81_spill] sm:$0xff]  ;;  %v13117_v50 = vld [vmem:[#allocation84_spill] sm:$0xff] }
 0x4db   :  { %13108 = vst [vmem:[#allocation61_spill] sm:$0xff] %v8853_v35  ;;  %13110 = vst [vmem:[#allocation57_spill] sm:$0xff] %v8857_v3  ;;  %v8869_v21 = vmul.f32 %v8593_v6, %v13115_v5  ;;  %v8873_v32 = vmul.f32 %v8593_v6, %v13117_v50  ;;  %v13119_v35 = vld [vmem:[#allocation91_spill] sm:$0xff]  ;;  %v13121_v3 = vld [vmem:[#allocation93_spill] sm:$0xff] }
 0x4dc   :  { %13112 = vst [vmem:[#allocation60_spill] sm:$0xff] %v8861_v12  ;;  %13114 = vst [vmem:[#allocation67_spill] sm:$0xff] %v8865_v51  ;;  %v8877_v58 = vmul.f32 %v8593_v6, %v13119_v35  ;;  %v8881_v24 = vmul.f32 %v8593_v6, %v13121_v3  ;;  %v13123_v12 = vld [vmem:[#allocation89_spill] sm:$0xff]  ;;  %v13125_v51 = vld [vmem:[#allocation92_spill] sm:$0xff] }
 0x4dd   :  { %13116 = vst [vmem:[#allocation69_spill] sm:$0xff] %v8869_v21  ;;  %13118 = vst [vmem:[#allocation65_spill] sm:$0xff] %v8873_v32  ;;  %v8885_v61 = vmul.f32 %v8593_v6, %v13123_v12  ;;  %v8889_v5 = vmul.f32 %v8593_v6, %v13125_v51  ;;  %v13127_v21 = vld [vmem:[#allocation99_spill] sm:$0xff]  ;;  %v13129_v32 = vld [vmem:[#allocation101_spill] sm:$0xff] }
 0x4de   :  { %13120 = vst [vmem:[#allocation68_spill] sm:$0xff] %v8877_v58  ;;  %13122 = vst [vmem:[#allocation75_spill] sm:$0xff] %v8881_v24  ;;  %v8893_v50 = vmul.f32 %v8593_v6, %v13127_v21  ;;  %v8897_v35 = vmul.f32 %v8593_v6, %v13129_v32  ;;  %v13131_v58 = vld [vmem:[#allocation97_spill] sm:$0xff]  ;;  %v13133_v24 = vld [vmem:[#allocation100_spill] sm:$0xff] }
 0x4df   :  { %13124 = vst [vmem:[#allocation77_spill] sm:$0xff] %v8885_v61  ;;  %13126 = vst [vmem:[#allocation73_spill] sm:$0xff] %v8889_v5  ;;  %v8901_v3 = vmul.f32 %v8593_v6, %v13131_v58  ;;  %v8905_v12 = vmul.f32 %v8593_v6, %v13133_v24  ;;  %v13135_v61 = vld [vmem:[#allocation107_spill] sm:$0xff]  ;;  %v13137_v5 = vld [vmem:[#allocation109_spill] sm:$0xff] }
 0x4e0   :  { %13128 = vst [vmem:[#allocation76_spill] sm:$0xff] %v8893_v50  ;;  %13130 = vst [vmem:[#allocation83_spill] sm:$0xff] %v8897_v35  ;;  %v8909_v51 = vmul.f32 %v8593_v6, %v13135_v61  ;;  %v8913_v21 = vmul.f32 %v8593_v6, %v13137_v5  ;;  %v13139_v50 = vld [vmem:[#allocation105_spill] sm:$0xff]  ;;  %v13141_v35 = vld [vmem:[#allocation108_spill] sm:$0xff] }
 0x4e1   :  { %13132 = vst [vmem:[#allocation85_spill] sm:$0xff] %v8901_v3  ;;  %13134 = vst [vmem:[#allocation81_spill] sm:$0xff] %v8905_v12  ;;  %v8917_v32 = vmul.f32 %v8593_v6, %v13139_v50  ;;  %v8921_v58 = vmul.f32 %v8593_v6, %v13141_v35  ;;  %v13143_v3 = vld [vmem:[#allocation114_spill] sm:$0xff]  ;;  %v13145_v12 = vld [vmem:[#allocation116_spill] sm:$0xff] }
 0x4e2   :  { %13136 = vst [vmem:[#allocation84_spill] sm:$0xff] %v8909_v51  ;;  %13138 = vst [vmem:[#allocation91_spill] sm:$0xff] %v8913_v21  ;;  %v8925_v24 = vmul.f32 %v8593_v6, %v13143_v3  ;;  %v8929_v61 = vmul.f32 %v8593_v6, %v13145_v12  ;;  %v13147_v51 = vld [vmem:[#allocation112_spill] sm:$0xff]  ;;  %v13149_v21 = vld [vmem:[#allocation115_spill] sm:$0xff] }
 0x4e3   :  { %13140 = vst [vmem:[#allocation93_spill] sm:$0xff] %v8917_v32  ;;  %13142 = vst [vmem:[#allocation89_spill] sm:$0xff] %v8921_v58  ;;  %v8933_v5 = vmul.f32 %v8593_v6, %v13147_v51  ;;  %v8937_v50 = vmul.f32 %v8593_v6, %v13149_v21  ;;  %v13151_v32 = vld [vmem:[#allocation119_spill] sm:$0xff]  ;;  %v13153_v58 = vld [vmem:[#allocation121_spill] sm:$0xff] }
 0x4e4   :  { %13144 = vst [vmem:[#allocation92_spill] sm:$0xff] %v8925_v24  ;;  %13146 = vst [vmem:[#allocation99_spill] sm:$0xff] %v8929_v61  ;;  %v8941_v35 = vmul.f32 %v8593_v6, %v13151_v32  ;;  %v8945_v3 = vmul.f32 %v8593_v6, %v13153_v58  ;;  %v13155_v24 = vld [vmem:[#allocation118_spill] sm:$0xff]  ;;  %v13157_v61 = vld [vmem:[#allocation120_spill] sm:$0xff] }
 0x4e5   :  { %13148 = vst [vmem:[#allocation101_spill] sm:$0xff] %v8933_v5  ;;  %13150 = vst [vmem:[#allocation97_spill] sm:$0xff] %v8937_v50  ;;  %v8949_v12 = vmul.f32 %v8593_v6, %v13155_v24  ;;  %v8953_v51 = vmul.f32 %v8593_v6, %v13157_v61  ;;  %v13159_v5 = vld [vmem:[#allocation124_spill] sm:$0xff]  ;;  %v13161_v50 = vld [vmem:[#allocation126_spill] sm:$0xff] }
 0x4e6   :  { %13152 = vst [vmem:[#allocation100_spill] sm:$0xff] %v8941_v35  ;;  %13154 = vst [vmem:[#allocation107_spill] sm:$0xff] %v8945_v3  ;;  %v8957_v21 = vmul.f32 %v8593_v6, %v13159_v5  ;;  %v8961_v32 = vmul.f32 %v8593_v6, %v13161_v50  ;;  %v13163_v35 = vld [vmem:[#allocation123_spill] sm:$0xff]  ;;  %v13165_v3 = vld [vmem:[#allocation125_spill] sm:$0xff] }
 0x4e7   :  { %13156 = vst [vmem:[#allocation109_spill] sm:$0xff] %v8949_v12  ;;  %13158 = vst [vmem:[#allocation105_spill] sm:$0xff] %v8953_v51  ;;  %v8965_v58 = vmul.f32 %v8593_v6, %v13163_v35  ;;  %v8969_v24 = vmul.f32 %v8593_v6, %v13165_v3  ;;  %v13167_v12 = vld [vmem:[#allocation132_spill] sm:$0xff]  ;;  %v13169_v51 = vld [vmem:[#allocation134_spill] sm:$0xff] }
 0x4e8   :  { %13160 = vst [vmem:[#allocation108_spill] sm:$0xff] %v8957_v21  ;;  %13162 = vst [vmem:[#allocation114_spill] sm:$0xff] %v8961_v32  ;;  %v8973_v61 = vmul.f32 %v8593_v6, %v13167_v12  ;;  %v8977_v5 = vmul.f32 %v8593_v6, %v13169_v51  ;;  %v13171_v21 = vld [vmem:[#allocation130_spill] sm:$0xff]  ;;  %v13173_v32 = vld [vmem:[#allocation133_spill] sm:$0xff] }
 0x4e9   :  { %13164 = vst [vmem:[#allocation116_spill] sm:$0xff] %v8965_v58  ;;  %13166 = vst [vmem:[#allocation112_spill] sm:$0xff] %v8969_v24  ;;  %v8981_v50 = vmul.f32 %v8593_v6, %v13171_v21  ;;  %v8985_v35 = vmul.f32 %v8593_v6, %v13173_v32  ;;  %v13175_v58 = vld [vmem:[#allocation140_spill] sm:$0xff]  ;;  %v13177_v24 = vld [vmem:[#allocation142_spill] sm:$0xff] }
 0x4ea   :  { %13168 = vst [vmem:[#allocation115_spill] sm:$0xff] %v8973_v61  ;;  %13170 = vst [vmem:[#allocation119_spill] sm:$0xff] %v8977_v5  ;;  %v8989_v3 = vmul.f32 %v8593_v6, %v13175_v58  ;;  %v8993_v12 = vmul.f32 %v8593_v6, %v13177_v24  ;;  %v13179_v61 = vld [vmem:[#allocation138_spill] sm:$0xff]  ;;  %v13181_v5 = vld [vmem:[#allocation141_spill] sm:$0xff] }
 0x4eb   :  { %13172 = vst [vmem:[#allocation121_spill] sm:$0xff] %v8981_v50  ;;  %13174 = vst [vmem:[#allocation118_spill] sm:$0xff] %v8985_v35  ;;  %v8997_v51 = vmul.f32 %v8593_v6, %v13179_v61  ;;  %v9001_v21 = vmul.f32 %v8593_v6, %v13181_v5  ;;  %v13183_v50 = vld [vmem:[#allocation148_spill] sm:$0xff]  ;;  %v13185_v35 = vld [vmem:[#allocation150_spill] sm:$0xff] }
 0x4ec   :  { %13176 = vst [vmem:[#allocation120_spill] sm:$0xff] %v8989_v3  ;;  %13178 = vst [vmem:[#allocation124_spill] sm:$0xff] %v8993_v12  ;;  %v9005_v32 = vmul.f32 %v8593_v6, %v13183_v50  ;;  %v9009_v58 = vmul.f32 %v8593_v6, %v13185_v35  ;;  %v13187_v3 = vld [vmem:[#allocation146_spill] sm:$0xff]  ;;  %v13189_v12 = vld [vmem:[#allocation149_spill] sm:$0xff] }
 0x4ed   :  { %13180 = vst [vmem:[#allocation126_spill] sm:$0xff] %v8997_v51  ;;  %13182 = vst [vmem:[#allocation123_spill] sm:$0xff] %v9001_v21  ;;  %v9013_v24 = vmul.f32 %v8593_v6, %v13187_v3  ;;  %v9017_v61 = vmul.f32 %v8593_v6, %v13189_v12  ;;  %v13191_v51 = vld [vmem:[#allocation156_spill] sm:$0xff]  ;;  %v13193_v21 = vld [vmem:[#allocation158_spill] sm:$0xff] }
 0x4ee   :  { %13184 = vst [vmem:[#allocation125_spill] sm:$0xff] %v9005_v32  ;;  %13186 = vst [vmem:[#allocation132_spill] sm:$0xff] %v9009_v58  ;;  %v9021_v5 = vmul.f32 %v8593_v6, %v13191_v51  ;;  %v9025_v50 = vmul.f32 %v8593_v6, %v13193_v21  ;;  %v13195_v32 = vld [vmem:[#allocation154_spill] sm:$0xff]  ;;  %v13197_v58 = vld [vmem:[#allocation157_spill] sm:$0xff] }
 0x4ef   :  { %13188 = vst [vmem:[#allocation134_spill] sm:$0xff] %v9013_v24  ;;  %13190 = vst [vmem:[#allocation130_spill] sm:$0xff] %v9017_v61  ;;  %v9029_v35 = vmul.f32 %v8593_v6, %v13195_v32  ;;  %v9033_v3 = vmul.f32 %v8593_v6, %v13197_v58  ;;  %v13199_v24 = vld [vmem:[#allocation163_spill] sm:$0xff]  ;;  %v13201_v61 = vld [vmem:[#allocation165_spill] sm:$0xff] }
 0x4f0   :  { %13192 = vst [vmem:[#allocation133_spill] sm:$0xff] %v9021_v5  ;;  %13194 = vst [vmem:[#allocation140_spill] sm:$0xff] %v9025_v50  ;;  %v9037_v12 = vmul.f32 %v8593_v6, %v13199_v24  ;;  %v9041_v51 = vmul.f32 %v8593_v6, %v13201_v61  ;;  %v13203_v5 = vld [vmem:[#allocation161_spill] sm:$0xff]  ;;  %v13205_v50 = vld [vmem:[#allocation164_spill] sm:$0xff] }
 0x4f1   :  { %13196 = vst [vmem:[#allocation142_spill] sm:$0xff] %v9029_v35  ;;  %13198 = vst [vmem:[#allocation138_spill] sm:$0xff] %v9033_v3  ;;  %v9045_v21 = vmul.f32 %v8593_v6, %v13203_v5  ;;  %v9049_v32 = vmul.f32 %v8593_v6, %v13205_v50  ;;  %v13207_v35 = vld [vmem:[#allocation47_spill] sm:$0xff]  ;;  %v13209_v3 = vld [vmem:[#allocation50_spill] sm:$0xff] }
 0x4f2   :  { %13200 = vst [vmem:[#allocation141_spill] sm:$0xff] %v9037_v12  ;;  %13202 = vst [vmem:[#allocation148_spill] sm:$0xff] %v9041_v51  ;;  %v9053_v58 = vmul.f32 %v8593_v6, %v13207_v35  ;;  %v9057_v24 = vmul.f32 %v8593_v6, %v13209_v3  ;;  %v13211_v12 = vld [vmem:[#allocation46_spill] sm:$0xff]  ;;  %v13213_v51 = vld [vmem:[#allocation48_spill] sm:$0xff] }
 0x4f3   :  { %13204 = vst [vmem:[#allocation150_spill] sm:$0xff] %v9045_v21  ;;  %13206 = vst [vmem:[#allocation146_spill] sm:$0xff] %v9049_v32  ;;  %v9061_v61 = vmul.f32 %v8593_v6, %v13211_v12  ;;  %v9065_v5 = vmul.f32 %v8593_v6, %v13213_v51  ;;  %v13215_v21 = vld [vmem:[#allocation55_spill] sm:$0xff]  ;;  %v13217_v32 = vld [vmem:[#allocation58_spill] sm:$0xff] }
 0x4f4   :  { %13208 = vst [vmem:[#allocation149_spill] sm:$0xff] %v9053_v58  ;;  %13210 = vst [vmem:[#allocation156_spill] sm:$0xff] %v9057_v24  ;;  %v9069_v50 = vmul.f32 %v8593_v6, %v13215_v21  ;;  %v9073_v35 = vmul.f32 %v8593_v6, %v13217_v32  ;;  %v13219_v58 = vld [vmem:[#allocation54_spill] sm:$0xff]  ;;  %v13221_v24 = vld [vmem:[#allocation56_spill] sm:$0xff] }
 0x4f5   :  { %13212 = vst [vmem:[#allocation158_spill] sm:$0xff] %v9061_v61  ;;  %13214 = vst [vmem:[#allocation154_spill] sm:$0xff] %v9065_v5  ;;  %v9077_v3 = vmul.f32 %v8593_v6, %v13219_v58  ;;  %v9081_v12 = vmul.f32 %v8593_v6, %v13221_v24  ;;  %v13223_v61 = vld [vmem:[#allocation63_spill] sm:$0xff]  ;;  %v13225_v5 = vld [vmem:[#allocation66_spill] sm:$0xff] }
 0x4f6   :  { %13216 = vst [vmem:[#allocation157_spill] sm:$0xff] %v9069_v50  ;;  %13218 = vst [vmem:[#allocation163_spill] sm:$0xff] %v9073_v35  ;;  %v9085_v51 = vmul.f32 %v8593_v6, %v13223_v61  ;;  %v9089_v21 = vmul.f32 %v8593_v6, %v13225_v5  ;;  %v13227_v50 = vld [vmem:[#allocation62_spill] sm:$0xff]  ;;  %v13229_v35 = vld [vmem:[#allocation64_spill] sm:$0xff] }
 0x4f7   :  { %13220 = vst [vmem:[#allocation165_spill] sm:$0xff] %v9077_v3  ;;  %13222 = vst [vmem:[#allocation161_spill] sm:$0xff] %v9081_v12  ;;  %v9093_v32 = vmul.f32 %v8593_v6, %v13227_v50  ;;  %v9097_v58 = vmul.f32 %v8593_v6, %v13229_v35  ;;  %v13231_v3 = vld [vmem:[#allocation71_spill] sm:$0xff]  ;;  %v13233_v12 = vld [vmem:[#allocation74_spill] sm:$0xff] }
 0x4f8   :  { %13224 = vst [vmem:[#allocation164_spill] sm:$0xff] %v9085_v51  ;;  %13226 = vst [vmem:[#allocation47_spill] sm:$0xff] %v9089_v21  ;;  %v9101_v24 = vmul.f32 %v8593_v6, %v13231_v3  ;;  %v9105_v61 = vmul.f32 %v8593_v6, %v13233_v12  ;;  %v13235_v51 = vld [vmem:[#allocation70_spill] sm:$0xff]  ;;  %v13237_v21 = vld [vmem:[#allocation72_spill] sm:$0xff] }
 0x4f9   :  { %13228 = vst [vmem:[#allocation50_spill] sm:$0xff] %v9093_v32  ;;  %13230 = vst [vmem:[#allocation46_spill] sm:$0xff] %v9097_v58  ;;  %v9109_v5 = vmul.f32 %v8593_v6, %v13235_v51  ;;  %v9113_v50 = vmul.f32 %v8593_v6, %v13237_v21  ;;  %v13239_v32 = vld [vmem:[#allocation79_spill] sm:$0xff]  ;;  %v13241_v58 = vld [vmem:[#allocation82_spill] sm:$0xff]  ;;  %v9133_v21 = vmul.f32 %v8593_v6, %v12948_v56 }
 0x4fa   :  { %13232 = vst [vmem:[#allocation48_spill] sm:$0xff] %v9101_v24  ;;  %13234 = vst [vmem:[#allocation55_spill] sm:$0xff] %v9105_v61  ;;  %v9117_v35 = vmul.f32 %v8593_v6, %v13239_v32  ;;  %v9121_v3 = vmul.f32 %v8593_v6, %v13241_v58  ;;  %v13243_v24 = vld [vmem:[#allocation78_spill] sm:$0xff]  ;;  %v13245_v61 = vld [vmem:[#allocation80_spill] sm:$0xff]  ;;  %v9141_v58 = vmul.f32 %v8593_v6, %v12950_v36 }
 0x4fb   :  { %13236 = vst [vmem:[#allocation58_spill] sm:$0xff] %v9109_v5  ;;  %13238 = vst [vmem:[#allocation54_spill] sm:$0xff] %v9113_v50  ;;  %v9125_v12 = vmul.f32 %v8593_v6, %v13243_v24  ;;  %v9129_v51 = vmul.f32 %v8593_v6, %v13245_v61  ;;  %v13247_v50 = vld [vmem:[#allocation90_spill] sm:$0xff]  ;;  %v9145_v24 = vmul.f32 %v8593_v6, %v7666_v2 }
 0x4fc   :  { %13240 = vst [vmem:[#allocation56_spill] sm:$0xff] %v9117_v35  ;;  %13242 = vst [vmem:[#allocation63_spill] sm:$0xff] %v9121_v3  ;;  %v9137_v32 = vmul.f32 %v8593_v6, %v13247_v50  ;;  %v9149_v61 = vmul.f32 %v8593_v6, %v12951_v44  ;;  %v9153_v56 = vmul.f32 %v8593_v6, %v7674_v15  ;;  %v13441_v14 = vld [vmem:[#allocation154_spill] sm:$0xff] }
 0x4fd   :  { %13244 = vst [vmem:[#allocation66_spill] sm:$0xff] %v9125_v12  ;;  %13246 = vst [vmem:[#allocation62_spill] sm:$0xff] %v9129_v51  ;;  %v9157_v50 = vmul.f32 %v8593_v6, %v7678_v19  ;;  %v9161_v36 = vmul.f32 %v8593_v6, %v7682_v1 }
 0x4fe   :  { %13248 = vst [vmem:[#allocation64_spill] sm:$0xff] %v9137_v32  ;;  %13249 = vst [vmem:[#allocation71_spill] sm:$0xff] %v9141_v58  ;;  %v13255_v58 = vld [vmem:[#allocation95_spill] sm:$0xff]  ;;  %v13445_v42 = vld [vmem:[#allocation161_spill] sm:$0xff] }
 0x4ff   :  { %13250 = vst [vmem:[#allocation74_spill] sm:$0xff] %v9145_v24  ;;  %13251 = vst [vmem:[#allocation70_spill] sm:$0xff] %v9149_v61  ;;  %v9165_v2 = vmul.f32 %v8593_v6, %v13255_v58  ;;  %v13257_v24 = vld [vmem:[#allocation98_spill] sm:$0xff]  ;;  %v13446_v34 = vld [vmem:[#allocation164_spill] sm:$0xff] }
 0x500   :  { %13252 = vst [vmem:[#allocation72_spill] sm:$0xff] %v9153_v56  ;;  %13253 = vst [vmem:[#allocation79_spill] sm:$0xff] %v9157_v50  ;;  %v9169_v44 = vmul.f32 %v8593_v6, %v13257_v24  ;;  %v13259_v61 = vld [vmem:[#allocation94_spill] sm:$0xff]  ;;  %v13261_v56 = vld [vmem:[#allocation96_spill] sm:$0xff] }
 0x501   :  { %13254 = vst [vmem:[#allocation82_spill] sm:$0xff] %v9161_v36  ;;  %13256 = vst [vmem:[#allocation78_spill] sm:$0xff] %v9165_v2  ;;  %v9173_v15 = vmul.f32 %v8593_v6, %v13259_v61  ;;  %v9177_v19 = vmul.f32 %v8593_v6, %v13261_v56  ;;  %v13263_v50 = vld [vmem:[#allocation103_spill] sm:$0xff]  ;;  %v13265_v36 = vld [vmem:[#allocation106_spill] sm:$0xff] }
 0x502   :  { %13258 = vst [vmem:[#allocation80_spill] sm:$0xff] %v9169_v44  ;;  %v9181_v1 = vmul.f32 %v8593_v6, %v13263_v50  ;;  %v9185_v58 = vmul.f32 %v8593_v6, %v13265_v36  ;;  %v13267_v2 = vld [vmem:[#allocation102_spill] sm:$0xff]  ;;  %v13269_v44 = vld [vmem:[#allocation104_spill] sm:$0xff]  ;;  %v9201_v50 = vmul.f32 %v8593_v6, %v12958_v4  ;;  %v9221_v4 = vmul.f32 %v8593_v6, %v12962_v23  ;;  %v13447_v8 = vld [vmem:[#allocation47_spill] sm:$0xff] }
 0x503   :  { %13260 = vst [vmem:[#allocation90_spill] sm:$0xff] %v9173_v15  ;;  %13262 = vst [vmem:[#allocation95_spill] sm:$0xff] %v9177_v19  ;;  %v9189_v24 = vmul.f32 %v8593_v6, %v13267_v2  ;;  %v9193_v61 = vmul.f32 %v8593_v6, %v13269_v44  ;;  %v13270_v15 = vld [vmem:[#allocation111_spill] sm:$0xff]  ;;  %v13448_v31 = vld [vmem:[#allocation50_spill] sm:$0xff] }
 0x504   :  { %13264 = vst [vmem:[#allocation98_spill] sm:$0xff] %v9181_v1  ;;  %13266 = vst [vmem:[#allocation94_spill] sm:$0xff] %v9185_v58  ;;  %v9197_v56 = vmul.f32 %v8593_v6, %v13270_v15  ;;  %v13272_v1 = vld [vmem:[#allocation110_spill] sm:$0xff]  ;;  %v13274_v58 = vld [vmem:[#allocation117_spill] sm:$0xff]  ;;  %v9217_v15 = vmul.f32 %v8593_v6, %v12961_v28  ;;  %v9237_v28 = vmul.f32 %v8593_v6, %v12964_v17 }
 0x505   :  { %13268 = vst [vmem:[#allocation96_spill] sm:$0xff] %v9189_v24  ;;  %13271 = vst [vmem:[#allocation103_spill] sm:$0xff] %v9201_v50  ;;  %v9205_v36 = vmul.f32 %v8593_v6, %v13272_v1  ;;  %v9209_v2 = vmul.f32 %v8593_v6, %v13274_v58  ;;  %v13275_v24 = vld [vmem:[#allocation122_spill] sm:$0xff]  ;;  %v13278_v50 = vld [vmem:[#allocation127_spill] sm:$0xff]  ;;  %v9257_v17 = vmul.f32 %v8593_v6, %v12967_v20 }
 0x506   :  { %v9213_v44 = vmul.f32 %v8593_v6, %v13275_v24  ;;  %13276 = vst [vmem:[#allocation102_spill] sm:$0xff] %v9217_v15  ;;  %13277 = vst [vmem:[#allocation104_spill] sm:$0xff] %v9221_v4  ;;  %v9225_v1 = vmul.f32 %v8593_v6, %v13278_v50  ;;  %v9233_v24 = vmul.f32 %v8593_v6, %v7754_v18  ;;  %v13280_v15 = vld [vmem:[#allocation139_spill] sm:$0xff]  ;;  %v13455_v11 = vld [vmem:[#allocation70_spill] sm:$0xff] }
 0x507   :  { %13273 = vst [vmem:[#allocation106_spill] sm:$0xff] %v9205_v36  ;;  %v13279_v36 = vld [vmem:[#allocation129_spill] sm:$0xff]  ;;  %v9241_v23 = vmul.f32 %v8593_v6, %v13280_v15  ;;  %v13281_v4 = vld [vmem:[#allocation135_spill] sm:$0xff]  ;;  %v9253_v18 = vmul.f32 %v8593_v6, %v12966_v25  ;;  %v9261_v15 = vmul.f32 %v8593_v6, %v7782_v37  ;;  %v9273_v25 = vmul.f32 %v8593_v6, %v7794_v10  ;;  %v13456_v5 = vld [vmem:[#allocation72_spill] sm:$0xff] }
 0x508   :  { %v9229_v58 = vmul.f32 %v8593_v6, %v13279_v36  ;;  %v9245_v50 = vmul.f32 %v8593_v6, %v13281_v4  ;;  %v9249_v36 = vmul.f32 %v8593_v6, %v7770_v63  ;;  %v9265_v4 = vmul.f32 %v8593_v6, %v7786_v53  ;;  %v13459_v3 = vld [vmem:[#allocation78_spill] sm:$0xff] }
 0x509   :  { %v9269_v63 = vmul.f32 %v8593_v6, %v7790_v60  ;;  %v9277_v20 = vmul.f32 %v8593_v6, %v7798_v26  ;;  %v9281_v37 = vmul.f32 %v8593_v6, %v7802_v16  ;;  %v9285_v53 = vmul.f32 %v8593_v6, %v7806_v40  ;;  %v13460_v12 = vld [vmem:[#allocation80_spill] sm:$0xff] }
 0x50a   :  { %v9289_v60 = vmul.f32 %v8593_v6, %v7810_v29  ;;  %v9293_v10 = vmul.f32 %v8593_v6, %v7814_v38  ;;  %v9297_v26 = vmul.f32 %v8593_v6, %v7818_v52  ;;  %v9301_v16 = vmul.f32 %v8593_v6, %v7822_v47 }
 0x50b   :  { %v9305_v40 = vmul.f32 %v8593_v6, %v7826_v9  ;;  %v9309_v29 = vmul.f32 %v8593_v6, %v7830_v59  ;;  %v9313_v38 = vmul.f32 %v8593_v6, %v7834_v0  ;;  %v9317_v52 = vmul.f32 %v8593_v6, %v7838_v13  ;;  %v13462_v32 = vld [vmem:[#allocation98_spill] sm:$0xff] }
 0x50c   :  { %v9321_v47 = vmul.f32 %v8593_v6, %v7842_v33  ;;  %v9325_v9 = vmul.f32 %v8593_v6, %v7846_v43  ;;  %v9329_v59 = vmul.f32 %v8593_v6, %v7850_v62  ;;  %v9333_v0 = vmul.f32 %v8593_v6, %v7854_v41  ;;  %v13463_v7 = vld [vmem:[#allocation94_spill] sm:$0xff]  ;;  %v13464_v22 = vld [vmem:[#allocation96_spill] sm:$0xff] }
 0x50d   :  { %13282 = vst [vmem:[#allocation111_spill] sm:$0xff] %v9305_v40  ;;  %13283 = vst [vmem:[#allocation110_spill] sm:$0xff] %v9309_v29  ;;  %v9337_v13 = vmul.f32 %v8593_v6, %v7858_v30  ;;  %v9341_v33 = vmul.f32 %v8593_v6, %v7862_v57  ;;  %v9345_v43 = vmul.f32 %v8593_v6, %v7866_v48  ;;  %v13467_v51 = vld [vmem:[#allocation102_spill] sm:$0xff]  ;;  %v13468_v19 = vld [vmem:[#allocation104_spill] sm:$0xff] }
 0x50e   :  { %13284 = vst [vmem:[#allocation117_spill] sm:$0xff] %v9313_v38  ;;  %13285 = vst [vmem:[#allocation122_spill] sm:$0xff] %v9317_v52  ;;  %v9349_v62 = vmul.f32 %v8593_v6, %v7870_v54  ;;  %v9353_v41 = vmul.f32 %v8593_v6, %v7874_v55  ;;  %v9357_v30 = vmul.f32 %v8593_v6, %v7878_v39  ;;  %v13466_v35 = vld [vmem:[#allocation106_spill] sm:$0xff]  ;;  %v13492_v29 = vld [vmem:[#allocation87_spill] sm:$0xff] }
 0x50f   :  { %13286 = vst [vmem:[#allocation127_spill] sm:$0xff] %v9321_v47  ;;  %13287 = vst [vmem:[#allocation129_spill] sm:$0xff] %v9325_v9  ;;  %v9361_v57 = vmul.f32 %v8593_v6, %v7882_v27  ;;  %v9365_v48 = vmul.f32 %v8593_v6, %v7886_v49  ;;  %v9369_v54 = vmul.f32 %v8593_v6, %v7890_v45 }
 0x510   :  { %13288 = vst [vmem:[#allocation139_spill] sm:$0xff] %v9329_v59  ;;  %13289 = vst [vmem:[#allocation135_spill] sm:$0xff] %v9333_v0  ;;  %v9373_v55 = vmul.f32 %v8593_v6, %v7894_v46 }
 0x511   :  { %13290 = vst [vmem:[#allocation178_spill] sm:$0xff] %v9337_v13  ;;  %13291 = vst [vmem:[#allocation179_spill] sm:$0xff] %v9341_v33 }
 0x512   :  { %13292 = vst [vmem:[#allocation180_spill] sm:$0xff] %v9345_v43  ;;  %13293 = vst [vmem:[#allocation181_spill] sm:$0xff] %v9349_v62  ;;  %v13501_v62 = vld [vmem:[#allocation113_spill] sm:$0xff] }
 0x513   :  { %13294 = vst [vmem:[#allocation182_spill] sm:$0xff] %v9353_v41  ;;  %13295 = vst [vmem:[#allocation183_spill] sm:$0xff] %v9357_v30  ;;  %v13300_v41 = vld [vmem:[#allocation143_spill] sm:$0xff]  ;;  %v13302_v30 = vld [vmem:[#allocation145_spill] sm:$0xff]  ;;  %v13502_v33 = vmax.f32 %v13501_v62, 0.0 }
 0x514   :  { %13296 = vst [vmem:[#allocation184_spill] sm:$0xff] %v9361_v57  ;;  %13297 = vst [vmem:[#allocation185_spill] sm:$0xff] %v9365_v48  ;;  %v9377_v39 = vmul.f32 %v8593_v6, %v13300_v41  ;;  %v9381_v27 = vmul.f32 %v8593_v6, %v13302_v30  ;;  %v13304_v57 = vld [vmem:[#allocation151_spill] sm:$0xff]  ;;  %v13306_v48 = vld [vmem:[#allocation153_spill] sm:$0xff] }
 0x515   :  { %13298 = vst [vmem:[#allocation186_spill] sm:$0xff] %v9369_v54  ;;  %13299 = vst [vmem:[#allocation187_spill] sm:$0xff] %v9373_v55  ;;  %v9385_v49 = vmul.f32 %v8593_v6, %v13304_v57  ;;  %v9389_v45 = vmul.f32 %v8593_v6, %v13306_v48  ;;  %v13308_v54 = vld [vmem:[#allocation159_spill] sm:$0xff]  ;;  %v13310_v55 = vld [vmem:[#allocation160_spill] sm:$0xff] }
 0x516   :  { %13301 = vst [vmem:[#allocation143_spill] sm:$0xff] %v9377_v39  ;;  %13303 = vst [vmem:[#allocation145_spill] sm:$0xff] %v9381_v27  ;;  %v9393_v46 = vmul.f32 %v8593_v6, %v13308_v54  ;;  %v9397_v41 = vmul.f32 %v8593_v6, %v13310_v55  ;;  %v13312_v39 = vld [vmem:[#allocation171_spill] sm:$0xff]  ;;  %v13314_v27 = vld [vmem:[#allocation172_spill] sm:$0xff] }
 0x517   :  { %13305 = vst [vmem:[#allocation151_spill] sm:$0xff] %v9385_v49  ;;  %13307 = vst [vmem:[#allocation153_spill] sm:$0xff] %v9389_v45  ;;  %v9401_v30 = vmul.f32 %v8593_v6, %v13312_v39  ;;  %v9405_v57 = vmul.f32 %v8593_v6, %v13314_v27  ;;  %v13316_v49 = vld [vmem:[#allocation173_spill] sm:$0xff]  ;;  %v13318_v45 = vld [vmem:[#allocation174_spill] sm:$0xff] }
 0x518   :  { %13309 = vst [vmem:[#allocation159_spill] sm:$0xff] %v9393_v46  ;;  %13311 = vst [vmem:[#allocation160_spill] sm:$0xff] %v9397_v41  ;;  %v9409_v48 = vmul.f32 %v8593_v6, %v13316_v49  ;;  %v9413_v54 = vmul.f32 %v8593_v6, %v13318_v45  ;;  %v13320_v46 = vld [vmem:[#allocation170_spill] sm:$0xff]  ;;  %v13322_v41 = vld [vmem:[#allocation168_spill] sm:$0xff] }
 0x519   :  { %13313 = vst [vmem:[#allocation171_spill] sm:$0xff] %v9401_v30  ;;  %13315 = vst [vmem:[#allocation172_spill] sm:$0xff] %v9405_v57  ;;  %v9417_v55 = vmul.f32 %v8593_v6, %v13320_v46  ;;  %v9421_v39 = vmul.f32 %v8593_v6, %v13322_v41  ;;  %v13324_v30 = vld [vmem:[#allocation169_spill] sm:$0xff]  ;;  %v13326_v57 = vld [vmem:[#allocation175_spill] sm:$0xff]  ;;  %v13493_v41 = vmax.f32 %v13492_v29, 0.0 }
 0x51a   :  { %13317 = vst [vmem:[#allocation173_spill] sm:$0xff] %v9409_v48  ;;  %13319 = vst [vmem:[#allocation174_spill] sm:$0xff] %v9413_v54  ;;  %v9425_v27 = vmul.f32 %v8593_v6, %v13324_v30  ;;  %v9429_v49 = vmul.f32 %v8593_v6, %v13326_v57  ;;  %v13328_v48 = vld [vmem:[#allocation176_spill] sm:$0xff]  ;;  %v13330_v54 = vld [vmem:[#allocation177_spill] sm:$0xff] }
 0x51b   :  { %13321 = vst [vmem:[#allocation170_spill] sm:$0xff] %v9417_v55  ;;  %13323 = vst [vmem:[#allocation168_spill] sm:$0xff] %v9421_v39  ;;  %v9433_v45 = vmul.f32 %v8593_v6, %v13328_v48  ;;  %v9437_v46 = vmul.f32 %v8593_v6, %v13330_v54  ;;  %v13443_v6 = vld [vmem:[#allocation163_spill] sm:$0xff]  ;;  %v13486_v59 = vmov %v9417_v55  ;;  %v13487_v0 = vmov %v9421_v39  ;;  %v13495_v30 = vld [vmem:[#allocation86_spill] sm:$0xff] }
 0x51c   :  { %13325 = vst [vmem:[#allocation169_spill] sm:$0xff] %v9425_v27  ;;  %13327 = vst [vmem:[#allocation175_spill] sm:$0xff] %v9429_v49  ;;  %v13488_v13 = vmov %v9425_v27  ;;  %v9653_v39 = vpack.c.bf16 %v13493_v41, %v13493_v41  ;;  %v13496_v47 = vmax.f32 %v13495_v30, 0.0  ;;  %v13498_v57 = vld [vmem:[#allocation88_spill] sm:$0xff]  ;;  %v9668_v54 = vpack.c.bf16 %v13502_v33, %v13502_v33 }
 0x51d   :  { %13329 = vst [vmem:[#allocation176_spill] sm:$0xff] %v9433_v45  ;;  %13331 = vst [vmem:[#allocation177_spill] sm:$0xff] %v9437_v46  ;;  %v13444_v46 = vld [vmem:[#allocation165_spill] sm:$0xff]  ;;  %v13465_v45 = vld [vmem:[#allocation103_spill] sm:$0xff]  ;;  %v13499_v49 = vmax.f32 %v13498_v57, 0.0 }
 0x51e   :  { %13494 = vst [vmem:[#allocation154_spill] sm:$0xff] %v9653_v39  ;;  %v9658_v27 = vpack.c.bf16 %v13496_v47, %v13496_v47  ;;  %13503 = vst [vmem:[#allocation161_spill] sm:$0xff] %v9668_v54  ;;  %v13504_v55 = vld [vmem:[#allocation128_spill] sm:$0xff]  ;;  %v13507_v39 = vld [vmem:[#allocation131_spill] sm:$0xff] }
 0x51f   :  { %v9663_v48 = vpack.c.bf16 %v13499_v49, %v13499_v49  ;;  %v13505_v29 = vmax.f32 %v13504_v55, 0.0  ;;  %v13508_v30 = vmax.f32 %v13507_v39, 0.0  ;;  %v13516_v54 = vld [vmem:[#allocation147_spill] sm:$0xff] }
 0x520   :  { %v13482_v38 = vld [vmem:[#allocation171_spill] sm:$0xff]  ;;  %v13483_v52 = vld [vmem:[#allocation172_spill] sm:$0xff]  ;;  %13497 = vst [vmem:[#allocation163_spill] sm:$0xff] %v9658_v27  ;;  %v13517_v55 = vmax.f32 %v13516_v54, 0.0 }
 0x521   :  { %v13485_v9 = vld [vmem:[#allocation174_spill] sm:$0xff]  ;;  %13500 = vst [vmem:[#allocation165_spill] sm:$0xff] %v9663_v48  ;;  %v9673_v41 = vpack.c.bf16 %v13505_v29, %v13505_v29  ;;  %v9678_v47 = vpack.c.bf16 %v13508_v30, %v13508_v30  ;;  %v13510_v27 = vld [vmem:[#allocation136_spill] sm:$0xff]  ;;  %v13513_v48 = vld [vmem:[#allocation137_spill] sm:$0xff] }
 0x522   :  { %v13511_v57 = vmax.f32 %v13510_v27, 0.0  ;;  %v13514_v62 = vmax.f32 %v13513_v48, 0.0  ;;  %v9693_v29 = vpack.c.bf16 %v13517_v55, %v13517_v55 }
 0x523   :  { %13506 = vst [vmem:[#allocation164_spill] sm:$0xff] %v9673_v41  ;;  %13509 = vst [vmem:[#allocation47_spill] sm:$0xff] %v9678_v47  ;;  %v13519_v41 = vld [vmem:[#allocation144_spill] sm:$0xff] }
 0x524   :  { %v13490_v43 = vld [vmem:[#allocation176_spill] sm:$0xff]  ;;  %v13491_v40 = vld [vmem:[#allocation177_spill] sm:$0xff]  ;;  %v9683_v49 = vpack.c.bf16 %v13511_v57, %v13511_v57  ;;  %v9688_v33 = vpack.c.bf16 %v13514_v62, %v13514_v62  ;;  %13518 = vst [vmem:[#allocation72_spill] sm:$0xff] %v9693_v29  ;;  %v13520_v39 = vmax.f32 %v13519_v41, 0.0  ;;  %v13531_v29 = vld [vmem:[#allocation166_spill] sm:$0xff] }
 0x525   :  { %v13522_v47 = vld [vmem:[#allocation152_spill] sm:$0xff]  ;;  %v13532_v41 = vmax.f32 %v13531_v29, 0.0 }
 0x526   :  { %13512 = vst [vmem:[#allocation50_spill] sm:$0xff] %v9683_v49  ;;  %13515 = vst [vmem:[#allocation70_spill] sm:$0xff] %v9688_v33  ;;  %v9698_v30 = vpack.c.bf16 %v13520_v39, %v13520_v39  ;;  %v13523_v27 = vmax.f32 %v13522_v47, 0.0  ;;  %v13525_v49 = vld [vmem:[#allocation155_spill] sm:$0xff]  ;;  %v13528_v33 = vld [vmem:[#allocation162_spill] sm:$0xff] }
 0x527   :  { %v13526_v48 = vmax.f32 %v13525_v49, 0.0  ;;  %v13529_v54 = vmax.f32 %v13528_v33, 0.0  ;;  %v9718_v39 = vpack.c.bf16 %v13532_v41, %v13532_v41 }
 0x528   :  { %13521 = vst [vmem:[#allocation78_spill] sm:$0xff] %v9698_v30  ;;  %v9703_v57 = vpack.c.bf16 %v13523_v27, %v13523_v27  ;;  %v13534_v30 = vld [vmem:[#allocation167_spill] sm:$0xff] }
 0x529   :  { %v9708_v62 = vpack.c.bf16 %v13526_v48, %v13526_v48  ;;  %v9713_v55 = vpack.c.bf16 %v13529_v54, %v13529_v54  ;;  %13533 = vst [vmem:[#allocation96_spill] sm:$0xff] %v9718_v39  ;;  %v13535_v47 = vmax.f32 %v13534_v30, 0.0  ;;  %v13546_v39 = vld [vmem:[#allocation4_spill] sm:$0xff] }
 0x52a   :  { %13524 = vst [vmem:[#allocation80_spill] sm:$0xff] %v9703_v57  ;;  %v13537_v57 = vld [vmem:[#allocation3_spill] sm:$0xff]  ;;  %v13547_v30 = vmax.f32 %v13546_v39, 0.0 }
 0x52b   :  { %13527 = vst [vmem:[#allocation98_spill] sm:$0xff] %v9708_v62  ;;  %13530 = vst [vmem:[#allocation94_spill] sm:$0xff] %v9713_v55  ;;  %v9723_v27 = vpack.c.bf16 %v13535_v47, %v13535_v47  ;;  %v13538_v49 = vmax.f32 %v13537_v57, 0.0  ;;  %v13540_v62 = vld [vmem:[#allocation5_spill] sm:$0xff]  ;;  %v13543_v55 = vld [vmem:[#allocation2_spill] sm:$0xff] }
 0x52c   :  { %v13541_v33 = vmax.f32 %v13540_v62, 0.0  ;;  %v13544_v29 = vmax.f32 %v13543_v55, 0.0  ;;  %v9743_v47 = vpack.c.bf16 %v13547_v30, %v13547_v30 }
 0x52d   :  { %13536 = vst [vmem:[#allocation103_spill] sm:$0xff] %v9723_v27  ;;  %v9728_v48 = vpack.c.bf16 %v13538_v49, %v13538_v49  ;;  %v13549_v27 = vld [vmem:[#allocation7_spill] sm:$0xff] }
 0x52e   :  { %v9733_v54 = vpack.c.bf16 %v13541_v33, %v13541_v33  ;;  %v9738_v41 = vpack.c.bf16 %v13544_v29, %v13544_v29  ;;  %13548 = vst [vmem:[#allocation171_spill] sm:$0xff] %v9743_v47  ;;  %v13550_v57 = vmax.f32 %v13549_v27, 0.0  ;;  %v13561_v47 = vld [vmem:[#allocation11_spill] sm:$0xff] }
 0x52f   :  { %13539 = vst [vmem:[#allocation106_spill] sm:$0xff] %v9728_v48  ;;  %v13552_v48 = vld [vmem:[#allocation9_spill] sm:$0xff]  ;;  %v13562_v27 = vmax.f32 %v13561_v47, 0.0 }
 0x530   :  { %13542 = vst [vmem:[#allocation102_spill] sm:$0xff] %v9733_v54  ;;  %13545 = vst [vmem:[#allocation104_spill] sm:$0xff] %v9738_v41  ;;  %v9748_v49 = vpack.c.bf16 %v13550_v57, %v13550_v57  ;;  %v13553_v62 = vmax.f32 %v13552_v48, 0.0  ;;  %v13555_v54 = vld [vmem:[#allocation6_spill] sm:$0xff]  ;;  %v13558_v41 = vld [vmem:[#allocation8_spill] sm:$0xff] }
 0x531   :  { %v13556_v55 = vmax.f32 %v13555_v54, 0.0  ;;  %v13559_v39 = vmax.f32 %v13558_v41, 0.0  ;;  %v9768_v57 = vpack.c.bf16 %v13562_v27, %v13562_v27 }
 0x532   :  { %13551 = vst [vmem:[#allocation172_spill] sm:$0xff] %v9748_v49  ;;  %v9753_v33 = vpack.c.bf16 %v13553_v62, %v13553_v62  ;;  %v13564_v49 = vld [vmem:[#allocation13_spill] sm:$0xff] }
 0x533   :  { %v9758_v29 = vpack.c.bf16 %v13556_v55, %v13556_v55  ;;  %v9763_v30 = vpack.c.bf16 %v13559_v39, %v13559_v39  ;;  %13563 = vst [vmem:[#allocation169_spill] sm:$0xff] %v9768_v57  ;;  %v13565_v48 = vmax.f32 %v13564_v49, 0.0  ;;  %v13576_v57 = vld [vmem:[#allocation17_spill] sm:$0xff] }
 0x534   :  { %13554 = vst [vmem:[#allocation174_spill] sm:$0xff] %v9753_v33  ;;  %v13567_v33 = vld [vmem:[#allocation10_spill] sm:$0xff]  ;;  %v13577_v49 = vmax.f32 %v13576_v57, 0.0 }
 0x535   :  { %13557 = vst [vmem:[#allocation170_spill] sm:$0xff] %v9758_v29  ;;  %13560 = vst [vmem:[#allocation168_spill] sm:$0xff] %v9763_v30  ;;  %v9773_v62 = vpack.c.bf16 %v13565_v48, %v13565_v48  ;;  %v13568_v54 = vmax.f32 %v13567_v33, 0.0  ;;  %v13570_v29 = vld [vmem:[#allocation12_spill] sm:$0xff]  ;;  %v13573_v30 = vld [vmem:[#allocation15_spill] sm:$0xff] }
 0x536   :  { %v13571_v41 = vmax.f32 %v13570_v29, 0.0  ;;  %v13574_v47 = vmax.f32 %v13573_v30, 0.0  ;;  %v9793_v48 = vpack.c.bf16 %v13577_v49, %v13577_v49 }
 0x537   :  { %13566 = vst [vmem:[#allocation176_spill] sm:$0xff] %v9773_v62  ;;  %v9778_v55 = vpack.c.bf16 %v13568_v54, %v13568_v54  ;;  %v13579_v62 = vld [vmem:[#allocation14_spill] sm:$0xff] }
 0x538   :  { %v9783_v39 = vpack.c.bf16 %v13571_v41, %v13571_v41  ;;  %v9788_v27 = vpack.c.bf16 %v13574_v47, %v13574_v47  ;;  %13578 = vst [vmem:[#allocation88_spill] sm:$0xff] %v9793_v48  ;;  %v13580_v33 = vmax.f32 %v13579_v62, 0.0  ;;  %v13591_v48 = vld [vmem:[#allocation18_spill] sm:$0xff] }
 0x539   :  { %13569 = vst [vmem:[#allocation177_spill] sm:$0xff] %v9778_v55  ;;  %v13582_v55 = vld [vmem:[#allocation16_spill] sm:$0xff]  ;;  %v13592_v62 = vmax.f32 %v13591_v48, 0.0 }
 0x53a   :  { %13572 = vst [vmem:[#allocation87_spill] sm:$0xff] %v9783_v39  ;;  %13575 = vst [vmem:[#allocation86_spill] sm:$0xff] %v9788_v27  ;;  %v9798_v54 = vpack.c.bf16 %v13580_v33, %v13580_v33  ;;  %v13583_v29 = vmax.f32 %v13582_v55, 0.0  ;;  %v13585_v39 = vld [vmem:[#allocation19_spill] sm:$0xff]  ;;  %v13588_v27 = vld [vmem:[#allocation21_spill] sm:$0xff] }
 0x53b   :  { %v13586_v30 = vmax.f32 %v13585_v39, 0.0  ;;  %v13589_v57 = vmax.f32 %v13588_v27, 0.0  ;;  %v9818_v33 = vpack.c.bf16 %v13592_v62, %v13592_v62 }
 0x53c   :  { %13581 = vst [vmem:[#allocation113_spill] sm:$0xff] %v9798_v54  ;;  %v9803_v41 = vpack.c.bf16 %v13583_v29, %v13583_v29  ;;  %v13594_v54 = vld [vmem:[#allocation20_spill] sm:$0xff] }
 0x53d   :  { %v9808_v47 = vpack.c.bf16 %v13586_v30, %v13586_v30  ;;  %v9813_v49 = vpack.c.bf16 %v13589_v57, %v13589_v57  ;;  %13593 = vst [vmem:[#allocation137_spill] sm:$0xff] %v9818_v33  ;;  %v13595_v55 = vmax.f32 %v13594_v54, 0.0  ;;  %v13606_v33 = vld [vmem:[#allocation24_spill] sm:$0xff] }
 0x53e   :  { %13584 = vst [vmem:[#allocation128_spill] sm:$0xff] %v9803_v41  ;;  %v13597_v41 = vld [vmem:[#allocation23_spill] sm:$0xff]  ;;  %v13607_v54 = vmax.f32 %v13606_v33, 0.0 }
 0x53f   :  { %13587 = vst [vmem:[#allocation131_spill] sm:$0xff] %v9808_v47  ;;  %13590 = vst [vmem:[#allocation136_spill] sm:$0xff] %v9813_v49  ;;  %v9823_v29 = vpack.c.bf16 %v13595_v55, %v13595_v55  ;;  %v13598_v39 = vmax.f32 %v13597_v41, 0.0  ;;  %v13600_v47 = vld [vmem:[#allocation25_spill] sm:$0xff]  ;;  %v13603_v49 = vld [vmem:[#allocation22_spill] sm:$0xff] }
 0x540   :  { %v13601_v27 = vmax.f32 %v13600_v47, 0.0  ;;  %v13604_v48 = vmax.f32 %v13603_v49, 0.0  ;;  %v9843_v55 = vpack.c.bf16 %v13607_v54, %v13607_v54 }
 0x541   :  { %13596 = vst [vmem:[#allocation147_spill] sm:$0xff] %v9823_v29  ;;  %v9828_v30 = vpack.c.bf16 %v13598_v39, %v13598_v39  ;;  %v13609_v29 = vld [vmem:[#allocation27_spill] sm:$0xff] }
 0x542   :  { %v9833_v57 = vpack.c.bf16 %v13601_v27, %v13601_v27  ;;  %v9838_v62 = vpack.c.bf16 %v13604_v48, %v13604_v48  ;;  %13608 = vst [vmem:[#allocation162_spill] sm:$0xff] %v9843_v55  ;;  %v13610_v41 = vmax.f32 %v13609_v29, 0.0  ;;  %v13621_v55 = vld [vmem:[#allocation31_spill] sm:$0xff] }
 0x543   :  { %13599 = vst [vmem:[#allocation144_spill] sm:$0xff] %v9828_v30  ;;  %v13612_v30 = vld [vmem:[#allocation29_spill] sm:$0xff]  ;;  %v13622_v29 = vmax.f32 %v13621_v55, 0.0 }
 0x544   :  { %13602 = vst [vmem:[#allocation152_spill] sm:$0xff] %v9833_v57  ;;  %13605 = vst [vmem:[#allocation155_spill] sm:$0xff] %v9838_v62  ;;  %v9848_v39 = vpack.c.bf16 %v13610_v41, %v13610_v41  ;;  %v13613_v47 = vmax.f32 %v13612_v30, 0.0  ;;  %v13615_v57 = vld [vmem:[#allocation26_spill] sm:$0xff]  ;;  %v13618_v62 = vld [vmem:[#allocation28_spill] sm:$0xff] }
 0x545   :  { %v13616_v49 = vmax.f32 %v13615_v57, 0.0  ;;  %v13619_v33 = vmax.f32 %v13618_v62, 0.0  ;;  %v9868_v41 = vpack.c.bf16 %v13622_v29, %v13622_v29 }
 0x546   :  { %13611 = vst [vmem:[#allocation166_spill] sm:$0xff] %v9848_v39  ;;  %v9853_v27 = vpack.c.bf16 %v13613_v47, %v13613_v47  ;;  %v13624_v39 = vld [vmem:[#allocation33_spill] sm:$0xff] }
 0x547   :  { %v9858_v48 = vpack.c.bf16 %v13616_v49, %v13616_v49  ;;  %v9863_v54 = vpack.c.bf16 %v13619_v33, %v13619_v33  ;;  %13623 = vst [vmem:[#allocation2_spill] sm:$0xff] %v9868_v41  ;;  %v13625_v30 = vmax.f32 %v13624_v39, 0.0  ;;  %v13636_v41 = vld [vmem:[#allocation37_spill] sm:$0xff] }
 0x548   :  { %13614 = vst [vmem:[#allocation167_spill] sm:$0xff] %v9853_v27  ;;  %v13627_v27 = vld [vmem:[#allocation30_spill] sm:$0xff]  ;;  %v13637_v39 = vmax.f32 %v13636_v41, 0.0 }
 0x549   :  { %13617 = vst [vmem:[#allocation3_spill] sm:$0xff] %v9858_v48  ;;  %13620 = vst [vmem:[#allocation5_spill] sm:$0xff] %v9863_v54  ;;  %v9873_v47 = vpack.c.bf16 %v13625_v30, %v13625_v30  ;;  %v13628_v57 = vmax.f32 %v13627_v27, 0.0  ;;  %v13630_v48 = vld [vmem:[#allocation32_spill] sm:$0xff]  ;;  %v13633_v54 = vld [vmem:[#allocation35_spill] sm:$0xff] }
 0x54a   :  { %v13631_v62 = vmax.f32 %v13630_v48, 0.0  ;;  %v13634_v55 = vmax.f32 %v13633_v54, 0.0  ;;  %v9893_v30 = vpack.c.bf16 %v13637_v39, %v13637_v39 }
 0x54b   :  { %13626 = vst [vmem:[#allocation4_spill] sm:$0xff] %v9873_v47  ;;  %v9878_v49 = vpack.c.bf16 %v13628_v57, %v13628_v57  ;;  %v13639_v47 = vld [vmem:[#allocation34_spill] sm:$0xff] }
 0x54c   :  { %v9883_v33 = vpack.c.bf16 %v13631_v62, %v13631_v62  ;;  %v9888_v29 = vpack.c.bf16 %v13634_v55, %v13634_v55  ;;  %13638 = vst [vmem:[#allocation8_spill] sm:$0xff] %v9893_v30  ;;  %v13640_v27 = vmax.f32 %v13639_v47, 0.0  ;;  %v13651_v30 = vld [vmem:[#allocation38_spill] sm:$0xff] }
 0x54d   :  { %13629 = vst [vmem:[#allocation7_spill] sm:$0xff] %v9878_v49  ;;  %v13642_v49 = vld [vmem:[#allocation36_spill] sm:$0xff]  ;;  %v13652_v47 = vmax.f32 %v13651_v30, 0.0 }
 0x54e   :  { %13632 = vst [vmem:[#allocation9_spill] sm:$0xff] %v9883_v33  ;;  %13635 = vst [vmem:[#allocation6_spill] sm:$0xff] %v9888_v29  ;;  %v9898_v57 = vpack.c.bf16 %v13640_v27, %v13640_v27  ;;  %v13643_v48 = vmax.f32 %v13642_v49, 0.0  ;;  %v13645_v33 = vld [vmem:[#allocation39_spill] sm:$0xff]  ;;  %v13648_v29 = vld [vmem:[#allocation41_spill] sm:$0xff] }
 0x54f   :  { %v13646_v54 = vmax.f32 %v13645_v33, 0.0  ;;  %v13649_v41 = vmax.f32 %v13648_v29, 0.0  ;;  %v9918_v27 = vpack.c.bf16 %v13652_v47, %v13652_v47 }
 0x550   :  { %13641 = vst [vmem:[#allocation11_spill] sm:$0xff] %v9898_v57  ;;  %v9903_v62 = vpack.c.bf16 %v13643_v48, %v13643_v48  ;;  %v13654_v57 = vld [vmem:[#allocation40_spill] sm:$0xff] }
 0x551   :  { %v9908_v55 = vpack.c.bf16 %v13646_v54, %v13646_v54  ;;  %v9913_v39 = vpack.c.bf16 %v13649_v41, %v13649_v41  ;;  %13653 = vst [vmem:[#allocation15_spill] sm:$0xff] %v9918_v27  ;;  %v13655_v49 = vmax.f32 %v13654_v57, 0.0  ;;  %v13666_v27 = vld [vmem:[#allocation44_spill] sm:$0xff] }
 0x552   :  { %13644 = vst [vmem:[#allocation13_spill] sm:$0xff] %v9903_v62  ;;  %v13657_v62 = vld [vmem:[#allocation43_spill] sm:$0xff]  ;;  %v13667_v57 = vmax.f32 %v13666_v27, 0.0 }
 0x553   :  { %13647 = vst [vmem:[#allocation10_spill] sm:$0xff] %v9908_v55  ;;  %13650 = vst [vmem:[#allocation12_spill] sm:$0xff] %v9913_v39  ;;  %v9923_v48 = vpack.c.bf16 %v13655_v49, %v13655_v49  ;;  %v13658_v33 = vmax.f32 %v13657_v62, 0.0  ;;  %v13660_v55 = vld [vmem:[#allocation45_spill] sm:$0xff]  ;;  %v13663_v39 = vld [vmem:[#allocation42_spill] sm:$0xff] }
 0x554   :  { %v13661_v29 = vmax.f32 %v13660_v55, 0.0  ;;  %v13664_v30 = vmax.f32 %v13663_v39, 0.0  ;;  %v9943_v49 = vpack.c.bf16 %v13667_v57, %v13667_v57 }
 0x555   :  { %13656 = vst [vmem:[#allocation17_spill] sm:$0xff] %v9923_v48  ;;  %v9928_v54 = vpack.c.bf16 %v13658_v33, %v13658_v33  ;;  %v13669_v48 = vld [vmem:[#allocation51_spill] sm:$0xff] }
 0x556   :  { %v9933_v41 = vpack.c.bf16 %v13661_v29, %v13661_v29  ;;  %v9938_v47 = vpack.c.bf16 %v13664_v30, %v13664_v30  ;;  %13668 = vst [vmem:[#allocation21_spill] sm:$0xff] %v9943_v49  ;;  %v13670_v62 = vmax.f32 %v13669_v48, 0.0  ;;  %v13681_v49 = vld [vmem:[#allocation59_spill] sm:$0xff] }
 0x557   :  { %13659 = vst [vmem:[#allocation14_spill] sm:$0xff] %v9928_v54  ;;  %v13672_v54 = vld [vmem:[#allocation53_spill] sm:$0xff]  ;;  %v13682_v48 = vmax.f32 %v13681_v49, 0.0 }
 0x558   :  { %13662 = vst [vmem:[#allocation16_spill] sm:$0xff] %v9933_v41  ;;  %13665 = vst [vmem:[#allocation19_spill] sm:$0xff] %v9938_v47  ;;  %v9948_v33 = vpack.c.bf16 %v13670_v62, %v13670_v62  ;;  %v13673_v55 = vmax.f32 %v13672_v54, 0.0  ;;  %v13675_v41 = vld [vmem:[#allocation49_spill] sm:$0xff]  ;;  %v13678_v47 = vld [vmem:[#allocation52_spill] sm:$0xff] }
 0x559   :  { %v13676_v39 = vmax.f32 %v13675_v41, 0.0  ;;  %v13679_v27 = vmax.f32 %v13678_v47, 0.0  ;;  %v9968_v62 = vpack.c.bf16 %v13682_v48, %v13682_v48 }
 0x55a   :  { %13671 = vst [vmem:[#allocation18_spill] sm:$0xff] %v9948_v33  ;;  %v9953_v29 = vpack.c.bf16 %v13673_v55, %v13673_v55  ;;  %v13684_v33 = vld [vmem:[#allocation61_spill] sm:$0xff] }
 0x55b   :  { %v9958_v30 = vpack.c.bf16 %v13676_v39, %v13676_v39  ;;  %v9963_v57 = vpack.c.bf16 %v13679_v27, %v13679_v27  ;;  %13683 = vst [vmem:[#allocation22_spill] sm:$0xff] %v9968_v62  ;;  %v13685_v54 = vmax.f32 %v13684_v33, 0.0  ;;  %v13696_v62 = vld [vmem:[#allocation69_spill] sm:$0xff] }
 0x55c   :  { %13674 = vst [vmem:[#allocation20_spill] sm:$0xff] %v9953_v29  ;;  %v13687_v29 = vld [vmem:[#allocation57_spill] sm:$0xff]  ;;  %v13697_v33 = vmax.f32 %v13696_v62, 0.0 }
 0x55d   :  { %13677 = vst [vmem:[#allocation23_spill] sm:$0xff] %v9958_v30  ;;  %13680 = vst [vmem:[#allocation25_spill] sm:$0xff] %v9963_v57  ;;  %v9973_v55 = vpack.c.bf16 %v13685_v54, %v13685_v54  ;;  %v13688_v41 = vmax.f32 %v13687_v29, 0.0  ;;  %v13690_v30 = vld [vmem:[#allocation60_spill] sm:$0xff]  ;;  %v13693_v57 = vld [vmem:[#allocation67_spill] sm:$0xff] }
 0x55e   :  { %v13691_v47 = vmax.f32 %v13690_v30, 0.0  ;;  %v13694_v49 = vmax.f32 %v13693_v57, 0.0  ;;  %v9993_v54 = vpack.c.bf16 %v13697_v33, %v13697_v33 }
 0x55f   :  { %13686 = vst [vmem:[#allocation24_spill] sm:$0xff] %v9973_v55  ;;  %v9978_v39 = vpack.c.bf16 %v13688_v41, %v13688_v41  ;;  %v13699_v55 = vld [vmem:[#allocation65_spill] sm:$0xff] }
 0x560   :  { %v9983_v27 = vpack.c.bf16 %v13691_v47, %v13691_v47  ;;  %v9988_v48 = vpack.c.bf16 %v13694_v49, %v13694_v49  ;;  %13698 = vst [vmem:[#allocation28_spill] sm:$0xff] %v9993_v54  ;;  %v13700_v29 = vmax.f32 %v13699_v55, 0.0  ;;  %v13711_v54 = vld [vmem:[#allocation73_spill] sm:$0xff] }
 0x561   :  { %13689 = vst [vmem:[#allocation27_spill] sm:$0xff] %v9978_v39  ;;  %v13702_v39 = vld [vmem:[#allocation68_spill] sm:$0xff]  ;;  %v13712_v55 = vmax.f32 %v13711_v54, 0.0 }
 0x562   :  { %13692 = vst [vmem:[#allocation29_spill] sm:$0xff] %v9983_v27  ;;  %13695 = vst [vmem:[#allocation26_spill] sm:$0xff] %v9988_v48  ;;  %v9998_v41 = vpack.c.bf16 %v13700_v29, %v13700_v29  ;;  %v13703_v30 = vmax.f32 %v13702_v39, 0.0  ;;  %v13705_v27 = vld [vmem:[#allocation75_spill] sm:$0xff]  ;;  %v13708_v48 = vld [vmem:[#allocation77_spill] sm:$0xff] }
 0x563   :  { %v13706_v57 = vmax.f32 %v13705_v27, 0.0  ;;  %v13709_v62 = vmax.f32 %v13708_v48, 0.0  ;;  %v10018_v29 = vpack.c.bf16 %v13712_v55, %v13712_v55 }
 0x564   :  { %13701 = vst [vmem:[#allocation31_spill] sm:$0xff] %v9998_v41  ;;  %v10003_v47 = vpack.c.bf16 %v13703_v30, %v13703_v30  ;;  %v13714_v41 = vld [vmem:[#allocation76_spill] sm:$0xff] }
 0x565   :  { %v10008_v49 = vpack.c.bf16 %v13706_v57, %v13706_v57  ;;  %v10013_v33 = vpack.c.bf16 %v13709_v62, %v13709_v62  ;;  %13713 = vst [vmem:[#allocation35_spill] sm:$0xff] %v10018_v29  ;;  %v13715_v39 = vmax.f32 %v13714_v41, 0.0  ;;  %v13726_v29 = vld [vmem:[#allocation84_spill] sm:$0xff] }
 0x566   :  { %13704 = vst [vmem:[#allocation33_spill] sm:$0xff] %v10003_v47  ;;  %v13717_v47 = vld [vmem:[#allocation83_spill] sm:$0xff]  ;;  %v13727_v41 = vmax.f32 %v13726_v29, 0.0 }
 0x567   :  { %13707 = vst [vmem:[#allocation30_spill] sm:$0xff] %v10008_v49  ;;  %13710 = vst [vmem:[#allocation32_spill] sm:$0xff] %v10013_v33  ;;  %v10023_v30 = vpack.c.bf16 %v13715_v39, %v13715_v39  ;;  %v13718_v27 = vmax.f32 %v13717_v47, 0.0  ;;  %v13720_v49 = vld [vmem:[#allocation85_spill] sm:$0xff] }
 0x568   :  { %v13721_v48 = vmax.f32 %v13720_v49, 0.0  ;;  %v13723_v33 = vld [vmem:[#allocation81_spill] sm:$0xff]  ;;  %v10043_v39 = vpack.c.bf16 %v13727_v41, %v13727_v41 }
 0x569   :  { %13716 = vst [vmem:[#allocation37_spill] sm:$0xff] %v10023_v30  ;;  %v10028_v57 = vpack.c.bf16 %v13718_v27, %v13718_v27  ;;  %v13724_v54 = vmax.f32 %v13723_v33, 0.0  ;;  %v13729_v30 = vld [vmem:[#allocation91_spill] sm:$0xff] }
 0x56a   :  { %v10033_v62 = vpack.c.bf16 %v13721_v48, %v13721_v48  ;;  %13728 = vst [vmem:[#allocation41_spill] sm:$0xff] %v10043_v39  ;;  %v13730_v47 = vmax.f32 %v13729_v30, 0.0  ;;  %v13741_v39 = vld [vmem:[#allocation99_spill] sm:$0xff] }
 0x56b   :  { %13719 = vst [vmem:[#allocation34_spill] sm:$0xff] %v10028_v57  ;;  %v10038_v55 = vpack.c.bf16 %v13724_v54, %v13724_v54  ;;  %v13732_v57 = vld [vmem:[#allocation93_spill] sm:$0xff]  ;;  %v13742_v30 = vmax.f32 %v13741_v39, 0.0 }
 0x56c   :  { %13722 = vst [vmem:[#allocation36_spill] sm:$0xff] %v10033_v62  ;;  %v10048_v27 = vpack.c.bf16 %v13730_v47, %v13730_v47  ;;  %v13733_v49 = vmax.f32 %v13732_v57, 0.0  ;;  %v13735_v62 = vld [vmem:[#allocation89_spill] sm:$0xff] }
 0x56d   :  { %13725 = vst [vmem:[#allocation39_spill] sm:$0xff] %v10038_v55  ;;  %v13736_v33 = vmax.f32 %v13735_v62, 0.0  ;;  %v13738_v55 = vld [vmem:[#allocation92_spill] sm:$0xff]  ;;  %v10068_v47 = vpack.c.bf16 %v13742_v30, %v13742_v30 }
 0x56e   :  { %13731 = vst [vmem:[#allocation38_spill] sm:$0xff] %v10048_v27  ;;  %v10053_v48 = vpack.c.bf16 %v13733_v49, %v13733_v49  ;;  %v13739_v29 = vmax.f32 %v13738_v55, 0.0  ;;  %v13744_v27 = vld [vmem:[#allocation101_spill] sm:$0xff] }
 0x56f   :  { %v10058_v54 = vpack.c.bf16 %v13736_v33, %v13736_v33  ;;  %13743 = vst [vmem:[#allocation42_spill] sm:$0xff] %v10068_v47  ;;  %v13745_v57 = vmax.f32 %v13744_v27, 0.0  ;;  %v13756_v47 = vld [vmem:[#allocation109_spill] sm:$0xff] }
 0x570   :  { %13734 = vst [vmem:[#allocation40_spill] sm:$0xff] %v10053_v48  ;;  %v10063_v41 = vpack.c.bf16 %v13739_v29, %v13739_v29  ;;  %v13747_v48 = vld [vmem:[#allocation97_spill] sm:$0xff]  ;;  %v13757_v27 = vmax.f32 %v13756_v47, 0.0 }
 0x571   :  { %13737 = vst [vmem:[#allocation43_spill] sm:$0xff] %v10058_v54  ;;  %v10073_v49 = vpack.c.bf16 %v13745_v57, %v13745_v57  ;;  %v13748_v62 = vmax.f32 %v13747_v48, 0.0  ;;  %v13750_v54 = vld [vmem:[#allocation100_spill] sm:$0xff] }
 0x572   :  { %13740 = vst [vmem:[#allocation45_spill] sm:$0xff] %v10063_v41  ;;  %v13751_v55 = vmax.f32 %v13750_v54, 0.0  ;;  %v13753_v41 = vld [vmem:[#allocation107_spill] sm:$0xff]  ;;  %v10093_v57 = vpack.c.bf16 %v13757_v27, %v13757_v27 }
 0x573   :  { %13746 = vst [vmem:[#allocation44_spill] sm:$0xff] %v10073_v49  ;;  %v10078_v33 = vpack.c.bf16 %v13748_v62, %v13748_v62  ;;  %v13754_v39 = vmax.f32 %v13753_v41, 0.0  ;;  %v13759_v49 = vld [vmem:[#allocation105_spill] sm:$0xff] }
 0x574   :  { %v10083_v29 = vpack.c.bf16 %v13751_v55, %v13751_v55  ;;  %13758 = vst [vmem:[#allocation52_spill] sm:$0xff] %v10093_v57  ;;  %v13760_v48 = vmax.f32 %v13759_v49, 0.0  ;;  %v13771_v57 = vld [vmem:[#allocation112_spill] sm:$0xff] }
 0x575   :  { %13749 = vst [vmem:[#allocation51_spill] sm:$0xff] %v10078_v33  ;;  %v10088_v30 = vpack.c.bf16 %v13754_v39, %v13754_v39  ;;  %v13762_v33 = vld [vmem:[#allocation108_spill] sm:$0xff]  ;;  %v13772_v49 = vmax.f32 %v13771_v57, 0.0 }
 0x576   :  { %13752 = vst [vmem:[#allocation53_spill] sm:$0xff] %v10083_v29  ;;  %v10098_v62 = vpack.c.bf16 %v13760_v48, %v13760_v48  ;;  %v13763_v54 = vmax.f32 %v13762_v33, 0.0  ;;  %v13765_v29 = vld [vmem:[#allocation114_spill] sm:$0xff] }
 0x577   :  { %13755 = vst [vmem:[#allocation49_spill] sm:$0xff] %v10088_v30  ;;  %v13766_v41 = vmax.f32 %v13765_v29, 0.0  ;;  %v13768_v30 = vld [vmem:[#allocation116_spill] sm:$0xff]  ;;  %v10118_v48 = vpack.c.bf16 %v13772_v49, %v13772_v49 }
 0x578   :  { %13761 = vst [vmem:[#allocation59_spill] sm:$0xff] %v10098_v62  ;;  %v10103_v55 = vpack.c.bf16 %v13763_v54, %v13763_v54  ;;  %v13769_v47 = vmax.f32 %v13768_v30, 0.0  ;;  %v13774_v62 = vld [vmem:[#allocation115_spill] sm:$0xff] }
 0x579   :  { %v10108_v39 = vpack.c.bf16 %v13766_v41, %v13766_v41  ;;  %13773 = vst [vmem:[#allocation67_spill] sm:$0xff] %v10118_v48  ;;  %v13775_v33 = vmax.f32 %v13774_v62, 0.0  ;;  %v13786_v48 = vld [vmem:[#allocation120_spill] sm:$0xff] }
 0x57a   :  { %13764 = vst [vmem:[#allocation61_spill] sm:$0xff] %v10103_v55  ;;  %v10113_v27 = vpack.c.bf16 %v13769_v47, %v13769_v47  ;;  %v13777_v55 = vld [vmem:[#allocation119_spill] sm:$0xff]  ;;  %v13787_v62 = vmax.f32 %v13786_v48, 0.0 }
 0x57b   :  { %13767 = vst [vmem:[#allocation57_spill] sm:$0xff] %v10108_v39  ;;  %v10123_v54 = vpack.c.bf16 %v13775_v33, %v13775_v33  ;;  %v13778_v29 = vmax.f32 %v13777_v55, 0.0  ;;  %v13780_v39 = vld [vmem:[#allocation121_spill] sm:$0xff] }
 0x57c   :  { %13770 = vst [vmem:[#allocation60_spill] sm:$0xff] %v10113_v27  ;;  %v13781_v30 = vmax.f32 %v13780_v39, 0.0  ;;  %v13783_v27 = vld [vmem:[#allocation118_spill] sm:$0xff]  ;;  %v10143_v33 = vpack.c.bf16 %v13787_v62, %v13787_v62 }
 0x57d   :  { %13776 = vst [vmem:[#allocation69_spill] sm:$0xff] %v10123_v54  ;;  %v10128_v41 = vpack.c.bf16 %v13778_v29, %v13778_v29  ;;  %v13784_v57 = vmax.f32 %v13783_v27, 0.0  ;;  %v13789_v54 = vld [vmem:[#allocation124_spill] sm:$0xff] }
 0x57e   :  { %v10133_v47 = vpack.c.bf16 %v13781_v30, %v13781_v30  ;;  %13788 = vst [vmem:[#allocation77_spill] sm:$0xff] %v10143_v33  ;;  %v13790_v55 = vmax.f32 %v13789_v54, 0.0  ;;  %v13801_v33 = vld [vmem:[#allocation132_spill] sm:$0xff] }
 0x57f   :  { %13779 = vst [vmem:[#allocation65_spill] sm:$0xff] %v10128_v41  ;;  %v10138_v49 = vpack.c.bf16 %v13784_v57, %v13784_v57  ;;  %v13792_v41 = vld [vmem:[#allocation126_spill] sm:$0xff]  ;;  %v13802_v54 = vmax.f32 %v13801_v33, 0.0 }
 0x580   :  { %13782 = vst [vmem:[#allocation68_spill] sm:$0xff] %v10133_v47  ;;  %v10148_v29 = vpack.c.bf16 %v13790_v55, %v13790_v55  ;;  %v13793_v39 = vmax.f32 %v13792_v41, 0.0  ;;  %v13795_v47 = vld [vmem:[#allocation123_spill] sm:$0xff] }
 0x581   :  { %13785 = vst [vmem:[#allocation75_spill] sm:$0xff] %v10138_v49  ;;  %v13796_v27 = vmax.f32 %v13795_v47, 0.0  ;;  %v13798_v49 = vld [vmem:[#allocation125_spill] sm:$0xff]  ;;  %v10168_v55 = vpack.c.bf16 %v13802_v54, %v13802_v54 }
 0x582   :  { %13791 = vst [vmem:[#allocation73_spill] sm:$0xff] %v10148_v29  ;;  %v10153_v30 = vpack.c.bf16 %v13793_v39, %v13793_v39  ;;  %v13799_v48 = vmax.f32 %v13798_v49, 0.0  ;;  %v13804_v29 = vld [vmem:[#allocation134_spill] sm:$0xff] }
 0x583   :  { %v10158_v57 = vpack.c.bf16 %v13796_v27, %v13796_v27  ;;  %13803 = vst [vmem:[#allocation81_spill] sm:$0xff] %v10168_v55  ;;  %v13805_v41 = vmax.f32 %v13804_v29, 0.0  ;;  %v13816_v55 = vld [vmem:[#allocation142_spill] sm:$0xff] }
 0x584   :  { %13794 = vst [vmem:[#allocation76_spill] sm:$0xff] %v10153_v30  ;;  %v10163_v62 = vpack.c.bf16 %v13799_v48, %v13799_v48  ;;  %v13807_v30 = vld [vmem:[#allocation130_spill] sm:$0xff]  ;;  %v13817_v29 = vmax.f32 %v13816_v55, 0.0 }
 0x585   :  { %13797 = vst [vmem:[#allocation83_spill] sm:$0xff] %v10158_v57  ;;  %v10173_v39 = vpack.c.bf16 %v13805_v41, %v13805_v41  ;;  %v13808_v47 = vmax.f32 %v13807_v30, 0.0  ;;  %v13810_v57 = vld [vmem:[#allocation133_spill] sm:$0xff] }
 0x586   :  { %13800 = vst [vmem:[#allocation85_spill] sm:$0xff] %v10163_v62  ;;  %v13811_v49 = vmax.f32 %v13810_v57, 0.0  ;;  %v13813_v62 = vld [vmem:[#allocation140_spill] sm:$0xff]  ;;  %v10193_v41 = vpack.c.bf16 %v13817_v29, %v13817_v29 }
 0x587   :  { %13806 = vst [vmem:[#allocation84_spill] sm:$0xff] %v10173_v39  ;;  %v10178_v27 = vpack.c.bf16 %v13808_v47, %v13808_v47  ;;  %v13814_v33 = vmax.f32 %v13813_v62, 0.0  ;;  %v13819_v39 = vld [vmem:[#allocation138_spill] sm:$0xff] }
 0x588   :  { %v10183_v48 = vpack.c.bf16 %v13811_v49, %v13811_v49  ;;  %13818 = vst [vmem:[#allocation92_spill] sm:$0xff] %v10193_v41  ;;  %v13820_v30 = vmax.f32 %v13819_v39, 0.0  ;;  %v13830_v41 = vld [vmem:[#allocation146_spill] sm:$0xff] }
 0x589   :  { %13809 = vst [vmem:[#allocation91_spill] sm:$0xff] %v10178_v27  ;;  %v10188_v54 = vpack.c.bf16 %v13814_v33, %v13814_v33  ;;  %v13822_v27 = vld [vmem:[#allocation141_spill] sm:$0xff]  ;;  %v13831_v39 = vmax.f32 %v13830_v41, 0.0  ;;  %v13839_v41 = vmax.f32 %v13441_v14, 0.0  ;;  %v13845_v14 = vmax.f32 %v13445_v42, 0.0 }
 0x58a   :  { %13812 = vst [vmem:[#allocation93_spill] sm:$0xff] %v10183_v48  ;;  %v10198_v47 = vpack.c.bf16 %v13820_v30, %v13820_v30  ;;  %v13823_v57 = vmax.f32 %v13822_v27, 0.0  ;;  %v13825_v48 = vld [vmem:[#allocation148_spill] sm:$0xff] }
 0x58b   :  { %13815 = vst [vmem:[#allocation89_spill] sm:$0xff] %v10188_v54  ;;  %v13826_v62 = vmax.f32 %v13825_v48, 0.0  ;;  %v13828_v54 = vld [vmem:[#allocation150_spill] sm:$0xff]  ;;  %v10218_v30 = vpack.c.bf16 %v13831_v39, %v13831_v39  ;;  %v10238_v39 = vpack.c.bf16 %v13839_v41, %v13839_v41  ;;  %v10258_v41 = vpack.c.bf16 %v13845_v14, %v13845_v14 }
 0x58c   :  { %13821 = vst [vmem:[#allocation99_spill] sm:$0xff] %v10198_v47  ;;  %v10203_v49 = vpack.c.bf16 %v13823_v57, %v13823_v57  ;;  %v13829_v55 = vmax.f32 %v13828_v54, 0.0  ;;  %v13833_v47 = vld [vmem:[#allocation149_spill] sm:$0xff] }
 0x58d   :  { %v10208_v33 = vpack.c.bf16 %v13826_v62, %v13826_v62  ;;  %13832 = vst [vmem:[#allocation100_spill] sm:$0xff] %v10218_v30  ;;  %v13834_v27 = vmax.f32 %v13833_v47, 0.0  ;;  %v13840_v30 = vld [vmem:[#allocation157_spill] sm:$0xff]  ;;  %13846 = vst [vmem:[#allocation109_spill] sm:$0xff] %v10258_v41  ;;  %v13856_v41 = vld [vmem:[#allocation48_spill] sm:$0xff] }
 0x58e   :  { %13824 = vst [vmem:[#allocation101_spill] sm:$0xff] %v10203_v49  ;;  %v10213_v29 = vpack.c.bf16 %v13829_v55, %v13829_v55  ;;  %v13835_v49 = vld [vmem:[#allocation156_spill] sm:$0xff]  ;;  %v13841_v47 = vmax.f32 %v13840_v30, 0.0  ;;  %v13847_v30 = vmax.f32 %v13446_v34, 0.0  ;;  %v13857_v34 = vmax.f32 %v13856_v41, 0.0 }
 0x58f   :  { %13827 = vst [vmem:[#allocation97_spill] sm:$0xff] %v10208_v33  ;;  %v10223_v57 = vpack.c.bf16 %v13834_v27, %v13834_v27  ;;  %v13836_v48 = vmax.f32 %v13835_v49, 0.0  ;;  %v13837_v33 = vld [vmem:[#allocation158_spill] sm:$0xff]  ;;  %v13842_v49 = vmax.f32 %v13443_v6, 0.0  ;;  %v13849_v6 = vmax.f32 %v13447_v8, 0.0 }
 0x590   :  { %v13838_v54 = vmax.f32 %v13837_v33, 0.0  ;;  %v10243_v27 = vpack.c.bf16 %v13841_v47, %v13841_v47  ;;  %v13843_v33 = vmax.f32 %v13444_v46, 0.0  ;;  %v10263_v47 = vpack.c.bf16 %v13847_v30, %v13847_v30  ;;  %4637 = vst.msk [vmem:[%s11762_s2 + $0x1c0] sm:$0xf] %vm4524_vm3, %v10213_v29  ;;  %4642 = vst.msk [vmem:[%s11762_s2 + $0x1d4] sm:$0xf] %vm4524_vm3, %v10238_v39 }
 0x591   :  { %v10228_v62 = vpack.c.bf16 %v13836_v48, %v13836_v48  ;;  %v10248_v48 = vpack.c.bf16 %v13842_v49, %v13842_v49  ;;  %v10268_v49 = vpack.c.bf16 %v13849_v6, %v13849_v6  ;;  %v13851_v46 = vmax.f32 %v13448_v31, 0.0  ;;  %4639 = vst.msk [vmem:[%s11762_s2 + $0x1c8] sm:$0xf] %vm4524_vm3, %v10223_v57 }
 0x592   :  { %v10233_v55 = vpack.c.bf16 %v13838_v54, %v13838_v54  ;;  %v10253_v54 = vpack.c.bf16 %v13843_v33, %v13843_v33  ;;  %13848 = vst [vmem:[#allocation105_spill] sm:$0xff] %v10263_v47  ;;  %v10283_v30 = vpack.c.bf16 %v13857_v34, %v13857_v34  ;;  %v13859_v47 = vld [vmem:[#allocation55_spill] sm:$0xff]  ;;  %4643 = vst.msk [vmem:[%s11762_s2 + $0x1d8] sm:$0xf] %vm4524_vm3, %v10243_v27 }
 0x593   :  { %13850 = vst [vmem:[#allocation108_spill] sm:$0xff] %v10268_v49  ;;  %v10273_v33 = vpack.c.bf16 %v13851_v46, %v13851_v46  ;;  %v13860_v8 = vmax.f32 %v13859_v47, 0.0  ;;  %v13862_v49 = vld [vmem:[#allocation58_spill] sm:$0xff]  ;;  %4640 = vst.msk [vmem:[%s11762_s2 + $0x1cc] sm:$0xf] %vm4524_vm3, %v10228_v62 }
 0x594   :  { %13844 = vst [vmem:[#allocation107_spill] sm:$0xff] %v10253_v54  ;;  %v13853_v54 = vld [vmem:[#allocation46_spill] sm:$0xff]  ;;  %13858 = vst [vmem:[#allocation112_spill] sm:$0xff] %v10283_v30  ;;  %v13863_v31 = vmax.f32 %v13862_v49, 0.0  ;;  %v13870_v30 = vld [vmem:[#allocation63_spill] sm:$0xff] }
 0x595   :  { %13852 = vst [vmem:[#allocation114_spill] sm:$0xff] %v10273_v33  ;;  %v13854_v42 = vmax.f32 %v13853_v54, 0.0  ;;  %v10288_v6 = vpack.c.bf16 %v13860_v8, %v13860_v8  ;;  %v13865_v33 = vld [vmem:[#allocation54_spill] sm:$0xff]  ;;  %v13871_v47 = vmax.f32 %v13870_v30, 0.0  ;;  %4641 = vst.msk [vmem:[%s11762_s2 + $0x1d0] sm:$0xf] %vm4524_vm3, %v10233_v55 }
 0x596   :  { %v10293_v46 = vpack.c.bf16 %v13863_v31, %v13863_v31  ;;  %v13866_v54 = vmax.f32 %v13865_v33, 0.0  ;;  %4644 = vst.msk [vmem:[%s11762_s2 + $0x1dc] sm:$0xf] %vm4524_vm3, %v10248_v48  ;;  %v14132_v57 = vld [vmem:[#allocation109_spill] sm:$0xff] }
 0x597   :  { %v10278_v14 = vpack.c.bf16 %v13854_v42, %v13854_v42  ;;  %13861 = vst [vmem:[#allocation115_spill] sm:$0xff] %v10288_v6  ;;  %v10308_v8 = vpack.c.bf16 %v13871_v47, %v13871_v47  ;;  %v13873_v6 = vld [vmem:[#allocation66_spill] sm:$0xff]  ;;  %4646 = vst.msk [vmem:[%s11762_s2 + $0x1e4] sm:$0xf] %vm4524_vm3, %v14132_v57 }
 0x598   :  { %13864 = vst [vmem:[#allocation119_spill] sm:$0xff] %v10293_v46  ;;  %v10298_v42 = vpack.c.bf16 %v13866_v54, %v13866_v54  ;;  %v13874_v49 = vmax.f32 %v13873_v6, 0.0  ;;  %v13876_v46 = vld [vmem:[#allocation62_spill] sm:$0xff] }
 0x599   :  { %13855 = vst [vmem:[#allocation116_spill] sm:$0xff] %v10278_v14  ;;  %v13867_v14 = vld [vmem:[#allocation56_spill] sm:$0xff]  ;;  %13872 = vst [vmem:[#allocation118_spill] sm:$0xff] %v10308_v8  ;;  %v13877_v33 = vmax.f32 %v13876_v46, 0.0  ;;  %v13882_v8 = vld [vmem:[#allocation71_spill] sm:$0xff] }
 0x59a   :  { %v13868_v41 = vmax.f32 %v13867_v14, 0.0  ;;  %v10313_v31 = vpack.c.bf16 %v13874_v49, %v13874_v49  ;;  %v13878_v14 = vmax.f32 %v9133_v21, 0.0  ;;  %v13883_v6 = vmax.f32 %v13882_v8, 0.0  ;;  %v14133_v62 = vld [vmem:[#allocation105_spill] sm:$0xff]  ;;  %v14134_v55 = vld [vmem:[#allocation108_spill] sm:$0xff] }
 0x59b   :  { %v10318_v54 = vpack.c.bf16 %v13877_v33, %v13877_v33  ;;  %v13887_v21 = vmax.f32 %v13455_v11, 0.0  ;;  %v13895_v11 = vmax.f32 %v13459_v3, 0.0  ;;  %v13901_v3 = vmax.f32 %v13462_v32, 0.0  ;;  %v14131_v29 = vld [vmem:[#allocation107_spill] sm:$0xff]  ;;  %4647 = vst.msk [vmem:[%s11762_s2 + $0x1e8] sm:$0xf] %vm4524_vm3, %v14133_v62 }
 0x59c   :  { %v10303_v34 = vpack.c.bf16 %v13868_v41, %v13868_v41  ;;  %13875 = vst [vmem:[#allocation120_spill] sm:$0xff] %v10313_v31  ;;  %v10323_v41 = vpack.c.bf16 %v13878_v14, %v13878_v14  ;;  %v10333_v49 = vpack.c.bf16 %v13883_v6, %v13883_v6  ;;  %v13885_v31 = vld [vmem:[#allocation74_spill] sm:$0xff]  ;;  %v13905_v32 = vmax.f32 %v9197_v56, 0.0  ;;  %4645 = vst.msk [vmem:[%s11762_s2 + $0x1e0] sm:$0xf] %vm4524_vm3, %v14131_v29  ;;  %v14137_v48 = vld [vmem:[#allocation112_spill] sm:$0xff] }
 0x59d   :  { %v13886_v46 = vmax.f32 %v13885_v31, 0.0  ;;  %v10343_v14 = vpack.c.bf16 %v13887_v21, %v13887_v21  ;;  %v10363_v21 = vpack.c.bf16 %v13895_v11, %v13895_v11  ;;  %v10383_v11 = vpack.c.bf16 %v13901_v3, %v13901_v3  ;;  %4648 = vst.msk [vmem:[%s11762_s2 + $0x1ec] sm:$0xf] %vm4524_vm3, %v14134_v55  ;;  %v14135_v39 = vld [vmem:[#allocation114_spill] sm:$0xff]  ;;  %4651 = vst.msk [vmem:[%s11762_s2 + $0x1f8] sm:$0xf] %vm4524_vm3, %v14137_v48 }
 0x59e   :  { %13869 = vst [vmem:[#allocation121_spill] sm:$0xff] %v10303_v34  ;;  %v13879_v34 = vld [vmem:[#allocation64_spill] sm:$0xff]  ;;  %13884 = vst [vmem:[#allocation126_spill] sm:$0xff] %v10333_v49  ;;  %v13893_v49 = vld [vmem:[#allocation82_spill] sm:$0xff]  ;;  %v10403_v3 = vpack.c.bf16 %v13905_v32, %v13905_v32  ;;  %v13909_v56 = vmax.f32 %v9213_v44, 0.0  ;;  %v13913_v44 = vmax.f32 %v9229_v58, 0.0 }
 0x59f   :  { %v13880_v30 = vmax.f32 %v13879_v34, 0.0  ;;  %v10338_v33 = vpack.c.bf16 %v13886_v46, %v13886_v46  ;;  %v13888_v34 = vmax.f32 %v13456_v5, 0.0  ;;  %v13894_v31 = vmax.f32 %v13893_v49, 0.0  ;;  %4649 = vst.msk [vmem:[%s11762_s2 + $0x1f0] sm:$0xf] %vm4524_vm3, %v14135_v39 }
 0x5a0   :  { %v13896_v5 = vmax.f32 %v13460_v12, 0.0  ;;  %v13902_v12 = vmax.f32 %v13463_v7, 0.0  ;;  %v13906_v7 = vmax.f32 %v13465_v45, 0.0  ;;  %v10423_v32 = vpack.c.bf16 %v13909_v56, %v13909_v56  ;;  %v14136_v27 = vld [vmem:[#allocation116_spill] sm:$0xff]  ;;  %4654 = vst.msk [vmem:[%s11762_s2 + $0x204] sm:$0xf] %vm4524_vm3, %v10298_v42 }
 0x5a1   :  { %v10328_v47 = vpack.c.bf16 %v13880_v30, %v13880_v30  ;;  %v10348_v30 = vpack.c.bf16 %v13888_v34, %v13888_v34  ;;  %v10358_v46 = vpack.c.bf16 %v13894_v31, %v13894_v31  ;;  %v13910_v45 = vmax.f32 %v13467_v51, 0.0  ;;  %4650 = vst.msk [vmem:[%s11762_s2 + $0x1f4] sm:$0xf] %vm4524_vm3, %v14136_v27  ;;  %4658 = vst.msk [vmem:[%s11762_s2 + $0x214] sm:$0xf] %vm4524_vm3, %v10318_v54 }
 0x5a2   :  { %v10368_v34 = vpack.c.bf16 %v13896_v5, %v13896_v5  ;;  %v10388_v5 = vpack.c.bf16 %v13902_v12, %v13902_v12  ;;  %v10408_v12 = vpack.c.bf16 %v13906_v7, %v13906_v7  ;;  %v10443_v56 = vpack.c.bf16 %v13913_v44, %v13913_v44  ;;  %4659 = vst.msk [vmem:[%s11762_s2 + $0x218] sm:$0xf] %vm4524_vm3, %v10323_v41 }
 0x5a3   :  { %13881 = vst [vmem:[#allocation124_spill] sm:$0xff] %v10328_v47  ;;  %13889 = vst [vmem:[#allocation123_spill] sm:$0xff] %v10348_v30  ;;  %v13890_v47 = vld [vmem:[#allocation79_spill] sm:$0xff]  ;;  %v13897_v30 = vld [vmem:[#allocation90_spill] sm:$0xff]  ;;  %v10428_v7 = vpack.c.bf16 %v13910_v45, %v13910_v45  ;;  %v13914_v51 = vmax.f32 %v9233_v24, 0.0  ;;  %v13917_v58 = vmax.f32 %v9245_v50, 0.0 }
 0x5a4   :  { %v13891_v8 = vmax.f32 %v13890_v47, 0.0  ;;  %v13898_v47 = vmax.f32 %v13897_v30, 0.0  ;;  %v13903_v30 = vmax.f32 %v13464_v22, 0.0  ;;  %v13907_v22 = vmax.f32 %v13466_v35, 0.0  ;;  %4662 = vst.msk [vmem:[%s11762_s2 + $0x224] sm:$0xf] %vm4524_vm3, %v10338_v33 }
 0x5a5   :  { %v13911_v35 = vmax.f32 %v13468_v19, 0.0  ;;  %v10448_v45 = vpack.c.bf16 %v13914_v51, %v13914_v51  ;;  %v13915_v19 = vmax.f32 %v9237_v28, 0.0  ;;  %v10463_v44 = vpack.c.bf16 %v13917_v58, %v13917_v58  ;;  %4663 = vst.msk [vmem:[%s11762_s2 + $0x228] sm:$0xf] %vm4524_vm3, %v10343_v14  ;;  %4666 = vst.msk [vmem:[%s11762_s2 + $0x234] sm:$0xf] %vm4524_vm3, %v10358_v46 }
 0x5a6   :  { %v10353_v6 = vpack.c.bf16 %v13891_v8, %v13891_v8  ;;  %v10373_v8 = vpack.c.bf16 %v13898_v47, %v13898_v47  ;;  %v10393_v47 = vpack.c.bf16 %v13903_v30, %v13903_v30  ;;  %v10413_v30 = vpack.c.bf16 %v13907_v22, %v13907_v22  ;;  %4667 = vst.msk [vmem:[%s11762_s2 + $0x238] sm:$0xf] %vm4524_vm3, %v10363_v21 }
 0x5a7   :  { %v10433_v22 = vpack.c.bf16 %v13911_v35, %v13911_v35  ;;  %v10453_v35 = vpack.c.bf16 %v13915_v19, %v13915_v19  ;;  %v13918_v24 = vmax.f32 %v9249_v36, 0.0  ;;  %v13919_v28 = vmax.f32 %v9253_v18, 0.0  ;;  %4668 = vst.msk [vmem:[%s11762_s2 + $0x23c] sm:$0xf] %vm4524_vm3, %v10368_v34  ;;  %4671 = vst.msk [vmem:[%s11762_s2 + $0x248] sm:$0xf] %vm4524_vm3, %v10383_v11 }
 0x5a8   :  { %13892 = vst [vmem:[#allocation125_spill] sm:$0xff] %v10353_v6  ;;  %v13899_v6 = vld [vmem:[#allocation95_spill] sm:$0xff]  ;;  %v13921_v50 = vmax.f32 %v9261_v15, 0.0  ;;  %v13922_v36 = vmax.f32 %v9265_v4, 0.0  ;;  %v13923_v18 = vmax.f32 %v9269_v63, 0.0  ;;  %v13925_v15 = vmax.f32 %v9277_v20, 0.0 }
 0x5a9   :  { %v13900_v49 = vmax.f32 %v13899_v6, 0.0  ;;  %v13904_v6 = vmax.f32 %v9193_v61, 0.0  ;;  %v13908_v61 = vmax.f32 %v9209_v2, 0.0  ;;  %v13912_v2 = vmax.f32 %v9225_v1, 0.0  ;;  %4669 = vst.msk [vmem:[%s11762_s2 + $0x240] sm:$0xf] %vm4524_vm3, %v10373_v8 }
 0x5aa   :  { %v13916_v1 = vmax.f32 %v9241_v23, 0.0  ;;  %v10468_v51 = vpack.c.bf16 %v13918_v24, %v13918_v24  ;;  %v10473_v19 = vpack.c.bf16 %v13919_v28, %v13919_v28  ;;  %v13920_v23 = vmax.f32 %v9257_v17, 0.0  ;;  %v14143_v42 = vld [vmem:[#allocation124_spill] sm:$0xff]  ;;  %v14145_v54 = vld [vmem:[#allocation123_spill] sm:$0xff]  ;;  %4672 = vst.msk [vmem:[%s11762_s2 + $0x24c] sm:$0xf] %vm4524_vm3, %v10388_v5 }
 0x5ab   :  { %v10378_v31 = vpack.c.bf16 %v13900_v49, %v13900_v49  ;;  %v10398_v49 = vpack.c.bf16 %v13904_v6, %v13904_v6  ;;  %v10418_v6 = vpack.c.bf16 %v13908_v61, %v13908_v61  ;;  %v10438_v61 = vpack.c.bf16 %v13912_v2, %v13912_v2  ;;  %4660 = vst.msk [vmem:[%s11762_s2 + $0x21c] sm:$0xf] %vm4524_vm3, %v14143_v42 }
 0x5ac   :  { %v10458_v2 = vpack.c.bf16 %v13916_v1, %v13916_v1  ;;  %v10478_v1 = vpack.c.bf16 %v13920_v23, %v13920_v23  ;;  %v10483_v58 = vpack.c.bf16 %v13921_v50, %v13921_v50  ;;  %v10488_v24 = vpack.c.bf16 %v13922_v36, %v13922_v36  ;;  %4664 = vst.msk [vmem:[%s11762_s2 + $0x22c] sm:$0xf] %vm4524_vm3, %v14145_v54 }
 0x5ad   :  { %v10493_v28 = vpack.c.bf16 %v13923_v18, %v13923_v18  ;;  %v13924_v17 = vmax.f32 %v9273_v25, 0.0  ;;  %v10503_v50 = vpack.c.bf16 %v13925_v15, %v13925_v15  ;;  %v13926_v4 = vmax.f32 %v9281_v37, 0.0  ;;  %4670 = vst.msk [vmem:[%s11762_s2 + $0x244] sm:$0xf] %vm4524_vm3, %v10378_v31  ;;  %4673 = vst.msk [vmem:[%s11762_s2 + $0x250] sm:$0xf] %vm4524_vm3, %v10393_v47 }
 0x5ae   :  { %v13927_v63 = vmax.f32 %v9285_v53, 0.0  ;;  %v13929_v25 = vmax.f32 %v9289_v60, 0.0  ;;  %v13931_v20 = vmax.f32 %v9293_v10, 0.0  ;;  %v13933_v37 = vmax.f32 %v9297_v26, 0.0  ;;  %4674 = vst.msk [vmem:[%s11762_s2 + $0x254] sm:$0xf] %vm4524_vm3, %v10398_v49 }
 0x5af   :  { %v10498_v23 = vpack.c.bf16 %v13924_v17, %v13924_v17  ;;  %v10508_v36 = vpack.c.bf16 %v13926_v4, %v13926_v4  ;;  %v13935_v53 = vmax.f32 %v9301_v16, 0.0  ;;  %v14146_v41 = vld [vmem:[#allocation125_spill] sm:$0xff]  ;;  %4675 = vst.msk [vmem:[%s11762_s2 + $0x258] sm:$0xf] %vm4524_vm3, %v10403_v3  ;;  %4676 = vst.msk [vmem:[%s11762_s2 + $0x25c] sm:$0xf] %vm4524_vm3, %v10408_v12 }
 0x5b0   :  { %v10513_v18 = vpack.c.bf16 %v13927_v63, %v13927_v63  ;;  %v10518_v17 = vpack.c.bf16 %v13929_v25, %v13929_v25  ;;  %v10523_v15 = vpack.c.bf16 %v13931_v20, %v13931_v20  ;;  %v10528_v4 = vpack.c.bf16 %v13933_v37, %v13933_v37  ;;  %4665 = vst.msk [vmem:[%s11762_s2 + $0x230] sm:$0xf] %vm4524_vm3, %v14146_v41 }
 0x5b1   :  { %v10533_v63 = vpack.c.bf16 %v13935_v53, %v13935_v53  ;;  %4677 = vst.msk [vmem:[%s11762_s2 + $0x260] sm:$0xf] %vm4524_vm3, %v10413_v30  ;;  %4678 = vst.msk [vmem:[%s11762_s2 + $0x264] sm:$0xf] %vm4524_vm3, %v10418_v6 }
 0x5b2   :  { %13928 = vst [vmem:[#allocation132_spill] sm:$0xff] %v10513_v18  ;;  %13930 = vst [vmem:[#allocation134_spill] sm:$0xff] %v10518_v17  ;;  %v13937_v18 = vld [vmem:[#allocation111_spill] sm:$0xff]  ;;  %v13940_v17 = vld [vmem:[#allocation110_spill] sm:$0xff] }
 0x5b3   :  { %13932 = vst [vmem:[#allocation130_spill] sm:$0xff] %v10523_v15  ;;  %13934 = vst [vmem:[#allocation133_spill] sm:$0xff] %v10528_v4  ;;  %v13938_v60 = vmax.f32 %v13937_v18, 0.0  ;;  %v13941_v10 = vmax.f32 %v13940_v17, 0.0  ;;  %v13943_v15 = vld [vmem:[#allocation117_spill] sm:$0xff]  ;;  %v13946_v4 = vld [vmem:[#allocation122_spill] sm:$0xff] }
 0x5b4   :  { %13936 = vst [vmem:[#allocation140_spill] sm:$0xff] %v10533_v63  ;;  %v13944_v26 = vmax.f32 %v13943_v15, 0.0  ;;  %v13947_v16 = vmax.f32 %v13946_v4, 0.0  ;;  %v13949_v63 = vld [vmem:[#allocation127_spill] sm:$0xff]  ;;  %4679 = vst.msk [vmem:[%s11762_s2 + $0x268] sm:$0xf] %vm4524_vm3, %v10423_v32 }
 0x5b5   :  { %v10538_v25 = vpack.c.bf16 %v13938_v60, %v13938_v60  ;;  %v10543_v20 = vpack.c.bf16 %v13941_v10, %v13941_v10  ;;  %v13950_v18 = vmax.f32 %v13949_v63, 0.0  ;;  %4680 = vst.msk [vmem:[%s11762_s2 + $0x26c] sm:$0xf] %vm4524_vm3, %v10428_v7  ;;  %4681 = vst.msk [vmem:[%s11762_s2 + $0x270] sm:$0xf] %vm4524_vm3, %v10433_v22 }
 0x5b6   :  { %v10548_v37 = vpack.c.bf16 %v13944_v26, %v13944_v26  ;;  %v10553_v53 = vpack.c.bf16 %v13947_v16, %v13947_v16  ;;  %4682 = vst.msk [vmem:[%s11762_s2 + $0x274] sm:$0xf] %vm4524_vm3, %v10438_v61  ;;  %4683 = vst.msk [vmem:[%s11762_s2 + $0x278] sm:$0xf] %vm4524_vm3, %v10443_v56 }
 0x5b7   :  { %13939 = vst [vmem:[#allocation142_spill] sm:$0xff] %v10538_v25  ;;  %13942 = vst [vmem:[#allocation138_spill] sm:$0xff] %v10543_v20  ;;  %v10558_v60 = vpack.c.bf16 %v13950_v18, %v13950_v18  ;;  %v13952_v25 = vld [vmem:[#allocation129_spill] sm:$0xff]  ;;  %v13955_v20 = vld [vmem:[#allocation139_spill] sm:$0xff] }
 0x5b8   :  { %13945 = vst [vmem:[#allocation141_spill] sm:$0xff] %v10548_v37  ;;  %13948 = vst [vmem:[#allocation148_spill] sm:$0xff] %v10553_v53  ;;  %v13953_v17 = vmax.f32 %v13952_v25, 0.0  ;;  %v13956_v15 = vmax.f32 %v13955_v20, 0.0  ;;  %v13958_v37 = vld [vmem:[#allocation135_spill] sm:$0xff]  ;;  %v13961_v53 = vld [vmem:[#allocation178_spill] sm:$0xff] }
 0x5b9   :  { %13951 = vst [vmem:[#allocation150_spill] sm:$0xff] %v10558_v60  ;;  %v13959_v4 = vmax.f32 %v13958_v37, 0.0  ;;  %v13962_v63 = vmax.f32 %v13961_v53, 0.0  ;;  %v13964_v60 = vld [vmem:[#allocation179_spill] sm:$0xff]  ;;  %4684 = vst.msk [vmem:[%s11762_s2 + $0x27c] sm:$0xf] %vm4524_vm3, %v10448_v45 }
 0x5ba   :  { %v10563_v10 = vpack.c.bf16 %v13953_v17, %v13953_v17  ;;  %v10568_v26 = vpack.c.bf16 %v13956_v15, %v13956_v15  ;;  %v13965_v25 = vmax.f32 %v13964_v60, 0.0  ;;  %4685 = vst.msk [vmem:[%s11762_s2 + $0x280] sm:$0xf] %vm4524_vm3, %v10453_v35  ;;  %4686 = vst.msk [vmem:[%s11762_s2 + $0x284] sm:$0xf] %vm4524_vm3, %v10458_v2  ;;  %v14147_v33 = vld [vmem:[#allocation132_spill] sm:$0xff] }
 0x5bb   :  { %v10573_v16 = vpack.c.bf16 %v13959_v4, %v13959_v4  ;;  %v10578_v18 = vpack.c.bf16 %v13962_v63, %v13962_v63  ;;  %4687 = vst.msk [vmem:[%s11762_s2 + $0x288] sm:$0xf] %vm4524_vm3, %v10463_v44  ;;  %4688 = vst.msk [vmem:[%s11762_s2 + $0x28c] sm:$0xf] %vm4524_vm3, %v10468_v51  ;;  %v14148_v14 = vld [vmem:[#allocation134_spill] sm:$0xff]  ;;  %v14150_v21 = vld [vmem:[#allocation133_spill] sm:$0xff] }
 0x5bc   :  { %13954 = vst [vmem:[#allocation146_spill] sm:$0xff] %v10563_v10  ;;  %13957 = vst [vmem:[#allocation149_spill] sm:$0xff] %v10568_v26  ;;  %v10583_v17 = vpack.c.bf16 %v13965_v25, %v13965_v25  ;;  %v13967_v10 = vld [vmem:[#allocation180_spill] sm:$0xff]  ;;  %v13970_v26 = vld [vmem:[#allocation181_spill] sm:$0xff] }
 0x5bd   :  { %13960 = vst [vmem:[#allocation156_spill] sm:$0xff] %v10573_v16  ;;  %13963 = vst [vmem:[#allocation158_spill] sm:$0xff] %v10578_v18  ;;  %v13968_v20 = vmax.f32 %v13967_v10, 0.0  ;;  %v13971_v37 = vmax.f32 %v13970_v26, 0.0  ;;  %v13973_v16 = vld [vmem:[#allocation182_spill] sm:$0xff]  ;;  %v13976_v18 = vld [vmem:[#allocation183_spill] sm:$0xff] }
 0x5be   :  { %13966 = vst [vmem:[#allocation157_spill] sm:$0xff] %v10583_v17  ;;  %v13974_v53 = vmax.f32 %v13973_v16, 0.0  ;;  %v13977_v60 = vmax.f32 %v13976_v18, 0.0  ;;  %v13979_v17 = vld [vmem:[#allocation184_spill] sm:$0xff]  ;;  %4689 = vst.msk [vmem:[%s11762_s2 + $0x290] sm:$0xf] %vm4524_vm3, %v10473_v19 }
 0x5bf   :  { %v10588_v15 = vpack.c.bf16 %v13968_v20, %v13968_v20  ;;  %v10593_v4 = vpack.c.bf16 %v13971_v37, %v13971_v37  ;;  %v13980_v10 = vmax.f32 %v13979_v17, 0.0  ;;  %4690 = vst.msk [vmem:[%s11762_s2 + $0x294] sm:$0xf] %vm4524_vm3, %v10478_v1  ;;  %4691 = vst.msk [vmem:[%s11762_s2 + $0x298] sm:$0xf] %vm4524_vm3, %v10483_v58  ;;  %v14149_v46 = vld [vmem:[#allocation130_spill] sm:$0xff] }
 0x5c0   :  { %v10598_v63 = vpack.c.bf16 %v13974_v53, %v13974_v53  ;;  %v10603_v25 = vpack.c.bf16 %v13977_v60, %v13977_v60  ;;  %4692 = vst.msk [vmem:[%s11762_s2 + $0x29c] sm:$0xf] %vm4524_vm3, %v10488_v24  ;;  %4693 = vst.msk [vmem:[%s11762_s2 + $0x2a0] sm:$0xf] %vm4524_vm3, %v10493_v28  ;;  %v14151_v34 = vld [vmem:[#allocation140_spill] sm:$0xff]  ;;  %v14152_v8 = vld [vmem:[#allocation142_spill] sm:$0xff] }
 0x5c1   :  { %13969 = vst [vmem:[#allocation46_spill] sm:$0xff] %v10588_v15  ;;  %13972 = vst [vmem:[#allocation48_spill] sm:$0xff] %v10593_v4  ;;  %v10608_v20 = vpack.c.bf16 %v13980_v10, %v13980_v10  ;;  %v13982_v15 = vld [vmem:[#allocation185_spill] sm:$0xff]  ;;  %v13985_v4 = vld [vmem:[#allocation186_spill] sm:$0xff] }
 0x5c2   :  { %13975 = vst [vmem:[#allocation55_spill] sm:$0xff] %v10598_v63  ;;  %13978 = vst [vmem:[#allocation58_spill] sm:$0xff] %v10603_v25  ;;  %v13983_v26 = vmax.f32 %v13982_v15, 0.0  ;;  %v13986_v16 = vmax.f32 %v13985_v4, 0.0  ;;  %v13988_v63 = vld [vmem:[#allocation187_spill] sm:$0xff]  ;;  %v14153_v31 = vld [vmem:[#allocation138_spill] sm:$0xff] }
 0x5c3   :  { %13981 = vst [vmem:[#allocation54_spill] sm:$0xff] %v10608_v20  ;;  %v13989_v18 = vmax.f32 %v13988_v63, 0.0  ;;  %v13991_v25 = vld [vmem:[#allocation143_spill] sm:$0xff]  ;;  %v13994_v20 = vld [vmem:[#allocation145_spill] sm:$0xff]  ;;  %4694 = vst.msk [vmem:[%s11762_s2 + $0x2a4] sm:$0xf] %vm4524_vm3, %v10498_v23 }
 0x5c4   :  { %v10613_v37 = vpack.c.bf16 %v13983_v26, %v13983_v26  ;;  %v10618_v53 = vpack.c.bf16 %v13986_v16, %v13986_v16  ;;  %v13992_v17 = vmax.f32 %v13991_v25, 0.0  ;;  %v13995_v15 = vmax.f32 %v13994_v20, 0.0  ;;  %4695 = vst.msk [vmem:[%s11762_s2 + $0x2a8] sm:$0xf] %vm4524_vm3, %v10503_v50  ;;  %4696 = vst.msk [vmem:[%s11762_s2 + $0x2ac] sm:$0xf] %vm4524_vm3, %v10508_v36 }
 0x5c5   :  { %v10623_v60 = vpack.c.bf16 %v13989_v18, %v13989_v18  ;;  %4697 = vst.msk [vmem:[%s11762_s2 + $0x2b0] sm:$0xf] %vm4524_vm3, %v14147_v33  ;;  %4698 = vst.msk [vmem:[%s11762_s2 + $0x2b4] sm:$0xf] %vm4524_vm3, %v14148_v14  ;;  %v14154_v11 = vld [vmem:[#allocation141_spill] sm:$0xff]  ;;  %v14155_v5 = vld [vmem:[#allocation148_spill] sm:$0xff] }
 0x5c6   :  { %13984 = vst [vmem:[#allocation56_spill] sm:$0xff] %v10613_v37  ;;  %13987 = vst [vmem:[#allocation63_spill] sm:$0xff] %v10618_v53  ;;  %v10628_v10 = vpack.c.bf16 %v13992_v17, %v13992_v17  ;;  %v10633_v26 = vpack.c.bf16 %v13995_v15, %v13995_v15  ;;  %v13996_v37 = vld [vmem:[#allocation151_spill] sm:$0xff]  ;;  %v13998_v53 = vld [vmem:[#allocation153_spill] sm:$0xff] }
 0x5c7   :  { %13990 = vst [vmem:[#allocation66_spill] sm:$0xff] %v10623_v60  ;;  %v13997_v4 = vmax.f32 %v13996_v37, 0.0  ;;  %v13999_v63 = vmax.f32 %v13998_v53, 0.0  ;;  %v14001_v60 = vld [vmem:[#allocation159_spill] sm:$0xff]  ;;  %v14005_v37 = vmax.f32 %v13482_v38, 0.0  ;;  %v14006_v53 = vmax.f32 %v13483_v52, 0.0 }
 0x5c8   :  { %13993 = vst [vmem:[#allocation62_spill] sm:$0xff] %v10628_v10  ;;  %v14002_v25 = vmax.f32 %v14001_v60, 0.0  ;;  %v14003_v10 = vld [vmem:[#allocation160_spill] sm:$0xff]  ;;  %v14011_v38 = vmax.f32 %v13486_v59, 0.0  ;;  %v14012_v52 = vmax.f32 %v13487_v0, 0.0  ;;  %v14016_v59 = vmax.f32 %v13490_v43, 0.0 }
 0x5c9   :  { %v10638_v16 = vpack.c.bf16 %v13997_v4, %v13997_v4  ;;  %v10643_v18 = vpack.c.bf16 %v13999_v63, %v13999_v63  ;;  %v14004_v20 = vmax.f32 %v14003_v10, 0.0  ;;  %v10658_v4 = vpack.c.bf16 %v14005_v37, %v14005_v37  ;;  %v14020_v43 = vld [vmem:[#allocation165_spill] sm:$0xff]  ;;  %4699 = vst.msk [vmem:[%s11762_s2 + $0x2b8] sm:$0xf] %vm4524_vm3, %v14149_v46  ;;  %4700 = vst.msk [vmem:[%s11762_s2 + $0x2bc] sm:$0xf] %vm4524_vm3, %v14150_v21 }
 0x5ca   :  { %v10648_v17 = vpack.c.bf16 %v14002_v25, %v14002_v25  ;;  %v10663_v63 = vpack.c.bf16 %v14006_v53, %v14006_v53  ;;  %v14010_v10 = vmax.f32 %v13485_v9, 0.0  ;;  %v10678_v37 = vpack.c.bf16 %v14011_v38, %v14011_v38  ;;  %4527 = vst.msk [vmem:[%s11762_s2 + $0x8] sm:$0xf] %vm4524_vm3, %v14020_v43  ;;  %v14028_v43 = vld [vmem:[#allocation80_spill] sm:$0xff]  ;;  %4701 = vst.msk [vmem:[%s11762_s2 + $0x2c0] sm:$0xf] %vm4524_vm3, %v14151_v34 }
 0x5cb   :  { %14000 = vst [vmem:[#allocation64_spill] sm:$0xff] %v10643_v18  ;;  %v10653_v15 = vpack.c.bf16 %v14004_v20, %v14004_v20  ;;  %v14007_v18 = vld [vmem:[#allocation173_spill] sm:$0xff]  ;;  %v10683_v53 = vpack.c.bf16 %v14012_v52, %v14012_v52  ;;  %v10698_v38 = vpack.c.bf16 %v14016_v59, %v14016_v59  ;;  %v14017_v0 = vmax.f32 %v13491_v40, 0.0  ;;  %v14024_v59 = vld [vmem:[#allocation50_spill] sm:$0xff]  ;;  %4535 = vst.msk [vmem:[%s11762_s2 + $0x28] sm:$0xf] %vm4524_vm3, %v14028_v43 }
 0x5cc   :  { %v14008_v60 = vmax.f32 %v14007_v18, 0.0  ;;  %v10673_v20 = vpack.c.bf16 %v14010_v10, %v14010_v10  ;;  %v14013_v18 = vmax.f32 %v13488_v13, 0.0  ;;  %v14018_v13 = vld [vmem:[#allocation154_spill] sm:$0xff]  ;;  %v14021_v40 = vld [vmem:[#allocation161_spill] sm:$0xff]  ;;  %4531 = vst.msk [vmem:[%s11762_s2 + $0x18] sm:$0xf] %vm4524_vm3, %v14024_v59 }
 0x5cd   :  { %v10703_v52 = vpack.c.bf16 %v14017_v0, %v14017_v0  ;;  %4525 = vst.msk [vmem:[%s11762_s2] sm:$0xf] %vm4524_vm3, %v14018_v13  ;;  %4528 = vst.msk [vmem:[%s11762_s2 + $0xc] sm:$0xf] %vm4524_vm3, %v14021_v40  ;;  %v14025_v0 = vld [vmem:[#allocation70_spill] sm:$0xff]  ;;  %v14026_v13 = vld [vmem:[#allocation72_spill] sm:$0xff] }
 0x5ce   :  { %v10668_v25 = vpack.c.bf16 %v14008_v60, %v14008_v60  ;;  %v10688_v60 = vpack.c.bf16 %v14013_v18, %v14013_v18  ;;  %v14022_v18 = vld [vmem:[#allocation164_spill] sm:$0xff]  ;;  %4532 = vst.msk [vmem:[%s11762_s2 + $0x1c] sm:$0xf] %vm4524_vm3, %v14025_v0  ;;  %4533 = vst.msk [vmem:[%s11762_s2 + $0x20] sm:$0xf] %vm4524_vm3, %v14026_v13  ;;  %v14029_v40 = vld [vmem:[#allocation98_spill] sm:$0xff] }
 0x5cf   :  { %4529 = vst.msk [vmem:[%s11762_s2 + $0x10] sm:$0xf] %vm4524_vm3, %v14022_v18  ;;  %4536 = vst.msk [vmem:[%s11762_s2 + $0x2c] sm:$0xf] %vm4524_vm3, %v14029_v40  ;;  %v14030_v18 = vld [vmem:[#allocation94_spill] sm:$0xff]  ;;  %v14032_v59 = vld [vmem:[#allocation103_spill] sm:$0xff] }
 0x5d0   :  { %14009 = vst [vmem:[#allocation71_spill] sm:$0xff] %v10668_v25  ;;  %v14014_v25 = vld [vmem:[#allocation175_spill] sm:$0xff]  ;;  %4537 = vst.msk [vmem:[%s11762_s2 + $0x30] sm:$0xf] %vm4524_vm3, %v14030_v18  ;;  %v14033_v0 = vld [vmem:[#allocation106_spill] sm:$0xff] }
 0x5d1   :  { %v14015_v9 = vmax.f32 %v14014_v25, 0.0  ;;  %v14019_v25 = vld [vmem:[#allocation163_spill] sm:$0xff]  ;;  %4539 = vst.msk [vmem:[%s11762_s2 + $0x38] sm:$0xf] %vm4524_vm3, %v14032_v59  ;;  %4540 = vst.msk [vmem:[%s11762_s2 + $0x3c] sm:$0xf] %vm4524_vm3, %v14033_v0 }
 0x5d2   :  { %4526 = vst.msk [vmem:[%s11762_s2 + $0x4] sm:$0xf] %vm4524_vm3, %v14019_v25  ;;  %v14027_v25 = vld [vmem:[#allocation78_spill] sm:$0xff]  ;;  %v14036_v43 = vld [vmem:[#allocation171_spill] sm:$0xff]  ;;  %v14037_v40 = vld [vmem:[#allocation172_spill] sm:$0xff] }
 0x5d3   :  { %v10693_v10 = vpack.c.bf16 %v14015_v9, %v14015_v9  ;;  %v14023_v9 = vld [vmem:[#allocation47_spill] sm:$0xff]  ;;  %4534 = vst.msk [vmem:[%s11762_s2 + $0x24] sm:$0xf] %vm4524_vm3, %v14027_v25  ;;  %v14034_v13 = vld [vmem:[#allocation102_spill] sm:$0xff]  ;;  %v14035_v25 = vld [vmem:[#allocation104_spill] sm:$0xff] }
 0x5d4   :  { %4530 = vst.msk [vmem:[%s11762_s2 + $0x14] sm:$0xf] %vm4524_vm3, %v14023_v9  ;;  %v14031_v9 = vld [vmem:[#allocation96_spill] sm:$0xff]  ;;  %4541 = vst.msk [vmem:[%s11762_s2 + $0x40] sm:$0xf] %vm4524_vm3, %v14034_v13  ;;  %v14038_v18 = vld [vmem:[#allocation174_spill] sm:$0xff] }
 0x5d5   :  { %4538 = vst.msk [vmem:[%s11762_s2 + $0x34] sm:$0xf] %vm4524_vm3, %v14031_v9  ;;  %4542 = vst.msk [vmem:[%s11762_s2 + $0x44] sm:$0xf] %vm4524_vm3, %v14035_v25  ;;  %v14039_v9 = vld [vmem:[#allocation170_spill] sm:$0xff]  ;;  %v14040_v59 = vld [vmem:[#allocation168_spill] sm:$0xff] }
 0x5d6   :  { %4543 = vst.msk [vmem:[%s11762_s2 + $0x48] sm:$0xf] %vm4524_vm3, %v14036_v43  ;;  %4544 = vst.msk [vmem:[%s11762_s2 + $0x4c] sm:$0xf] %vm4524_vm3, %v14037_v40  ;;  %v14041_v0 = vld [vmem:[#allocation169_spill] sm:$0xff]  ;;  %v14042_v13 = vld [vmem:[#allocation176_spill] sm:$0xff] }
 0x5d7   :  { %4545 = vst.msk [vmem:[%s11762_s2 + $0x50] sm:$0xf] %vm4524_vm3, %v14038_v18  ;;  %4546 = vst.msk [vmem:[%s11762_s2 + $0x54] sm:$0xf] %vm4524_vm3, %v14039_v9  ;;  %v14043_v25 = vld [vmem:[#allocation177_spill] sm:$0xff]  ;;  %v14044_v43 = vld [vmem:[#allocation87_spill] sm:$0xff] }
 0x5d8   :  { %4547 = vst.msk [vmem:[%s11762_s2 + $0x58] sm:$0xf] %vm4524_vm3, %v14040_v59  ;;  %4548 = vst.msk [vmem:[%s11762_s2 + $0x5c] sm:$0xf] %vm4524_vm3, %v14041_v0  ;;  %v14045_v40 = vld [vmem:[#allocation86_spill] sm:$0xff]  ;;  %v14046_v18 = vld [vmem:[#allocation88_spill] sm:$0xff] }
 0x5d9   :  { %4549 = vst.msk [vmem:[%s11762_s2 + $0x60] sm:$0xf] %vm4524_vm3, %v14042_v13  ;;  %4550 = vst.msk [vmem:[%s11762_s2 + $0x64] sm:$0xf] %vm4524_vm3, %v14043_v25  ;;  %v14047_v9 = vld [vmem:[#allocation113_spill] sm:$0xff]  ;;  %v14048_v59 = vld [vmem:[#allocation128_spill] sm:$0xff] }
 0x5da   :  { %4551 = vst.msk [vmem:[%s11762_s2 + $0x68] sm:$0xf] %vm4524_vm3, %v14044_v43  ;;  %4552 = vst.msk [vmem:[%s11762_s2 + $0x6c] sm:$0xf] %vm4524_vm3, %v14045_v40  ;;  %v14049_v0 = vld [vmem:[#allocation131_spill] sm:$0xff]  ;;  %v14050_v13 = vld [vmem:[#allocation136_spill] sm:$0xff] }
 0x5db   :  { %4553 = vst.msk [vmem:[%s11762_s2 + $0x70] sm:$0xf] %vm4524_vm3, %v14046_v18  ;;  %4554 = vst.msk [vmem:[%s11762_s2 + $0x74] sm:$0xf] %vm4524_vm3, %v14047_v9  ;;  %v14051_v25 = vld [vmem:[#allocation137_spill] sm:$0xff]  ;;  %v14052_v43 = vld [vmem:[#allocation147_spill] sm:$0xff] }
 0x5dc   :  { %4555 = vst.msk [vmem:[%s11762_s2 + $0x78] sm:$0xf] %vm4524_vm3, %v14048_v59  ;;  %4556 = vst.msk [vmem:[%s11762_s2 + $0x7c] sm:$0xf] %vm4524_vm3, %v14049_v0  ;;  %v14053_v40 = vld [vmem:[#allocation144_spill] sm:$0xff]  ;;  %v14055_v9 = vld [vmem:[#allocation155_spill] sm:$0xff] }
 0x5dd   :  { %4557 = vst.msk [vmem:[%s11762_s2 + $0x80] sm:$0xf] %vm4524_vm3, %v14050_v13  ;;  %4558 = vst.msk [vmem:[%s11762_s2 + $0x84] sm:$0xf] %vm4524_vm3, %v14051_v25  ;;  %v14054_v18 = vld [vmem:[#allocation152_spill] sm:$0xff]  ;;  %v14056_v59 = vld [vmem:[#allocation162_spill] sm:$0xff] }
 0x5de   :  { %4559 = vst.msk [vmem:[%s11762_s2 + $0x88] sm:$0xf] %vm4524_vm3, %v14052_v43  ;;  %4560 = vst.msk [vmem:[%s11762_s2 + $0x8c] sm:$0xf] %vm4524_vm3, %v14053_v40  ;;  %v14057_v0 = vld [vmem:[#allocation166_spill] sm:$0xff]  ;;  %v14058_v13 = vld [vmem:[#allocation167_spill] sm:$0xff] }
 0x5df   :  { %4561 = vst.msk [vmem:[%s11762_s2 + $0x90] sm:$0xf] %vm4524_vm3, %v14054_v18  ;;  %4562 = vst.msk [vmem:[%s11762_s2 + $0x94] sm:$0xf] %vm4524_vm3, %v14055_v9  ;;  %v14059_v25 = vld [vmem:[#allocation3_spill] sm:$0xff]  ;;  %v14060_v43 = vld [vmem:[#allocation5_spill] sm:$0xff] }
 0x5e0   :  { %4563 = vst.msk [vmem:[%s11762_s2 + $0x98] sm:$0xf] %vm4524_vm3, %v14056_v59  ;;  %4564 = vst.msk [vmem:[%s11762_s2 + $0x9c] sm:$0xf] %vm4524_vm3, %v14057_v0  ;;  %v14061_v40 = vld [vmem:[#allocation2_spill] sm:$0xff]  ;;  %v14062_v18 = vld [vmem:[#allocation4_spill] sm:$0xff] }
 0x5e1   :  { %4565 = vst.msk [vmem:[%s11762_s2 + $0xa0] sm:$0xf] %vm4524_vm3, %v14058_v13  ;;  %4566 = vst.msk [vmem:[%s11762_s2 + $0xa4] sm:$0xf] %vm4524_vm3, %v14059_v25  ;;  %v14063_v9 = vld [vmem:[#allocation7_spill] sm:$0xff]  ;;  %v14064_v59 = vld [vmem:[#allocation9_spill] sm:$0xff] }
 0x5e2   :  { %4567 = vst.msk [vmem:[%s11762_s2 + $0xa8] sm:$0xf] %vm4524_vm3, %v14060_v43  ;;  %4568 = vst.msk [vmem:[%s11762_s2 + $0xac] sm:$0xf] %vm4524_vm3, %v14061_v40  ;;  %v14065_v0 = vld [vmem:[#allocation6_spill] sm:$0xff]  ;;  %v14066_v13 = vld [vmem:[#allocation8_spill] sm:$0xff] }
 0x5e3   :  { %4569 = vst.msk [vmem:[%s11762_s2 + $0xb0] sm:$0xf] %vm4524_vm3, %v14062_v18  ;;  %4570 = vst.msk [vmem:[%s11762_s2 + $0xb4] sm:$0xf] %vm4524_vm3, %v14063_v9  ;;  %v14067_v25 = vld [vmem:[#allocation11_spill] sm:$0xff]  ;;  %v14068_v43 = vld [vmem:[#allocation13_spill] sm:$0xff] }
 0x5e4   :  { %4571 = vst.msk [vmem:[%s11762_s2 + $0xb8] sm:$0xf] %vm4524_vm3, %v14064_v59  ;;  %4572 = vst.msk [vmem:[%s11762_s2 + $0xbc] sm:$0xf] %vm4524_vm3, %v14065_v0  ;;  %v14069_v40 = vld [vmem:[#allocation10_spill] sm:$0xff]  ;;  %v14070_v18 = vld [vmem:[#allocation12_spill] sm:$0xff] }
 0x5e5   :  { %4573 = vst.msk [vmem:[%s11762_s2 + $0xc0] sm:$0xf] %vm4524_vm3, %v14066_v13  ;;  %4574 = vst.msk [vmem:[%s11762_s2 + $0xc4] sm:$0xf] %vm4524_vm3, %v14067_v25  ;;  %v14071_v9 = vld [vmem:[#allocation15_spill] sm:$0xff]  ;;  %v14072_v59 = vld [vmem:[#allocation17_spill] sm:$0xff] }
 0x5e6   :  { %4575 = vst.msk [vmem:[%s11762_s2 + $0xc8] sm:$0xf] %vm4524_vm3, %v14068_v43  ;;  %4576 = vst.msk [vmem:[%s11762_s2 + $0xcc] sm:$0xf] %vm4524_vm3, %v14069_v40  ;;  %v14073_v0 = vld [vmem:[#allocation14_spill] sm:$0xff]  ;;  %v14074_v13 = vld [vmem:[#allocation16_spill] sm:$0xff] }
 0x5e7   :  { %4577 = vst.msk [vmem:[%s11762_s2 + $0xd0] sm:$0xf] %vm4524_vm3, %v14070_v18  ;;  %4578 = vst.msk [vmem:[%s11762_s2 + $0xd4] sm:$0xf] %vm4524_vm3, %v14071_v9  ;;  %v14075_v25 = vld [vmem:[#allocation19_spill] sm:$0xff]  ;;  %v14076_v43 = vld [vmem:[#allocation21_spill] sm:$0xff] }
 0x5e8   :  { %4579 = vst.msk [vmem:[%s11762_s2 + $0xd8] sm:$0xf] %vm4524_vm3, %v14072_v59  ;;  %4580 = vst.msk [vmem:[%s11762_s2 + $0xdc] sm:$0xf] %vm4524_vm3, %v14073_v0  ;;  %v14077_v40 = vld [vmem:[#allocation18_spill] sm:$0xff]  ;;  %v14078_v18 = vld [vmem:[#allocation20_spill] sm:$0xff] }
 0x5e9   :  { %4581 = vst.msk [vmem:[%s11762_s2 + $0xe0] sm:$0xf] %vm4524_vm3, %v14074_v13  ;;  %4582 = vst.msk [vmem:[%s11762_s2 + $0xe4] sm:$0xf] %vm4524_vm3, %v14075_v25  ;;  %v14079_v9 = vld [vmem:[#allocation23_spill] sm:$0xff]  ;;  %v14080_v59 = vld [vmem:[#allocation25_spill] sm:$0xff] }
 0x5ea   :  { %4583 = vst.msk [vmem:[%s11762_s2 + $0xe8] sm:$0xf] %vm4524_vm3, %v14076_v43  ;;  %4584 = vst.msk [vmem:[%s11762_s2 + $0xec] sm:$0xf] %vm4524_vm3, %v14077_v40  ;;  %v14081_v0 = vld [vmem:[#allocation22_spill] sm:$0xff]  ;;  %v14082_v13 = vld [vmem:[#allocation24_spill] sm:$0xff] }
 0x5eb   :  { %4585 = vst.msk [vmem:[%s11762_s2 + $0xf0] sm:$0xf] %vm4524_vm3, %v14078_v18  ;;  %4586 = vst.msk [vmem:[%s11762_s2 + $0xf4] sm:$0xf] %vm4524_vm3, %v14079_v9  ;;  %v14083_v25 = vld [vmem:[#allocation27_spill] sm:$0xff]  ;;  %v14084_v43 = vld [vmem:[#allocation29_spill] sm:$0xff] }
 0x5ec   :  { %4587 = vst.msk [vmem:[%s11762_s2 + $0xf8] sm:$0xf] %vm4524_vm3, %v14080_v59  ;;  %4588 = vst.msk [vmem:[%s11762_s2 + $0xfc] sm:$0xf] %vm4524_vm3, %v14081_v0  ;;  %v14085_v40 = vld [vmem:[#allocation26_spill] sm:$0xff]  ;;  %v14086_v18 = vld [vmem:[#allocation28_spill] sm:$0xff] }
 0x5ed   :  { %4589 = vst.msk [vmem:[%s11762_s2 + $0x100] sm:$0xf] %vm4524_vm3, %v14082_v13  ;;  %4590 = vst.msk [vmem:[%s11762_s2 + $0x104] sm:$0xf] %vm4524_vm3, %v14083_v25  ;;  %v14087_v9 = vld [vmem:[#allocation31_spill] sm:$0xff]  ;;  %v14088_v59 = vld [vmem:[#allocation33_spill] sm:$0xff] }
 0x5ee   :  { %4591 = vst.msk [vmem:[%s11762_s2 + $0x108] sm:$0xf] %vm4524_vm3, %v14084_v43  ;;  %4592 = vst.msk [vmem:[%s11762_s2 + $0x10c] sm:$0xf] %vm4524_vm3, %v14085_v40  ;;  %v14089_v0 = vld [vmem:[#allocation30_spill] sm:$0xff]  ;;  %v14090_v13 = vld [vmem:[#allocation32_spill] sm:$0xff] }
 0x5ef   :  { %4593 = vst.msk [vmem:[%s11762_s2 + $0x110] sm:$0xf] %vm4524_vm3, %v14086_v18  ;;  %4594 = vst.msk [vmem:[%s11762_s2 + $0x114] sm:$0xf] %vm4524_vm3, %v14087_v9  ;;  %v14091_v25 = vld [vmem:[#allocation35_spill] sm:$0xff]  ;;  %v14092_v43 = vld [vmem:[#allocation37_spill] sm:$0xff] }
 0x5f0   :  { %4595 = vst.msk [vmem:[%s11762_s2 + $0x118] sm:$0xf] %vm4524_vm3, %v14088_v59  ;;  %4596 = vst.msk [vmem:[%s11762_s2 + $0x11c] sm:$0xf] %vm4524_vm3, %v14089_v0  ;;  %v14093_v40 = vld [vmem:[#allocation34_spill] sm:$0xff]  ;;  %v14094_v18 = vld [vmem:[#allocation36_spill] sm:$0xff] }
 0x5f1   :  { %4597 = vst.msk [vmem:[%s11762_s2 + $0x120] sm:$0xf] %vm4524_vm3, %v14090_v13  ;;  %4598 = vst.msk [vmem:[%s11762_s2 + $0x124] sm:$0xf] %vm4524_vm3, %v14091_v25  ;;  %v14095_v9 = vld [vmem:[#allocation39_spill] sm:$0xff]  ;;  %v14096_v59 = vld [vmem:[#allocation41_spill] sm:$0xff] }
 0x5f2   :  { %4599 = vst.msk [vmem:[%s11762_s2 + $0x128] sm:$0xf] %vm4524_vm3, %v14092_v43  ;;  %4600 = vst.msk [vmem:[%s11762_s2 + $0x12c] sm:$0xf] %vm4524_vm3, %v14093_v40  ;;  %v14097_v0 = vld [vmem:[#allocation38_spill] sm:$0xff]  ;;  %v14098_v13 = vld [vmem:[#allocation40_spill] sm:$0xff] }
 0x5f3   :  { %4601 = vst.msk [vmem:[%s11762_s2 + $0x130] sm:$0xf] %vm4524_vm3, %v14094_v18  ;;  %4602 = vst.msk [vmem:[%s11762_s2 + $0x134] sm:$0xf] %vm4524_vm3, %v14095_v9  ;;  %v14099_v25 = vld [vmem:[#allocation43_spill] sm:$0xff]  ;;  %v14100_v43 = vld [vmem:[#allocation45_spill] sm:$0xff] }
 0x5f4   :  { %4603 = vst.msk [vmem:[%s11762_s2 + $0x138] sm:$0xf] %vm4524_vm3, %v14096_v59  ;;  %4604 = vst.msk [vmem:[%s11762_s2 + $0x13c] sm:$0xf] %vm4524_vm3, %v14097_v0  ;;  %v14101_v40 = vld [vmem:[#allocation42_spill] sm:$0xff]  ;;  %v14102_v18 = vld [vmem:[#allocation44_spill] sm:$0xff] }
 0x5f5   :  { %4605 = vst.msk [vmem:[%s11762_s2 + $0x140] sm:$0xf] %vm4524_vm3, %v14098_v13  ;;  %4606 = vst.msk [vmem:[%s11762_s2 + $0x144] sm:$0xf] %vm4524_vm3, %v14099_v25  ;;  %v14103_v9 = vld [vmem:[#allocation51_spill] sm:$0xff]  ;;  %v14104_v59 = vld [vmem:[#allocation53_spill] sm:$0xff] }
 0x5f6   :  { %4607 = vst.msk [vmem:[%s11762_s2 + $0x148] sm:$0xf] %vm4524_vm3, %v14100_v43  ;;  %4608 = vst.msk [vmem:[%s11762_s2 + $0x14c] sm:$0xf] %vm4524_vm3, %v14101_v40  ;;  %v14105_v0 = vld [vmem:[#allocation49_spill] sm:$0xff]  ;;  %v14106_v13 = vld [vmem:[#allocation52_spill] sm:$0xff] }
 0x5f7   :  { %4609 = vst.msk [vmem:[%s11762_s2 + $0x150] sm:$0xf] %vm4524_vm3, %v14102_v18  ;;  %4610 = vst.msk [vmem:[%s11762_s2 + $0x154] sm:$0xf] %vm4524_vm3, %v14103_v9  ;;  %v14107_v25 = vld [vmem:[#allocation59_spill] sm:$0xff]  ;;  %v14108_v43 = vld [vmem:[#allocation61_spill] sm:$0xff] }
 0x5f8   :  { %4611 = vst.msk [vmem:[%s11762_s2 + $0x158] sm:$0xf] %vm4524_vm3, %v14104_v59  ;;  %4612 = vst.msk [vmem:[%s11762_s2 + $0x15c] sm:$0xf] %vm4524_vm3, %v14105_v0  ;;  %v14109_v40 = vld [vmem:[#allocation57_spill] sm:$0xff]  ;;  %v14110_v18 = vld [vmem:[#allocation60_spill] sm:$0xff] }
 0x5f9   :  { %4613 = vst.msk [vmem:[%s11762_s2 + $0x160] sm:$0xf] %vm4524_vm3, %v14106_v13  ;;  %4614 = vst.msk [vmem:[%s11762_s2 + $0x164] sm:$0xf] %vm4524_vm3, %v14107_v25  ;;  %v14111_v9 = vld [vmem:[#allocation67_spill] sm:$0xff]  ;;  %v14112_v59 = vld [vmem:[#allocation69_spill] sm:$0xff] }
 0x5fa   :  { %4615 = vst.msk [vmem:[%s11762_s2 + $0x168] sm:$0xf] %vm4524_vm3, %v14108_v43  ;;  %4616 = vst.msk [vmem:[%s11762_s2 + $0x16c] sm:$0xf] %vm4524_vm3, %v14109_v40  ;;  %v14113_v0 = vld [vmem:[#allocation65_spill] sm:$0xff]  ;;  %v14114_v13 = vld [vmem:[#allocation68_spill] sm:$0xff] }
 0x5fb   :  { %4617 = vst.msk [vmem:[%s11762_s2 + $0x170] sm:$0xf] %vm4524_vm3, %v14110_v18  ;;  %4618 = vst.msk [vmem:[%s11762_s2 + $0x174] sm:$0xf] %vm4524_vm3, %v14111_v9  ;;  %v14115_v25 = vld [vmem:[#allocation75_spill] sm:$0xff]  ;;  %v14116_v43 = vld [vmem:[#allocation77_spill] sm:$0xff] }
 0x5fc   :  { %4619 = vst.msk [vmem:[%s11762_s2 + $0x178] sm:$0xf] %vm4524_vm3, %v14112_v59  ;;  %4620 = vst.msk [vmem:[%s11762_s2 + $0x17c] sm:$0xf] %vm4524_vm3, %v14113_v0  ;;  %v14117_v40 = vld [vmem:[#allocation73_spill] sm:$0xff]  ;;  %v14118_v18 = vld [vmem:[#allocation76_spill] sm:$0xff] }
 0x5fd   :  { %4621 = vst.msk [vmem:[%s11762_s2 + $0x180] sm:$0xf] %vm4524_vm3, %v14114_v13  ;;  %4622 = vst.msk [vmem:[%s11762_s2 + $0x184] sm:$0xf] %vm4524_vm3, %v14115_v25  ;;  %v14119_v9 = vld [vmem:[#allocation83_spill] sm:$0xff]  ;;  %v14120_v59 = vld [vmem:[#allocation85_spill] sm:$0xff] }
 0x5fe   :  { %4623 = vst.msk [vmem:[%s11762_s2 + $0x188] sm:$0xf] %vm4524_vm3, %v14116_v43  ;;  %4624 = vst.msk [vmem:[%s11762_s2 + $0x18c] sm:$0xf] %vm4524_vm3, %v14117_v40  ;;  %v14121_v0 = vld [vmem:[#allocation81_spill] sm:$0xff]  ;;  %v14122_v13 = vld [vmem:[#allocation84_spill] sm:$0xff] }
 0x5ff   :  { %4625 = vst.msk [vmem:[%s11762_s2 + $0x190] sm:$0xf] %vm4524_vm3, %v14118_v18  ;;  %4626 = vst.msk [vmem:[%s11762_s2 + $0x194] sm:$0xf] %vm4524_vm3, %v14119_v9  ;;  %v14123_v25 = vld [vmem:[#allocation91_spill] sm:$0xff]  ;;  %v14124_v43 = vld [vmem:[#allocation93_spill] sm:$0xff] }
 0x600   :  { %4627 = vst.msk [vmem:[%s11762_s2 + $0x198] sm:$0xf] %vm4524_vm3, %v14120_v59  ;;  %4628 = vst.msk [vmem:[%s11762_s2 + $0x19c] sm:$0xf] %vm4524_vm3, %v14121_v0  ;;  %v14125_v40 = vld [vmem:[#allocation89_spill] sm:$0xff]  ;;  %v14126_v18 = vld [vmem:[#allocation92_spill] sm:$0xff] }
 0x601   :  { %4629 = vst.msk [vmem:[%s11762_s2 + $0x1a0] sm:$0xf] %vm4524_vm3, %v14122_v13  ;;  %4630 = vst.msk [vmem:[%s11762_s2 + $0x1a4] sm:$0xf] %vm4524_vm3, %v14123_v25  ;;  %v14127_v9 = vld [vmem:[#allocation99_spill] sm:$0xff]  ;;  %v14128_v59 = vld [vmem:[#allocation101_spill] sm:$0xff] }
 0x602   :  { %4631 = vst.msk [vmem:[%s11762_s2 + $0x1a8] sm:$0xf] %vm4524_vm3, %v14124_v43  ;;  %4632 = vst.msk [vmem:[%s11762_s2 + $0x1ac] sm:$0xf] %vm4524_vm3, %v14125_v40  ;;  %v14129_v0 = vld [vmem:[#allocation97_spill] sm:$0xff]  ;;  %v14130_v13 = vld [vmem:[#allocation100_spill] sm:$0xff] }
 0x603   :  { %4633 = vst.msk [vmem:[%s11762_s2 + $0x1b0] sm:$0xf] %vm4524_vm3, %v14126_v18  ;;  %4634 = vst.msk [vmem:[%s11762_s2 + $0x1b4] sm:$0xf] %vm4524_vm3, %v14127_v9  ;;  %v14138_v25 = vld [vmem:[#allocation115_spill] sm:$0xff]  ;;  %v14140_v40 = vld [vmem:[#allocation121_spill] sm:$0xff] }
 0x604   :  { %4635 = vst.msk [vmem:[%s11762_s2 + $0x1b8] sm:$0xf] %vm4524_vm3, %v14128_v59  ;;  %4636 = vst.msk [vmem:[%s11762_s2 + $0x1bc] sm:$0xf] %vm4524_vm3, %v14129_v0  ;;  %v14139_v43 = vld [vmem:[#allocation119_spill] sm:$0xff]  ;;  %v14141_v18 = vld [vmem:[#allocation118_spill] sm:$0xff] }
 0x605   :  { %4638 = vst.msk [vmem:[%s11762_s2 + $0x1c4] sm:$0xf] %vm4524_vm3, %v14130_v13  ;;  %4652 = vst.msk [vmem:[%s11762_s2 + $0x1fc] sm:$0xf] %vm4524_vm3, %v14138_v25  ;;  %v14142_v9 = vld [vmem:[#allocation120_spill] sm:$0xff]  ;;  %v14144_v59 = vld [vmem:[#allocation126_spill] sm:$0xff] }
 0x606   :  { %4653 = vst.msk [vmem:[%s11762_s2 + $0x200] sm:$0xf] %vm4524_vm3, %v14139_v43  ;;  %4655 = vst.msk [vmem:[%s11762_s2 + $0x208] sm:$0xf] %vm4524_vm3, %v14140_v40  ;;  %v14156_v47 = vld [vmem:[#allocation150_spill] sm:$0xff]  ;;  %v14158_v3 = vld [vmem:[#allocation149_spill] sm:$0xff] }
 0x607   :  { %4656 = vst.msk [vmem:[%s11762_s2 + $0x20c] sm:$0xf] %vm4524_vm3, %v14141_v18  ;;  %4657 = vst.msk [vmem:[%s11762_s2 + $0x210] sm:$0xf] %vm4524_vm3, %v14142_v9  ;;  %v14157_v49 = vld [vmem:[#allocation146_spill] sm:$0xff]  ;;  %v14159_v12 = vld [vmem:[#allocation156_spill] sm:$0xff] }
 0x608   :  { %4661 = vst.msk [vmem:[%s11762_s2 + $0x220] sm:$0xf] %vm4524_vm3, %v14144_v59  ;;  %4702 = vst.msk [vmem:[%s11762_s2 + $0x2c4] sm:$0xf] %vm4524_vm3, %v14152_v8  ;;  %v14160_v30 = vld [vmem:[#allocation158_spill] sm:$0xff]  ;;  %v14161_v6 = vld [vmem:[#allocation157_spill] sm:$0xff] }
 0x609   :  { %4703 = vst.msk [vmem:[%s11762_s2 + $0x2c8] sm:$0xf] %vm4524_vm3, %v14153_v31  ;;  %4704 = vst.msk [vmem:[%s11762_s2 + $0x2cc] sm:$0xf] %vm4524_vm3, %v14154_v11  ;;  %v14162_v32 = vld [vmem:[#allocation46_spill] sm:$0xff]  ;;  %v14163_v7 = vld [vmem:[#allocation48_spill] sm:$0xff] }
 0x60a   :  { %4705 = vst.msk [vmem:[%s11762_s2 + $0x2d0] sm:$0xf] %vm4524_vm3, %v14155_v5  ;;  %4706 = vst.msk [vmem:[%s11762_s2 + $0x2d4] sm:$0xf] %vm4524_vm3, %v14156_v47  ;;  %v14164_v22 = vld [vmem:[#allocation55_spill] sm:$0xff]  ;;  %v14165_v61 = vld [vmem:[#allocation58_spill] sm:$0xff] }
 0x60b   :  { %4707 = vst.msk [vmem:[%s11762_s2 + $0x2d8] sm:$0xf] %vm4524_vm3, %v14157_v49  ;;  %4708 = vst.msk [vmem:[%s11762_s2 + $0x2dc] sm:$0xf] %vm4524_vm3, %v14158_v3  ;;  %v14166_v56 = vld [vmem:[#allocation54_spill] sm:$0xff]  ;;  %v14167_v45 = vld [vmem:[#allocation56_spill] sm:$0xff] }
 0x60c   :  { %4709 = vst.msk [vmem:[%s11762_s2 + $0x2e0] sm:$0xf] %vm4524_vm3, %v14159_v12  ;;  %4710 = vst.msk [vmem:[%s11762_s2 + $0x2e4] sm:$0xf] %vm4524_vm3, %v14160_v30  ;;  %v14168_v35 = vld [vmem:[#allocation63_spill] sm:$0xff]  ;;  %v14169_v2 = vld [vmem:[#allocation66_spill] sm:$0xff] }
 0x60d   :  { %4711 = vst.msk [vmem:[%s11762_s2 + $0x2e8] sm:$0xf] %vm4524_vm3, %v14161_v6  ;;  %4712 = vst.msk [vmem:[%s11762_s2 + $0x2ec] sm:$0xf] %vm4524_vm3, %v14162_v32  ;;  %v14170_v44 = vld [vmem:[#allocation62_spill] sm:$0xff]  ;;  %v14171_v51 = vld [vmem:[#allocation64_spill] sm:$0xff] }
 0x60e   :  { %4713 = vst.msk [vmem:[%s11762_s2 + $0x2f0] sm:$0xf] %vm4524_vm3, %v14163_v7  ;;  %4714 = vst.msk [vmem:[%s11762_s2 + $0x2f4] sm:$0xf] %vm4524_vm3, %v14164_v22  ;;  %v14172_v19 = vld [vmem:[#allocation71_spill] sm:$0xff] }
 0x60f   :  { %4715 = vst.msk [vmem:[%s11762_s2 + $0x2f8] sm:$0xf] %vm4524_vm3, %v14165_v61  ;;  %4716 = vst.msk [vmem:[%s11762_s2 + $0x2fc] sm:$0xf] %vm4524_vm3, %v14166_v56 }
 0x610   :  { %4717 = vst.msk [vmem:[%s11762_s2 + $0x300] sm:$0xf] %vm4524_vm3, %v14167_v45  ;;  %4718 = vst.msk [vmem:[%s11762_s2 + $0x304] sm:$0xf] %vm4524_vm3, %v14168_v35 }
 0x611   :  { %4719 = vst.msk [vmem:[%s11762_s2 + $0x308] sm:$0xf] %vm4524_vm3, %v14169_v2  ;;  %4720 = vst.msk [vmem:[%s11762_s2 + $0x30c] sm:$0xf] %vm4524_vm3, %v14170_v44 }
 0x612   :  { %4721 = vst.msk [vmem:[%s11762_s2 + $0x310] sm:$0xf] %vm4524_vm3, %v10633_v26  ;;  %4722 = vst.msk [vmem:[%s11762_s2 + $0x314] sm:$0xf] %vm4524_vm3, %v10638_v16 }
 0x613   :  { %4723 = vst.msk [vmem:[%s11762_s2 + $0x318] sm:$0xf] %vm4524_vm3, %v14171_v51  ;;  %4724 = vst.msk [vmem:[%s11762_s2 + $0x31c] sm:$0xf] %vm4524_vm3, %v10648_v17 }
 0x614   :  { %4725 = vst.msk [vmem:[%s11762_s2 + $0x320] sm:$0xf] %vm4524_vm3, %v10653_v15  ;;  %4726 = vst.msk [vmem:[%s11762_s2 + $0x324] sm:$0xf] %vm4524_vm3, %v10658_v4 }
 0x615   :  { %4727 = vst.msk [vmem:[%s11762_s2 + $0x328] sm:$0xf] %vm4524_vm3, %v10663_v63  ;;  %4728 = vst.msk [vmem:[%s11762_s2 + $0x32c] sm:$0xf] %vm4524_vm3, %v14172_v19 }
 0x616   :  { %4729 = vst.msk [vmem:[%s11762_s2 + $0x330] sm:$0xf] %vm4524_vm3, %v10673_v20  ;;  %4730 = vst.msk [vmem:[%s11762_s2 + $0x334] sm:$0xf] %vm4524_vm3, %v10678_v37 }
 0x617   :  { %4731 = vst.msk [vmem:[%s11762_s2 + $0x338] sm:$0xf] %vm4524_vm3, %v10683_v53  ;;  %4732 = vst.msk [vmem:[%s11762_s2 + $0x33c] sm:$0xf] %vm4524_vm3, %v10688_v60 }
 0x618   :  { %4733 = vst.msk [vmem:[%s11762_s2 + $0x340] sm:$0xf] %vm4524_vm3, %v10693_v10  ;;  %4734 = vst.msk [vmem:[%s11762_s2 + $0x344] sm:$0xf] %vm4524_vm3, %v10698_v38 }
 0x619   :  { %4736 = vst.msk [vmem:[%s11762_s2 + $0x348] sm:$0x1] %vm4735_vm4, %v10703_v52 }

// kernel: forward.5
= control target key start
LH: loop header
LB: loop body
LE: loop exit
PB: predicated region body
PF: predicated region fallthrough
CT: control target
= control target key end

     0   :  { %v2491_v0 = vmov 0   ;;  %vm858_vm0 = vcmask 523264   ;;  %s3603_s1 = inlined_call_operand.vmem [shape: bf16[576,128], index: 1, kind: input, shape index: {}]   ;;  %s3604_s0 = inlined_call_operand.vmem [shape: bf16[288,576], index: 0, kind: input, shape index: {}]   ;;  %s3605_s2 = inlined_call_operand.vmem [shape: bf16[288,128], index: 2, kind: output, shape index: {}]  }
   0x1   :  { %913 = vmatprep.subr.bf16.mxu0 %v2491_v0  ;;  %2248 = vmatprep.subr.bf16.mxu1 %v2491_v0  ;;  %v2327_v1 = vld [vmem:[%s3603_s1] sm:$0xff]   ;;  %v2329_v3 = vld [vmem:[%s3603_s1 + $0x8] sm:$0xff]   ;;  %v2331_v5 = vld [vmem:[%s3603_s1 + $0x10] sm:$0xff]  }
   0x2   :  { %v2515_v2 = vld [vmem:[%s3603_s1 + $0x80] sm:$0xff]   ;;  %914 = vmatpush1.bf16.msra.mxu0 %v2327_v1  ;;  %v2525_v4 = vld [vmem:[%s3603_s1 + $0x88] sm:$0xff]   ;;  %v2536_v6 = vld [vmem:[%s3603_s1 + $0x90] sm:$0xff]  }
   0x3   :  { %2264 = vmatpush1.bf16.msra.mxu1 %v2515_v2  ;;  %915 = vmatprep.subr.bf16.mxu0 %v2491_v0  ;;  %v2333_v7 = vld [vmem:[%s3603_s1 + $0x18] sm:$0xff]   ;;  %v2335_v9 = vld [vmem:[%s3603_s1 + $0x20] sm:$0xff]   ;;  %v2337_v11 = vld [vmem:[%s3603_s1 + $0x28] sm:$0xff]  }
   0x4   :  { %2249 = vmatprep.subr.bf16.mxu1 %v2491_v0  ;;  %v2547_v8 = vld [vmem:[%s3603_s1 + $0x98] sm:$0xff]   ;;  %v2558_v10 = vld [vmem:[%s3603_s1 + $0xa0] sm:$0xff]   ;;  %v2569_v12 = vld [vmem:[%s3603_s1 + $0xa8] sm:$0xff]  }
   0x5   :  { %v2339_v13 = vld [vmem:[%s3603_s1 + $0x30] sm:$0xff]   ;;  %v2341_v15 = vld [vmem:[%s3603_s1 + $0x38] sm:$0xff]   ;;  %v2343_v17 = vld [vmem:[%s3603_s1 + $0x40] sm:$0xff]  }
   0x6   :  { %916 = vmatpush1.bf16.msra.mxu0 %v2329_v3  ;;  %v2580_v14 = vld [vmem:[%s3603_s1 + $0xb0] sm:$0xff]   ;;  %v2591_v16 = vld [vmem:[%s3603_s1 + $0xb8] sm:$0xff]   ;;  %v2602_v18 = vld [vmem:[%s3603_s1 + $0xc0] sm:$0xff]  }
   0x7   :  { %2265 = vmatpush1.bf16.msra.mxu1 %v2525_v4  ;;  %917 = vmatprep.subr.bf16.mxu0 %v2491_v0  ;;  %v2361_v19 = vld [vmem:[%s3604_s0 + $0x4] ss:$20 sps:$4 sm:$0xff]   ;;  %v2345_v20 = vld [vmem:[%s3603_s1 + $0x48] sm:$0xff]   ;;  %v2347_v23 = vld [vmem:[%s3603_s1 + $0x50] sm:$0xff]  }
   0x8   :  { %2250 = vmatprep.subr.bf16.mxu1 %v2491_v0  ;;  %v2364_v21 = vld [vmem:[%s3604_s0 + $0xd4] ss:$20 sps:$4 sm:$0xff]   ;;  %945 = vmatprep.mubr.bf16.mxu0 %v2361_v19  ;;  %v2349_v25 = vld [vmem:[%s3603_s1 + $0x58] sm:$0xff]   ;;  %v2351_v27 = vld [vmem:[%s3603_s1 + $0x60] sm:$0xff]  }
   0x9   :  { %v2619_v22 = vld [vmem:[%s3603_s1 + $0xc8] sm:$0xff]   ;;  %1162 = vmatprep.mubr.bf16.mxu1 %v2364_v21  ;;  %v2630_v24 = vld [vmem:[%s3603_s1 + $0xd0] sm:$0xff]   ;;  %v2641_v26 = vld [vmem:[%s3603_s1 + $0xd8] sm:$0xff]  }
   0xa   :  { %918 = vmatpush1.bf16.msra.mxu0 %v2331_v5  ;;  %v2652_v28 = vld [vmem:[%s3603_s1 + $0xe0] sm:$0xff]   ;;  %v2353_v29 = vld [vmem:[%s3603_s1 + $0x68] sm:$0xff]   ;;  %v2355_v31 = vld [vmem:[%s3603_s1 + $0x70] sm:$0xff]  }
   0xb   :  { %2266 = vmatpush1.bf16.msra.mxu1 %v2536_v6  ;;  %919 = vmatprep.subr.bf16.mxu0 %v2491_v0  ;;  %v2663_v30 = vld [vmem:[%s3603_s1 + $0xe8] sm:$0xff]   ;;  %v2674_v32 = vld [vmem:[%s3603_s1 + $0xf0] sm:$0xff]   ;;  %v2357_v33 = vld [vmem:[%s3603_s1 + $0x78] sm:$0xff]  }
   0xc   :  { %2251 = vmatprep.subr.bf16.mxu1 %v2491_v0  ;;  %v2685_v34 = vld [vmem:[%s3603_s1 + $0xf8] sm:$0xff]   ;;  %v2405_v35 = vld [vmem:[%s3603_s1 + $0x100] sm:$0xff]   ;;  %v2426_v40 = vld [vmem:[%s3603_s1 + $0x108] sm:$0xff]  }
   0xd   :  { %v2359_v36 = vld [vmem:[%s3604_s0] ss:$20 sps:$4 sm:$0xff]   ;;  %v2362_v37 = vld [vmem:[%s3604_s0 + $0xd0] ss:$20 sps:$4 sm:$0xff]   ;;  %v2369_v41 = vld [vmem:[%s3604_s0 + $0x28] ss:$20 sps:$4 sm:$0xff]  }
   0xe   :  { %920 = vmatpush1.bf16.msra.mxu0 %v2333_v7  ;;  %v2365_v38 = vld [vmem:[%s3604_s0 + $0x2c] ss:$20 sps:$4 sm:$0xff]   ;;  %v2367_v39 = vld [vmem:[%s3604_s0 + $0xfc] ss:$20 sps:$4 sm:$0xff]   ;;  %v2371_v44 = vld [vmem:[%s3604_s0 + $0x54] ss:$20 sps:$4 sm:$0xff]  }
   0xf   :  { %2267 = vmatpush1.bf16.msra.mxu1 %v2547_v8  ;;  %921 = vmatprep.subr.bf16.mxu0 %v2491_v0  ;;  %v2370_v42 = vld [vmem:[%s3604_s0 + $0xf8] ss:$20 sps:$4 sm:$0xff]   ;;  %v2439_v43 = vld [vmem:[%s3603_s1 + $0x110] sm:$0xff]   ;;  %v2382_v52 = vld [vmem:[%s3604_s0 + $0x148] ss:$20 sps:$4 sm:$0xff]  }
  0x10   :  { %2252 = vmatprep.subr.bf16.mxu1 %v2491_v0  ;;  %v2373_v45 = vld [vmem:[%s3604_s0 + $0x124] ss:$20 sps:$4 sm:$0xff]   ;;  %v2376_v48 = vld [vmem:[%s3604_s0 + $0x120] ss:$20 sps:$4 sm:$0xff]   ;;  %v2377_v49 = vld [vmem:[%s3604_s0 + $0x7c] ss:$20 sps:$4 sm:$0xff]  }
  0x11   :  { %v2440_v46 = vld [vmem:[%s3603_s1 + $0x118] sm:$0xff]   ;;  %v2375_v47 = vld [vmem:[%s3604_s0 + $0x50] ss:$20 sps:$4 sm:$0xff]   ;;  %v2379_v50 = vld [vmem:[%s3604_s0 + $0x14c] ss:$20 sps:$4 sm:$0xff]  }
  0x12   :  { %922 = vmatpush1.bf16.msra.mxu0 %v2335_v9  ;;  %v2381_v51 = vld [vmem:[%s3604_s0 + $0x78] ss:$20 sps:$4 sm:$0xff]   ;;  %v2385_v54 = vld [vmem:[%s3604_s0 + $0x174] ss:$20 sps:$4 sm:$0xff]   ;;  %v2388_v56 = vld [vmem:[%s3604_s0 + $0x170] ss:$20 sps:$4 sm:$0xff]  }
  0x13   :  { %2268 = vmatpush1.bf16.msra.mxu1 %v2558_v10  ;;  %923 = vmatprep.subr.bf16.mxu0 %v2491_v0  ;;  %v2383_v53 = vld [vmem:[%s3604_s0 + $0xa4] ss:$20 sps:$4 sm:$0xff]   ;;  %v2387_v55 = vld [vmem:[%s3604_s0 + $0xa0] ss:$20 sps:$4 sm:$0xff]   ;;  %v2391_v58 = vld [vmem:[%s3604_s0 + $0x19c] ss:$20 sps:$4 sm:$0xff]  }
  0x14   :  { %2253 = vmatprep.subr.bf16.mxu1 %v2491_v0  ;;  %v2389_v57 = vld [vmem:[%s3604_s0 + $0xcc] ss:$20 sps:$4 sm:$0xff]   ;;  %v2393_v59 = vld [vmem:[%s3604_s0 + $0xc8] ss:$20 sps:$4 sm:$0xff]   ;;  %v2397_v62 = vld [vmem:[%s3604_s0 + $0x1c4] ss:$20 sps:$4 sm:$0xff]  }
  0x15   :  { %v2394_v60 = vld [vmem:[%s3604_s0 + $0x198] ss:$20 sps:$4 sm:$0xff]   ;;  %v2395_v61 = vld [vmem:[%s3604_s0 + $0xf4] ss:$20 sps:$4 sm:$0xff]   ;;  %v2399_v63 = vld [vmem:[%s3604_s0 + $0xf0] ss:$20 sps:$4 sm:$0xff]  }
  0x16   :  { %924 = vmatpush1.bf16.msra.mxu0 %v2337_v11  ;;  %v2400_v1 = vld [vmem:[%s3604_s0 + $0x1c0] ss:$20 sps:$4 sm:$0xff]   ;;  %v2407_v5 = vld [vmem:[%s3604_s0 + $0x1e8] ss:$20 sps:$4 sm:$0xff]   ;;  %v2413_v9 = vld [vmem:[%s3604_s0 + $0x210] ss:$20 sps:$4 sm:$0xff]  }
  0x17   :  { %2269 = vmatpush1.bf16.msra.mxu1 %v2569_v12  ;;  %925 = vmatprep.subr.bf16.mxu0 %v2491_v0  ;;  %v2403_v3 = vld [vmem:[%s3604_s0 + $0x1ec] ss:$20 sps:$4 sm:$0xff]   ;;  %v2410_v7 = vld [vmem:[%s3604_s0 + $0x214] ss:$20 sps:$4 sm:$0xff]   ;;  %v2416_v11 = vld [vmem:[%s3604_s0 + $0x23c] ss:$20 sps:$4 sm:$0xff]  }
  0x18   :  { %2254 = vmatprep.subr.bf16.mxu1 %v2491_v0  ;;  %v2431_v19 = vld [vmem:[%s3604_s0 + $0x1b8] ss:$20 sps:$4 sm:$0xff]  }
  0x19   :  { %v2433_v21 = vld [vmem:[%s3604_s0 + $0x1e4] ss:$20 sps:$4 sm:$0xff]  }
  0x1a   :  { %926 = vmatpush1.bf16.msra.mxu0 %v2339_v13  ;;  %v2420_v13 = vld [vmem:[%s3604_s0 + $0x194] ss:$20 sps:$4 sm:$0xff]  }
  0x1b   :  { %2270 = vmatpush1.bf16.msra.mxu1 %v2580_v14  ;;  %927 = vmatprep.subr.bf16.mxu0 %v2491_v0 }
  0x1c   :  { %2255 = vmatprep.subr.bf16.mxu1 %v2491_v0 }
  0x1e   :  { %928 = vmatpush1.bf16.msra.mxu0 %v2341_v15  ;;  %v2424_v15 = vld [vmem:[%s3604_s0 + $0x190] ss:$20 sps:$4 sm:$0xff]  }
  0x1f   :  { %2271 = vmatpush1.bf16.msra.mxu1 %v2591_v16  ;;  %929 = vmatprep.subr.bf16.mxu0 %v2491_v0 }
  0x20   :  { %2256 = vmatprep.subr.bf16.mxu1 %v2491_v0 }
  0x22   :  { %930 = vmatpush1.bf16.msra.mxu0 %v2343_v17  ;;  %v2427_v17 = vld [vmem:[%s3604_s0 + $0x1bc] ss:$20 sps:$4 sm:$0xff]  }
  0x23   :  { %2272 = vmatpush1.bf16.msra.mxu1 %v2602_v18  ;;  %931 = vmatprep.subr.bf16.mxu0 %v2491_v0 }
  0x24   :  { %2257 = vmatprep.subr.bf16.mxu1 %v2491_v0 }
  0x26   :  { %932 = vmatpush1.bf16.msra.mxu0 %v2345_v20  ;;  %v2432_v20 = vld [vmem:[%s3604_s0 + $0x288] ss:$20 sps:$4 sm:$0xff]  }
  0x27   :  { %2273 = vmatpush1.bf16.msra.mxu1 %v2619_v22  ;;  %933 = vmatprep.subr.bf16.mxu0 %v2491_v0 }
  0x28   :  { %2258 = vmatprep.subr.bf16.mxu1 %v2491_v0 }
  0x2a   :  { %934 = vmatpush1.bf16.msra.mxu0 %v2347_v23  ;;  %v2437_v23 = vld [vmem:[%s3604_s0 + $0x1e0] ss:$20 sps:$4 sm:$0xff]  }
  0x2b   :  { %2274 = vmatpush1.bf16.msra.mxu1 %v2630_v24  ;;  %935 = vmatprep.subr.bf16.mxu0 %v2491_v0 }
  0x2c   :  { %2259 = vmatprep.subr.bf16.mxu1 %v2491_v0 }
  0x2e   :  { %936 = vmatpush1.bf16.msra.mxu0 %v2349_v25  ;;  %v2441_v25 = vld [vmem:[%s3604_s0 + $0x20c] ss:$20 sps:$4 sm:$0xff]  }
  0x2f   :  { %2275 = vmatpush1.bf16.msra.mxu1 %v2641_v26  ;;  %937 = vmatprep.subr.bf16.mxu0 %v2491_v0 }
  0x30   :  { %2260 = vmatprep.subr.bf16.mxu1 %v2491_v0 }
  0x32   :  { %938 = vmatpush1.bf16.msra.mxu0 %v2351_v27  ;;  %v2444_v27 = vld [vmem:[%s3604_s0 + $0x208] ss:$20 sps:$4 sm:$0xff]  }
  0x33   :  { %2276 = vmatpush1.bf16.msra.mxu1 %v2652_v28  ;;  %939 = vmatprep.subr.bf16.mxu0 %v2491_v0 }
  0x34   :  { %2261 = vmatprep.subr.bf16.mxu1 %v2491_v0 }
  0x36   :  { %940 = vmatpush1.bf16.msra.mxu0 %v2353_v29  ;;  %v2446_v29 = vld [vmem:[%s3604_s0 + $0x234] ss:$20 sps:$4 sm:$0xff]  }
  0x37   :  { %2277 = vmatpush1.bf16.msra.mxu1 %v2663_v30  ;;  %941 = vmatprep.subr.bf16.mxu0 %v2491_v0 }
  0x38   :  { %2262 = vmatprep.subr.bf16.mxu1 %v2491_v0 }
  0x3a   :  { %942 = vmatpush1.bf16.msra.mxu0 %v2355_v31  ;;  %v2449_v31 = vld [vmem:[%s3604_s0 + $0x230] ss:$20 sps:$4 sm:$0xff]  }
  0x3b   :  { %2278 = vmatpush1.bf16.msra.mxu1 %v2674_v32  ;;  %943 = vmatprep.subr.bf16.mxu0 %v2491_v0 }
  0x3c   :  { %2263 = vmatprep.subr.bf16.mxu1 %v2491_v0 }
  0x3e   :  { %944 = vmatpush1.bf16.msra.mxu0 %v2357_v33  ;;  %v2451_v33 = vld [vmem:[%s3604_s0 + $0x25c] ss:$20 sps:$4 sm:$0xff]  }
  0x3f   :  { %2279 = vmatpush1.bf16.msra.mxu1 %v2685_v34  ;;  %1090 = vmatprep.subr.bf16.mxu0 %v2491_v0 }
  0x40   :  { %2204 = vmatprep.subr.bf16.mxu1 %v2405_v35 }
  0x41   :  { %946 = vmatmul.mubr.bf16.vlgmr.msra.gmra.mrb[0].mxu0 %v2359_v36  ;;  %v2455_v36 = vld [vmem:[%s3604_s0 + $0xd8] ss:$20 sps:$4 sm:$0xff]  }
  0x42   :  { %1163 = vmatmul.mubr.bf16.vlgmr.msra.gmra.mrb[0].mxu1 %v2362_v37  ;;  %1091 = vmatpush1.bf16.msra.mxu0 %v2515_v2  ;;  %v2401_v2 = vld [vmem:[%s3604_s0 + $0x11c] ss:$20 sps:$4 sm:$0xff]   ;;  %v2456_v37 = vld [vmem:[%s3604_s0 + $0x284] ss:$20 sps:$4 sm:$0xff]  }
  0x43   :  { %953 = vmatprep.mubr.bf16.mxu0 %v2365_v38  ;;  %1170 = vmatprep.mubr.bf16.mxu1 %v2367_v39  ;;  %v2458_v38 = vld [vmem:[%s3604_s0 + $0x100] ss:$20 sps:$4 sm:$0xff]  }
  0x44   :  { %1092 = vmatprep.subr.bf16.mxu0 %v2491_v0  ;;  %2205 = vmatpush3.bf16.msra.mxu1 %v2405_v35  ;;  %v2454_v35 = vld [vmem:[%s3604_s0 + $0x258] ss:$20 sps:$4 sm:$0xff]   ;;  %v2459_v39 = vld [vmem:[%s3604_s0 + $0x280] ss:$20 sps:$4 sm:$0xff]  }
  0x45   :  { %2206 = vmatprep.subr.bf16.mxu1 %v2426_v40 }
  0x46   :  { %1093 = vmatpush1.bf16.msra.mxu0 %v2525_v4  ;;  %v2406_v4 = vld [vmem:[%s3604_s0 + $0x118] ss:$20 sps:$4 sm:$0xff]  }
  0x47   :  { %1094 = vmatprep.subr.bf16.mxu0 %v2491_v0 }
  0x48   :  { %2207 = vmatpush3.bf16.msra.mxu1 %v2426_v40  ;;  %v2460_v40 = vld [vmem:[%s3604_s0 + $0x128] ss:$20 sps:$4 sm:$0xff]  }
  0x49   :  { %954 = vmatmul.mubr.bf16.gmra.mrb[4].mxu0 %v2369_v41  ;;  %2208 = vmatprep.subr.bf16.mxu1 %v2439_v43  ;;  %v2461_v41 = vld [vmem:[%s3604_s0 + $0x2ac] ss:$20 sps:$4 sm:$0xff]  }
  0x4a   :  { %1171 = vmatmul.mubr.bf16.gmra.mrb[4].mxu1 %v2370_v42  ;;  %961 = vmatprep.mubr.bf16.mxu0 %v2371_v44  ;;  %v2463_v42 = vld [vmem:[%s3604_s0 + $0x150] ss:$20 sps:$4 sm:$0xff]   ;;  %v2465_v44 = vld [vmem:[%s3604_s0 + $0x178] ss:$20 sps:$4 sm:$0xff]  }
  0x4b   :  { %1178 = vmatprep.mubr.bf16.mxu1 %v2373_v45  ;;  %1095 = vmatpush1.bf16.msra.mxu0 %v2536_v6  ;;  %v2408_v6 = vld [vmem:[%s3604_s0 + $0x144] ss:$20 sps:$4 sm:$0xff]   ;;  %v2468_v45 = vld [vmem:[%s3604_s0 + $0xc] ss:$20 sps:$4 sm:$0xff]  }
  0x4c   :  { %1096 = vmatprep.subr.bf16.mxu0 %v2491_v0  ;;  %2209 = vmatpush3.bf16.msra.mxu1 %v2439_v43  ;;  %v2464_v43 = vld [vmem:[%s3604_s0 + $0x2a8] ss:$20 sps:$4 sm:$0xff]  }
  0x4d   :  { %2210 = vmatprep.subr.bf16.mxu1 %v2440_v46 }
  0x4f   :  { %1097 = vmatpush1.bf16.msra.mxu0 %v2547_v8  ;;  %v2412_v8 = vld [vmem:[%s3604_s0 + $0x140] ss:$20 sps:$4 sm:$0xff]  }
  0x50   :  { %1098 = vmatprep.subr.bf16.mxu0 %v2491_v0  ;;  %2211 = vmatpush3.bf16.msra.mxu1 %v2440_v46  ;;  %v2469_v46 = vld [vmem:[%s3604_s0 + $0x1a0] ss:$20 sps:$4 sm:$0xff]  }
  0x51   :  { %962 = vmatmul.mubr.bf16.gmra.mrb[8].mxu0 %v2375_v47  ;;  %v2466_v47 = vld [vmem:[%s3604_s0 + $0x8] ss:$20 sps:$4 sm:$0xff]  }
  0x52   :  { %1179 = vmatmul.mubr.bf16.gmra.mrb[8].mxu1 %v2376_v48  ;;  %969 = vmatprep.mubr.bf16.mxu0 %v2377_v49  ;;  %v2470_v48 = vld [vmem:[%s3604_s0 + $0x1c8] ss:$20 sps:$4 sm:$0xff]  }
  0x53   :  { %1186 = vmatprep.mubr.bf16.mxu1 %v2379_v50  ;;  %1099 = vmatpush1.bf16.msra.mxu0 %v2558_v10  ;;  %v2414_v10 = vld [vmem:[%s3604_s0 + $0x16c] ss:$20 sps:$4 sm:$0xff]   ;;  %v2471_v49 = vld [vmem:[%s3604_s0 + $0x34] ss:$20 sps:$4 sm:$0xff]   ;;  %v2473_v50 = vld [vmem:[%s3604_s0 + $0x1f0] ss:$20 sps:$4 sm:$0xff]  }
  0x54   :  { %1100 = vmatprep.subr.bf16.mxu0 %v2491_v0 }
  0x57   :  { %1101 = vmatpush1.bf16.msra.mxu0 %v2569_v12  ;;  %v2419_v12 = vld [vmem:[%s3604_s0 + $0x238] ss:$20 sps:$4 sm:$0xff]  }
  0x58   :  { %1102 = vmatprep.subr.bf16.mxu0 %v2491_v0 }
  0x59   :  { %970 = vmatmul.mubr.bf16.gmra.mrb[12].mxu0 %v2381_v51  ;;  %v2474_v51 = vld [vmem:[%s3604_s0 + $0x30] ss:$20 sps:$4 sm:$0xff]  }
  0x5a   :  { %1187 = vmatmul.mubr.bf16.gmra.mrb[12].mxu1 %v2382_v52  ;;  %977 = vmatprep.mubr.bf16.mxu0 %v2383_v53  ;;  %v2475_v52 = vld [vmem:[%s3604_s0 + $0x218] ss:$20 sps:$4 sm:$0xff]   ;;  %v2476_v53 = vld [vmem:[%s3604_s0 + $0x5c] ss:$20 sps:$4 sm:$0xff]  }
  0x5b   :  { %1194 = vmatprep.mubr.bf16.mxu1 %v2385_v54  ;;  %1103 = vmatpush1.bf16.msra.mxu0 %v2580_v14  ;;  %v2422_v14 = vld [vmem:[%s3604_s0 + $0x264] ss:$20 sps:$4 sm:$0xff]   ;;  %v2478_v54 = vld [vmem:[%s3604_s0 + $0x240] ss:$20 sps:$4 sm:$0xff]  }
  0x5c   :  { %1104 = vmatprep.subr.bf16.mxu0 %v2491_v0 }
  0x5f   :  { %1105 = vmatpush1.bf16.msra.mxu0 %v2591_v16  ;;  %v2425_v16 = vld [vmem:[%s3604_s0 + $0x260] ss:$20 sps:$4 sm:$0xff]  }
  0x60   :  { %1106 = vmatprep.subr.bf16.mxu0 %v2491_v0 }
  0x61   :  { %978 = vmatmul.mubr.bf16.gmra.mrb[16].mxu0 %v2387_v55  ;;  %v2479_v55 = vld [vmem:[%s3604_s0 + $0x58] ss:$20 sps:$4 sm:$0xff]  }
  0x62   :  { %1195 = vmatmul.mubr.bf16.gmra.mrb[16].mxu1 %v2388_v56  ;;  %985 = vmatprep.mubr.bf16.mxu0 %v2389_v57  ;;  %v2480_v56 = vld [vmem:[%s3604_s0 + $0x268] ss:$20 sps:$4 sm:$0xff]   ;;  %v2481_v57 = vld [vmem:[%s3604_s0 + $0x84] ss:$20 sps:$4 sm:$0xff]  }
  0x63   :  { %1202 = vmatprep.mubr.bf16.mxu1 %v2391_v58  ;;  %1107 = vmatpush1.bf16.msra.mxu0 %v2602_v18  ;;  %v2429_v18 = vld [vmem:[%s3604_s0 + $0x28c] ss:$20 sps:$4 sm:$0xff]   ;;  %v2483_v58 = vld [vmem:[%s3604_s0 + $0x290] ss:$20 sps:$4 sm:$0xff]  }
  0x64   :  { %1108 = vmatprep.subr.bf16.mxu0 %v2491_v0 }
  0x67   :  { %1109 = vmatpush1.bf16.msra.mxu0 %v2619_v22  ;;  %v2435_v22 = vld [vmem:[%s3604_s0 + $0x2b4] ss:$20 sps:$4 sm:$0xff]  }
  0x68   :  { %1110 = vmatprep.subr.bf16.mxu0 %v2491_v0 }
  0x69   :  { %986 = vmatmul.mubr.bf16.gmra.mrb[20].mxu0 %v2393_v59  ;;  %v2484_v59 = vld [vmem:[%s3604_s0 + $0x80] ss:$20 sps:$4 sm:$0xff]  }
  0x6a   :  { %1203 = vmatmul.mubr.bf16.gmra.mrb[20].mxu1 %v2394_v60  ;;  %993 = vmatprep.mubr.bf16.mxu0 %v2395_v61  ;;  %v2485_v60 = vld [vmem:[%s3604_s0 + $0x2b8] ss:$20 sps:$4 sm:$0xff]  }
  0x6b   :  { %1210 = vmatprep.mubr.bf16.mxu1 %v2397_v62  ;;  %1111 = vmatpush1.bf16.msra.mxu0 %v2630_v24  ;;  %v2438_v24 = vld [vmem:[%s3604_s0 + $0x2b0] ss:$20 sps:$4 sm:$0xff]   ;;  %v2486_v61 = vld [vmem:[%s3604_s0 + $0xac] ss:$20 sps:$4 sm:$0xff]   ;;  %v2488_v62 = vld [vmem:[%s3604_s0 + $0xa8] ss:$20 sps:$4 sm:$0xff]  }
  0x6c   :  { %1112 = vmatprep.subr.bf16.mxu0 %v2491_v0 }
  0x6f   :  { %1113 = vmatpush1.bf16.msra.mxu0 %v2641_v26  ;;  %v2443_v26 = vld [vmem:[%s3604_s0 + $0x10] ss:$20 sps:$4 sm:$0xff]  }
  0x70   :  { %1114 = vmatprep.subr.bf16.mxu0 %v2491_v0 }
  0x71   :  { %994 = vmatmul.mubr.bf16.gmra.mrb[24].mxu0 %v2399_v63 }
  0x72   :  { %1211 = vmatmul.mubr.bf16.gmra.mrb[24].mxu1 %v2400_v1  ;;  %1001 = vmatprep.mubr.bf16.mxu0 %v2401_v2 }
  0x73   :  { %1218 = vmatprep.mubr.bf16.mxu1 %v2403_v3  ;;  %1115 = vmatpush1.bf16.msra.mxu0 %v2652_v28  ;;  %v2445_v28 = vld [vmem:[%s3604_s0 + $0x38] ss:$20 sps:$4 sm:$0xff]  }
  0x74   :  { %1116 = vmatprep.subr.bf16.mxu0 %v2491_v0 }
  0x77   :  { %1117 = vmatpush1.bf16.msra.mxu0 %v2663_v30  ;;  %v2448_v30 = vld [vmem:[%s3604_s0 + $0x60] ss:$20 sps:$4 sm:$0xff]  }
  0x78   :  { %1118 = vmatprep.subr.bf16.mxu0 %v2491_v0 }
  0x79   :  { %1002 = vmatmul.mubr.bf16.gmra.mrb[28].mxu0 %v2406_v4 }
  0x7a   :  { %1219 = vmatmul.mubr.bf16.gmra.mrb[28].mxu1 %v2407_v5  ;;  %1009 = vmatprep.mubr.bf16.mxu0 %v2408_v6 }
  0x7b   :  { %1226 = vmatprep.mubr.bf16.mxu1 %v2410_v7  ;;  %1119 = vmatpush1.bf16.msra.mxu0 %v2674_v32  ;;  %v2450_v32 = vld [vmem:[%s3604_s0 + $0x88] ss:$20 sps:$4 sm:$0xff]  }
  0x7c   :  { %1120 = vmatprep.subr.bf16.mxu0 %v2491_v0  ;;  %v2418_v0 = vld [vmem:[%s3604_s0 + $0x168] ss:$20 sps:$4 sm:$0xff]  }
  0x7f   :  { %1121 = vmatpush1.bf16.msra.mxu0 %v2685_v34  ;;  %v2453_v34 = vld [vmem:[%s3604_s0 + $0xb0] ss:$20 sps:$4 sm:$0xff]  }
  0x81   :  { %1010 = vmatmul.mubr.bf16.gmra.mrb[32].mxu0 %v2412_v8 }
  0x82   :  { %1227 = vmatmul.mubr.bf16.gmra.mrb[32].mxu1 %v2413_v9  ;;  %1017 = vmatprep.mubr.bf16.mxu0 %v2414_v10 }
  0x83   :  { %1234 = vmatprep.mubr.bf16.mxu1 %v2416_v11 }
  0x89   :  { %1018 = vmatmul.mubr.bf16.gmra.mrb[36].mxu0 %v2418_v0 }
  0x8a   :  { %1235 = vmatmul.mubr.bf16.gmra.mrb[36].mxu1 %v2419_v12  ;;  %1025 = vmatprep.mubr.bf16.mxu0 %v2420_v13 }
  0x8b   :  { %1242 = vmatprep.mubr.bf16.mxu1 %v2422_v14 }
  0x91   :  { %1026 = vmatmul.mubr.bf16.gmra.mrb[40].mxu0 %v2424_v15 }
  0x92   :  { %1243 = vmatmul.mubr.bf16.gmra.mrb[40].mxu1 %v2425_v16  ;;  %1033 = vmatprep.mubr.bf16.mxu0 %v2427_v17 }
  0x93   :  { %1250 = vmatprep.mubr.bf16.mxu1 %v2429_v18 }
  0x99   :  { %1034 = vmatmul.mubr.bf16.gmra.mrb[44].mxu0 %v2431_v19 }
  0x9a   :  { %1251 = vmatmul.mubr.bf16.gmra.mrb[44].mxu1 %v2432_v20  ;;  %1041 = vmatprep.mubr.bf16.mxu0 %v2433_v21 }
  0x9b   :  { %1258 = vmatprep.mubr.bf16.mxu1 %v2435_v22 }
  0xa1   :  { %1042 = vmatmul.mubr.bf16.gmra.mrb[48].mxu0 %v2437_v23 }
  0xa2   :  { %1259 = vmatmul.mubr.bf16.gmra.mrb[48].mxu1 %v2438_v24  ;;  %1049 = vmatprep.mubr.bf16.mxu0 %v2441_v25 }
  0xa3   :  { %2212 = vmatprep.mubr.msk.bf16.mxu1 %vm858_vm0, %v2443_v26 }
  0xa9   :  { %1050 = vmatmul.mubr.bf16.gmra.mrb[52].mxu0 %v2444_v27 }
  0xaa   :  { %2213 = vmatmul.mubr.msk.bf16.vlgmr.msra.gmra.mrb[52].mxu1 %vm858_vm0, %v2445_v28  ;;  %1057 = vmatprep.mubr.bf16.mxu0 %v2446_v29 }
  0xab   :  { %2216 = vmatprep.mubr.msk.bf16.mxu1 %vm858_vm0, %v2448_v30 }
  0xb1   :  { %1058 = vmatmul.mubr.bf16.gmra.mrb[56].mxu0 %v2449_v31 }
  0xb2   :  { %2217 = vmatmul.mubr.msk.bf16.gmra.mrb[56].mxu1 %vm858_vm0, %v2450_v32  ;;  %1065 = vmatprep.mubr.bf16.mxu0 %v2451_v33 }
  0xb3   :  { %2220 = vmatprep.mubr.msk.bf16.mxu1 %vm858_vm0, %v2453_v34 }
  0xb9   :  { %1066 = vmatmul.mubr.bf16.gmra.mrb[60].mxu0 %v2454_v35 }
  0xba   :  { %2221 = vmatmul.mubr.msk.bf16.gmra.mrb[60].mxu1 %vm858_vm0, %v2455_v36  ;;  %1073 = vmatprep.mubr.bf16.mxu0 %v2456_v37 }
  0xbb   :  { %2224 = vmatprep.mubr.msk.bf16.mxu1 %vm858_vm0, %v2458_v38 }
  0xc1   :  { %1074 = vmatmul.mubr.bf16.gmra.mrb[64].mxu0 %v2459_v39 }
  0xc2   :  { %2225 = vmatmul.mubr.msk.bf16.gmra.mrb[64].mxu1 %vm858_vm0, %v2460_v40  ;;  %1081 = vmatprep.mubr.bf16.mxu0 %v2461_v41 }
  0xc3   :  { %2228 = vmatprep.mubr.msk.bf16.mxu1 %vm858_vm0, %v2463_v42 }
  0xc9   :  { %1082 = vmatmul.mubr.bf16.gmra.mrb[68].mxu0 %v2464_v43 }
  0xca   :  { %2229 = vmatmul.mubr.msk.bf16.gmra.mrb[68].mxu1 %vm858_vm0, %v2465_v44  ;;  %1122 = vmatprep.mubr.bf16.mxu0 %v2468_v45 }
  0xcb   :  { %2232 = vmatprep.mubr.msk.bf16.mxu1 %vm858_vm0, %v2469_v46 }
  0xd1   :  { %1123 = vmatmul.mubr.bf16.vlgmr.msra.gmra.mrb[0].mxu0 %v2466_v47 }
  0xd2   :  { %2233 = vmatmul.mubr.msk.bf16.gmra.mrb[72].mxu1 %vm858_vm0, %v2470_v48  ;;  %1130 = vmatprep.mubr.bf16.mxu0 %v2471_v49 }
  0xd3   :  { %2236 = vmatprep.mubr.msk.bf16.mxu1 %vm858_vm0, %v2473_v50 }
  0xd9   :  { %1131 = vmatmul.mubr.bf16.gmra.mrb[4].mxu0 %v2474_v51 }
  0xda   :  { %2237 = vmatmul.mubr.msk.bf16.gmra.mrb[76].mxu1 %vm858_vm0, %v2475_v52  ;;  %1138 = vmatprep.mubr.bf16.mxu0 %v2476_v53 }
  0xdb   :  { %2240 = vmatprep.mubr.msk.bf16.mxu1 %vm858_vm0, %v2478_v54 }
  0xe1   :  { %1139 = vmatmul.mubr.bf16.gmra.mrb[8].mxu0 %v2479_v55 }
  0xe2   :  { %2241 = vmatmul.mubr.msk.bf16.gmra.mrb[80].mxu1 %vm858_vm0, %v2480_v56  ;;  %1146 = vmatprep.mubr.bf16.mxu0 %v2481_v57 }
  0xe3   :  { %2244 = vmatprep.mubr.msk.bf16.mxu1 %vm858_vm0, %v2483_v58 }
  0xe9   :  { %1147 = vmatmul.mubr.bf16.gmra.mrb[12].mxu0 %v2484_v59 }
  0xea   :  { %2245 = vmatmul.mubr.msk.bf16.gmra.mrb[84].mxu1 %vm858_vm0, %v2485_v60  ;;  %1154 = vmatprep.mubr.bf16.mxu0 %v2486_v61 }
  0xf1   :  { %1155 = vmatmul.mubr.bf16.gmra.mrb[16].mxu0 %v2488_v62 }
 0x115   :  { %v1164_v63 = vpop.f32.mrb[0].mxu1 }
 0x116   :  { %v1166_v1 = vpop.f32.mrb[1].mxu1 }
 0x117   :  { %v1167_v2 = vpop.f32.mrb[2].mxu1 }
 0x118   :  { %v1169_v3 = vpop.f32.mrb[3].mxu1 }
 0x11d   :  { %v1172_v4 = vpop.f32.mrb[4].mxu1 }
 0x11e   :  { %v1174_v5 = vpop.f32.mrb[5].mxu1 }
 0x11f   :  { %v1175_v6 = vpop.f32.mrb[6].mxu1 }
 0x120   :  { %v1177_v7 = vpop.f32.mrb[7].mxu1 }
 0x125   :  { %v1180_v8 = vpop.f32.mrb[8].mxu1 }
 0x126   :  { %v1182_v9 = vpop.f32.mrb[9].mxu1 }
 0x127   :  { %v1183_v10 = vpop.f32.mrb[10].mxu1 }
 0x128   :  { %v1185_v11 = vpop.f32.mrb[11].mxu1 }
 0x12d   :  { %v1188_v0 = vpop.f32.mrb[12].mxu1 }
 0x12e   :  { %v1190_v12 = vpop.f32.mrb[13].mxu1 }
 0x12f   :  { %v1191_v13 = vpop.f32.mrb[14].mxu1 }
 0x130   :  { %v1193_v14 = vpop.f32.mrb[15].mxu1 }
 0x135   :  { %v1196_v15 = vpop.f32.mrb[16].mxu1 }
 0x136   :  { %v1198_v16 = vpop.f32.mrb[17].mxu1 }
 0x137   :  { %v1199_v17 = vpop.f32.mrb[18].mxu1 }
 0x138   :  { %v1201_v18 = vpop.f32.mrb[19].mxu1 }
 0x13c   :  { %v987_v19 = vpop.f32.mrb[20].mxu0 }
 0x13d   :  { %v3015_v20 = vadd.f32 %v1164_v63, %v987_v19  ;;  %v989_v21 = vpop.f32.mrb[21].mxu0  ;;  %v1204_v22 = vpop.f32.mrb[20].mxu1 }
 0x13e   :  { %v990_v23 = vpop.f32.mrb[22].mxu0  ;;  %v1206_v24 = vpop.f32.mrb[21].mxu1 }
 0x13f   :  { %v3017_v25 = vadd.f32 %v1167_v2, %v990_v23  ;;  %v992_v26 = vpop.f32.mrb[23].mxu0  ;;  %v1207_v27 = vpop.f32.mrb[22].mxu1 }
 0x140   :  { %v1209_v28 = vpop.f32.mrb[23].mxu1 }
 0x144   :  { %v995_v29 = vpop.f32.mrb[24].mxu0 }
 0x145   :  { %v3019_v30 = vadd.f32 %v1172_v4, %v995_v29  ;;  %v997_v31 = vpop.f32.mrb[25].mxu0  ;;  %v1212_v32 = vpop.f32.mrb[24].mxu1 }
 0x146   :  { %v998_v33 = vpop.f32.mrb[26].mxu0  ;;  %v1214_v34 = vpop.f32.mrb[25].mxu1 }
 0x147   :  { %v3021_v35 = vadd.f32 %v1175_v6, %v998_v33  ;;  %v1000_v36 = vpop.f32.mrb[27].mxu0  ;;  %v1215_v37 = vpop.f32.mrb[26].mxu1 }
 0x148   :  { %v1217_v38 = vpop.f32.mrb[27].mxu1 }
 0x14c   :  { %v1003_v39 = vpop.f32.mrb[28].mxu0 }
 0x14d   :  { %v3023_v40 = vadd.f32 %v1180_v8, %v1003_v39  ;;  %v1005_v41 = vpop.f32.mrb[29].mxu0  ;;  %v1220_v42 = vpop.f32.mrb[28].mxu1 }
 0x14e   :  { %v1006_v43 = vpop.f32.mrb[30].mxu0  ;;  %v1222_v44 = vpop.f32.mrb[29].mxu1 }
 0x14f   :  { %v3025_v45 = vadd.f32 %v1183_v10, %v1006_v43  ;;  %v1008_v46 = vpop.f32.mrb[31].mxu0  ;;  %v1223_v47 = vpop.f32.mrb[30].mxu1 }
 0x150   :  { %v1225_v48 = vpop.f32.mrb[31].mxu1 }
 0x154   :  { %v1011_v49 = vpop.f32.mrb[32].mxu0 }
 0x155   :  { %v3027_v50 = vadd.f32 %v1188_v0, %v1011_v49  ;;  %v1013_v51 = vpop.f32.mrb[33].mxu0  ;;  %v1228_v52 = vpop.f32.mrb[32].mxu1 }
 0x156   :  { %v1014_v53 = vpop.f32.mrb[34].mxu0  ;;  %v1230_v54 = vpop.f32.mrb[33].mxu1 }
 0x157   :  { %v3029_v55 = vadd.f32 %v1191_v13, %v1014_v53  ;;  %v1016_v56 = vpop.f32.mrb[35].mxu0  ;;  %v1231_v57 = vpop.f32.mrb[34].mxu1 }
 0x158   :  { %v1233_v58 = vpop.f32.mrb[35].mxu1 }
 0x15c   :  { %v1019_v59 = vpop.f32.mrb[36].mxu0 }
 0x15d   :  { %v3031_v60 = vadd.f32 %v1196_v15, %v1019_v59  ;;  %v1021_v61 = vpop.f32.mrb[37].mxu0  ;;  %v1236_v62 = vpop.f32.mrb[36].mxu1 }
 0x15e   :  { %v1022_v63 = vpop.f32.mrb[38].mxu0  ;;  %v1238_v1 = vpop.f32.mrb[37].mxu1 }
 0x15f   :  { %v3033_v2 = vadd.f32 %v1199_v17, %v1022_v63  ;;  %v1024_v3 = vpop.f32.mrb[39].mxu0  ;;  %v1239_v4 = vpop.f32.mrb[38].mxu1 }
 0x160   :  { %v1241_v5 = vpop.f32.mrb[39].mxu1 }
 0x164   :  { %v1027_v6 = vpop.f32.mrb[40].mxu0 }
 0x165   :  { %v3035_v7 = vadd.f32 %v1204_v22, %v1027_v6  ;;  %v1029_v8 = vpop.f32.mrb[41].mxu0  ;;  %v1244_v9 = vpop.f32.mrb[40].mxu1 }
 0x166   :  { %v1030_v10 = vpop.f32.mrb[42].mxu0  ;;  %v1246_v11 = vpop.f32.mrb[41].mxu1 }
 0x167   :  { %v3037_v0 = vadd.f32 %v1207_v27, %v1030_v10  ;;  %v1032_v12 = vpop.f32.mrb[43].mxu0  ;;  %v1247_v13 = vpop.f32.mrb[42].mxu1 }
 0x168   :  { %v1249_v14 = vpop.f32.mrb[43].mxu1 }
 0x16c   :  { %v1035_v15 = vpop.f32.mrb[44].mxu0 }
 0x16d   :  { %v3039_v16 = vadd.f32 %v1212_v32, %v1035_v15  ;;  %v1037_v17 = vpop.f32.mrb[45].mxu0  ;;  %v1252_v18 = vpop.f32.mrb[44].mxu1 }
 0x16e   :  { %v1038_v19 = vpop.f32.mrb[46].mxu0  ;;  %v1254_v21 = vpop.f32.mrb[45].mxu1 }
 0x16f   :  { %v3041_v23 = vadd.f32 %v1215_v37, %v1038_v19  ;;  %v1040_v22 = vpop.f32.mrb[47].mxu0  ;;  %v1255_v24 = vpop.f32.mrb[46].mxu1 }
 0x170   :  { %v1257_v26 = vpop.f32.mrb[47].mxu1 }
 0x174   :  { %v1043_v28 = vpop.f32.mrb[48].mxu0 }
 0x175   :  { %v3043_v29 = vadd.f32 %v1220_v42, %v1043_v28  ;;  %v1045_v27 = vpop.f32.mrb[49].mxu0  ;;  %v1260_v31 = vpop.f32.mrb[48].mxu1 }
 0x176   :  { %v1046_v33 = vpop.f32.mrb[50].mxu0  ;;  %v1262_v34 = vpop.f32.mrb[49].mxu1 }
 0x177   :  { %v3045_v36 = vadd.f32 %v1223_v47, %v1046_v33  ;;  %v1048_v32 = vpop.f32.mrb[51].mxu0  ;;  %v1263_v38 = vpop.f32.mrb[50].mxu1 }
 0x178   :  { %v1265_v39 = vpop.f32.mrb[51].mxu1 }
 0x17c   :  { %v1051_v41 = vpop.f32.mrb[52].mxu0 }
 0x17d   :  { %v3047_v43 = vadd.f32 %v1228_v52, %v1051_v41  ;;  %v1053_v37 = vpop.f32.mrb[53].mxu0  ;;  %v3049_v44 = vpop.f32.mrb[52].mxu1 }
 0x17e   :  { %v1054_v46 = vpop.f32.mrb[54].mxu0  ;;  %v1301_v48 = vpop.f32.mrb[53].mxu1 }
 0x17f   :  { %v3051_v49 = vadd.f32 %v1231_v57, %v1054_v46  ;;  %v1056_v42 = vpop.f32.mrb[55].mxu0  ;;  %v3053_v51 = vpop.f32.mrb[54].mxu1 }
 0x180   :  { %v1304_v53 = vpop.f32.mrb[55].mxu1 }
 0x184   :  { %v1059_v54 = vpop.f32.mrb[56].mxu0 }
 0x185   :  { %v3055_v47 = vadd.f32 %v1236_v62, %v1059_v54  ;;  %v1061_v56 = vpop.f32.mrb[57].mxu0  ;;  %v3057_v58 = vpop.f32.mrb[56].mxu1 }
 0x186   :  { %v1062_v59 = vpop.f32.mrb[58].mxu0  ;;  %v3059_v52 = vpop.f32.mrb[57].mxu1 }
 0x187   :  { %v3061_v61 = vadd.f32 %v1239_v4, %v1062_v59  ;;  %v1064_v63 = vpop.f32.mrb[59].mxu0  ;;  %v3063_v1 = vpop.f32.mrb[58].mxu1 }
 0x188   :  { %v3065_v57 = vpop.f32.mrb[59].mxu1 }
 0x18c   :  { %v1067_v3 = vpop.f32.mrb[60].mxu0 }
 0x18d   :  { %v3067_v5 = vadd.f32 %v1244_v9, %v1067_v3  ;;  %v2222_v6 = vpop.f32.mrb[60].mxu1  ;;  %v1069_v8 = vpop.f32.mrb[61].mxu0 }
 0x18e   :  { %v3070_v62 = vadd.f32 %v2222_v6, %v3015_v20  ;;  %v3072_v10 = vpop.f32.mrb[61].mxu1  ;;  %v1070_v11 = vpop.f32.mrb[62].mxu0 }
 0x18f   :  { %v3074_v12 = vadd.f32 %v1247_v13, %v1070_v11  ;;  %v2223_v4 = vpop.f32.mrb[62].mxu1  ;;  %v1072_v14 = vpop.f32.mrb[63].mxu0 }
 0x190   :  { %v3077_v15 = vadd.f32 %v2223_v4, %v3017_v25  ;;  %v3079_v17 = vpop.f32.mrb[63].mxu1 }
 0x194   :  { %v1075_v19 = vpop.f32.mrb[64].mxu0 }
 0x195   :  { %v3081_v9 = vadd.f32 %v1252_v18, %v1075_v19  ;;  %v2226_v21 = vpop.f32.mrb[64].mxu1  ;;  %v1077_v22 = vpop.f32.mrb[65].mxu0 }
 0x196   :  { %v3084_v20 = vadd.f32 %v2226_v21, %v3023_v40  ;;  %v1349_v26 = vpop.f32.mrb[65].mxu1  ;;  %v1078_v28 = vpop.f32.mrb[66].mxu0 }
 0x197   :  { %v3087_v13 = vadd.f32 %v1349_v26, %v3019_v30  ;;  %v3089_v27 = vadd.f32 %v1255_v24, %v1078_v28  ;;  %v2227_v33 = vpop.f32.mrb[66].mxu1  ;;  %v1080_v25 = vpop.f32.mrb[67].mxu0 }
 0x198   :  { %v3092_v34 = vadd.f32 %v2227_v33, %v3025_v45  ;;  %v1352_v32 = vpop.f32.mrb[67].mxu1 }
 0x199   :  { %v3095_v18 = vadd.f32 %v1352_v32, %v3021_v35 }
 0x19c   :  { %v1083_v39 = vpop.f32.mrb[68].mxu0 }
 0x19d   :  { %v3097_v41 = vadd.f32 %v1260_v31, %v1083_v39  ;;  %v2230_v40 = vpop.f32.mrb[68].mxu1  ;;  %v1085_v37 = vpop.f32.mrb[69].mxu0 }
 0x19e   :  { %v3100_v46 = vadd.f32 %v2230_v40, %v3031_v60  ;;  %v1365_v30 = vpop.f32.mrb[69].mxu1  ;;  %v1086_v24 = vpop.f32.mrb[70].mxu0 }
 0x19f   :  { %v3103_v42 = vadd.f32 %v1365_v30, %v3027_v50  ;;  %v3105_v54 = vadd.f32 %v1263_v38, %v1086_v24  ;;  %v2231_v45 = vpop.f32.mrb[70].mxu1  ;;  %v1088_v56 = vpop.f32.mrb[71].mxu0 }
 0x1a0   :  { %v3108_v35 = vadd.f32 %v2231_v45, %v3033_v2  ;;  %v1368_v59 = vpop.f32.mrb[71].mxu1 }
 0x1a1   :  { %v3111_v31 = vadd.f32 %v1368_v59, %v3029_v55 }
 0x1a4   :  { %v1124_v63 = vpop.f32.mrb[0].mxu0 }
 0x1a5   :  { %v3113_v3 = vadd.f32 %v1301_v48, %v1124_v63  ;;  %v2234_v60 = vpop.f32.mrb[72].mxu1  ;;  %v1126_v6 = vpop.f32.mrb[1].mxu0 }
 0x1a6   :  { %v3116_v8 = vadd.f32 %v2234_v60, %v3039_v16  ;;  %v1381_v50 = vpop.f32.mrb[73].mxu1  ;;  %v1127_v38 = vpop.f32.mrb[2].mxu0 }
 0x1a7   :  { %v3119_v11 = vadd.f32 %v1381_v50, %v3035_v7  ;;  %v3121_v4 = vadd.f32 %v1304_v53, %v1127_v38  ;;  %v2235_v2 = vpop.f32.mrb[74].mxu1  ;;  %v1129_v14 = vpop.f32.mrb[3].mxu0 }
 0x1a8   :  { %v3124_v55 = vadd.f32 %v2235_v2, %v3041_v23  ;;  %v1384_v19 = vpop.f32.mrb[75].mxu1 }
 0x1a9   :  { %v3127_v48 = vadd.f32 %v1384_v19, %v3037_v0 }
 0x1ac   :  { %v1132_v21 = vpop.f32.mrb[4].mxu0 }
 0x1ad   :  { %v3130_v16 = vadd.f32 %v3049_v44, %v1132_v21  ;;  %v2238_v22 = vpop.f32.mrb[76].mxu1  ;;  %v1134_v26 = vpop.f32.mrb[5].mxu0 }
 0x1ae   :  { %v3133_v7 = vadd.f32 %v2238_v22, %v3047_v43  ;;  %v1397_v53 = vpop.f32.mrb[77].mxu1  ;;  %v1135_v28 = vpop.f32.mrb[6].mxu0  ;;  %v1444_v43 = vadd.f32 %v3121_v4, %v3113_v3 }
 0x1af   :  { %v3136_v33 = vadd.f32 %v1397_v53, %v3043_v29  ;;  %v3139_v23 = vadd.f32 %v3053_v51, %v1135_v28  ;;  %v2239_v25 = vpop.f32.mrb[78].mxu1  ;;  %v1137_v0 = vpop.f32.mrb[7].mxu0 }
 0x1b0   :  { %v3142_v32 = vadd.f32 %v2239_v25, %v3051_v49  ;;  %v1400_v44 = vpop.f32.mrb[79].mxu1  ;;  %v1445_v37 = vadd.f32 %v1444_v43, %v3130_v16 }
 0x1b1   :  { %v3145_v39 = vadd.f32 %v1400_v44, %v3045_v36 }
 0x1b2   :  { %v1446_v6 = vadd.f32 %v1445_v37, %v3139_v23 }
 0x1b4   :  { %v1140_v40 = vpop.f32.mrb[8].mxu0 }
 0x1b5   :  { %v3151_v29 = vadd.f32 %v3059_v52, %v1140_v40  ;;  %v2242_v51 = vpop.f32.mrb[80].mxu1  ;;  %v1142_v30 = vpop.f32.mrb[9].mxu0 }
 0x1b6   :  { %v3154_v24 = vadd.f32 %v2242_v51, %v3067_v5  ;;  %v1413_v49 = vpop.f32.mrb[81].mxu1  ;;  %v1143_v45 = vpop.f32.mrb[10].mxu0 }
 0x1b7   :  { %v3157_v56 = vadd.f32 %v1413_v49, %v3055_v47  ;;  %v3160_v36 = vadd.f32 %v3065_v57, %v1143_v45  ;;  %v2243_v59 = vpop.f32.mrb[82].mxu1  ;;  %v1145_v63 = vpop.f32.mrb[11].mxu0  ;;  %v1447_v5 = vadd.f32 %v1446_v6, %v3151_v29 }
 0x1b8   :  { %v3163_v60 = vadd.f32 %v2243_v59, %v3074_v12  ;;  %v1416_v52 = vpop.f32.mrb[83].mxu1 }
 0x1b9   :  { %v3167_v50 = vadd.f32 %v1416_v52, %v3061_v61  ;;  %v1448_v21 = vadd.f32 %v1447_v5, %v3160_v36 }
 0x1bc   :  { %v1148_v38 = vpop.f32.mrb[12].mxu0 }
 0x1bd   :  { %v3171_v47 = vadd.f32 %v3057_v58, %v1148_v38  ;;  %v2246_v2 = vpop.f32.mrb[84].mxu1  ;;  %v1150_v57 = vpop.f32.mrb[13].mxu0 }
 0x1be   :  { %v3174_v14 = vadd.f32 %v2246_v2, %v3097_v41  ;;  %v1429_v19 = vpop.f32.mrb[85].mxu1  ;;  %v1151_v12 = vpop.f32.mrb[14].mxu0 }
 0x1bf   :  { %v3178_v22 = vadd.f32 %v1429_v19, %v3081_v9  ;;  %v3181_v61 = vadd.f32 %v3063_v1, %v1151_v12  ;;  %v2247_v26 = vpop.f32.mrb[86].mxu1  ;;  %v1153_v53 = vpop.f32.mrb[15].mxu0  ;;  %v1449_v25 = vadd.f32 %v1448_v21, %v3171_v47 }
 0x1c0   :  { %v3184_v58 = vadd.f32 %v2247_v26, %v3105_v54  ;;  %v1432_v28 = vpop.f32.mrb[87].mxu1 }
 0x1c1   :  { %v3188_v41 = vadd.f32 %v1432_v28, %v3089_v27  ;;  %v1450_v44 = vadd.f32 %v1449_v25, %v3181_v61 }
 0x1c4   :  { %v1156_v0 = vpop.f32.mrb[16].mxu0 }
 0x1c5   :  { %v3192_v9 = vadd.f32 %v3072_v10, %v1156_v0  ;;  %v1158_v43 = vpop.f32.mrb[17].mxu0 }
 0x1c6   :  { %v1159_v1 = vpop.f32.mrb[18].mxu0 }
 0x1c7   :  { %v1451_v40 = vadd.f32 %v1450_v44, %v3192_v9  ;;  %v3196_v37 = vadd.f32 %v3079_v17, %v1159_v1  ;;  %v1161_v54 = vpop.f32.mrb[19].mxu0 }
 0x1c9   :  { %v1452_v51 = vadd.f32 %v1451_v40, %v3196_v37 }
 0x1cb   :  { %v1453_v30 = vadd.f32 %v1452_v51, %v3070_v62 }
 0x1cd   :  { %v1454_v27 = vadd.f32 %v1453_v30, %v3077_v15 }
 0x1cf   :  { %v1455_v49 = vadd.f32 %v1454_v27, %v3087_v13 }
 0x1d1   :  { %v1456_v45 = vadd.f32 %v1455_v49, %v3095_v18 }
 0x1d3   :  { %v1457_v10 = vadd.f32 %v1456_v45, %v3084_v20 }
 0x1d5   :  { %v1458_v59 = vadd.f32 %v1457_v10, %v3092_v34 }
 0x1d7   :  { %v1459_v63 = vadd.f32 %v1458_v59, %v3103_v42 }
 0x1d9   :  { %v1460_v17 = vadd.f32 %v1459_v63, %v3111_v31 }
 0x1db   :  { %v1461_v52 = vadd.f32 %v1460_v17, %v3100_v46 }
 0x1dd   :  { %v1462_v6 = vadd.f32 %v1461_v52, %v3108_v35 }
 0x1df   :  { %v1463_v5 = vadd.f32 %v1462_v6, %v3119_v11 }
 0x1e1   :  { %v1464_v38 = vadd.f32 %v1463_v5, %v3127_v48 }
 0x1e3   :  { %v1465_v2 = vadd.f32 %v1464_v38, %v3116_v8 }
 0x1e5   :  { %v1466_v57 = vadd.f32 %v1465_v2, %v3124_v55 }
 0x1e7   :  { %v1467_v19 = vadd.f32 %v1466_v57, %v3136_v33 }
 0x1e9   :  { %v1468_v12 = vadd.f32 %v1467_v19, %v3145_v39 }
 0x1eb   :  { %v1469_v21 = vadd.f32 %v1468_v12, %v3133_v7 }
 0x1ed   :  { %v1470_v26 = vadd.f32 %v1469_v21, %v3142_v32 }
 0x1ef   :  { %v1471_v53 = vadd.f32 %v1470_v26, %v3157_v56 }
 0x1f1   :  { %v1472_v28 = vadd.f32 %v1471_v53, %v3167_v50 }
 0x1f3   :  { %v1473_v25 = vadd.f32 %v1472_v28, %v3154_v24 }
 0x1f5   :  { %v1474_v0 = vadd.f32 %v1473_v25, %v3163_v60 }
 0x1f7   :  { %v1475_v44 = vadd.f32 %v1474_v0, %v3178_v22 }
 0x1f9   :  { %v1476_v43 = vadd.f32 %v1475_v44, %v3188_v41 }
 0x1fb   :  { %v1477_v1 = vadd.f32 %v1476_v43, %v3174_v14 }
 0x1fd   :  { %v1478_v40 = vadd.f32 %v1477_v1, %v3184_v58 }
 0x1ff   :  { %v1479_v54 = vrot.slane %v1478_v40, 4 }
 0x201   :  { %v1480_v51 = vadd.f32 %v1479_v54, %v1478_v40 }
 0x203   :  { %v1481_v30 = vrot.slane %v1480_v51, 2 }
 0x205   :  { %v1482_v27 = vadd.f32 %v1481_v30, %v1480_v51 }
 0x207   :  { %v1483_v49 = vrot.slane %v1482_v27, 1 }
 0x209   :  { %v1484_v45 = vadd.f32 %v1483_v49, %v1482_v27 }
 0x20b   :  { %v1486_v10 = vmul.f32 0.0034722222, %v1484_v45 }
 0x20d   :  { %v3226_v59 = vsub.f32 %v3095_v18, %v1486_v10  ;;  %v3229_v63 = vsub.f32 %v3084_v20, %v1486_v10  ;;  %v3232_v17 = vsub.f32 %v3092_v34, %v1486_v10  ;;  %v3235_v52 = vsub.f32 %v3103_v42, %v1486_v10 }
 0x20e   :  { %v3238_v6 = vsub.f32 %v3111_v31, %v1486_v10  ;;  %v3241_v5 = vsub.f32 %v3100_v46, %v1486_v10  ;;  %v3244_v38 = vsub.f32 %v3108_v35, %v1486_v10  ;;  %v3247_v18 = vsub.f32 %v3119_v11, %v1486_v10 }
 0x20f   :  { %v3250_v20 = vsub.f32 %v3127_v48, %v1486_v10  ;;  %v3253_v34 = vsub.f32 %v3116_v8, %v1486_v10  ;;  %v3256_v42 = vsub.f32 %v3124_v55, %v1486_v10  ;;  %v3259_v31 = vsub.f32 %v3136_v33, %v1486_v10 }
 0x210   :  { %v3262_v46 = vsub.f32 %v3145_v39, %v1486_v10  ;;  %v3265_v35 = vsub.f32 %v3133_v7, %v1486_v10  ;;  %v3268_v11 = vsub.f32 %v3142_v32, %v1486_v10  ;;  %v3271_v48 = vsub.f32 %v3157_v56, %v1486_v10 }
 0x211   :  { %v3274_v8 = vsub.f32 %v3167_v50, %v1486_v10  ;;  %v3277_v55 = vsub.f32 %v3154_v24, %v1486_v10  ;;  %v3280_v33 = vsub.f32 %v3163_v60, %v1486_v10  ;;  %v3283_v39 = vsub.f32 %v3178_v22, %v1486_v10 }
 0x212   :  { %v3286_v7 = vsub.f32 %v3188_v41, %v1486_v10  ;;  %v3289_v32 = vsub.f32 %v3174_v14, %v1486_v10  ;;  %v3292_v56 = vsub.f32 %v3184_v58, %v1486_v10  ;;  %v3295_v50 = vsub.f32 %v3113_v3, %v1486_v10 }
 0x213   :  { %v3298_v24 = vsub.f32 %v3121_v4, %v1486_v10  ;;  %v3301_v60 = vsub.f32 %v3130_v16, %v1486_v10  ;;  %v3308_v14 = vsub.f32 %v3139_v23, %v1486_v10  ;;  %v3311_v58 = vsub.f32 %v3151_v29, %v1486_v10 }
 0x214   :  { %v1523_v22 = vmul.f32 %v3295_v50, %v3295_v50  ;;  %v3316_v2 = vsub.f32 %v3160_v36, %v1486_v10  ;;  %v3321_v19 = vsub.f32 %v3171_v47, %v1486_v10  ;;  %v3326_v29 = vsub.f32 %v3181_v61, %v1486_v10 }
 0x215   :  { %v1524_v41 = vmul.f32 %v3298_v24, %v3298_v24  ;;  %v1525_v3 = vmul.f32 %v3301_v60, %v3301_v60  ;;  %v1526_v16 = vmul.f32 %v3308_v14, %v3308_v14  ;;  %v1527_v23 = vmul.f32 %v3311_v58, %v3311_v58 }
 0x216   :  { %v1528_v21 = vmul.f32 %v3316_v2, %v3316_v2  ;;  %v3331_v36 = vsub.f32 %v3192_v9, %v1486_v10  ;;  %v1529_v53 = vmul.f32 %v3321_v19, %v3321_v19  ;;  %v3336_v47 = vsub.f32 %v3196_v37, %v1486_v10 }
 0x217   :  { %v1559_v4 = vadd.f32 %v1524_v41, %v1523_v22  ;;  %v1530_v25 = vmul.f32 %v3326_v29, %v3326_v29  ;;  %v3341_v61 = vsub.f32 %v3070_v62, %v1486_v10  ;;  %v3346_v9 = vsub.f32 %v3077_v15, %v1486_v10 }
 0x218   :  { %v1531_v44 = vmul.f32 %v3331_v36, %v3331_v36  ;;  %v1532_v1 = vmul.f32 %v3336_v47, %v3336_v47  ;;  %v3351_v37 = vsub.f32 %v3087_v13, %v1486_v10  ;;  %v1536_v49 = vmul.f32 %v3226_v59, %v3226_v59 }
 0x219   :  { %v1560_v57 = vadd.f32 %v1559_v4, %v1525_v3  ;;  %v1533_v54 = vmul.f32 %v3341_v61, %v3341_v61  ;;  %v1534_v62 = vmul.f32 %v3346_v9, %v3346_v9  ;;  %v1537_v13 = vmul.f32 %v3229_v63, %v3229_v63 }
 0x21a   :  { %v1535_v27 = vmul.f32 %v3351_v37, %v3351_v37  ;;  %v1538_v22 = vmul.f32 %v3232_v17, %v3232_v17  ;;  %v1539_v3 = vmul.f32 %v3235_v52, %v3235_v52 }
 0x21b   :  { %v1561_v12 = vadd.f32 %v1560_v57, %v1526_v16  ;;  %v1540_v16 = vmul.f32 %v3238_v6, %v3238_v6 }
 0x21d   :  { %v1562_v26 = vadd.f32 %v1561_v12, %v1527_v23  ;;  %v1541_v23 = vmul.f32 %v3241_v5, %v3241_v5 }
 0x21f   :  { %v1563_v28 = vadd.f32 %v1562_v26, %v1528_v21  ;;  %v1542_v21 = vmul.f32 %v3244_v38, %v3244_v38 }
 0x221   :  { %v1564_v0 = vadd.f32 %v1563_v28, %v1529_v53  ;;  %v1543_v53 = vmul.f32 %v3247_v18, %v3247_v18 }
 0x223   :  { %v1565_v43 = vadd.f32 %v1564_v0, %v1530_v25  ;;  %v1544_v25 = vmul.f32 %v3250_v20, %v3250_v20 }
 0x225   :  { %v1566_v40 = vadd.f32 %v1565_v43, %v1531_v44  ;;  %v1545_v44 = vmul.f32 %v3253_v34, %v3253_v34 }
 0x227   :  { %v1567_v51 = vadd.f32 %v1566_v40, %v1532_v1  ;;  %v1546_v1 = vmul.f32 %v3256_v42, %v3256_v42 }
 0x229   :  { %v1568_v30 = vadd.f32 %v1567_v51, %v1533_v54  ;;  %v1547_v54 = vmul.f32 %v3259_v31, %v3259_v31 }
 0x22b   :  { %v1569_v15 = vadd.f32 %v1568_v30, %v1534_v62  ;;  %v1548_v62 = vmul.f32 %v3262_v46, %v3262_v46 }
 0x22d   :  { %v1570_v45 = vadd.f32 %v1569_v15, %v1535_v27  ;;  %v1549_v27 = vmul.f32 %v3265_v35, %v3265_v35 }
 0x22f   :  { %v1571_v10 = vadd.f32 %v1570_v45, %v1536_v49  ;;  %v1550_v49 = vmul.f32 %v3268_v11, %v3268_v11 }
 0x231   :  { %v1572_v41 = vadd.f32 %v1571_v10, %v1537_v13  ;;  %v1551_v13 = vmul.f32 %v3271_v48, %v3271_v48 }
 0x233   :  { %v1573_v4 = vadd.f32 %v1572_v41, %v1538_v22  ;;  %v1552_v22 = vmul.f32 %v3274_v8, %v3274_v8 }
 0x235   :  { %v1574_v57 = vadd.f32 %v1573_v4, %v1539_v3  ;;  %v1553_v3 = vmul.f32 %v3277_v55, %v3277_v55 }
 0x237   :  { %v1575_v12 = vadd.f32 %v1574_v57, %v1540_v16  ;;  %v1554_v16 = vmul.f32 %v3280_v33, %v3280_v33 }
 0x239   :  { %v1576_v26 = vadd.f32 %v1575_v12, %v1541_v23  ;;  %v1555_v23 = vmul.f32 %v3283_v39, %v3283_v39 }
 0x23b   :  { %v1577_v28 = vadd.f32 %v1576_v26, %v1542_v21  ;;  %v1556_v21 = vmul.f32 %v3286_v7, %v3286_v7 }
 0x23d   :  { %v1578_v0 = vadd.f32 %v1577_v28, %v1543_v53  ;;  %v1557_v53 = vmul.f32 %v3289_v32, %v3289_v32 }
 0x23f   :  { %v1579_v43 = vadd.f32 %v1578_v0, %v1544_v25  ;;  %v1558_v25 = vmul.f32 %v3292_v56, %v3292_v56 }
 0x241   :  { %v1580_v40 = vadd.f32 %v1579_v43, %v1545_v44 }
 0x243   :  { %v1581_v51 = vadd.f32 %v1580_v40, %v1546_v1 }
 0x245   :  { %v1582_v30 = vadd.f32 %v1581_v51, %v1547_v54 }
 0x247   :  { %v1583_v15 = vadd.f32 %v1582_v30, %v1548_v62 }
 0x249   :  { %v1584_v45 = vadd.f32 %v1583_v15, %v1549_v27 }
 0x24b   :  { %v1585_v10 = vadd.f32 %v1584_v45, %v1550_v49 }
 0x24d   :  { %v1586_v41 = vadd.f32 %v1585_v10, %v1551_v13 }
 0x24f   :  { %v1587_v4 = vadd.f32 %v1586_v41, %v1552_v22 }
 0x251   :  { %v1588_v57 = vadd.f32 %v1587_v4, %v1553_v3 }
 0x253   :  { %v1589_v12 = vadd.f32 %v1588_v57, %v1554_v16 }
 0x255   :  { %v1590_v26 = vadd.f32 %v1589_v12, %v1555_v23 }
 0x257   :  { %v1591_v28 = vadd.f32 %v1590_v26, %v1556_v21 }
 0x259   :  { %v1592_v0 = vadd.f32 %v1591_v28, %v1557_v53 }
 0x25b   :  { %v1593_v44 = vadd.f32 %v1592_v0, %v1558_v25 }
 0x25d   :  { %v1594_v43 = vrot.slane %v1593_v44, 4 }
 0x25f   :  { %v1595_v1 = vadd.f32 %v1594_v43, %v1593_v44 }
 0x261   :  { %v1596_v40 = vrot.slane %v1595_v1, 2 }
 0x263   :  { %v1597_v54 = vadd.f32 %v1596_v40, %v1595_v1 }
 0x265   :  { %v1598_v51 = vrot.slane %v1597_v54, 1 }
 0x267   :  { %v1599_v62 = vadd.f32 %v1598_v51, %v1597_v54 }
 0x269   :  { %v1600_v30 = vmul.f32 0.0034722222, %v1599_v62 }
 0x26b   :  { %v1601_v27 = vadd.f32 1e-05, %v1600_v30 }
 0x26d   :  { %2489 = vrsqrt.f32 %v1601_v27 }
 0x277   :  { %v2490_v15 = vpop.eup %2489 }
 0x278   :  { %v3406_v49 = vmul.f32 %v2490_v15, %v3295_v50  ;;  %v3409_v45 = vmul.f32 %v2490_v15, %v3298_v24  ;;  %v3412_v13 = vmul.f32 %v2490_v15, %v3301_v60  ;;  %v3415_v10 = vmul.f32 %v2490_v15, %v3308_v14 }
 0x279   :  { %v3418_v22 = vmul.f32 %v2490_v15, %v3311_v58  ;;  %v3421_v41 = vmul.f32 %v2490_v15, %v3316_v2  ;;  %v3424_v3 = vmul.f32 %v2490_v15, %v3321_v19  ;;  %v3427_v50 = vmul.f32 %v2490_v15, %v3326_v29 }
 0x27a   :  { %v3430_v24 = vmul.f32 %v2490_v15, %v3331_v36  ;;  %v3433_v60 = vmul.f32 %v2490_v15, %v3336_v47  ;;  %v3436_v14 = vmul.f32 %v2490_v15, %v3341_v61  ;;  %v3439_v58 = vmul.f32 %v2490_v15, %v3346_v9 }
 0x27b   :  { %v3442_v2 = vmul.f32 %v2490_v15, %v3351_v37  ;;  %v3445_v19 = vmul.f32 %v2490_v15, %v3226_v59  ;;  %v3448_v29 = vmul.f32 %v2490_v15, %v3229_v63  ;;  %v3451_v36 = vmul.f32 %v2490_v15, %v3232_v17 }
 0x27c   :  { %v3454_v47 = vmul.f32 %v2490_v15, %v3235_v52  ;;  %v3457_v61 = vmul.f32 %v2490_v15, %v3238_v6  ;;  %v3460_v9 = vmul.f32 %v2490_v15, %v3241_v5  ;;  %v3463_v37 = vmul.f32 %v2490_v15, %v3244_v38 }
 0x27d   :  { %v3466_v59 = vmul.f32 %v2490_v15, %v3247_v18  ;;  %v3469_v63 = vmul.f32 %v2490_v15, %v3250_v20  ;;  %v3472_v17 = vmul.f32 %v2490_v15, %v3253_v34  ;;  %v3475_v52 = vmul.f32 %v2490_v15, %v3256_v42 }
 0x27e   :  { %v3478_v6 = vmul.f32 %v2490_v15, %v3259_v31  ;;  %v3481_v5 = vmul.f32 %v2490_v15, %v3262_v46  ;;  %v3484_v38 = vmul.f32 %v2490_v15, %v3265_v35  ;;  %v3487_v18 = vmul.f32 %v2490_v15, %v3268_v11 }
 0x27f   :  { %v3490_v20 = vmul.f32 %v2490_v15, %v3271_v48  ;;  %v3493_v34 = vmul.f32 %v2490_v15, %v3274_v8  ;;  %v3496_v42 = vmul.f32 %v2490_v15, %v3277_v55  ;;  %v3499_v31 = vmul.f32 %v2490_v15, %v3280_v33 }
 0x280   :  { %v3502_v46 = vmul.f32 %v2490_v15, %v3283_v39  ;;  %v3505_v35 = vmul.f32 %v2490_v15, %v3286_v7  ;;  %v3508_v11 = vmul.f32 %v2490_v15, %v3289_v32  ;;  %v3511_v48 = vmul.f32 %v2490_v15, %v3292_v56 }
 0x281   :  { %v1639_v8 = vmax.f32 %v3406_v49, 0.0  ;;  %v1640_v55 = vmax.f32 %v3409_v45, 0.0  ;;  %v1641_v4 = vmax.f32 %v3412_v13, 0.0  ;;  %v1642_v33 = vmax.f32 %v3415_v10, 0.0 }
 0x282   :  { %v1643_v39 = vmax.f32 %v3418_v22, 0.0  ;;  %v1644_v16 = vmax.f32 %v3421_v41, 0.0  ;;  %v1645_v7 = vmax.f32 %v3424_v3, 0.0  ;;  %v1646_v32 = vmax.f32 %v3427_v50, 0.0 }
 0x283   :  { %v1647_v57 = vmax.f32 %v3430_v24, 0.0  ;;  %v1648_v56 = vmax.f32 %v3433_v60, 0.0  ;;  %v1649_v23 = vmax.f32 %v3436_v14, 0.0  ;;  %v1650_v12 = vmax.f32 %v3439_v58, 0.0 }
 0x284   :  { %v1651_v21 = vmax.f32 %v3442_v2, 0.0  ;;  %v1652_v26 = vmax.f32 %v3445_v19, 0.0  ;;  %v1653_v53 = vmax.f32 %v3448_v29, 0.0  ;;  %v1654_v28 = vmax.f32 %v3451_v36, 0.0 }
 0x285   :  { %v1655_v25 = vmax.f32 %v3454_v47, 0.0  ;;  %v1656_v0 = vmax.f32 %v3457_v61, 0.0  ;;  %v1657_v44 = vmax.f32 %v3460_v9, 0.0  ;;  %v1658_v43 = vmax.f32 %v3463_v37, 0.0 }
 0x286   :  { %v1659_v1 = vmax.f32 %v3466_v59, 0.0  ;;  %v1660_v40 = vmax.f32 %v3469_v63, 0.0  ;;  %v1661_v54 = vmax.f32 %v3472_v17, 0.0  ;;  %v1662_v51 = vmax.f32 %v3475_v52, 0.0 }
 0x287   :  { %v1663_v62 = vmax.f32 %v3478_v6, 0.0  ;;  %v1664_v30 = vmax.f32 %v3481_v5, 0.0  ;;  %v1665_v27 = vmax.f32 %v3484_v38, 0.0  ;;  %v1666_v15 = vmax.f32 %v3487_v18, 0.0 }
 0x288   :  { %v1667_v49 = vmax.f32 %v3490_v20, 0.0  ;;  %v1668_v45 = vmax.f32 %v3493_v34, 0.0  ;;  %v1669_v13 = vmax.f32 %v3496_v42, 0.0  ;;  %v1670_v10 = vmax.f32 %v3499_v31, 0.0 }
 0x289   :  { %v1671_v22 = vmax.f32 %v3502_v46, 0.0  ;;  %v1672_v41 = vmax.f32 %v3505_v35, 0.0  ;;  %v1673_v3 = vmax.f32 %v3508_v11, 0.0  ;;  %v1674_v50 = vmax.f32 %v3511_v48, 0.0 }
 0x28a   :  { %v2078_v24 = vpack.c.bf16 %v1640_v55, %v1639_v8  ;;  %v2083_v60 = vpack.c.bf16 %v1642_v33, %v1641_v4  ;;  %v2088_v14 = vpack.c.bf16 %v1644_v16, %v1643_v39  ;;  %v2093_v58 = vpack.c.bf16 %v1646_v32, %v1645_v7 }
 0x28b   :  { %v2098_v2 = vpack.c.bf16 %v1648_v56, %v1647_v57  ;;  %v2103_v19 = vpack.c.bf16 %v1650_v12, %v1649_v23  ;;  %v2108_v29 = vpack.c.bf16 %v1652_v26, %v1651_v21  ;;  %v2113_v36 = vpack.c.bf16 %v1654_v28, %v1653_v53 }
 0x28c   :  { %2079 = vst [vmem:[%s3605_s2] sm:$0xff] %v2078_v24   ;;  %2165 = vst [vmem:[%s3605_s2 + $0x8] sm:$0xff] %v2083_v60   ;;  %v2118_v47 = vpack.c.bf16 %v1656_v0, %v1655_v25  ;;  %v2123_v61 = vpack.c.bf16 %v1658_v43, %v1657_v44  ;;  %v2128_v9 = vpack.c.bf16 %v1660_v40, %v1659_v1 }
 0x28d   :  { %2166 = vst [vmem:[%s3605_s2 + $0x10] sm:$0xff] %v2088_v14   ;;  %2167 = vst [vmem:[%s3605_s2 + $0x18] sm:$0xff] %v2093_v58   ;;  %v2133_v37 = vpack.c.bf16 %v1662_v51, %v1661_v54  ;;  %v2138_v59 = vpack.c.bf16 %v1664_v30, %v1663_v62  ;;  %v2143_v63 = vpack.c.bf16 %v1666_v15, %v1665_v27 }
 0x28e   :  { %2168 = vst [vmem:[%s3605_s2 + $0x20] sm:$0xff] %v2098_v2   ;;  %2169 = vst [vmem:[%s3605_s2 + $0x28] sm:$0xff] %v2103_v19   ;;  %v2148_v17 = vpack.c.bf16 %v1668_v45, %v1667_v49  ;;  %v2153_v52 = vpack.c.bf16 %v1670_v10, %v1669_v13  ;;  %v2158_v6 = vpack.c.bf16 %v1672_v41, %v1671_v22 }
 0x28f   :  { %2170 = vst [vmem:[%s3605_s2 + $0x30] sm:$0xff] %v2108_v29   ;;  %2171 = vst [vmem:[%s3605_s2 + $0x38] sm:$0xff] %v2113_v36   ;;  %v2163_v5 = vpack.c.bf16 %v1674_v50, %v1673_v3 }
 0x290   :  { %2172 = vst [vmem:[%s3605_s2 + $0x40] sm:$0xff] %v2118_v47   ;;  %2173 = vst [vmem:[%s3605_s2 + $0x48] sm:$0xff] %v2123_v61  }
 0x291   :  { %2174 = vst [vmem:[%s3605_s2 + $0x50] sm:$0xff] %v2128_v9   ;;  %2175 = vst [vmem:[%s3605_s2 + $0x58] sm:$0xff] %v2133_v37  }
 0x292   :  { %2176 = vst [vmem:[%s3605_s2 + $0x60] sm:$0xff] %v2138_v59   ;;  %2177 = vst [vmem:[%s3605_s2 + $0x68] sm:$0xff] %v2143_v63  }
 0x293   :  { %2178 = vst [vmem:[%s3605_s2 + $0x70] sm:$0xff] %v2148_v17   ;;  %2179 = vst [vmem:[%s3605_s2 + $0x78] sm:$0xff] %v2153_v52  }
 0x294   :  { %2180 = vst [vmem:[%s3605_s2 + $0x80] sm:$0xff] %v2158_v6   ;;  %2181 = vst [vmem:[%s3605_s2 + $0x88] sm:$0xff] %v2163_v5  }

// kernel: forward.6
= control target key start
LH: loop header
LB: loop body
LE: loop exit
PB: predicated region body
PF: predicated region fallthrough
CT: control target
= control target key end

     0   :  { %vm630_vm0 = vcmask 1041408   ;;  %s1357_s1 = inlined_call_operand.vmem [shape: bf16[512,256], index: 1, kind: input, shape index: {}]   ;;  %s1358_s0 = inlined_call_operand.vmem [shape: bf16[50,512], index: 0, kind: input, shape index: {}]   ;;  %s1359_s2 = inlined_call_operand.vmem [shape: bf16[50,256], index: 2, kind: output, shape index: {}]  }
   0x1   :  { %v906_v0 = vld [vmem:[%s1357_s1 + $0x4] ss:$8 sps:$4 sm:$0xff]   ;;  %v910_v2 = vld [vmem:[%s1357_s1] ss:$8 sps:$4 sm:$0xff]   ;;  %v912_v4 = vld [vmem:[%s1357_s1 + $0x14] ss:$8 sps:$4 sm:$0xff]  }
   0x2   :  { %v908_v1 = vld [vmem:[%s1357_s1 + $0x104] ss:$8 sps:$4 sm:$0xff]   ;;  %483 = vmatprep.subr.bf16.mxu1 %v906_v0  ;;  %v911_v3 = vld [vmem:[%s1357_s1 + $0x100] ss:$8 sps:$4 sm:$0xff]   ;;  %v914_v5 = vld [vmem:[%s1357_s1 + $0x114] ss:$8 sps:$4 sm:$0xff]  }
   0x3   :  { %554 = vmatprep.subr.bf16.mxu0 %v908_v1  ;;  %484 = vmatpush1.bf16.msra.mxu1 %v910_v2  ;;  %v916_v6 = vld [vmem:[%s1357_s1 + $0x10] ss:$8 sps:$4 sm:$0xff]   ;;  %v918_v8 = vld [vmem:[%s1357_s1 + $0x24] ss:$8 sps:$4 sm:$0xff]   ;;  %v922_v10 = vld [vmem:[%s1357_s1 + $0x20] ss:$8 sps:$4 sm:$0xff]  }
   0x4   :  { %555 = vmatpush1.bf16.msra.mxu0 %v911_v3  ;;  %485 = vmatprep.subr.bf16.mxu1 %v912_v4  ;;  %v917_v7 = vld [vmem:[%s1357_s1 + $0x110] ss:$8 sps:$4 sm:$0xff]   ;;  %v920_v9 = vld [vmem:[%s1357_s1 + $0x124] ss:$8 sps:$4 sm:$0xff]   ;;  %v923_v11 = vld [vmem:[%s1357_s1 + $0x120] ss:$8 sps:$4 sm:$0xff]  }
   0x5   :  { %556 = vmatprep.subr.bf16.mxu0 %v914_v5  ;;  %v924_v12 = vld [vmem:[%s1357_s1 + $0x34] ss:$8 sps:$4 sm:$0xff]   ;;  %v928_v14 = vld [vmem:[%s1357_s1 + $0x30] ss:$8 sps:$4 sm:$0xff]   ;;  %v930_v16 = vld [vmem:[%s1357_s1 + $0x44] ss:$8 sps:$4 sm:$0xff]  }
   0x6   :  { %v926_v13 = vld [vmem:[%s1357_s1 + $0x134] ss:$8 sps:$4 sm:$0xff]   ;;  %v929_v15 = vld [vmem:[%s1357_s1 + $0x130] ss:$8 sps:$4 sm:$0xff]   ;;  %v932_v17 = vld [vmem:[%s1357_s1 + $0x144] ss:$8 sps:$4 sm:$0xff]  }
   0x7   :  { %486 = vmatpush1.bf16.msra.mxu1 %v916_v6  ;;  %v934_v18 = vld [vmem:[%s1357_s1 + $0x40] ss:$8 sps:$4 sm:$0xff]   ;;  %v936_v20 = vld [vmem:[%s1357_s1 + $0x54] ss:$8 sps:$4 sm:$0xff]   ;;  %v940_v22 = vld [vmem:[%s1357_s1 + $0x50] ss:$8 sps:$4 sm:$0xff]  }
   0x8   :  { %557 = vmatpush1.bf16.msra.mxu0 %v917_v7  ;;  %487 = vmatprep.subr.bf16.mxu1 %v918_v8  ;;  %v935_v19 = vld [vmem:[%s1357_s1 + $0x140] ss:$8 sps:$4 sm:$0xff]   ;;  %v938_v21 = vld [vmem:[%s1357_s1 + $0x154] ss:$8 sps:$4 sm:$0xff]   ;;  %v941_v23 = vld [vmem:[%s1357_s1 + $0x150] ss:$8 sps:$4 sm:$0xff]  }
   0x9   :  { %558 = vmatprep.subr.bf16.mxu0 %v920_v9  ;;  %v942_v24 = vld [vmem:[%s1357_s1 + $0x64] ss:$8 sps:$4 sm:$0xff]   ;;  %v946_v26 = vld [vmem:[%s1357_s1 + $0x60] ss:$8 sps:$4 sm:$0xff]   ;;  %v948_v28 = vld [vmem:[%s1357_s1 + $0x74] ss:$8 sps:$4 sm:$0xff]  }
   0xa   :  { %v944_v25 = vld [vmem:[%s1357_s1 + $0x164] ss:$8 sps:$4 sm:$0xff]   ;;  %v947_v27 = vld [vmem:[%s1357_s1 + $0x160] ss:$8 sps:$4 sm:$0xff]   ;;  %v950_v29 = vld [vmem:[%s1357_s1 + $0x174] ss:$8 sps:$4 sm:$0xff]  }
   0xb   :  { %488 = vmatpush1.bf16.msra.mxu1 %v922_v10  ;;  %v952_v30 = vld [vmem:[%s1357_s1 + $0x70] ss:$8 sps:$4 sm:$0xff]   ;;  %v954_v32 = vld [vmem:[%s1357_s1 + $0x84] ss:$8 sps:$4 sm:$0xff]   ;;  %v958_v34 = vld [vmem:[%s1357_s1 + $0x80] ss:$8 sps:$4 sm:$0xff]  }
   0xc   :  { %559 = vmatpush1.bf16.msra.mxu0 %v923_v11  ;;  %489 = vmatprep.subr.bf16.mxu1 %v924_v12  ;;  %v953_v31 = vld [vmem:[%s1357_s1 + $0x170] ss:$8 sps:$4 sm:$0xff]   ;;  %v956_v33 = vld [vmem:[%s1357_s1 + $0x184] ss:$8 sps:$4 sm:$0xff]   ;;  %v959_v35 = vld [vmem:[%s1357_s1 + $0x180] ss:$8 sps:$4 sm:$0xff]  }
   0xd   :  { %560 = vmatprep.subr.bf16.mxu0 %v926_v13  ;;  %v960_v36 = vld [vmem:[%s1357_s1 + $0x94] ss:$8 sps:$4 sm:$0xff]   ;;  %v964_v38 = vld [vmem:[%s1357_s1 + $0x90] ss:$8 sps:$4 sm:$0xff]   ;;  %v966_v40 = vld [vmem:[%s1357_s1 + $0xa4] ss:$8 sps:$4 sm:$0xff]  }
   0xe   :  { %v962_v37 = vld [vmem:[%s1357_s1 + $0x194] ss:$8 sps:$4 sm:$0xff]   ;;  %v965_v39 = vld [vmem:[%s1357_s1 + $0x190] ss:$8 sps:$4 sm:$0xff]   ;;  %v968_v41 = vld [vmem:[%s1357_s1 + $0x1a4] ss:$8 sps:$4 sm:$0xff]  }
   0xf   :  { %490 = vmatpush1.bf16.msra.mxu1 %v928_v14  ;;  %v970_v42 = vld [vmem:[%s1357_s1 + $0xa0] ss:$8 sps:$4 sm:$0xff]   ;;  %v972_v44 = vld [vmem:[%s1357_s1 + $0xb4] ss:$8 sps:$4 sm:$0xff]   ;;  %v976_v46 = vld [vmem:[%s1357_s1 + $0xb0] ss:$8 sps:$4 sm:$0xff]  }
  0x10   :  { %561 = vmatpush1.bf16.msra.mxu0 %v929_v15  ;;  %491 = vmatprep.subr.bf16.mxu1 %v930_v16  ;;  %v971_v43 = vld [vmem:[%s1357_s1 + $0x1a0] ss:$8 sps:$4 sm:$0xff]   ;;  %v974_v45 = vld [vmem:[%s1357_s1 + $0x1b4] ss:$8 sps:$4 sm:$0xff]   ;;  %v977_v47 = vld [vmem:[%s1357_s1 + $0x1b0] ss:$8 sps:$4 sm:$0xff]  }
  0x11   :  { %562 = vmatprep.subr.bf16.mxu0 %v932_v17  ;;  %v978_v48 = vld [vmem:[%s1357_s1 + $0xc4] ss:$8 sps:$4 sm:$0xff]   ;;  %v982_v52 = vld [vmem:[%s1357_s1 + $0xc0] ss:$8 sps:$4 sm:$0xff]   ;;  %v984_v54 = vld [vmem:[%s1357_s1 + $0xd4] ss:$8 sps:$4 sm:$0xff]  }
  0x12   :  { %v1004_v49 = vld [vmem:[%s1358_s0 + $0x4] ss:$16 sps:$4 sm:$0xff]   ;;  %v1007_v51 = vld [vmem:[%s1358_s0 + $0xc] ss:$16 sps:$4 sm:$0xff]   ;;  %v983_v53 = vld [vmem:[%s1357_s1 + $0x1c0] ss:$8 sps:$4 sm:$0xff]  }
  0x13   :  { %492 = vmatpush1.bf16.msra.mxu1 %v934_v18  ;;  %v980_v50 = vld [vmem:[%s1357_s1 + $0x1c4] ss:$8 sps:$4 sm:$0xff]   ;;  %515 = vmatprep.mubr.bf16.mxu1 %v1004_v49  ;;  %v986_v55 = vld [vmem:[%s1357_s1 + $0x1d4] ss:$8 sps:$4 sm:$0xff]   ;;  %v988_v56 = vld [vmem:[%s1357_s1 + $0xd0] ss:$8 sps:$4 sm:$0xff]  }
  0x14   :  { %563 = vmatpush1.bf16.msra.mxu0 %v935_v19  ;;  %493 = vmatprep.subr.bf16.mxu1 %v936_v20  ;;  %v989_v57 = vld [vmem:[%s1357_s1 + $0x1d0] ss:$8 sps:$4 sm:$0xff]   ;;  %v990_v58 = vld [vmem:[%s1357_s1 + $0xe4] ss:$8 sps:$4 sm:$0xff]   ;;  %v994_v60 = vld [vmem:[%s1357_s1 + $0xe0] ss:$8 sps:$4 sm:$0xff]  }
  0x15   :  { %564 = vmatprep.subr.bf16.mxu0 %v938_v21  ;;  %586 = vmatprep.mubr.bf16.mxu0 %v1007_v51  ;;  %v992_v59 = vld [vmem:[%s1357_s1 + $0x1e4] ss:$8 sps:$4 sm:$0xff]   ;;  %v995_v61 = vld [vmem:[%s1357_s1 + $0x1e0] ss:$8 sps:$4 sm:$0xff]   ;;  %v996_v62 = vld [vmem:[%s1357_s1 + $0xf4] ss:$8 sps:$4 sm:$0xff]  }
  0x16   :  { %v998_v63 = vld [vmem:[%s1357_s1 + $0x1f4] ss:$8 sps:$4 sm:$0xff]   ;;  %v1000_v0 = vld [vmem:[%s1357_s1 + $0xf0] ss:$8 sps:$4 sm:$0xff]   ;;  %v23_v10 = vld [vmem:[%s1358_s0 + $0x60] sm:$0x11] }
  0x17   :  { %494 = vmatpush1.bf16.msra.mxu1 %v940_v22  ;;  %v1001_v1 = vld [vmem:[%s1357_s1 + $0x1f0] ss:$8 sps:$4 sm:$0xff]   ;;  %v1008_v4 = vld [vmem:[%s1358_s0 + $0x24] ss:$16 sps:$4 sm:$0xff]   ;;  %v1010_v5 = vld [vmem:[%s1358_s0 + $0x2c] ss:$16 sps:$4 sm:$0xff]   ;;  %v811_v14 = vcombine.high %v23_v10, %v23_v10  ;;  %v810_v16 = vcombine.low %v23_v10, %v23_v10 }
  0x18   :  { %565 = vmatpush1.bf16.msra.mxu0 %v941_v23  ;;  %495 = vmatprep.subr.bf16.mxu1 %v942_v24  ;;  %v1002_v2 = vld [vmem:[%s1358_s0] ss:$16 sps:$4 sm:$0xff]   ;;  %v1005_v3 = vld [vmem:[%s1358_s0 + $0x8] ss:$16 sps:$4 sm:$0xff]   ;;  %v1014_v8 = vld [vmem:[%s1358_s0 + $0x44] ss:$16 sps:$4 sm:$0xff]  }
  0x19   :  { %566 = vmatprep.subr.bf16.mxu0 %v944_v25  ;;  %v1012_v6 = vld [vmem:[%s1358_s0 + $0x20] ss:$16 sps:$4 sm:$0xff]   ;;  %v1013_v7 = vld [vmem:[%s1358_s0 + $0x28] ss:$16 sps:$4 sm:$0xff]   ;;  %v1016_v9 = vld [vmem:[%s1358_s0 + $0x4c] ss:$16 sps:$4 sm:$0xff]  }
  0x1a   :  { %v24_v11 = vld [vmem:[%s1358_s0 + $0x68] sm:$0x11]  ;;  %v1018_v12 = vld [vmem:[%s1358_s0 + $0x40] ss:$16 sps:$4 sm:$0xff]  }
  0x1b   :  { %496 = vmatpush1.bf16.msra.mxu1 %v946_v26  ;;  %v1019_v13 = vld [vmem:[%s1358_s0 + $0x48] ss:$16 sps:$4 sm:$0xff]   ;;  %v813_v15 = vcombine.high %v24_v11, %v24_v11  ;;  %v812_v17 = vcombine.low %v24_v11, %v24_v11 }
  0x1c   :  { %567 = vmatpush1.bf16.msra.mxu0 %v947_v27  ;;  %497 = vmatprep.subr.bf16.mxu1 %v948_v28 }
  0x1d   :  { %568 = vmatprep.subr.bf16.mxu0 %v950_v29 }
  0x1f   :  { %498 = vmatpush1.bf16.msra.mxu1 %v952_v30 }
  0x20   :  { %569 = vmatpush1.bf16.msra.mxu0 %v953_v31  ;;  %499 = vmatprep.subr.bf16.mxu1 %v954_v32 }
  0x21   :  { %570 = vmatprep.subr.bf16.mxu0 %v956_v33 }
  0x23   :  { %500 = vmatpush1.bf16.msra.mxu1 %v958_v34 }
  0x24   :  { %571 = vmatpush1.bf16.msra.mxu0 %v959_v35  ;;  %501 = vmatprep.subr.bf16.mxu1 %v960_v36 }
  0x25   :  { %572 = vmatprep.subr.bf16.mxu0 %v962_v37 }
  0x27   :  { %502 = vmatpush1.bf16.msra.mxu1 %v964_v38 }
  0x28   :  { %573 = vmatpush1.bf16.msra.mxu0 %v965_v39  ;;  %503 = vmatprep.subr.bf16.mxu1 %v966_v40 }
  0x29   :  { %574 = vmatprep.subr.bf16.mxu0 %v968_v41 }
  0x2b   :  { %504 = vmatpush1.bf16.msra.mxu1 %v970_v42 }
  0x2c   :  { %575 = vmatpush1.bf16.msra.mxu0 %v971_v43  ;;  %505 = vmatprep.subr.bf16.mxu1 %v972_v44 }
  0x2d   :  { %576 = vmatprep.subr.bf16.mxu0 %v974_v45 }
  0x2f   :  { %506 = vmatpush1.bf16.msra.mxu1 %v976_v46 }
  0x30   :  { %577 = vmatpush1.bf16.msra.mxu0 %v977_v47  ;;  %507 = vmatprep.subr.bf16.mxu1 %v978_v48 }
  0x31   :  { %578 = vmatprep.subr.bf16.mxu0 %v980_v50 }
  0x33   :  { %508 = vmatpush1.bf16.msra.mxu1 %v982_v52 }
  0x34   :  { %579 = vmatpush1.bf16.msra.mxu0 %v983_v53  ;;  %509 = vmatprep.subr.bf16.mxu1 %v984_v54 }
  0x35   :  { %580 = vmatprep.subr.bf16.mxu0 %v986_v55 }
  0x37   :  { %510 = vmatpush1.bf16.msra.mxu1 %v988_v56 }
  0x38   :  { %581 = vmatpush1.bf16.msra.mxu0 %v989_v57  ;;  %511 = vmatprep.subr.bf16.mxu1 %v990_v58 }
  0x39   :  { %582 = vmatprep.subr.bf16.mxu0 %v992_v59 }
  0x3b   :  { %512 = vmatpush1.bf16.msra.mxu1 %v994_v60 }
  0x3c   :  { %583 = vmatpush1.bf16.msra.mxu0 %v995_v61  ;;  %513 = vmatprep.subr.bf16.mxu1 %v996_v62 }
  0x3d   :  { %584 = vmatprep.subr.bf16.mxu0 %v998_v63 }
  0x3f   :  { %514 = vmatpush1.bf16.msra.mxu1 %v1000_v0 }
  0x40   :  { %585 = vmatpush1.bf16.msra.mxu0 %v1001_v1 }
  0x42   :  { %516 = vmatmul.mubr.bf16.vlgmr.msra.gmra.mrb[0].mxu1 %v1002_v2 }
  0x43   :  { %587 = vmatmul.mubr.bf16.vlgmr.msra.gmra.mrb[0].mxu0 %v1005_v3  ;;  %525 = vmatprep.mubr.bf16.mxu1 %v1008_v4 }
  0x44   :  { %596 = vmatprep.mubr.bf16.mxu0 %v1010_v5 }
  0x4a   :  { %526 = vmatmul.mubr.bf16.gmra.mrb[4].mxu1 %v1012_v6 }
  0x4b   :  { %597 = vmatmul.mubr.bf16.gmra.mrb[4].mxu0 %v1013_v7  ;;  %535 = vmatprep.mubr.bf16.mxu1 %v1014_v8 }
  0x4c   :  { %606 = vmatprep.mubr.bf16.mxu0 %v1016_v9 }
  0x52   :  { %536 = vmatmul.mubr.bf16.gmra.mrb[8].mxu1 %v1018_v12 }
  0x53   :  { %607 = vmatmul.mubr.bf16.gmra.mrb[8].mxu0 %v1019_v13  ;;  %545 = vmatprep.mubr.bf16.mxu1 %v811_v14 }
  0x54   :  { %616 = vmatprep.mubr.bf16.mxu0 %v813_v15 }
  0x5a   :  { %546 = vmatmul.mubr.bf16.gmra.mrb[12].mxu1 %v810_v16 }
  0x5b   :  { %617 = vmatmul.mubr.bf16.gmra.mrb[12].mxu0 %v812_v17 }
 0x115   :  { %v517_v18 = vpop.f32.mrb[0].mxu1 }
 0x116   :  { %v588_v19 = vpop.f32.mrb[0].mxu0  ;;  %v519_v21 = vpop.f32.mrb[1].mxu1 }
 0x117   :  { %v1277_v20 = vadd.f32 %v588_v19, %v517_v18  ;;  %v590_v22 = vpop.f32.mrb[1].mxu0  ;;  %v521_v24 = vpop.f32.mrb[2].mxu1 }
 0x118   :  { %v1279_v23 = vadd.f32 %v590_v22, %v519_v21  ;;  %v592_v25 = vpop.f32.mrb[2].mxu0  ;;  %v523_v27 = vpop.f32.mrb[3].mxu1 }
 0x119   :  { %v1281_v26 = vadd.f32 %v592_v25, %v521_v24  ;;  %v594_v28 = vpop.f32.mrb[3].mxu0 }
 0x11a   :  { %v1283_v29 = vadd.f32 %v594_v28, %v523_v27 }
 0x11b   :  { %v625_v30 = vadd.f32 %v1281_v26, %v1277_v20 }
 0x11c   :  { %v639_v31 = vadd.f32 %v1283_v29, %v1279_v23 }
 0x11d   :  { %v527_v32 = vpop.f32.mrb[4].mxu1 }
 0x11e   :  { %v598_v33 = vpop.f32.mrb[4].mxu0  ;;  %v529_v35 = vpop.f32.mrb[5].mxu1 }
 0x11f   :  { %v599_v34 = vadd.f32 %v598_v33, %v527_v32  ;;  %v600_v36 = vpop.f32.mrb[5].mxu0  ;;  %v531_v38 = vpop.f32.mrb[6].mxu1 }
 0x120   :  { %v1289_v37 = vadd.f32 %v600_v36, %v529_v35  ;;  %v602_v39 = vpop.f32.mrb[6].mxu0  ;;  %v533_v42 = vpop.f32.mrb[7].mxu1 }
 0x121   :  { %v626_v40 = vadd.f32 %v625_v30, %v599_v34  ;;  %v603_v41 = vadd.f32 %v602_v39, %v531_v38  ;;  %v604_v43 = vpop.f32.mrb[7].mxu0 }
 0x122   :  { %v640_v44 = vadd.f32 %v639_v31, %v1289_v37  ;;  %v605_v45 = vadd.f32 %v604_v43, %v533_v42 }
 0x123   :  { %v627_v46 = vadd.f32 %v626_v40, %v603_v41 }
 0x124   :  { %v641_v47 = vadd.f32 %v640_v44, %v605_v45 }
 0x125   :  { %v537_v48 = vpop.f32.mrb[8].mxu1 }
 0x126   :  { %v608_v49 = vpop.f32.mrb[8].mxu0  ;;  %v539_v51 = vpop.f32.mrb[9].mxu1 }
 0x127   :  { %v609_v50 = vadd.f32 %v608_v49, %v537_v48  ;;  %v610_v52 = vpop.f32.mrb[9].mxu0  ;;  %v541_v54 = vpop.f32.mrb[10].mxu1 }
 0x128   :  { %v611_v53 = vadd.f32 %v610_v52, %v539_v51  ;;  %v612_v55 = vpop.f32.mrb[10].mxu0  ;;  %v543_v58 = vpop.f32.mrb[11].mxu1 }
 0x129   :  { %v628_v56 = vadd.f32 %v627_v46, %v609_v50  ;;  %v613_v57 = vadd.f32 %v612_v55, %v541_v54  ;;  %v614_v59 = vpop.f32.mrb[11].mxu0 }
 0x12a   :  { %v642_v60 = vadd.f32 %v641_v47, %v611_v53  ;;  %v615_v61 = vadd.f32 %v614_v59, %v543_v58 }
 0x12b   :  { %v629_v62 = vadd.f32 %v628_v56, %v613_v57 }
 0x12c   :  { %v643_v63 = vadd.f32 %v642_v60, %v615_v61 }
 0x12d   :  { %v547_v0 = vpop.f32.mrb[12].mxu1 }
 0x12e   :  { %v618_v1 = vpop.f32.mrb[12].mxu0  ;;  %v549_v3 = vpop.f32.mrb[13].mxu1 }
 0x12f   :  { %v619_v2 = vadd.f32 %v618_v1, %v547_v0  ;;  %v620_v4 = vpop.f32.mrb[13].mxu0  ;;  %v551_v6 = vpop.f32.mrb[14].mxu1 }
 0x130   :  { %v621_v5 = vadd.f32 %v620_v4, %v549_v3  ;;  %v622_v7 = vpop.f32.mrb[14].mxu0  ;;  %v552_v9 = vpop.f32.mrb[15].mxu1 }
 0x131   :  { %v631_v8 = vsel %vm630_vm0, %v619_v2, 0.0  ;;  %v623_v10 = vpop.f32.mrb[15].mxu0 }
 0x132   :  { %v632_v11 = vadd.f32 %v631_v8, %v629_v62  ;;  %v644_v12 = vsel %vm630_vm0, %v621_v5, 0.0 }
 0x133   :  { %v645_v13 = vadd.f32 %v644_v12, %v643_v63 }
 0x134   :  { %v633_v14 = vrot.slane %v632_v11, 4 }
 0x135   :  { %v646_v15 = vrot.slane %v645_v13, 4 }
 0x136   :  { %v634_v16 = vadd.f32 %v633_v14, %v632_v11 }
 0x137   :  { %v647_v17 = vadd.f32 %v646_v15, %v645_v13 }
 0x138   :  { %v635_v18 = vrot.slane %v634_v16, 2 }
 0x139   :  { %v648_v19 = vrot.slane %v647_v17, 2 }
 0x13a   :  { %v636_v21 = vadd.f32 %v635_v18, %v634_v16 }
 0x13b   :  { %v649_v22 = vadd.f32 %v648_v19, %v647_v17 }
 0x13c   :  { %v637_v24 = vrot.slane %v636_v21, 1 }
 0x13d   :  { %v650_v25 = vrot.slane %v649_v22, 1 }
 0x13e   :  { %v638_v27 = vadd.f32 %v637_v24, %v636_v21 }
 0x13f   :  { %v651_v28 = vadd.f32 %v650_v25, %v649_v22 }
 0x140   :  { %v653_v30 = vmul.f32 0.02, %v638_v27 }
 0x141   :  { %v654_v31 = vmul.f32 0.02, %v651_v28 }
 0x142   :  { %v655_v32 = vsub.f32 %v1277_v20, %v653_v30  ;;  %v657_v33 = vsub.f32 %v1281_v26, %v653_v30  ;;  %v659_v35 = vsub.f32 %v599_v34, %v653_v30  ;;  %v661_v36 = vsub.f32 %v603_v41, %v653_v30 }
 0x143   :  { %v663_v38 = vsub.f32 %v609_v50, %v653_v30  ;;  %v665_v39 = vsub.f32 %v613_v57, %v653_v30  ;;  %v667_v40 = vsub.f32 %v619_v2, %v653_v30  ;;  %v1297_v42 = vsub.f32 %v1279_v23, %v654_v31 }
 0x144   :  { %v669_v43 = vmul.f32 %v655_v32, %v655_v32  ;;  %v671_v44 = vmul.f32 %v657_v33, %v657_v33  ;;  %v673_v46 = vmul.f32 %v659_v35, %v659_v35  ;;  %v1300_v47 = vsub.f32 %v1283_v29, %v654_v31 }
 0x145   :  { %v1303_v49 = vsub.f32 %v1289_v37, %v654_v31  ;;  %v1305_v20 = vsub.f32 %v605_v45, %v654_v31  ;;  %v1307_v26 = vsub.f32 %v611_v53, %v654_v31  ;;  %v1309_v34 = vsub.f32 %v615_v61, %v654_v31 }
 0x146   :  { %v683_v48 = vadd.f32 %v671_v44, %v669_v43  ;;  %v1311_v41 = vsub.f32 %v621_v5, %v654_v31  ;;  %v670_v23 = vmul.f32 %v1297_v42, %v1297_v42  ;;  %v675_v50 = vmul.f32 %v661_v36, %v661_v36 }
 0x147   :  { %v672_v29 = vmul.f32 %v1300_v47, %v1300_v47  ;;  %v677_v52 = vmul.f32 %v663_v38, %v663_v38  ;;  %v674_v37 = vmul.f32 %v1303_v49, %v1303_v49  ;;  %v681_v53 = vmul.f32 %v667_v40, %v667_v40 }
 0x148   :  { %v684_v51 = vadd.f32 %v683_v48, %v673_v46  ;;  %v679_v55 = vmul.f32 %v665_v39, %v665_v39  ;;  %v676_v57 = vmul.f32 %v1305_v20, %v1305_v20  ;;  %v678_v60 = vmul.f32 %v1307_v26, %v1307_v26 }
 0x149   :  { %v696_v45 = vadd.f32 %v672_v29, %v670_v23  ;;  %v688_v62 = vsel %vm630_vm0, %v681_v53, 0.0  ;;  %v682_v63 = vmul.f32 %v1311_v41, %v1311_v41  ;;  %v680_v1 = vmul.f32 %v1309_v34, %v1309_v34 }
 0x14a   :  { %v685_v54 = vadd.f32 %v684_v51, %v675_v50 }
 0x14b   :  { %v697_v58 = vadd.f32 %v696_v45, %v674_v37  ;;  %v701_v5 = vsel %vm630_vm0, %v682_v63, 0.0 }
 0x14c   :  { %v686_v56 = vadd.f32 %v685_v54, %v677_v52 }
 0x14d   :  { %v698_v61 = vadd.f32 %v697_v58, %v676_v57 }
 0x14e   :  { %v687_v59 = vadd.f32 %v686_v56, %v679_v55 }
 0x14f   :  { %v699_v2 = vadd.f32 %v698_v61, %v678_v60 }
 0x150   :  { %v689_v0 = vadd.f32 %v688_v62, %v687_v59 }
 0x151   :  { %v700_v4 = vadd.f32 %v699_v2, %v680_v1 }
 0x152   :  { %v690_v3 = vrot.slane %v689_v0, 4 }
 0x153   :  { %v702_v7 = vadd.f32 %v701_v5, %v700_v4 }
 0x154   :  { %v691_v6 = vadd.f32 %v690_v3, %v689_v0 }
 0x155   :  { %v703_v9 = vrot.slane %v702_v7, 4 }
 0x156   :  { %v692_v8 = vrot.slane %v691_v6, 2 }
 0x157   :  { %v704_v11 = vadd.f32 %v703_v9, %v702_v7 }
 0x158   :  { %v693_v10 = vadd.f32 %v692_v8, %v691_v6 }
 0x159   :  { %v705_v13 = vrot.slane %v704_v11, 2 }
 0x15a   :  { %v694_v12 = vrot.slane %v693_v10, 1 }
 0x15b   :  { %v706_v15 = vadd.f32 %v705_v13, %v704_v11 }
 0x15c   :  { %v695_v14 = vadd.f32 %v694_v12, %v693_v10 }
 0x15d   :  { %v707_v17 = vrot.slane %v706_v15, 1 }
 0x15e   :  { %v709_v16 = vmul.f32 0.02, %v695_v14 }
 0x15f   :  { %v708_v19 = vadd.f32 %v707_v17, %v706_v15 }
 0x160   :  { %v711_v18 = vadd.f32 1e-05, %v709_v16 }
 0x161   :  { %v710_v21 = vmul.f32 0.02, %v708_v19 }
 0x162   :  { %1024 = vrsqrt.f32 %v711_v18 }
 0x163   :  { %v712_v22 = vadd.f32 1e-05, %v710_v21 }
 0x165   :  { %1026 = vrsqrt.f32 %v712_v22 }
 0x16c   :  { %v1025_v24 = vpop.eup %1024 }
 0x16d   :  { %v715_v25 = vmul.f32 %v1025_v24, %v655_v32  ;;  %v717_v27 = vmul.f32 %v1025_v24, %v657_v33  ;;  %v719_v28 = vmul.f32 %v1025_v24, %v659_v35  ;;  %v721_v30 = vmul.f32 %v1025_v24, %v661_v36 }
 0x16e   :  { %v723_v31 = vmul.f32 %v1025_v24, %v663_v38  ;;  %v725_v43 = vmul.f32 %v1025_v24, %v665_v39  ;;  %v727_v44 = vmul.f32 %v1025_v24, %v667_v40 }
 0x16f   :  { %v729_v46 = vmax.f32 %v715_v25, 0.0  ;;  %v731_v48 = vmax.f32 %v717_v27, 0.0  ;;  %v1027_v23 = vpop.eup %1026  ;;  %v733_v50 = vmax.f32 %v719_v28, 0.0  ;;  %v735_v51 = vmax.f32 %v721_v30, 0.0 }
 0x170   :  { %v737_v29 = vmax.f32 %v723_v31, 0.0  ;;  %v739_v52 = vmax.f32 %v725_v43, 0.0  ;;  %v716_v54 = vmul.f32 %v1027_v23, %v1297_v42  ;;  %v718_v37 = vmul.f32 %v1027_v23, %v1300_v47 }
 0x171   :  { %v720_v45 = vmul.f32 %v1027_v23, %v1303_v49  ;;  %v722_v32 = vmul.f32 %v1027_v23, %v1305_v20  ;;  %v741_v33 = vmax.f32 %v727_v44, 0.0  ;;  %v724_v35 = vmul.f32 %v1027_v23, %v1307_v26 }
 0x172   :  { %v726_v36 = vmul.f32 %v1027_v23, %v1309_v34  ;;  %v728_v38 = vmul.f32 %v1027_v23, %v1311_v41  ;;  %v730_v39 = vmax.f32 %v716_v54, 0.0  ;;  %v732_v40 = vmax.f32 %v718_v37, 0.0 }
 0x173   :  { %v734_v53 = vmax.f32 %v720_v45, 0.0  ;;  %v736_v55 = vmax.f32 %v722_v32, 0.0  ;;  %v738_v56 = vmax.f32 %v724_v35, 0.0 }
 0x174   :  { %v740_v57 = vmax.f32 %v726_v36, 0.0  ;;  %v742_v42 = vmax.f32 %v728_v38, 0.0  ;;  %v885_v58 = vpack.c.bf16 %v730_v39, %v729_v46  ;;  %v886_v47 = vpack.c.bf16 %v732_v40, %v731_v48 }
 0x175   :  { %v887_v59 = vpack.c.bf16 %v734_v53, %v733_v50  ;;  %v888_v49 = vpack.c.bf16 %v736_v55, %v735_v51  ;;  %v889_v60 = vpack.c.bf16 %v738_v56, %v737_v29 }
 0x176   :  { %v890_v20 = vpack.c.bf16 %v740_v57, %v739_v52  ;;  %v891_v61 = vpack.c.bf16 %v742_v42, %v741_v33  ;;  %787 = vst [vmem:[%s1359_s2] sm:$0xff] %v885_v58  ;;  %788 = vst [vmem:[%s1359_s2 + $0x8] sm:$0xff] %v886_v47 }
 0x177   :  { %789 = vst [vmem:[%s1359_s2 + $0x10] sm:$0xff] %v887_v59  ;;  %790 = vst [vmem:[%s1359_s2 + $0x18] sm:$0xff] %v888_v49 }
 0x178   :  { %791 = vst [vmem:[%s1359_s2 + $0x20] sm:$0xff] %v889_v60  ;;  %792 = vst [vmem:[%s1359_s2 + $0x28] sm:$0xff] %v890_v20 }
 0x179   :  { %793 = vst [vmem:[%s1359_s2 + $0x30] sm:$0x11] %v891_v61 }

// kernel: forward.7
= control target key start
LH: loop header
LB: loop body
LE: loop exit
PB: predicated region body
PF: predicated region fallthrough
CT: control target
= control target key end

     0   :  { %v4555_v36 = vmov 1966171168   ;;  %v281_v38 = vlaneseq  ;;  %s5896_s0 = inlined_call_operand.vmem [shape: bf16[2,1024], index: 0, kind: input, shape index: {}]   ;;  %s5897_s1 = inlined_call_operand.vmem [shape: bf16[1024,512], index: 1, kind: input, shape index: {}]   ;;  %s5898_s2 = inlined_call_operand.vmem [shape: bf16[512,512], index: 2, kind: input, shape index: {}]   ;;  %s5899_s3 = inlined_call_operand.vmem [shape: bf16[512,100], index: 3, kind: input, shape index: {}]   ;;  %s5900_s4 = inlined_call_operand.hbm [shape: f32[2,100], index: 4, kind: output, shape index: {}]  }
   0x1   :  { %v3906_v0 = vld [vmem:[%s5897_s1 + $0x4] ss:$16 sps:$4 sm:$0xff]   ;;  %v3908_v1 = vld [vmem:[%s5897_s1 + $0xc] ss:$16 sps:$4 sm:$0xff]   ;;  %v3910_v2 = vld [vmem:[%s5897_s1] ss:$16 sps:$4 sm:$0xff]   ;;  %v279_v37 = vunpack.c.l.s4 %v4555_v36 }
   0x2   :  { %1614 = vmatprep.subr.bf16.mxu0 %v3906_v0  ;;  %v3911_v3 = vld [vmem:[%s5897_s1 + $0x8] ss:$16 sps:$4 sm:$0xff]   ;;  %1778 = vmatprep.subr.bf16.mxu1 %v3908_v1  ;;  %v3912_v4 = vld [vmem:[%s5897_s1 + $0x24] ss:$16 sps:$4 sm:$0xff]   ;;  %v3914_v5 = vld [vmem:[%s5897_s1 + $0x2c] ss:$16 sps:$4 sm:$0xff]  }
   0x3   :  { %1615 = vmatpush1.bf16.msra.mxu0 %v3910_v2  ;;  %1779 = vmatpush1.bf16.msra.mxu1 %v3911_v3  ;;  %v3916_v6 = vld [vmem:[%s5897_s1 + $0x20] ss:$16 sps:$4 sm:$0xff]   ;;  %v3917_v7 = vld [vmem:[%s5897_s1 + $0x28] ss:$16 sps:$4 sm:$0xff]   ;;  %v3918_v8 = vld [vmem:[%s5897_s1 + $0x44] ss:$16 sps:$4 sm:$0xff]   ;;  %v280_v42 = vunpack.c.0.s8 %v279_v37 }
   0x4   :  { %1616 = vmatprep.subr.bf16.mxu0 %v3912_v4  ;;  %1780 = vmatprep.subr.bf16.mxu1 %v3914_v5  ;;  %v3920_v9 = vld [vmem:[%s5897_s1 + $0x4c] ss:$16 sps:$4 sm:$0xff]   ;;  %v3922_v10 = vld [vmem:[%s5897_s1 + $0x40] ss:$16 sps:$4 sm:$0xff]   ;;  %v3923_v11 = vld [vmem:[%s5897_s1 + $0x48] ss:$16 sps:$4 sm:$0xff]  }
   0x5   :  { %v3924_v12 = vld [vmem:[%s5897_s1 + $0x64] ss:$16 sps:$4 sm:$0xff]   ;;  %v3926_v13 = vld [vmem:[%s5897_s1 + $0x6c] ss:$16 sps:$4 sm:$0xff]   ;;  %v3928_v14 = vld [vmem:[%s5897_s1 + $0x60] ss:$16 sps:$4 sm:$0xff]  }
   0x6   :  { %v3929_v15 = vld [vmem:[%s5897_s1 + $0x68] ss:$16 sps:$4 sm:$0xff]   ;;  %v3930_v16 = vld [vmem:[%s5897_s1 + $0x84] ss:$16 sps:$4 sm:$0xff]   ;;  %v3932_v17 = vld [vmem:[%s5897_s1 + $0x8c] ss:$16 sps:$4 sm:$0xff]  }
   0x7   :  { %1617 = vmatpush1.bf16.msra.mxu0 %v3916_v6  ;;  %1781 = vmatpush1.bf16.msra.mxu1 %v3917_v7  ;;  %v3934_v18 = vld [vmem:[%s5897_s1 + $0x80] ss:$16 sps:$4 sm:$0xff]   ;;  %v3935_v19 = vld [vmem:[%s5897_s1 + $0x88] ss:$16 sps:$4 sm:$0xff]   ;;  %v3936_v20 = vld [vmem:[%s5897_s1 + $0xa4] ss:$16 sps:$4 sm:$0xff]  }
   0x8   :  { %1618 = vmatprep.subr.bf16.mxu0 %v3918_v8  ;;  %1782 = vmatprep.subr.bf16.mxu1 %v3920_v9  ;;  %v3938_v21 = vld [vmem:[%s5897_s1 + $0xac] ss:$16 sps:$4 sm:$0xff]   ;;  %v3940_v22 = vld [vmem:[%s5897_s1 + $0xa0] ss:$16 sps:$4 sm:$0xff]   ;;  %v3941_v23 = vld [vmem:[%s5897_s1 + $0xa8] ss:$16 sps:$4 sm:$0xff]  }
   0x9   :  { %v3942_v24 = vld [vmem:[%s5897_s1 + $0xc4] ss:$16 sps:$4 sm:$0xff]   ;;  %v3944_v25 = vld [vmem:[%s5897_s1 + $0xcc] ss:$16 sps:$4 sm:$0xff]   ;;  %v3946_v26 = vld [vmem:[%s5897_s1 + $0xc0] ss:$16 sps:$4 sm:$0xff]  }
   0xa   :  { %v3947_v27 = vld [vmem:[%s5897_s1 + $0xc8] ss:$16 sps:$4 sm:$0xff]   ;;  %v3948_v28 = vld [vmem:[%s5897_s1 + $0xe4] ss:$16 sps:$4 sm:$0xff]   ;;  %v3950_v29 = vld [vmem:[%s5897_s1 + $0xec] ss:$16 sps:$4 sm:$0xff]  }
   0xb   :  { %1619 = vmatpush1.bf16.msra.mxu0 %v3922_v10  ;;  %1783 = vmatpush1.bf16.msra.mxu1 %v3923_v11  ;;  %v3952_v30 = vld [vmem:[%s5897_s1 + $0xe0] ss:$16 sps:$4 sm:$0xff]   ;;  %v3953_v31 = vld [vmem:[%s5897_s1 + $0xe8] ss:$16 sps:$4 sm:$0xff]   ;;  %v3954_v32 = vld [vmem:[%s5897_s1 + $0x104] ss:$16 sps:$4 sm:$0xff]  }
   0xc   :  { %1620 = vmatprep.subr.bf16.mxu0 %v3924_v12  ;;  %1784 = vmatprep.subr.bf16.mxu1 %v3926_v13  ;;  %v3956_v33 = vld [vmem:[%s5897_s1 + $0x10c] ss:$16 sps:$4 sm:$0xff]   ;;  %v3958_v34 = vld [vmem:[%s5897_s1 + $0x100] ss:$16 sps:$4 sm:$0xff]   ;;  %v3959_v35 = vld [vmem:[%s5897_s1 + $0x108] ss:$16 sps:$4 sm:$0xff]  }
   0xd   :  { %v3960_v39 = vld [vmem:[%s5897_s1 + $0x124] ss:$16 sps:$4 sm:$0xff]   ;;  %v3962_v40 = vld [vmem:[%s5897_s1 + $0x12c] ss:$16 sps:$4 sm:$0xff]   ;;  %v3964_v41 = vld [vmem:[%s5897_s1 + $0x120] ss:$16 sps:$4 sm:$0xff]  }
   0xe   :  { %v282_v43 = vshrl.u32 %v281_v38, 7  ;;  %v3965_v44 = vld [vmem:[%s5897_s1 + $0x128] ss:$16 sps:$4 sm:$0xff]   ;;  %v3966_v45 = vld [vmem:[%s5897_s1 + $0x144] ss:$16 sps:$4 sm:$0xff]  }
   0xf   :  { %1621 = vmatpush1.bf16.msra.mxu0 %v3928_v14  ;;  %1785 = vmatpush1.bf16.msra.mxu1 %v3929_v15  ;;  %v3968_v46 = vld [vmem:[%s5897_s1 + $0x14c] ss:$16 sps:$4 sm:$0xff]   ;;  %v3970_v47 = vld [vmem:[%s5897_s1 + $0x140] ss:$16 sps:$4 sm:$0xff]   ;;  %v3971_v48 = vld [vmem:[%s5897_s1 + $0x148] ss:$16 sps:$4 sm:$0xff]  }
  0x10   :  { %1622 = vmatprep.subr.bf16.mxu0 %v3930_v16  ;;  %1786 = vmatprep.subr.bf16.mxu1 %v3932_v17  ;;  %v4714_v49 = vsub.s32 %v280_v42, %v282_v43  ;;  %v3972_v50 = vld [vmem:[%s5897_s1 + $0x164] ss:$16 sps:$4 sm:$0xff]   ;;  %v3974_v51 = vld [vmem:[%s5897_s1 + $0x16c] ss:$16 sps:$4 sm:$0xff]   ;;  %v3976_v53 = vld [vmem:[%s5897_s1 + $0x160] ss:$16 sps:$4 sm:$0xff]  }
  0x11   :  { %v19_v52 = vld [vmem:[%s5896_s0] sm:$0xff]  ;;  %v3977_v55 = vld [vmem:[%s5897_s1 + $0x168] ss:$16 sps:$4 sm:$0xff]   ;;  %v3980_v57 = vld [vmem:[%s5897_s1 + $0x18c] ss:$16 sps:$4 sm:$0xff]  }
  0x12   :  { %v284_v54 = vrot.slane %v19_v52, %v4714_v49  ;;  %v3978_v56 = vld [vmem:[%s5897_s1 + $0x184] ss:$16 sps:$4 sm:$0xff]   ;;  %v3982_v59 = vld [vmem:[%s5897_s1 + $0x180] ss:$16 sps:$4 sm:$0xff]   ;;  %v3983_v61 = vld [vmem:[%s5897_s1 + $0x188] ss:$16 sps:$4 sm:$0xff]   ;;  %v277_v9 = vcombine.high %v19_v52, %v19_v52 }
  0x13   :  { %1623 = vmatpush1.bf16.msra.mxu0 %v3934_v18  ;;  %1787 = vmatpush1.bf16.msra.mxu1 %v3935_v19  ;;  %v3984_v62 = vld [vmem:[%s5897_s1 + $0x1a4] ss:$16 sps:$4 sm:$0xff]   ;;  %v3986_v63 = vld [vmem:[%s5897_s1 + $0x1ac] ss:$16 sps:$4 sm:$0xff]   ;;  %v3988_v0 = vld [vmem:[%s5897_s1 + $0x1a0] ss:$16 sps:$4 sm:$0xff]  }
  0x14   :  { %1624 = vmatprep.subr.bf16.mxu0 %v3936_v20  ;;  %1788 = vmatprep.subr.bf16.mxu1 %v3938_v21  ;;  %v292_v58 = vcombine.high %v284_v54, %v284_v54  ;;  %v3989_v1 = vld [vmem:[%s5897_s1 + $0x1a8] ss:$16 sps:$4 sm:$0xff]   ;;  %v3990_v2 = vld [vmem:[%s5897_s1 + $0x1c4] ss:$16 sps:$4 sm:$0xff]   ;;  %v3992_v3 = vld [vmem:[%s5897_s1 + $0x1cc] ss:$16 sps:$4 sm:$0xff]   ;;  %v291_v13 = vrot.slane %v277_v9, %v4714_v49  ;;  %v4792_v15 = vrot.slane %v284_v54, %v4714_v49 }
  0x15   :  { %v3994_v4 = vld [vmem:[%s5897_s1 + $0x1c0] ss:$16 sps:$4 sm:$0xff]   ;;  %v3995_v5 = vld [vmem:[%s5897_s1 + $0x1c8] ss:$16 sps:$4 sm:$0xff]   ;;  %v3996_v6 = vld [vmem:[%s5897_s1 + $0x1e4] ss:$16 sps:$4 sm:$0xff]  }
  0x16   :  { %v314_v60 = vrot.slane %v292_v58, %v4714_v49  ;;  %v3998_v7 = vld [vmem:[%s5897_s1 + $0x1ec] ss:$16 sps:$4 sm:$0xff]   ;;  %v4000_v8 = vld [vmem:[%s5897_s1 + $0x1e0] ss:$16 sps:$4 sm:$0xff]   ;;  %v4001_v10 = vld [vmem:[%s5897_s1 + $0x1e8] ss:$16 sps:$4 sm:$0xff]   ;;  %v293_v16 = vcombine.high %v291_v13, %v291_v13  ;;  %v4807_v21 = vrot.slane %v291_v13, %v4714_v49 }
  0x17   :  { %1625 = vmatpush1.bf16.msra.mxu0 %v3940_v22  ;;  %1789 = vmatpush1.bf16.msra.mxu1 %v3941_v23  ;;  %v4004_v11 = vld [vmem:[%s5897_s1 + $0x204] ss:$16 sps:$4 sm:$0xff]   ;;  %v4007_v12 = vld [vmem:[%s5897_s1 + $0x20c] ss:$16 sps:$4 sm:$0xff]   ;;  %v4002_v14 = vld [vmem:[%s5897_s1 + $0x200] ss:$16 sps:$4 sm:$0xff]  }
  0x18   :  { %1626 = vmatprep.subr.bf16.mxu0 %v3942_v24  ;;  %1790 = vmatprep.subr.bf16.mxu1 %v3944_v25  ;;  %v4005_v17 = vld [vmem:[%s5897_s1 + $0x208] ss:$16 sps:$4 sm:$0xff]   ;;  %v4010_v18 = vld [vmem:[%s5897_s1 + $0x224] ss:$16 sps:$4 sm:$0xff]   ;;  %v4013_v19 = vld [vmem:[%s5897_s1 + $0x22c] ss:$16 sps:$4 sm:$0xff]   ;;  %v4804_v20 = vrot.slane %v293_v16, %v4714_v49  ;;  %v324_v22 = vcombine.high %v314_v60, %v314_v60 }
  0x19   :  { %1646 = vmatprep.mubr.bf16.mxu0 %v314_v60  ;;  %1810 = vmatprep.mubr.bf16.mxu1 %v314_v60  ;;  %v4008_v23 = vld [vmem:[%s5897_s1 + $0x220] ss:$16 sps:$4 sm:$0xff]   ;;  %v4011_v24 = vld [vmem:[%s5897_s1 + $0x228] ss:$16 sps:$4 sm:$0xff]   ;;  %v4016_v25 = vld [vmem:[%s5897_s1 + $0x244] ss:$16 sps:$4 sm:$0xff]  }
  0x1a   :  { %v4029_v36 = vld [vmem:[%s5897_s1 + $0x288] ss:$16 sps:$4 sm:$0xff]   ;;  %v4034_v37 = vld [vmem:[%s5897_s1 + $0x2a4] ss:$16 sps:$4 sm:$0xff]   ;;  %v4037_v38 = vld [vmem:[%s5897_s1 + $0x2ac] ss:$16 sps:$4 sm:$0xff]  }
  0x1b   :  { %1627 = vmatpush1.bf16.msra.mxu0 %v3946_v26  ;;  %1791 = vmatpush1.bf16.msra.mxu1 %v3947_v27  ;;  %v4019_v26 = vld [vmem:[%s5897_s1 + $0x24c] ss:$16 sps:$4 sm:$0xff]   ;;  %v4014_v27 = vld [vmem:[%s5897_s1 + $0x240] ss:$16 sps:$4 sm:$0xff]   ;;  %v4052_v49 = vld [vmem:[%s5897_s1 + $0x304] ss:$16 sps:$4 sm:$0xff]  }
  0x1c   :  { %1628 = vmatprep.subr.bf16.mxu0 %v3948_v28  ;;  %1792 = vmatprep.subr.bf16.mxu1 %v3950_v29  ;;  %v4017_v28 = vld [vmem:[%s5897_s1 + $0x248] ss:$16 sps:$4 sm:$0xff]   ;;  %v4022_v29 = vld [vmem:[%s5897_s1 + $0x264] ss:$16 sps:$4 sm:$0xff]   ;;  %v4043_v42 = vld [vmem:[%s5897_s1 + $0x2cc] ss:$16 sps:$4 sm:$0xff]  }
  0x1d   :  { %v4038_v43 = vld [vmem:[%s5897_s1 + $0x2c0] ss:$16 sps:$4 sm:$0xff]   ;;  %v4053_v52 = vld [vmem:[%s5897_s1 + $0x308] ss:$16 sps:$4 sm:$0xff]   ;;  %v4061_v54 = vld [vmem:[%s5897_s1 + $0x32c] ss:$16 sps:$4 sm:$0xff]  }
  0x1e   :  { %v4067_v58 = vld [vmem:[%s5897_s1 + $0x34c] ss:$16 sps:$4 sm:$0xff]   ;;  %v4065_v60 = vld [vmem:[%s5897_s1 + $0x348] ss:$16 sps:$4 sm:$0xff]   ;;  %v4088_v9 = vld [vmem:[%s5897_s1 + $0x3c4] ss:$16 sps:$4 sm:$0xff]  }
  0x1f   :  { %1629 = vmatpush1.bf16.msra.mxu0 %v3952_v30  ;;  %1793 = vmatpush1.bf16.msra.mxu1 %v3953_v31  ;;  %v4025_v30 = vld [vmem:[%s5897_s1 + $0x26c] ss:$16 sps:$4 sm:$0xff]   ;;  %v4020_v31 = vld [vmem:[%s5897_s1 + $0x260] ss:$16 sps:$4 sm:$0xff]   ;;  %v4094_v13 = vld [vmem:[%s5897_s1 + $0x3e4] ss:$16 sps:$4 sm:$0xff]  }
  0x20   :  { %1630 = vmatprep.subr.bf16.mxu0 %v3954_v32  ;;  %1794 = vmatprep.subr.bf16.mxu1 %v3956_v33  ;;  %v4023_v32 = vld [vmem:[%s5897_s1 + $0x268] ss:$16 sps:$4 sm:$0xff]   ;;  %v4028_v33 = vld [vmem:[%s5897_s1 + $0x284] ss:$16 sps:$4 sm:$0xff]   ;;  %v4092_v16 = vld [vmem:[%s5897_s1 + $0x3e0] ss:$16 sps:$4 sm:$0xff]  }
  0x23   :  { %1631 = vmatpush1.bf16.msra.mxu0 %v3958_v34  ;;  %1795 = vmatpush1.bf16.msra.mxu1 %v3959_v35  ;;  %v4031_v34 = vld [vmem:[%s5897_s1 + $0x28c] ss:$16 sps:$4 sm:$0xff]   ;;  %v4026_v35 = vld [vmem:[%s5897_s1 + $0x280] ss:$16 sps:$4 sm:$0xff]  }
  0x24   :  { %1632 = vmatprep.subr.bf16.mxu0 %v3960_v39  ;;  %1796 = vmatprep.subr.bf16.mxu1 %v3962_v40  ;;  %v4032_v39 = vld [vmem:[%s5897_s1 + $0x2a0] ss:$16 sps:$4 sm:$0xff]   ;;  %v4035_v40 = vld [vmem:[%s5897_s1 + $0x2a8] ss:$16 sps:$4 sm:$0xff]  }
  0x27   :  { %1633 = vmatpush1.bf16.msra.mxu0 %v3964_v41  ;;  %1797 = vmatpush1.bf16.msra.mxu1 %v3965_v44  ;;  %v4040_v41 = vld [vmem:[%s5897_s1 + $0x2c4] ss:$16 sps:$4 sm:$0xff]   ;;  %v4041_v44 = vld [vmem:[%s5897_s1 + $0x2c8] ss:$16 sps:$4 sm:$0xff]  }
  0x28   :  { %1634 = vmatprep.subr.bf16.mxu0 %v3966_v45  ;;  %1798 = vmatprep.subr.bf16.mxu1 %v3968_v46  ;;  %v4046_v45 = vld [vmem:[%s5897_s1 + $0x2e4] ss:$16 sps:$4 sm:$0xff]   ;;  %v4049_v46 = vld [vmem:[%s5897_s1 + $0x2ec] ss:$16 sps:$4 sm:$0xff]  }
  0x2b   :  { %1635 = vmatpush1.bf16.msra.mxu0 %v3970_v47  ;;  %1799 = vmatpush1.bf16.msra.mxu1 %v3971_v48  ;;  %v4044_v47 = vld [vmem:[%s5897_s1 + $0x2e0] ss:$16 sps:$4 sm:$0xff]   ;;  %v4047_v48 = vld [vmem:[%s5897_s1 + $0x2e8] ss:$16 sps:$4 sm:$0xff]  }
  0x2c   :  { %1636 = vmatprep.subr.bf16.mxu0 %v3972_v50  ;;  %1800 = vmatprep.subr.bf16.mxu1 %v3974_v51  ;;  %v4055_v50 = vld [vmem:[%s5897_s1 + $0x30c] ss:$16 sps:$4 sm:$0xff]   ;;  %v4050_v51 = vld [vmem:[%s5897_s1 + $0x300] ss:$16 sps:$4 sm:$0xff]  }
  0x2f   :  { %1637 = vmatpush1.bf16.msra.mxu0 %v3976_v53  ;;  %1801 = vmatpush1.bf16.msra.mxu1 %v3977_v55  ;;  %v4058_v53 = vld [vmem:[%s5897_s1 + $0x324] ss:$16 sps:$4 sm:$0xff]   ;;  %v4056_v55 = vld [vmem:[%s5897_s1 + $0x320] ss:$16 sps:$4 sm:$0xff]  }
  0x30   :  { %1638 = vmatprep.subr.bf16.mxu0 %v3978_v56  ;;  %1802 = vmatprep.subr.bf16.mxu1 %v3980_v57  ;;  %v4059_v56 = vld [vmem:[%s5897_s1 + $0x328] ss:$16 sps:$4 sm:$0xff]   ;;  %v4064_v57 = vld [vmem:[%s5897_s1 + $0x344] ss:$16 sps:$4 sm:$0xff]  }
  0x33   :  { %1639 = vmatpush1.bf16.msra.mxu0 %v3982_v59  ;;  %1803 = vmatpush1.bf16.msra.mxu1 %v3983_v61  ;;  %v4062_v59 = vld [vmem:[%s5897_s1 + $0x340] ss:$16 sps:$4 sm:$0xff]   ;;  %v4070_v61 = vld [vmem:[%s5897_s1 + $0x364] ss:$16 sps:$4 sm:$0xff]  }
  0x34   :  { %1640 = vmatprep.subr.bf16.mxu0 %v3984_v62  ;;  %1804 = vmatprep.subr.bf16.mxu1 %v3986_v63  ;;  %v4073_v62 = vld [vmem:[%s5897_s1 + $0x36c] ss:$16 sps:$4 sm:$0xff]   ;;  %v4068_v63 = vld [vmem:[%s5897_s1 + $0x360] ss:$16 sps:$4 sm:$0xff]  }
  0x37   :  { %1641 = vmatpush1.bf16.msra.mxu0 %v3988_v0  ;;  %1805 = vmatpush1.bf16.msra.mxu1 %v3989_v1  ;;  %v4071_v0 = vld [vmem:[%s5897_s1 + $0x368] ss:$16 sps:$4 sm:$0xff]   ;;  %v4076_v1 = vld [vmem:[%s5897_s1 + $0x384] ss:$16 sps:$4 sm:$0xff]  }
  0x38   :  { %1642 = vmatprep.subr.bf16.mxu0 %v3990_v2  ;;  %1806 = vmatprep.subr.bf16.mxu1 %v3992_v3  ;;  %v4079_v2 = vld [vmem:[%s5897_s1 + $0x38c] ss:$16 sps:$4 sm:$0xff]   ;;  %v4074_v3 = vld [vmem:[%s5897_s1 + $0x380] ss:$16 sps:$4 sm:$0xff]  }
  0x3b   :  { %1643 = vmatpush1.bf16.msra.mxu0 %v3994_v4  ;;  %1807 = vmatpush1.bf16.msra.mxu1 %v3995_v5  ;;  %v4077_v4 = vld [vmem:[%s5897_s1 + $0x388] ss:$16 sps:$4 sm:$0xff]   ;;  %v4082_v5 = vld [vmem:[%s5897_s1 + $0x3a4] ss:$16 sps:$4 sm:$0xff]  }
  0x3c   :  { %1644 = vmatprep.subr.bf16.mxu0 %v3996_v6  ;;  %1808 = vmatprep.subr.bf16.mxu1 %v3998_v7  ;;  %v4085_v6 = vld [vmem:[%s5897_s1 + $0x3ac] ss:$16 sps:$4 sm:$0xff]   ;;  %v4080_v7 = vld [vmem:[%s5897_s1 + $0x3a0] ss:$16 sps:$4 sm:$0xff]  }
  0x3f   :  { %1645 = vmatpush1.bf16.msra.mxu0 %v4000_v8  ;;  %1809 = vmatpush1.bf16.msra.mxu1 %v4001_v10  ;;  %v4083_v8 = vld [vmem:[%s5897_s1 + $0x3a8] ss:$16 sps:$4 sm:$0xff]   ;;  %v4091_v10 = vld [vmem:[%s5897_s1 + $0x3cc] ss:$16 sps:$4 sm:$0xff]  }
  0x40   :  { %1655 = vmatprep.subr.bf16.mxu0 %v4004_v11  ;;  %1819 = vmatprep.subr.bf16.mxu1 %v4007_v12  ;;  %v4086_v11 = vld [vmem:[%s5897_s1 + $0x3c0] ss:$16 sps:$4 sm:$0xff]   ;;  %v4089_v12 = vld [vmem:[%s5897_s1 + $0x3c8] ss:$16 sps:$4 sm:$0xff]  }
  0x42   :  { %1647 = vmatmul.mubr.bf16.vlgmr.msra.gmra.mrb[0].mxu0 %v4792_v15  ;;  %1811 = vmatmul.mubr.bf16.vlgmr.msra.gmra.mrb[0].mxu1 %v4792_v15 }
  0x43   :  { %1656 = vmatpush1.bf16.msra.mxu0 %v4002_v14  ;;  %1820 = vmatpush1.bf16.msra.mxu1 %v4005_v17  ;;  %v4097_v14 = vld [vmem:[%s5897_s1 + $0x3ec] ss:$16 sps:$4 sm:$0xff]   ;;  %v4095_v17 = vld [vmem:[%s5897_s1 + $0x3e8] ss:$16 sps:$4 sm:$0xff]  }
  0x44   :  { %1657 = vmatprep.subr.bf16.mxu0 %v4010_v18  ;;  %1821 = vmatprep.subr.bf16.mxu1 %v4013_v19  ;;  %v4100_v18 = vld [vmem:[%s5897_s1 + $0x404] ss:$16 sps:$4 sm:$0xff]   ;;  %v4103_v19 = vld [vmem:[%s5897_s1 + $0x40c] ss:$16 sps:$4 sm:$0xff]  }
  0x45   :  { %1687 = vmatprep.mubr.bf16.mxu0 %v324_v22  ;;  %1851 = vmatprep.mubr.bf16.mxu1 %v324_v22  ;;  %v4098_v22 = vld [vmem:[%s5897_s1 + $0x400] ss:$16 sps:$4 sm:$0xff]  }
  0x47   :  { %1658 = vmatpush1.bf16.msra.mxu0 %v4008_v23  ;;  %1822 = vmatpush1.bf16.msra.mxu1 %v4011_v24  ;;  %v322_v23 = vcombine.high %v4792_v15, %v4792_v15  ;;  %v4101_v24 = vld [vmem:[%s5897_s1 + $0x408] ss:$16 sps:$4 sm:$0xff]   ;;  %v4104_v15 = vld [vmem:[%s5897_s1 + $0x420] ss:$16 sps:$4 sm:$0xff]  }
  0x48   :  { %1659 = vmatprep.subr.bf16.mxu0 %v4016_v25  ;;  %1823 = vmatprep.subr.bf16.mxu1 %v4019_v26  ;;  %v4106_v25 = vld [vmem:[%s5897_s1 + $0x424] ss:$16 sps:$4 sm:$0xff]   ;;  %v4109_v26 = vld [vmem:[%s5897_s1 + $0x42c] ss:$16 sps:$4 sm:$0xff]  }
  0x4b   :  { %1660 = vmatpush1.bf16.msra.mxu0 %v4014_v27  ;;  %1824 = vmatpush1.bf16.msra.mxu1 %v4017_v28  ;;  %v4107_v27 = vld [vmem:[%s5897_s1 + $0x428] ss:$16 sps:$4 sm:$0xff]   ;;  %v4112_v28 = vld [vmem:[%s5897_s1 + $0x444] ss:$16 sps:$4 sm:$0xff]  }
  0x4c   :  { %1661 = vmatprep.subr.bf16.mxu0 %v4022_v29  ;;  %1825 = vmatprep.subr.bf16.mxu1 %v4025_v30  ;;  %v4115_v29 = vld [vmem:[%s5897_s1 + $0x44c] ss:$16 sps:$4 sm:$0xff]   ;;  %v4110_v30 = vld [vmem:[%s5897_s1 + $0x440] ss:$16 sps:$4 sm:$0xff]  }
  0x4f   :  { %1662 = vmatpush1.bf16.msra.mxu0 %v4020_v31  ;;  %1826 = vmatpush1.bf16.msra.mxu1 %v4023_v32  ;;  %v4113_v31 = vld [vmem:[%s5897_s1 + $0x448] ss:$16 sps:$4 sm:$0xff]   ;;  %v4118_v32 = vld [vmem:[%s5897_s1 + $0x464] ss:$16 sps:$4 sm:$0xff]  }
  0x50   :  { %1663 = vmatprep.subr.bf16.mxu0 %v4028_v33  ;;  %1827 = vmatprep.subr.bf16.mxu1 %v4031_v34  ;;  %v4121_v33 = vld [vmem:[%s5897_s1 + $0x46c] ss:$16 sps:$4 sm:$0xff]   ;;  %v4116_v34 = vld [vmem:[%s5897_s1 + $0x460] ss:$16 sps:$4 sm:$0xff]  }
  0x53   :  { %1664 = vmatpush1.bf16.msra.mxu0 %v4026_v35  ;;  %1828 = vmatpush1.bf16.msra.mxu1 %v4029_v36  ;;  %v4119_v35 = vld [vmem:[%s5897_s1 + $0x468] ss:$16 sps:$4 sm:$0xff]   ;;  %v4124_v36 = vld [vmem:[%s5897_s1 + $0x484] ss:$16 sps:$4 sm:$0xff]  }
  0x54   :  { %1665 = vmatprep.subr.bf16.mxu0 %v4034_v37  ;;  %1829 = vmatprep.subr.bf16.mxu1 %v4037_v38  ;;  %v4127_v37 = vld [vmem:[%s5897_s1 + $0x48c] ss:$16 sps:$4 sm:$0xff]   ;;  %v4122_v38 = vld [vmem:[%s5897_s1 + $0x480] ss:$16 sps:$4 sm:$0xff]  }
  0x57   :  { %1666 = vmatpush1.bf16.msra.mxu0 %v4032_v39  ;;  %1830 = vmatpush1.bf16.msra.mxu1 %v4035_v40  ;;  %v4125_v39 = vld [vmem:[%s5897_s1 + $0x488] ss:$16 sps:$4 sm:$0xff]   ;;  %v4130_v40 = vld [vmem:[%s5897_s1 + $0x4a4] ss:$16 sps:$4 sm:$0xff]  }
  0x58   :  { %1667 = vmatprep.subr.bf16.mxu0 %v4040_v41  ;;  %1831 = vmatprep.subr.bf16.mxu1 %v4043_v42  ;;  %v4133_v41 = vld [vmem:[%s5897_s1 + $0x4ac] ss:$16 sps:$4 sm:$0xff]   ;;  %v4128_v42 = vld [vmem:[%s5897_s1 + $0x4a0] ss:$16 sps:$4 sm:$0xff]  }
  0x5b   :  { %1668 = vmatpush1.bf16.msra.mxu0 %v4038_v43  ;;  %1832 = vmatpush1.bf16.msra.mxu1 %v4041_v44  ;;  %v4131_v43 = vld [vmem:[%s5897_s1 + $0x4a8] ss:$16 sps:$4 sm:$0xff]   ;;  %v4136_v44 = vld [vmem:[%s5897_s1 + $0x4c4] ss:$16 sps:$4 sm:$0xff]  }
  0x5c   :  { %1669 = vmatprep.subr.bf16.mxu0 %v4046_v45  ;;  %1833 = vmatprep.subr.bf16.mxu1 %v4049_v46  ;;  %v4139_v45 = vld [vmem:[%s5897_s1 + $0x4cc] ss:$16 sps:$4 sm:$0xff]   ;;  %v4134_v46 = vld [vmem:[%s5897_s1 + $0x4c0] ss:$16 sps:$4 sm:$0xff]  }
  0x5f   :  { %1670 = vmatpush1.bf16.msra.mxu0 %v4044_v47  ;;  %1834 = vmatpush1.bf16.msra.mxu1 %v4047_v48  ;;  %v4137_v47 = vld [vmem:[%s5897_s1 + $0x4c8] ss:$16 sps:$4 sm:$0xff]   ;;  %v4142_v48 = vld [vmem:[%s5897_s1 + $0x4e4] ss:$16 sps:$4 sm:$0xff]  }
  0x60   :  { %1671 = vmatprep.subr.bf16.mxu0 %v4052_v49  ;;  %1835 = vmatprep.subr.bf16.mxu1 %v4055_v50  ;;  %v4145_v49 = vld [vmem:[%s5897_s1 + $0x4ec] ss:$16 sps:$4 sm:$0xff]   ;;  %v4140_v50 = vld [vmem:[%s5897_s1 + $0x4e0] ss:$16 sps:$4 sm:$0xff]  }
  0x63   :  { %1672 = vmatpush1.bf16.msra.mxu0 %v4050_v51  ;;  %1836 = vmatpush1.bf16.msra.mxu1 %v4053_v52  ;;  %v4143_v51 = vld [vmem:[%s5897_s1 + $0x4e8] ss:$16 sps:$4 sm:$0xff]   ;;  %v4148_v52 = vld [vmem:[%s5897_s1 + $0x504] ss:$16 sps:$4 sm:$0xff]  }
  0x64   :  { %1673 = vmatprep.subr.bf16.mxu0 %v4058_v53  ;;  %1837 = vmatprep.subr.bf16.mxu1 %v4061_v54  ;;  %v4151_v53 = vld [vmem:[%s5897_s1 + $0x50c] ss:$16 sps:$4 sm:$0xff]   ;;  %v4146_v54 = vld [vmem:[%s5897_s1 + $0x500] ss:$16 sps:$4 sm:$0xff]  }
  0x67   :  { %1674 = vmatpush1.bf16.msra.mxu0 %v4056_v55  ;;  %1838 = vmatpush1.bf16.msra.mxu1 %v4059_v56  ;;  %v4149_v55 = vld [vmem:[%s5897_s1 + $0x508] ss:$16 sps:$4 sm:$0xff]   ;;  %v4154_v56 = vld [vmem:[%s5897_s1 + $0x524] ss:$16 sps:$4 sm:$0xff]  }
  0x68   :  { %1675 = vmatprep.subr.bf16.mxu0 %v4064_v57  ;;  %1839 = vmatprep.subr.bf16.mxu1 %v4067_v58  ;;  %v4157_v57 = vld [vmem:[%s5897_s1 + $0x52c] ss:$16 sps:$4 sm:$0xff]   ;;  %v4152_v58 = vld [vmem:[%s5897_s1 + $0x520] ss:$16 sps:$4 sm:$0xff]  }
  0x6b   :  { %1676 = vmatpush1.bf16.msra.mxu0 %v4062_v59  ;;  %1840 = vmatpush1.bf16.msra.mxu1 %v4065_v60  ;;  %v4155_v59 = vld [vmem:[%s5897_s1 + $0x528] ss:$16 sps:$4 sm:$0xff]   ;;  %v4160_v60 = vld [vmem:[%s5897_s1 + $0x544] ss:$16 sps:$4 sm:$0xff]  }
  0x6c   :  { %1677 = vmatprep.subr.bf16.mxu0 %v4070_v61  ;;  %1841 = vmatprep.subr.bf16.mxu1 %v4073_v62  ;;  %v4163_v61 = vld [vmem:[%s5897_s1 + $0x54c] ss:$16 sps:$4 sm:$0xff]   ;;  %v4158_v62 = vld [vmem:[%s5897_s1 + $0x540] ss:$16 sps:$4 sm:$0xff]  }
  0x6f   :  { %1678 = vmatpush1.bf16.msra.mxu0 %v4068_v63  ;;  %1842 = vmatpush1.bf16.msra.mxu1 %v4071_v0  ;;  %v4161_v63 = vld [vmem:[%s5897_s1 + $0x548] ss:$16 sps:$4 sm:$0xff]   ;;  %v4166_v0 = vld [vmem:[%s5897_s1 + $0x564] ss:$16 sps:$4 sm:$0xff]  }
  0x70   :  { %1679 = vmatprep.subr.bf16.mxu0 %v4076_v1  ;;  %1843 = vmatprep.subr.bf16.mxu1 %v4079_v2  ;;  %v4169_v1 = vld [vmem:[%s5897_s1 + $0x56c] ss:$16 sps:$4 sm:$0xff]   ;;  %v4164_v2 = vld [vmem:[%s5897_s1 + $0x560] ss:$16 sps:$4 sm:$0xff]  }
  0x73   :  { %1680 = vmatpush1.bf16.msra.mxu0 %v4074_v3  ;;  %1844 = vmatpush1.bf16.msra.mxu1 %v4077_v4  ;;  %v4167_v3 = vld [vmem:[%s5897_s1 + $0x568] ss:$16 sps:$4 sm:$0xff]   ;;  %v4172_v4 = vld [vmem:[%s5897_s1 + $0x584] ss:$16 sps:$4 sm:$0xff]  }
  0x74   :  { %1681 = vmatprep.subr.bf16.mxu0 %v4082_v5  ;;  %1845 = vmatprep.subr.bf16.mxu1 %v4085_v6  ;;  %v4175_v5 = vld [vmem:[%s5897_s1 + $0x58c] ss:$16 sps:$4 sm:$0xff]   ;;  %v4170_v6 = vld [vmem:[%s5897_s1 + $0x580] ss:$16 sps:$4 sm:$0xff]  }
  0x77   :  { %1682 = vmatpush1.bf16.msra.mxu0 %v4080_v7  ;;  %1846 = vmatpush1.bf16.msra.mxu1 %v4083_v8  ;;  %v4173_v7 = vld [vmem:[%s5897_s1 + $0x588] ss:$16 sps:$4 sm:$0xff]   ;;  %v4178_v8 = vld [vmem:[%s5897_s1 + $0x5a4] ss:$16 sps:$4 sm:$0xff]  }
  0x78   :  { %1683 = vmatprep.subr.bf16.mxu0 %v4088_v9  ;;  %1847 = vmatprep.subr.bf16.mxu1 %v4091_v10  ;;  %v4181_v9 = vld [vmem:[%s5897_s1 + $0x5ac] ss:$16 sps:$4 sm:$0xff]   ;;  %v4176_v10 = vld [vmem:[%s5897_s1 + $0x5a0] ss:$16 sps:$4 sm:$0xff]  }
  0x7b   :  { %1684 = vmatpush1.bf16.msra.mxu0 %v4086_v11  ;;  %1848 = vmatpush1.bf16.msra.mxu1 %v4089_v12  ;;  %v4179_v11 = vld [vmem:[%s5897_s1 + $0x5a8] ss:$16 sps:$4 sm:$0xff]   ;;  %v4184_v12 = vld [vmem:[%s5897_s1 + $0x5c4] ss:$16 sps:$4 sm:$0xff]  }
  0x7c   :  { %1685 = vmatprep.subr.bf16.mxu0 %v4094_v13  ;;  %1849 = vmatprep.subr.bf16.mxu1 %v4097_v14  ;;  %v4187_v13 = vld [vmem:[%s5897_s1 + $0x5cc] ss:$16 sps:$4 sm:$0xff]   ;;  %v4182_v14 = vld [vmem:[%s5897_s1 + $0x5c0] ss:$16 sps:$4 sm:$0xff]  }
  0x7f   :  { %1686 = vmatpush1.bf16.msra.mxu0 %v4092_v16  ;;  %1850 = vmatpush1.bf16.msra.mxu1 %v4095_v17  ;;  %v4185_v16 = vld [vmem:[%s5897_s1 + $0x5c8] ss:$16 sps:$4 sm:$0xff]   ;;  %v4190_v17 = vld [vmem:[%s5897_s1 + $0x5e4] ss:$16 sps:$4 sm:$0xff]  }
  0x80   :  { %1696 = vmatprep.subr.bf16.mxu0 %v4100_v18  ;;  %1860 = vmatprep.subr.bf16.mxu1 %v4103_v19  ;;  %v4193_v18 = vld [vmem:[%s5897_s1 + $0x5ec] ss:$16 sps:$4 sm:$0xff]   ;;  %v4188_v19 = vld [vmem:[%s5897_s1 + $0x5e0] ss:$16 sps:$4 sm:$0xff]  }
  0x82   :  { %1688 = vmatmul.mubr.bf16.vlgmr.msra.gmra.mrb[0].mxu0 %v322_v23  ;;  %1852 = vmatmul.mubr.bf16.vlgmr.msra.gmra.mrb[0].mxu1 %v322_v23  ;;  %v4197_v23 = vld [vmem:[%s5897_s1 + $0x604] ss:$16 sps:$4 sm:$0xff]  }
  0x83   :  { %1697 = vmatpush1.bf16.msra.mxu0 %v4098_v22  ;;  %1861 = vmatpush1.bf16.msra.mxu1 %v4101_v24  ;;  %v4191_v22 = vld [vmem:[%s5897_s1 + $0x5e8] ss:$16 sps:$4 sm:$0xff]   ;;  %v4200_v24 = vld [vmem:[%s5897_s1 + $0x60c] ss:$16 sps:$4 sm:$0xff]  }
  0x84   :  { %1698 = vmatprep.subr.bf16.mxu0 %v4106_v25  ;;  %1862 = vmatprep.subr.bf16.mxu1 %v4109_v26  ;;  %v4195_v25 = vld [vmem:[%s5897_s1 + $0x600] ss:$16 sps:$4 sm:$0xff]   ;;  %v4198_v26 = vld [vmem:[%s5897_s1 + $0x608] ss:$16 sps:$4 sm:$0xff]  }
  0x85   :  { %1728 = vmatprep.mubr.bf16.mxu0 %v4804_v20  ;;  %1892 = vmatprep.mubr.bf16.mxu1 %v4804_v20 }
  0x87   :  { %1699 = vmatpush1.bf16.msra.mxu0 %v4104_v15  ;;  %1863 = vmatpush1.bf16.msra.mxu1 %v4107_v27  ;;  %v4203_v15 = vld [vmem:[%s5897_s1 + $0x624] ss:$16 sps:$4 sm:$0xff]   ;;  %v4206_v27 = vld [vmem:[%s5897_s1 + $0x62c] ss:$16 sps:$4 sm:$0xff]  }
  0x88   :  { %1700 = vmatprep.subr.bf16.mxu0 %v4112_v28  ;;  %1864 = vmatprep.subr.bf16.mxu1 %v4115_v29  ;;  %v4201_v28 = vld [vmem:[%s5897_s1 + $0x620] ss:$16 sps:$4 sm:$0xff]   ;;  %v4204_v29 = vld [vmem:[%s5897_s1 + $0x628] ss:$16 sps:$4 sm:$0xff]  }
  0x8b   :  { %1701 = vmatpush1.bf16.msra.mxu0 %v4110_v30  ;;  %1865 = vmatpush1.bf16.msra.mxu1 %v4113_v31  ;;  %v325_v30 = vcombine.high %v4804_v20, %v4804_v20  ;;  %v4209_v31 = vld [vmem:[%s5897_s1 + $0x644] ss:$16 sps:$4 sm:$0xff]   ;;  %v4207_v20 = vld [vmem:[%s5897_s1 + $0x640] ss:$16 sps:$4 sm:$0xff]  }
  0x8c   :  { %1702 = vmatprep.subr.bf16.mxu0 %v4118_v32  ;;  %1866 = vmatprep.subr.bf16.mxu1 %v4121_v33  ;;  %v4212_v32 = vld [vmem:[%s5897_s1 + $0x64c] ss:$16 sps:$4 sm:$0xff]   ;;  %v4210_v33 = vld [vmem:[%s5897_s1 + $0x648] ss:$16 sps:$4 sm:$0xff]  }
  0x8f   :  { %1703 = vmatpush1.bf16.msra.mxu0 %v4116_v34  ;;  %1867 = vmatpush1.bf16.msra.mxu1 %v4119_v35  ;;  %v4215_v34 = vld [vmem:[%s5897_s1 + $0x664] ss:$16 sps:$4 sm:$0xff]   ;;  %v4218_v35 = vld [vmem:[%s5897_s1 + $0x66c] ss:$16 sps:$4 sm:$0xff]  }
  0x90   :  { %1704 = vmatprep.subr.bf16.mxu0 %v4124_v36  ;;  %1868 = vmatprep.subr.bf16.mxu1 %v4127_v37  ;;  %v4213_v36 = vld [vmem:[%s5897_s1 + $0x660] ss:$16 sps:$4 sm:$0xff]   ;;  %v4216_v37 = vld [vmem:[%s5897_s1 + $0x668] ss:$16 sps:$4 sm:$0xff]  }
  0x93   :  { %1705 = vmatpush1.bf16.msra.mxu0 %v4122_v38  ;;  %1869 = vmatpush1.bf16.msra.mxu1 %v4125_v39  ;;  %v4221_v38 = vld [vmem:[%s5897_s1 + $0x684] ss:$16 sps:$4 sm:$0xff]   ;;  %v4224_v39 = vld [vmem:[%s5897_s1 + $0x68c] ss:$16 sps:$4 sm:$0xff]  }
  0x94   :  { %1706 = vmatprep.subr.bf16.mxu0 %v4130_v40  ;;  %1870 = vmatprep.subr.bf16.mxu1 %v4133_v41  ;;  %v4219_v40 = vld [vmem:[%s5897_s1 + $0x680] ss:$16 sps:$4 sm:$0xff]   ;;  %v4222_v41 = vld [vmem:[%s5897_s1 + $0x688] ss:$16 sps:$4 sm:$0xff]  }
  0x97   :  { %1707 = vmatpush1.bf16.msra.mxu0 %v4128_v42  ;;  %1871 = vmatpush1.bf16.msra.mxu1 %v4131_v43  ;;  %v4227_v42 = vld [vmem:[%s5897_s1 + $0x6a4] ss:$16 sps:$4 sm:$0xff]   ;;  %v4230_v43 = vld [vmem:[%s5897_s1 + $0x6ac] ss:$16 sps:$4 sm:$0xff]  }
  0x98   :  { %1708 = vmatprep.subr.bf16.mxu0 %v4136_v44  ;;  %1872 = vmatprep.subr.bf16.mxu1 %v4139_v45  ;;  %v4225_v44 = vld [vmem:[%s5897_s1 + $0x6a0] ss:$16 sps:$4 sm:$0xff]   ;;  %v4228_v45 = vld [vmem:[%s5897_s1 + $0x6a8] ss:$16 sps:$4 sm:$0xff]  }
  0x9b   :  { %1709 = vmatpush1.bf16.msra.mxu0 %v4134_v46  ;;  %1873 = vmatpush1.bf16.msra.mxu1 %v4137_v47  ;;  %v4233_v46 = vld [vmem:[%s5897_s1 + $0x6c4] ss:$16 sps:$4 sm:$0xff]   ;;  %v4236_v47 = vld [vmem:[%s5897_s1 + $0x6cc] ss:$16 sps:$4 sm:$0xff]  }
  0x9c   :  { %1710 = vmatprep.subr.bf16.mxu0 %v4142_v48  ;;  %1874 = vmatprep.subr.bf16.mxu1 %v4145_v49  ;;  %v4231_v48 = vld [vmem:[%s5897_s1 + $0x6c0] ss:$16 sps:$4 sm:$0xff]   ;;  %v4234_v49 = vld [vmem:[%s5897_s1 + $0x6c8] ss:$16 sps:$4 sm:$0xff]  }
  0x9f   :  { %1711 = vmatpush1.bf16.msra.mxu0 %v4140_v50  ;;  %1875 = vmatpush1.bf16.msra.mxu1 %v4143_v51  ;;  %v4239_v50 = vld [vmem:[%s5897_s1 + $0x6e4] ss:$16 sps:$4 sm:$0xff]   ;;  %v4242_v51 = vld [vmem:[%s5897_s1 + $0x6ec] ss:$16 sps:$4 sm:$0xff]  }
  0xa0   :  { %1712 = vmatprep.subr.bf16.mxu0 %v4148_v52  ;;  %1876 = vmatprep.subr.bf16.mxu1 %v4151_v53  ;;  %v4237_v52 = vld [vmem:[%s5897_s1 + $0x6e0] ss:$16 sps:$4 sm:$0xff]   ;;  %v4240_v53 = vld [vmem:[%s5897_s1 + $0x6e8] ss:$16 sps:$4 sm:$0xff]  }
  0xa3   :  { %1713 = vmatpush1.bf16.msra.mxu0 %v4146_v54  ;;  %1877 = vmatpush1.bf16.msra.mxu1 %v4149_v55  ;;  %v4245_v54 = vld [vmem:[%s5897_s1 + $0x704] ss:$16 sps:$4 sm:$0xff]   ;;  %v4248_v55 = vld [vmem:[%s5897_s1 + $0x70c] ss:$16 sps:$4 sm:$0xff]  }
  0xa4   :  { %1714 = vmatprep.subr.bf16.mxu0 %v4154_v56  ;;  %1878 = vmatprep.subr.bf16.mxu1 %v4157_v57  ;;  %v4243_v56 = vld [vmem:[%s5897_s1 + $0x700] ss:$16 sps:$4 sm:$0xff]   ;;  %v4246_v57 = vld [vmem:[%s5897_s1 + $0x708] ss:$16 sps:$4 sm:$0xff]  }
  0xa7   :  { %1715 = vmatpush1.bf16.msra.mxu0 %v4152_v58  ;;  %1879 = vmatpush1.bf16.msra.mxu1 %v4155_v59  ;;  %v4251_v58 = vld [vmem:[%s5897_s1 + $0x724] ss:$16 sps:$4 sm:$0xff]   ;;  %v4254_v59 = vld [vmem:[%s5897_s1 + $0x72c] ss:$16 sps:$4 sm:$0xff]  }
  0xa8   :  { %1716 = vmatprep.subr.bf16.mxu0 %v4160_v60  ;;  %1880 = vmatprep.subr.bf16.mxu1 %v4163_v61  ;;  %v4249_v60 = vld [vmem:[%s5897_s1 + $0x720] ss:$16 sps:$4 sm:$0xff]   ;;  %v4252_v61 = vld [vmem:[%s5897_s1 + $0x728] ss:$16 sps:$4 sm:$0xff]  }
  0xab   :  { %1717 = vmatpush1.bf16.msra.mxu0 %v4158_v62  ;;  %1881 = vmatpush1.bf16.msra.mxu1 %v4161_v63  ;;  %v4257_v62 = vld [vmem:[%s5897_s1 + $0x744] ss:$16 sps:$4 sm:$0xff]   ;;  %v4260_v63 = vld [vmem:[%s5897_s1 + $0x74c] ss:$16 sps:$4 sm:$0xff]  }
  0xac   :  { %1718 = vmatprep.subr.bf16.mxu0 %v4166_v0  ;;  %1882 = vmatprep.subr.bf16.mxu1 %v4169_v1  ;;  %v4255_v0 = vld [vmem:[%s5897_s1 + $0x740] ss:$16 sps:$4 sm:$0xff]   ;;  %v4258_v1 = vld [vmem:[%s5897_s1 + $0x748] ss:$16 sps:$4 sm:$0xff]  }
  0xaf   :  { %1719 = vmatpush1.bf16.msra.mxu0 %v4164_v2  ;;  %1883 = vmatpush1.bf16.msra.mxu1 %v4167_v3  ;;  %v4263_v2 = vld [vmem:[%s5897_s1 + $0x764] ss:$16 sps:$4 sm:$0xff]   ;;  %v4266_v3 = vld [vmem:[%s5897_s1 + $0x76c] ss:$16 sps:$4 sm:$0xff]  }
  0xb0   :  { %1720 = vmatprep.subr.bf16.mxu0 %v4172_v4  ;;  %1884 = vmatprep.subr.bf16.mxu1 %v4175_v5  ;;  %v4261_v4 = vld [vmem:[%s5897_s1 + $0x760] ss:$16 sps:$4 sm:$0xff]   ;;  %v4264_v5 = vld [vmem:[%s5897_s1 + $0x768] ss:$16 sps:$4 sm:$0xff]  }
  0xb3   :  { %1721 = vmatpush1.bf16.msra.mxu0 %v4170_v6  ;;  %1885 = vmatpush1.bf16.msra.mxu1 %v4173_v7  ;;  %v4269_v6 = vld [vmem:[%s5897_s1 + $0x784] ss:$16 sps:$4 sm:$0xff]   ;;  %v4272_v7 = vld [vmem:[%s5897_s1 + $0x78c] ss:$16 sps:$4 sm:$0xff]  }
  0xb4   :  { %1722 = vmatprep.subr.bf16.mxu0 %v4178_v8  ;;  %1886 = vmatprep.subr.bf16.mxu1 %v4181_v9 }
  0xb7   :  { %1723 = vmatpush1.bf16.msra.mxu0 %v4176_v10  ;;  %1887 = vmatpush1.bf16.msra.mxu1 %v4179_v11 }
  0xb8   :  { %1724 = vmatprep.subr.bf16.mxu0 %v4184_v12  ;;  %1888 = vmatprep.subr.bf16.mxu1 %v4187_v13 }
  0xbb   :  { %1725 = vmatpush1.bf16.msra.mxu0 %v4182_v14  ;;  %1889 = vmatpush1.bf16.msra.mxu1 %v4185_v16 }
  0xbc   :  { %1726 = vmatprep.subr.bf16.mxu0 %v4190_v17  ;;  %1890 = vmatprep.subr.bf16.mxu1 %v4193_v18 }
  0xbf   :  { %1727 = vmatpush1.bf16.msra.mxu0 %v4188_v19  ;;  %1891 = vmatpush1.bf16.msra.mxu1 %v4191_v22 }
  0xc0   :  { %1737 = vmatprep.subr.bf16.mxu0 %v4197_v23  ;;  %1901 = vmatprep.subr.bf16.mxu1 %v4200_v24 }
  0xc2   :  { %1729 = vmatmul.mubr.bf16.vlgmr.msra.gmra.mrb[0].mxu0 %v4807_v21  ;;  %1893 = vmatmul.mubr.bf16.vlgmr.msra.gmra.mrb[0].mxu1 %v4807_v21 }
  0xc3   :  { %1738 = vmatpush1.bf16.msra.mxu0 %v4195_v25  ;;  %1902 = vmatpush1.bf16.msra.mxu1 %v4198_v26 }
  0xc4   :  { %1739 = vmatprep.subr.bf16.mxu0 %v4203_v15  ;;  %1903 = vmatprep.subr.bf16.mxu1 %v4206_v27 }
  0xc5   :  { %1769 = vmatprep.mubr.bf16.mxu0 %v325_v30  ;;  %1933 = vmatprep.mubr.bf16.mxu1 %v325_v30 }
  0xc7   :  { %1740 = vmatpush1.bf16.msra.mxu0 %v4201_v28  ;;  %1904 = vmatpush1.bf16.msra.mxu1 %v4204_v29 }
  0xc8   :  { %1741 = vmatprep.subr.bf16.mxu0 %v4209_v31  ;;  %1905 = vmatprep.subr.bf16.mxu1 %v4212_v32 }
  0xcb   :  { %1742 = vmatpush1.bf16.msra.mxu0 %v4207_v20  ;;  %1906 = vmatpush1.bf16.msra.mxu1 %v4210_v33 }
  0xcc   :  { %1743 = vmatprep.subr.bf16.mxu0 %v4215_v34  ;;  %1907 = vmatprep.subr.bf16.mxu1 %v4218_v35 }
  0xcf   :  { %1744 = vmatpush1.bf16.msra.mxu0 %v4213_v36  ;;  %1908 = vmatpush1.bf16.msra.mxu1 %v4216_v37 }
  0xd0   :  { %1745 = vmatprep.subr.bf16.mxu0 %v4221_v38  ;;  %1909 = vmatprep.subr.bf16.mxu1 %v4224_v39 }
  0xd3   :  { %1746 = vmatpush1.bf16.msra.mxu0 %v4219_v40  ;;  %1910 = vmatpush1.bf16.msra.mxu1 %v4222_v41 }
  0xd4   :  { %1747 = vmatprep.subr.bf16.mxu0 %v4227_v42  ;;  %1911 = vmatprep.subr.bf16.mxu1 %v4230_v43 }
  0xd7   :  { %1748 = vmatpush1.bf16.msra.mxu0 %v4225_v44  ;;  %1912 = vmatpush1.bf16.msra.mxu1 %v4228_v45 }
  0xd8   :  { %1749 = vmatprep.subr.bf16.mxu0 %v4233_v46  ;;  %1913 = vmatprep.subr.bf16.mxu1 %v4236_v47 }
  0xdb   :  { %1750 = vmatpush1.bf16.msra.mxu0 %v4231_v48  ;;  %1914 = vmatpush1.bf16.msra.mxu1 %v4234_v49 }
  0xdc   :  { %1751 = vmatprep.subr.bf16.mxu0 %v4239_v50  ;;  %1915 = vmatprep.subr.bf16.mxu1 %v4242_v51 }
  0xdf   :  { %1752 = vmatpush1.bf16.msra.mxu0 %v4237_v52  ;;  %1916 = vmatpush1.bf16.msra.mxu1 %v4240_v53 }
  0xe0   :  { %1753 = vmatprep.subr.bf16.mxu0 %v4245_v54  ;;  %1917 = vmatprep.subr.bf16.mxu1 %v4248_v55 }
  0xe3   :  { %1754 = vmatpush1.bf16.msra.mxu0 %v4243_v56  ;;  %1918 = vmatpush1.bf16.msra.mxu1 %v4246_v57 }
  0xe4   :  { %1755 = vmatprep.subr.bf16.mxu0 %v4251_v58  ;;  %1919 = vmatprep.subr.bf16.mxu1 %v4254_v59 }
  0xe7   :  { %1756 = vmatpush1.bf16.msra.mxu0 %v4249_v60  ;;  %1920 = vmatpush1.bf16.msra.mxu1 %v4252_v61 }
  0xe8   :  { %1757 = vmatprep.subr.bf16.mxu0 %v4257_v62  ;;  %1921 = vmatprep.subr.bf16.mxu1 %v4260_v63 }
  0xeb   :  { %1758 = vmatpush1.bf16.msra.mxu0 %v4255_v0  ;;  %1922 = vmatpush1.bf16.msra.mxu1 %v4258_v1 }
  0xec   :  { %1759 = vmatprep.subr.bf16.mxu0 %v4263_v2  ;;  %1923 = vmatprep.subr.bf16.mxu1 %v4266_v3 }
  0xed   :  { %9 = vsyncpa [#allocation3], 0  ;;  %v4267_v8 = vld [vmem:[%s5897_s1 + $0x780] ss:$16 sps:$4 sm:$0xff]   ;;  %v4270_v9 = vld [vmem:[%s5897_s1 + $0x788] ss:$16 sps:$4 sm:$0xff]   ;;  %v323_v15 = vcombine.high %v4807_v21, %v4807_v21 }
  0xee   :  { %v4275_v10 = vld [vmem:[%s5897_s1 + $0x7a4] ss:$16 sps:$4 sm:$0xff]   ;;  %v4278_v11 = vld [vmem:[%s5897_s1 + $0x7ac] ss:$16 sps:$4 sm:$0xff]   ;;  %v4273_v12 = vld [vmem:[%s5897_s1 + $0x7a0] ss:$16 sps:$4 sm:$0xff]  }
  0xef   :  { %1760 = vmatpush1.bf16.msra.mxu0 %v4261_v4  ;;  %1924 = vmatpush1.bf16.msra.mxu1 %v4264_v5  ;;  %v4276_v13 = vld [vmem:[%s5897_s1 + $0x7a8] ss:$16 sps:$4 sm:$0xff]   ;;  %v4281_v14 = vld [vmem:[%s5897_s1 + $0x7c4] ss:$16 sps:$4 sm:$0xff]   ;;  %v4284_v16 = vld [vmem:[%s5897_s1 + $0x7cc] ss:$16 sps:$4 sm:$0xff]  }
  0xf0   :  { %1761 = vmatprep.subr.bf16.mxu0 %v4269_v6  ;;  %1925 = vmatprep.subr.bf16.mxu1 %v4272_v7  ;;  %v4279_v17 = vld [vmem:[%s5897_s1 + $0x7c0] ss:$16 sps:$4 sm:$0xff]   ;;  %v4282_v18 = vld [vmem:[%s5897_s1 + $0x7c8] ss:$16 sps:$4 sm:$0xff]   ;;  %v4287_v19 = vld [vmem:[%s5897_s1 + $0x7e4] ss:$16 sps:$4 sm:$0xff]  }
  0xf1   :  { %v4290_v22 = vld [vmem:[%s5897_s1 + $0x7ec] ss:$16 sps:$4 sm:$0xff]   ;;  %v4285_v23 = vld [vmem:[%s5897_s1 + $0x7e0] ss:$16 sps:$4 sm:$0xff]   ;;  %v4288_v24 = vld [vmem:[%s5897_s1 + $0x7e8] ss:$16 sps:$4 sm:$0xff]  }
  0xf2   :  { %v4293_v25 = vld [vmem:[%s5898_s2 + $0x4] ss:$16 sps:$4 sm:$0xff]   ;;  %v4296_v26 = vld [vmem:[%s5898_s2 + $0xc] ss:$16 sps:$4 sm:$0xff]   ;;  %v4291_v27 = vld [vmem:[%s5898_s2] ss:$16 sps:$4 sm:$0xff]  }
  0xf3   :  { %1762 = vmatpush1.bf16.msra.mxu0 %v4267_v8  ;;  %1926 = vmatpush1.bf16.msra.mxu1 %v4270_v9  ;;  %v4294_v28 = vld [vmem:[%s5898_s2 + $0x8] ss:$16 sps:$4 sm:$0xff]   ;;  %v4299_v29 = vld [vmem:[%s5898_s2 + $0x24] ss:$16 sps:$4 sm:$0xff]   ;;  %v4302_v21 = vld [vmem:[%s5898_s2 + $0x2c] ss:$16 sps:$4 sm:$0xff]  }
  0xf4   :  { %1763 = vmatprep.subr.bf16.mxu0 %v4275_v10  ;;  %1927 = vmatprep.subr.bf16.mxu1 %v4278_v11  ;;  %v4297_v30 = vld [vmem:[%s5898_s2 + $0x20] ss:$16 sps:$4 sm:$0xff]   ;;  %v4300_v31 = vld [vmem:[%s5898_s2 + $0x28] ss:$16 sps:$4 sm:$0xff]   ;;  %v4305_v32 = vld [vmem:[%s5898_s2 + $0x44] ss:$16 sps:$4 sm:$0xff]  }
  0xf5   :  { %v4308_v20 = vld [vmem:[%s5898_s2 + $0x4c] ss:$16 sps:$4 sm:$0xff]   ;;  %v4303_v33 = vld [vmem:[%s5898_s2 + $0x40] ss:$16 sps:$4 sm:$0xff]   ;;  %v4306_v34 = vld [vmem:[%s5898_s2 + $0x48] ss:$16 sps:$4 sm:$0xff]  }
  0xf6   :  { %v4311_v35 = vld [vmem:[%s5898_s2 + $0x64] ss:$16 sps:$4 sm:$0xff]   ;;  %v4314_v36 = vld [vmem:[%s5898_s2 + $0x6c] ss:$16 sps:$4 sm:$0xff]   ;;  %v4309_v37 = vld [vmem:[%s5898_s2 + $0x60] ss:$16 sps:$4 sm:$0xff]  }
  0xf7   :  { %1764 = vmatpush1.bf16.msra.mxu0 %v4273_v12  ;;  %1928 = vmatpush1.bf16.msra.mxu1 %v4276_v13  ;;  %v4312_v38 = vld [vmem:[%s5898_s2 + $0x68] ss:$16 sps:$4 sm:$0xff]   ;;  %v4317_v39 = vld [vmem:[%s5898_s2 + $0x84] ss:$16 sps:$4 sm:$0xff]   ;;  %v4320_v40 = vld [vmem:[%s5898_s2 + $0x8c] ss:$16 sps:$4 sm:$0xff]  }
  0xf8   :  { %1765 = vmatprep.subr.bf16.mxu0 %v4281_v14  ;;  %1929 = vmatprep.subr.bf16.mxu1 %v4284_v16  ;;  %v4315_v41 = vld [vmem:[%s5898_s2 + $0x80] ss:$16 sps:$4 sm:$0xff]   ;;  %v4318_v42 = vld [vmem:[%s5898_s2 + $0x88] ss:$16 sps:$4 sm:$0xff]   ;;  %v4323_v43 = vld [vmem:[%s5898_s2 + $0xa4] ss:$16 sps:$4 sm:$0xff]  }
  0xf9   :  { %v4326_v44 = vld [vmem:[%s5898_s2 + $0xac] ss:$16 sps:$4 sm:$0xff]   ;;  %v4321_v45 = vld [vmem:[%s5898_s2 + $0xa0] ss:$16 sps:$4 sm:$0xff]   ;;  %v4324_v46 = vld [vmem:[%s5898_s2 + $0xa8] ss:$16 sps:$4 sm:$0xff]  }
  0xfa   :  { %v4329_v47 = vld [vmem:[%s5898_s2 + $0xc4] ss:$16 sps:$4 sm:$0xff]   ;;  %v4332_v48 = vld [vmem:[%s5898_s2 + $0xcc] ss:$16 sps:$4 sm:$0xff]   ;;  %v4327_v49 = vld [vmem:[%s5898_s2 + $0xc0] ss:$16 sps:$4 sm:$0xff]  }
  0xfb   :  { %1766 = vmatpush1.bf16.msra.mxu0 %v4279_v17  ;;  %1930 = vmatpush1.bf16.msra.mxu1 %v4282_v18  ;;  %v4330_v50 = vld [vmem:[%s5898_s2 + $0xc8] ss:$16 sps:$4 sm:$0xff]   ;;  %v4335_v51 = vld [vmem:[%s5898_s2 + $0xe4] ss:$16 sps:$4 sm:$0xff]   ;;  %v4338_v52 = vld [vmem:[%s5898_s2 + $0xec] ss:$16 sps:$4 sm:$0xff]  }
  0xfc   :  { %1767 = vmatprep.subr.bf16.mxu0 %v4287_v19  ;;  %1931 = vmatprep.subr.bf16.mxu1 %v4290_v22  ;;  %v4333_v53 = vld [vmem:[%s5898_s2 + $0xe0] ss:$16 sps:$4 sm:$0xff]   ;;  %v4336_v54 = vld [vmem:[%s5898_s2 + $0xe8] ss:$16 sps:$4 sm:$0xff]   ;;  %v4341_v55 = vld [vmem:[%s5898_s2 + $0x104] ss:$16 sps:$4 sm:$0xff]  }
  0xfd   :  { %v4344_v56 = vld [vmem:[%s5898_s2 + $0x10c] ss:$16 sps:$4 sm:$0xff]   ;;  %v4339_v57 = vld [vmem:[%s5898_s2 + $0x100] ss:$16 sps:$4 sm:$0xff]   ;;  %v4342_v58 = vld [vmem:[%s5898_s2 + $0x108] ss:$16 sps:$4 sm:$0xff]  }
  0xfe   :  { %v4347_v59 = vld [vmem:[%s5898_s2 + $0x124] ss:$16 sps:$4 sm:$0xff]   ;;  %v4350_v60 = vld [vmem:[%s5898_s2 + $0x12c] ss:$16 sps:$4 sm:$0xff]   ;;  %v4345_v61 = vld [vmem:[%s5898_s2 + $0x120] ss:$16 sps:$4 sm:$0xff]  }
  0xff   :  { %1768 = vmatpush1.bf16.msra.mxu0 %v4285_v23  ;;  %1932 = vmatpush1.bf16.msra.mxu1 %v4288_v24  ;;  %v4348_v62 = vld [vmem:[%s5898_s2 + $0x128] ss:$16 sps:$4 sm:$0xff]   ;;  %v4353_v63 = vld [vmem:[%s5898_s2 + $0x144] ss:$16 sps:$4 sm:$0xff]   ;;  %v4356_v0 = vld [vmem:[%s5898_s2 + $0x14c] ss:$16 sps:$4 sm:$0xff]  }
 0x100   :  { %2804 = vmatprep.subr.bf16.mxu0 %v4293_v25  ;;  %2886 = vmatprep.subr.bf16.mxu1 %v4296_v26  ;;  %v4351_v1 = vld [vmem:[%s5898_s2 + $0x140] ss:$16 sps:$4 sm:$0xff]   ;;  %v4354_v2 = vld [vmem:[%s5898_s2 + $0x148] ss:$16 sps:$4 sm:$0xff]   ;;  %v4359_v3 = vld [vmem:[%s5898_s2 + $0x164] ss:$16 sps:$4 sm:$0xff]  }
 0x101   :  { %v4362_v4 = vld [vmem:[%s5898_s2 + $0x16c] ss:$16 sps:$4 sm:$0xff]   ;;  %v4357_v5 = vld [vmem:[%s5898_s2 + $0x160] ss:$16 sps:$4 sm:$0xff]   ;;  %v4360_v6 = vld [vmem:[%s5898_s2 + $0x168] ss:$16 sps:$4 sm:$0xff]  }
 0x102   :  { %1770 = vmatmul.mubr.bf16.vlgmr.msra.gmra.mrb[0].mxu0 %v323_v15  ;;  %1934 = vmatmul.mubr.bf16.vlgmr.msra.gmra.mrb[0].mxu1 %v323_v15  ;;  %v4365_v7 = vld [vmem:[%s5898_s2 + $0x184] ss:$16 sps:$4 sm:$0xff]   ;;  %v4368_v8 = vld [vmem:[%s5898_s2 + $0x18c] ss:$16 sps:$4 sm:$0xff]   ;;  %v4363_v9 = vld [vmem:[%s5898_s2 + $0x180] ss:$16 sps:$4 sm:$0xff]  }
 0x103   :  { %2805 = vmatpush1.bf16.msra.mxu0 %v4291_v27  ;;  %2887 = vmatpush1.bf16.msra.mxu1 %v4294_v28  ;;  %v4366_v10 = vld [vmem:[%s5898_s2 + $0x188] ss:$16 sps:$4 sm:$0xff]   ;;  %v4371_v11 = vld [vmem:[%s5898_s2 + $0x1a4] ss:$16 sps:$4 sm:$0xff]   ;;  %v4374_v12 = vld [vmem:[%s5898_s2 + $0x1ac] ss:$16 sps:$4 sm:$0xff]  }
 0x104   :  { %2806 = vmatprep.subr.bf16.mxu0 %v4299_v29  ;;  %2888 = vmatprep.subr.bf16.mxu1 %v4302_v21  ;;  %v4369_v13 = vld [vmem:[%s5898_s2 + $0x1a0] ss:$16 sps:$4 sm:$0xff]   ;;  %v4372_v14 = vld [vmem:[%s5898_s2 + $0x1a8] ss:$16 sps:$4 sm:$0xff]   ;;  %v4377_v16 = vld [vmem:[%s5898_s2 + $0x1c4] ss:$16 sps:$4 sm:$0xff]  }
 0x105   :  { %v4380_v17 = vld [vmem:[%s5898_s2 + $0x1cc] ss:$16 sps:$4 sm:$0xff]   ;;  %v4375_v18 = vld [vmem:[%s5898_s2 + $0x1c0] ss:$16 sps:$4 sm:$0xff]   ;;  %v4378_v19 = vld [vmem:[%s5898_s2 + $0x1c8] ss:$16 sps:$4 sm:$0xff]  }
 0x106   :  { %v4383_v22 = vld [vmem:[%s5898_s2 + $0x1e4] ss:$16 sps:$4 sm:$0xff]   ;;  %v4386_v23 = vld [vmem:[%s5898_s2 + $0x1ec] ss:$16 sps:$4 sm:$0xff]   ;;  %v4381_v24 = vld [vmem:[%s5898_s2 + $0x1e0] ss:$16 sps:$4 sm:$0xff]  }
 0x107   :  { %2807 = vmatpush1.bf16.msra.mxu0 %v4297_v30  ;;  %2889 = vmatpush1.bf16.msra.mxu1 %v4300_v31  ;;  %v4384_v25 = vld [vmem:[%s5898_s2 + $0x1e8] ss:$16 sps:$4 sm:$0xff]   ;;  %v4389_v26 = vld [vmem:[%s5898_s2 + $0x204] ss:$16 sps:$4 sm:$0xff]   ;;  %v4392_v15 = vld [vmem:[%s5898_s2 + $0x20c] ss:$16 sps:$4 sm:$0xff]  }
 0x108   :  { %2808 = vmatprep.subr.bf16.mxu0 %v4305_v32  ;;  %2890 = vmatprep.subr.bf16.mxu1 %v4308_v20  ;;  %vm1942_vm0 = vcmask 1041408   ;;  %vm3396_vm1 = vcmask 812032  }
 0x10b   :  { %2809 = vmatpush1.bf16.msra.mxu0 %v4303_v33  ;;  %2891 = vmatpush1.bf16.msra.mxu1 %v4306_v34 }
 0x10c   :  { %2810 = vmatprep.subr.bf16.mxu0 %v4311_v35  ;;  %2892 = vmatprep.subr.bf16.mxu1 %v4314_v36 }
 0x10f   :  { %2811 = vmatpush1.bf16.msra.mxu0 %v4309_v37  ;;  %2893 = vmatpush1.bf16.msra.mxu1 %v4312_v38 }
 0x110   :  { %2812 = vmatprep.subr.bf16.mxu0 %v4317_v39  ;;  %2894 = vmatprep.subr.bf16.mxu1 %v4320_v40 }
 0x113   :  { %2813 = vmatpush1.bf16.msra.mxu0 %v4315_v41  ;;  %2895 = vmatpush1.bf16.msra.mxu1 %v4318_v42 }
 0x114   :  { %2814 = vmatprep.subr.bf16.mxu0 %v4323_v43  ;;  %2896 = vmatprep.subr.bf16.mxu1 %v4326_v44 }
 0x117   :  { %2815 = vmatpush1.bf16.msra.mxu0 %v4321_v45  ;;  %2897 = vmatpush1.bf16.msra.mxu1 %v4324_v46 }
 0x118   :  { %2816 = vmatprep.subr.bf16.mxu0 %v4329_v47  ;;  %2898 = vmatprep.subr.bf16.mxu1 %v4332_v48 }
 0x11b   :  { %2817 = vmatpush1.bf16.msra.mxu0 %v4327_v49  ;;  %2899 = vmatpush1.bf16.msra.mxu1 %v4330_v50 }
 0x11c   :  { %2818 = vmatprep.subr.bf16.mxu0 %v4335_v51  ;;  %2900 = vmatprep.subr.bf16.mxu1 %v4338_v52 }
 0x11f   :  { %2819 = vmatpush1.bf16.msra.mxu0 %v4333_v53  ;;  %2901 = vmatpush1.bf16.msra.mxu1 %v4336_v54 }
 0x120   :  { %2820 = vmatprep.subr.bf16.mxu0 %v4341_v55  ;;  %2902 = vmatprep.subr.bf16.mxu1 %v4344_v56 }
 0x123   :  { %2821 = vmatpush1.bf16.msra.mxu0 %v4339_v57  ;;  %2903 = vmatpush1.bf16.msra.mxu1 %v4342_v58 }
 0x124   :  { %2822 = vmatprep.subr.bf16.mxu0 %v4347_v59  ;;  %2904 = vmatprep.subr.bf16.mxu1 %v4350_v60 }
 0x127   :  { %2823 = vmatpush1.bf16.msra.mxu0 %v4345_v61  ;;  %2905 = vmatpush1.bf16.msra.mxu1 %v4348_v62 }
 0x128   :  { %2824 = vmatprep.subr.bf16.mxu0 %v4353_v63  ;;  %2906 = vmatprep.subr.bf16.mxu1 %v4356_v0 }
 0x12b   :  { %2825 = vmatpush1.bf16.msra.mxu0 %v4351_v1  ;;  %2907 = vmatpush1.bf16.msra.mxu1 %v4354_v2 }
 0x12c   :  { %2826 = vmatprep.subr.bf16.mxu0 %v4359_v3  ;;  %2908 = vmatprep.subr.bf16.mxu1 %v4362_v4 }
 0x12f   :  { %2827 = vmatpush1.bf16.msra.mxu0 %v4357_v5  ;;  %2909 = vmatpush1.bf16.msra.mxu1 %v4360_v6 }
 0x130   :  { %2828 = vmatprep.subr.bf16.mxu0 %v4365_v7  ;;  %2910 = vmatprep.subr.bf16.mxu1 %v4368_v8 }
 0x133   :  { %2829 = vmatpush1.bf16.msra.mxu0 %v4363_v9  ;;  %2911 = vmatpush1.bf16.msra.mxu1 %v4366_v10 }
 0x134   :  { %2830 = vmatprep.subr.bf16.mxu0 %v4371_v11  ;;  %2912 = vmatprep.subr.bf16.mxu1 %v4374_v12 }
 0x137   :  { %2831 = vmatpush1.bf16.msra.mxu0 %v4369_v13  ;;  %2913 = vmatpush1.bf16.msra.mxu1 %v4372_v14 }
 0x138   :  { %2832 = vmatprep.subr.bf16.mxu0 %v4377_v16  ;;  %2914 = vmatprep.subr.bf16.mxu1 %v4380_v17 }
 0x13b   :  { %2833 = vmatpush1.bf16.msra.mxu0 %v4375_v18  ;;  %2915 = vmatpush1.bf16.msra.mxu1 %v4378_v19 }
 0x13c   :  { %2834 = vmatprep.subr.bf16.mxu0 %v4383_v22  ;;  %2916 = vmatprep.subr.bf16.mxu1 %v4386_v23 }
 0x13f   :  { %2835 = vmatpush1.bf16.msra.mxu0 %v4381_v24  ;;  %2917 = vmatpush1.bf16.msra.mxu1 %v4384_v25 }
 0x140   :  { %2845 = vmatprep.subr.bf16.mxu0 %v4389_v26  ;;  %2927 = vmatprep.subr.bf16.mxu1 %v4392_v15 }
 0x1d5   :  { %v1771_v27 = vpop.f32.mrb[0].mxu0  ;;  %v5577_v28 = vpop.f32.mrb[0].mxu1 }
 0x1d6   :  { %v1943_v29 = vsel %vm1942_vm0, %v1771_v27, 0.0  ;;  %v1773_v21 = vpop.f32.mrb[1].mxu0  ;;  %v1937_v30 = vpop.f32.mrb[1].mxu1  ;;  %v1957_v6 = vsel %vm1942_vm0, %v5577_v28, 0.0 }
 0x1d7   :  { %v1944_v31 = vrot.slane %v1943_v29, 4  ;;  %v1950_v32 = vsel %vm1942_vm0, %v1773_v21, 0.0  ;;  %v1964_v20 = vsel %vm1942_vm0, %v1937_v30, 0.0  ;;  %v1775_v33 = vpop.f32.mrb[2].mxu0  ;;  %v1939_v34 = vpop.f32.mrb[2].mxu1  ;;  %v1958_v13 = vrot.slane %v1957_v6, 4 }
 0x1d8   :  { %v1951_v35 = vrot.slane %v1950_v32, 4  ;;  %v1965_v36 = vrot.slane %v1964_v20, 4  ;;  %v1776_v37 = vpop.f32.mrb[3].mxu0  ;;  %v1940_v38 = vpop.f32.mrb[3].mxu1 }
 0x1d9   :  { %v1945_v39 = vadd.f32 %v1944_v31, %v1943_v29  ;;  %v1959_v23 = vadd.f32 %v1958_v13, %v1957_v6  ;;  %v4422_v6 = vld [vmem:[%s5898_s2 + $0x2ac] ss:$16 sps:$4 sm:$0xff]   ;;  %v4423_v13 = vld [vmem:[%s5898_s2 + $0x2c0] ss:$16 sps:$4 sm:$0xff]  }
 0x1da   :  { %v1952_v40 = vadd.f32 %v1951_v35, %v1950_v32  ;;  %v1966_v41 = vadd.f32 %v1965_v36, %v1964_v20 }
 0x1db   :  { %v1946_v42 = vrot.slane %v1945_v39, 2 }
 0x1dc   :  { %v1953_v43 = vrot.slane %v1952_v40, 2  ;;  %v1967_v44 = vrot.slane %v1966_v41, 2 }
 0x1dd   :  { %v1947_v45 = vadd.f32 %v1946_v42, %v1945_v39 }
 0x1de   :  { %v1954_v46 = vadd.f32 %v1953_v43, %v1952_v40  ;;  %v1968_v47 = vadd.f32 %v1967_v44, %v1966_v41 }
 0x1df   :  { %v1948_v48 = vrot.slane %v1947_v45, 1 }
 0x1e0   :  { %v1955_v49 = vrot.slane %v1954_v46, 1  ;;  %v1969_v50 = vrot.slane %v1968_v47, 1 }
 0x1e1   :  { %v1949_v51 = vadd.f32 %v1948_v48, %v1947_v45  ;;  %v4387_v45 = vld [vmem:[%s5898_s2 + $0x200] ss:$16 sps:$4 sm:$0xff]  }
 0x1e2   :  { %v1956_v52 = vadd.f32 %v1955_v49, %v1954_v46  ;;  %v1970_v53 = vadd.f32 %v1969_v50, %v1968_v47  ;;  %v4390_v46 = vld [vmem:[%s5898_s2 + $0x208] ss:$16 sps:$4 sm:$0xff]   ;;  %v4395_v49 = vld [vmem:[%s5898_s2 + $0x224] ss:$16 sps:$4 sm:$0xff]   ;;  %v4398_v50 = vld [vmem:[%s5898_s2 + $0x22c] ss:$16 sps:$4 sm:$0xff]  }
 0x1e3   :  { %v1972_v54 = vmul.f32 0.5, %v1949_v51 }
 0x1e4   :  { %v1973_v55 = vmul.f32 0.5, %v1956_v52  ;;  %v1975_v56 = vmul.f32 0.5, %v1970_v53  ;;  %v4396_v52 = vld [vmem:[%s5898_s2 + $0x228] ss:$16 sps:$4 sm:$0xff]  }
 0x1e5   :  { %v1976_v57 = vsub.f32 %v1771_v27, %v1972_v54  ;;  %v4401_v54 = vld [vmem:[%s5898_s2 + $0x244] ss:$16 sps:$4 sm:$0xff]  }
 0x1e6   :  { %v1977_v58 = vsub.f32 %v1773_v21, %v1973_v55  ;;  %v1979_v59 = vsub.f32 %v1937_v30, %v1975_v56  ;;  %v1960_v21 = vrot.slane %v1959_v23, 2  ;;  %v4404_v55 = vld [vmem:[%s5898_s2 + $0x24c] ss:$16 sps:$4 sm:$0xff]   ;;  %v4399_v56 = vld [vmem:[%s5898_s2 + $0x240] ss:$16 sps:$4 sm:$0xff]  }
 0x1e7   :  { %v1980_v60 = vmul.f32 %v1976_v57, %v1976_v57 }
 0x1e8   :  { %v1981_v61 = vmul.f32 %v1977_v58, %v1977_v58  ;;  %v1983_v62 = vmul.f32 %v1979_v59, %v1979_v59  ;;  %v1961_v32 = vadd.f32 %v1960_v21, %v1959_v23  ;;  %v4437_v23 = vld [vmem:[%s5898_s2 + $0x304] ss:$16 sps:$4 sm:$0xff]  }
 0x1e9   :  { %v1984_v63 = vsel %vm1942_vm0, %v1980_v60, 0.0  ;;  %v4410_v60 = vld [vmem:[%s5898_s2 + $0x26c] ss:$16 sps:$4 sm:$0xff]  }
 0x1ea   :  { %v1985_v0 = vrot.slane %v1984_v63, 4  ;;  %v1991_v1 = vsel %vm1942_vm0, %v1981_v61, 0.0  ;;  %v2005_v2 = vsel %vm1942_vm0, %v1983_v62, 0.0  ;;  %v1962_v20 = vrot.slane %v1961_v32, 1  ;;  %v4405_v62 = vld [vmem:[%s5898_s2 + $0x260] ss:$16 sps:$4 sm:$0xff]  }
 0x1eb   :  { %v1992_v3 = vrot.slane %v1991_v1, 4  ;;  %v2006_v4 = vrot.slane %v2005_v2, 4 }
 0x1ec   :  { %v1986_v5 = vadd.f32 %v1985_v0, %v1984_v63  ;;  %v1963_v34 = vadd.f32 %v1962_v20, %v1961_v32  ;;  %v4408_v63 = vld [vmem:[%s5898_s2 + $0x268] ss:$16 sps:$4 sm:$0xff]   ;;  %v4413_v0 = vld [vmem:[%s5898_s2 + $0x284] ss:$16 sps:$4 sm:$0xff]   ;;  %v4452_v20 = vld [vmem:[%s5898_s2 + $0x34c] ss:$16 sps:$4 sm:$0xff]  }
 0x1ed   :  { %v1993_v7 = vadd.f32 %v1992_v3, %v1991_v1  ;;  %v2007_v8 = vadd.f32 %v2006_v4, %v2005_v2  ;;  %v4416_v1 = vld [vmem:[%s5898_s2 + $0x28c] ss:$16 sps:$4 sm:$0xff]   ;;  %v4411_v3 = vld [vmem:[%s5898_s2 + $0x280] ss:$16 sps:$4 sm:$0xff]   ;;  %v4414_v4 = vld [vmem:[%s5898_s2 + $0x288] ss:$16 sps:$4 sm:$0xff]  }
 0x1ee   :  { %v1987_v9 = vrot.slane %v1986_v5, 2  ;;  %v1974_v40 = vmul.f32 0.5, %v1963_v34  ;;  %v4449_v32 = vld [vmem:[%s5898_s2 + $0x344] ss:$16 sps:$4 sm:$0xff]   ;;  %v4447_v34 = vld [vmem:[%s5898_s2 + $0x340] ss:$16 sps:$4 sm:$0xff]  }
 0x1ef   :  { %v1994_v10 = vrot.slane %v1993_v7, 2  ;;  %v2008_v11 = vrot.slane %v2007_v8, 2 }
 0x1f0   :  { %v1988_v12 = vadd.f32 %v1987_v9, %v1986_v5  ;;  %v5594_v48 = vsub.f32 %v5577_v28, %v1974_v40  ;;  %v4393_v28 = vld [vmem:[%s5898_s2 + $0x220] ss:$16 sps:$4 sm:$0xff]   ;;  %v4419_v5 = vld [vmem:[%s5898_s2 + $0x2a4] ss:$16 sps:$4 sm:$0xff]   ;;  %v4420_v9 = vld [vmem:[%s5898_s2 + $0x2a8] ss:$16 sps:$4 sm:$0xff]  }
 0x1f1   :  { %v1995_v14 = vadd.f32 %v1994_v10, %v1993_v7  ;;  %v2009_v16 = vadd.f32 %v2008_v11, %v2007_v8  ;;  %v4417_v8 = vld [vmem:[%s5898_s2 + $0x2a0] ss:$16 sps:$4 sm:$0xff]   ;;  %v4425_v10 = vld [vmem:[%s5898_s2 + $0x2c4] ss:$16 sps:$4 sm:$0xff]   ;;  %v4428_v11 = vld [vmem:[%s5898_s2 + $0x2cc] ss:$16 sps:$4 sm:$0xff]  }
 0x1f2   :  { %v1989_v17 = vrot.slane %v1988_v12, 1  ;;  %v1982_v53 = vmul.f32 %v5594_v48, %v5594_v48  ;;  %v4461_v40 = vld [vmem:[%s5898_s2 + $0x384] ss:$16 sps:$4 sm:$0xff]  }
 0x1f3   :  { %v1996_v18 = vrot.slane %v1995_v14, 1  ;;  %v2010_v19 = vrot.slane %v2009_v16, 1 }
 0x1f4   :  { %v1990_v22 = vadd.f32 %v1989_v17, %v1988_v12  ;;  %v4434_v17 = vld [vmem:[%s5898_s2 + $0x2ec] ss:$16 sps:$4 sm:$0xff]  }
 0x1f5   :  { %v1997_v24 = vadd.f32 %v1996_v18, %v1995_v14  ;;  %v2011_v25 = vadd.f32 %v2010_v19, %v2009_v16  ;;  %v4426_v14 = vld [vmem:[%s5898_s2 + $0x2c8] ss:$16 sps:$4 sm:$0xff]   ;;  %v4431_v16 = vld [vmem:[%s5898_s2 + $0x2e4] ss:$16 sps:$4 sm:$0xff]   ;;  %v4429_v19 = vld [vmem:[%s5898_s2 + $0x2e0] ss:$16 sps:$4 sm:$0xff]  }
 0x1f6   :  { %v2012_v26 = vmul.f32 0.5, %v1990_v22  ;;  %v4432_v22 = vld [vmem:[%s5898_s2 + $0x2e8] ss:$16 sps:$4 sm:$0xff]  }
 0x1f7   :  { %v2013_v15 = vmul.f32 0.5, %v1997_v24  ;;  %v2015_v27 = vmul.f32 0.5, %v2011_v25  ;;  %v4440_v24 = vld [vmem:[%s5898_s2 + $0x30c] ss:$16 sps:$4 sm:$0xff]  }
 0x1f8   :  { %v2016_v29 = vadd.f32 1e-05, %v2012_v26  ;;  %v4435_v26 = vld [vmem:[%s5898_s2 + $0x300] ss:$16 sps:$4 sm:$0xff]  }
 0x1f9   :  { %v2017_v30 = vadd.f32 1e-05, %v2013_v15  ;;  %v2019_v31 = vadd.f32 1e-05, %v2015_v27  ;;  %v4438_v15 = vld [vmem:[%s5898_s2 + $0x308] ss:$16 sps:$4 sm:$0xff]  }
 0x1fa   :  { %4515 = vrsqrt.f32 %v2016_v29  ;;  %v4443_v27 = vld [vmem:[%s5898_s2 + $0x324] ss:$16 sps:$4 sm:$0xff]   ;;  %v4446_v29 = vld [vmem:[%s5898_s2 + $0x32c] ss:$16 sps:$4 sm:$0xff]  }
 0x1fb   :  { %4517 = vrsqrt.f32 %v2017_v30  ;;  %v4441_v30 = vld [vmem:[%s5898_s2 + $0x320] ss:$16 sps:$4 sm:$0xff]  }
 0x1fc   :  { %4519 = vrsqrt.f32 %v2019_v31  ;;  %v4444_v31 = vld [vmem:[%s5898_s2 + $0x328] ss:$16 sps:$4 sm:$0xff]  }
 0x204   :  { %v4516_v33 = vpop.eup %4515 }
 0x205   :  { %v2024_v35 = vmul.f32 %v4516_v33, %v1976_v57  ;;  %v4518_v36 = vpop.eup %4517  ;;  %v4402_v57 = vld [vmem:[%s5898_s2 + $0x248] ss:$16 sps:$4 sm:$0xff]  }
 0x206   :  { %v4520_v37 = vpop.eup %4519  ;;  %v2025_v38 = vmul.f32 %v4518_v36, %v1977_v58  ;;  %v1998_v58 = vsel %vm1942_vm0, %v1982_v53, 0.0  ;;  %v4455_v36 = vld [vmem:[%s5898_s2 + $0x364] ss:$16 sps:$4 sm:$0xff]  }
 0x207   :  { %v2028_v39 = vmax.f32 %v2024_v35, 0.0  ;;  %v2027_v41 = vmul.f32 %v4520_v37, %v1979_v59  ;;  %v4407_v59 = vld [vmem:[%s5898_s2 + $0x264] ss:$16 sps:$4 sm:$0xff]   ;;  %v1999_v61 = vrot.slane %v1998_v58, 4  ;;  %v4450_v35 = vld [vmem:[%s5898_s2 + $0x348] ss:$16 sps:$4 sm:$0xff]  }
 0x208   :  { %v2029_v42 = vmax.f32 %v2025_v38, 0.0  ;;  %v4458_v37 = vld [vmem:[%s5898_s2 + $0x36c] ss:$16 sps:$4 sm:$0xff]   ;;  %v4453_v38 = vld [vmem:[%s5898_s2 + $0x360] ss:$16 sps:$4 sm:$0xff]  }
 0x209   :  { %v2031_v43 = vmax.f32 %v2027_v41, 0.0  ;;  %v2032_v47 = vpack.c.bf16 %v2028_v39, %v2028_v39  ;;  %v2000_v2 = vadd.f32 %v1999_v61, %v1998_v58  ;;  %v4456_v39 = vld [vmem:[%s5898_s2 + $0x368] ss:$16 sps:$4 sm:$0xff]   ;;  %v4464_v41 = vld [vmem:[%s5898_s2 + $0x38c] ss:$16 sps:$4 sm:$0xff]   ;;  %v4485_v61 = vld [vmem:[%s5899_s3] sm:$0xff]  }
 0x20a   :  { %v2033_v44 = vpack.c.bf16 %v2029_v42, %v2029_v42  ;;  %v4459_v42 = vld [vmem:[%s5898_s2 + $0x380] ss:$16 sps:$4 sm:$0xff]  }
 0x20b   :  { %v2035_v51 = vpack.c.bf16 %v2031_v43, %v2031_v43  ;;  %v2001_v7 = vrot.slane %v2000_v2, 2  ;;  %v4462_v43 = vld [vmem:[%s5898_s2 + $0x388] ss:$16 sps:$4 sm:$0xff]  }
 0x20c   :  { %2836 = vmatprep.mubr.bf16.mxu0 %v2033_v44  ;;  %2918 = vmatprep.mubr.bf16.mxu1 %v2033_v44  ;;  %v4467_v44 = vld [vmem:[%s5898_s2 + $0x3a4] ss:$16 sps:$4 sm:$0xff]  }
 0x20d   :  { %2837 = vmatmul.mubr.bf16.vlgmr.msra.gmra.mrb[4].mxu0 %v2032_v47  ;;  %2919 = vmatmul.mubr.bf16.vlgmr.msra.gmra.mrb[4].mxu1 %v2032_v47  ;;  %v2002_v12 = vadd.f32 %v2001_v7, %v2000_v2  ;;  %v4468_v47 = vld [vmem:[%s5898_s2 + $0x3a8] ss:$16 sps:$4 sm:$0xff]  }
 0x20e   :  { %2846 = vmatpush1.bf16.msra.mxu0 %v4387_v45  ;;  %2928 = vmatpush1.bf16.msra.mxu1 %v4390_v46  ;;  %v4470_v45 = vld [vmem:[%s5898_s2 + $0x3ac] ss:$16 sps:$4 sm:$0xff]   ;;  %v4465_v46 = vld [vmem:[%s5898_s2 + $0x3a0] ss:$16 sps:$4 sm:$0xff]  }
 0x20f   :  { %2877 = vmatprep.mubr.bf16.mxu0 %v2035_v51  ;;  %2959 = vmatprep.mubr.bf16.mxu1 %v2035_v51  ;;  %v2003_v18 = vrot.slane %v2002_v12, 1  ;;  %v4490_v2 = vld [vmem:[%s5899_s3 + $0x88] sm:$0xff]   ;;  %v4495_v7 = vld [vmem:[%s5899_s3 + $0x58] sm:$0xff]  }
 0x210   :  { %2847 = vmatprep.subr.bf16.mxu0 %v4395_v49  ;;  %2929 = vmatprep.subr.bf16.mxu1 %v4398_v50  ;;  %v4473_v49 = vld [vmem:[%s5898_s2 + $0x3c4] ss:$16 sps:$4 sm:$0xff]   ;;  %v4476_v50 = vld [vmem:[%s5898_s2 + $0x3cc] ss:$16 sps:$4 sm:$0xff]  }
 0x211   :  { %v2004_v25 = vadd.f32 %v2003_v18, %v2002_v12  ;;  %v4500_v12 = vld [vmem:[%s5899_s3 + $0xe0] sm:$0xff]   ;;  %v4505_v18 = vld [vmem:[%s5899_s3 + $0x28] sm:$0xff]  }
 0x212   :  { %2848 = vmatpush1.bf16.msra.mxu0 %v4393_v28  ;;  %2930 = vmatpush1.bf16.msra.mxu1 %v4396_v52  ;;  %v4471_v28 = vld [vmem:[%s5898_s2 + $0x3c0] ss:$16 sps:$4 sm:$0xff]   ;;  %v4474_v52 = vld [vmem:[%s5898_s2 + $0x3c8] ss:$16 sps:$4 sm:$0xff]  }
 0x213   :  { %2849 = vmatprep.subr.bf16.mxu0 %v4401_v54  ;;  %2931 = vmatprep.subr.bf16.mxu1 %v4404_v55  ;;  %v2014_v21 = vmul.f32 0.5, %v2004_v25  ;;  %v4479_v54 = vld [vmem:[%s5898_s2 + $0x3e4] ss:$16 sps:$4 sm:$0xff]   ;;  %v4482_v55 = vld [vmem:[%s5898_s2 + $0x3ec] ss:$16 sps:$4 sm:$0xff]  }
 0x214   :  { %v4510_v25 = vld [vmem:[%s5899_s3 + $0xb0] sm:$0xff]  }
 0x215   :  { %v2018_v33 = vadd.f32 1e-05, %v2014_v21 }
 0x216   :  { %2850 = vmatpush1.bf16.msra.mxu0 %v4399_v56  ;;  %2932 = vmatpush1.bf16.msra.mxu1 %v4402_v57  ;;  %v4477_v56 = vld [vmem:[%s5898_s2 + $0x3e0] ss:$16 sps:$4 sm:$0xff]  }
 0x217   :  { %2851 = vmatprep.subr.bf16.mxu0 %v4407_v59  ;;  %2933 = vmatprep.subr.bf16.mxu1 %v4410_v60  ;;  %4521 = vrsqrt.f32 %v2018_v33  ;;  %v4483_v59 = vld [vmem:[%s5899_s3 + $0x40] sm:$0xff]  }
 0x218   :  { %v4484_v60 = vld [vmem:[%s5899_s3 + $0xc0] sm:$0xff]  }
 0x21a   :  { %2852 = vmatpush1.bf16.msra.mxu0 %v4405_v62  ;;  %2934 = vmatpush1.bf16.msra.mxu1 %v4408_v63  ;;  %v4486_v62 = vld [vmem:[%s5899_s3 + $0x80] sm:$0xff]   ;;  %v4487_v63 = vld [vmem:[%s5899_s3 + $0x48] sm:$0xff]  }
 0x21b   :  { %2853 = vmatprep.subr.bf16.mxu0 %v4413_v0  ;;  %2935 = vmatprep.subr.bf16.mxu1 %v4416_v1  ;;  %v4488_v0 = vld [vmem:[%s5899_s3 + $0xc8] sm:$0xff]  }
 0x21c   :  { %v4489_v1 = vld [vmem:[%s5899_s3 + $0x8] sm:$0xff]  }
 0x21e   :  { %2854 = vmatpush1.bf16.msra.mxu0 %v4411_v3  ;;  %2936 = vmatpush1.bf16.msra.mxu1 %v4414_v4  ;;  %v4491_v3 = vld [vmem:[%s5899_s3 + $0x50] sm:$0xff]  }
 0x21f   :  { %2855 = vmatprep.subr.bf16.mxu0 %v4419_v5  ;;  %2937 = vmatprep.subr.bf16.mxu1 %v4422_v6  ;;  %v4492_v4 = vld [vmem:[%s5899_s3 + $0xd0] sm:$0xff]  }
 0x220   :  { %v4493_v5 = vld [vmem:[%s5899_s3 + $0x10] sm:$0xff]  }
 0x221   :  { %v4522_v51 = vpop.eup %4521  ;;  %v4494_v6 = vld [vmem:[%s5899_s3 + $0x90] sm:$0xff]  }
 0x222   :  { %2856 = vmatpush1.bf16.msra.mxu0 %v4417_v8  ;;  %2938 = vmatpush1.bf16.msra.mxu1 %v4420_v9  ;;  %v2026_v53 = vmul.f32 %v4522_v51, %v5594_v48  ;;  %v4480_v48 = vld [vmem:[%s5898_s2 + $0x3e8] ss:$16 sps:$4 sm:$0xff]  }
 0x223   :  { %2857 = vmatprep.subr.bf16.mxu0 %v4425_v10  ;;  %2939 = vmatprep.subr.bf16.mxu1 %v4428_v11  ;;  %v4496_v8 = vld [vmem:[%s5899_s3 + $0xd8] sm:$0xff]   ;;  %v4499_v11 = vld [vmem:[%s5899_s3 + $0x60] sm:$0xff]  }
 0x224   :  { %v2030_v57 = vmax.f32 %v2026_v53, 0.0  ;;  %v4497_v9 = vld [vmem:[%s5899_s3 + $0x18] sm:$0xff]  }
 0x225   :  { %v4498_v10 = vld [vmem:[%s5899_s3 + $0x98] sm:$0xff]  }
 0x226   :  { %2858 = vmatpush1.bf16.msra.mxu0 %v4423_v13  ;;  %2940 = vmatpush1.bf16.msra.mxu1 %v4426_v14  ;;  %v2034_v58 = vpack.c.bf16 %v2030_v57, %v2030_v57  ;;  %v4501_v13 = vld [vmem:[%s5899_s3 + $0x20] sm:$0xff]  }
 0x227   :  { %2859 = vmatprep.subr.bf16.mxu0 %v4431_v16  ;;  %2941 = vmatprep.subr.bf16.mxu1 %v4434_v17  ;;  %v4502_v14 = vld [vmem:[%s5899_s3 + $0xa0] sm:$0xff]   ;;  %v4503_v16 = vld [vmem:[%s5899_s3 + $0x68] sm:$0xff]  }
 0x228   :  { %v4504_v17 = vld [vmem:[%s5899_s3 + $0xe8] sm:$0xff]  }
 0x22a   :  { %2860 = vmatpush1.bf16.msra.mxu0 %v4429_v19  ;;  %2942 = vmatpush1.bf16.msra.mxu1 %v4432_v22  ;;  %v4506_v19 = vld [vmem:[%s5899_s3 + $0xa8] sm:$0xff]   ;;  %v4507_v22 = vld [vmem:[%s5899_s3 + $0x70] sm:$0xff]  }
 0x22b   :  { %2861 = vmatprep.subr.bf16.mxu0 %v4437_v23  ;;  %2943 = vmatprep.subr.bf16.mxu1 %v4440_v24  ;;  %v4508_v23 = vld [vmem:[%s5899_s3 + $0xf0] sm:$0xff]  }
 0x22c   :  { %v4509_v24 = vld [vmem:[%s5899_s3 + $0x30] sm:$0xff]  }
 0x22e   :  { %2862 = vmatpush1.bf16.msra.mxu0 %v4435_v26  ;;  %2944 = vmatpush1.bf16.msra.mxu1 %v4438_v15  ;;  %v4511_v26 = vld [vmem:[%s5899_s3 + $0x78] sm:$0xff]  }
 0x22f   :  { %2863 = vmatprep.subr.bf16.mxu0 %v4443_v27  ;;  %2945 = vmatprep.subr.bf16.mxu1 %v4446_v29  ;;  %v4512_v15 = vld [vmem:[%s5899_s3 + $0xf8] sm:$0xff]  }
 0x230   :  { %v4513_v27 = vld [vmem:[%s5899_s3 + $0x38] sm:$0xff]  }
 0x231   :  { %v4514_v29 = vld [vmem:[%s5899_s3 + $0xb8] sm:$0xff]   ;;  %s4556_s3 = smov [#allocation2]  }
 0x232   :  { %2864 = vmatpush1.bf16.msra.mxu0 %v4441_v30  ;;  %2946 = vmatpush1.bf16.msra.mxu1 %v4444_v31  ;;  %s3404_s2 = sshll.u32 %s4556_s3, 4  ;;  %s3405_s2 = int_to_ptr.vmem [resolvable:$true] %s3404_s2 }
 0x233   :  { %2865 = vmatprep.subr.bf16.mxu0 %v4449_v32  ;;  %2947 = vmatprep.subr.bf16.mxu1 %v4452_v20  ;;  %s4531_s28 = scalar_lea.vmem %s3405_s2, 32  ;;  %p4536_p1 = scmp.lt.s32.totalorder %s3405_s2, %s3405_s2 }
 0x234   :  { %p4532_p0 = scmp.ne.s32.totalorder %s3405_s2, %s4531_s28  ;;  %p4537_p2 = scmp.lt.s32.totalorder %s4531_s28, %s4531_s28 }
 0x236   :  { %2866 = vmatpush1.bf16.msra.mxu0 %v4447_v34  ;;  %2948 = vmatpush1.bf16.msra.mxu1 %v4450_v35  ;;  %p4538_p3 = por %p4537_p2, %p4536_p1 }
 0x237   :  { %2867 = vmatprep.subr.bf16.mxu0 %v4455_v36  ;;  %2949 = vmatprep.subr.bf16.mxu1 %v4458_v37 }
 0x238   :  { %p4539_p4 = pnand %p4538_p3, %p4532_p0 }
 0x23a   :  { %2868 = vmatpush1.bf16.msra.mxu0 %v4453_v38  ;;  %2950 = vmatpush1.bf16.msra.mxu1 %v4456_v39 }
 0x23b   :  { %2869 = vmatprep.subr.bf16.mxu0 %v4461_v40  ;;  %2951 = vmatprep.subr.bf16.mxu1 %v4464_v41 }
 0x23e   :  { %2870 = vmatpush1.bf16.msra.mxu0 %v4459_v42  ;;  %2952 = vmatpush1.bf16.msra.mxu1 %v4462_v43 }
 0x23f   :  { %2871 = vmatprep.subr.bf16.mxu0 %v4467_v44  ;;  %2953 = vmatprep.subr.bf16.mxu1 %v4470_v45 }
 0x242   :  { %2872 = vmatpush1.bf16.msra.mxu0 %v4465_v46  ;;  %2954 = vmatpush1.bf16.msra.mxu1 %v4468_v47 }
 0x243   :  { %2873 = vmatprep.subr.bf16.mxu0 %v4473_v49  ;;  %2955 = vmatprep.subr.bf16.mxu1 %v4476_v50 }
 0x246   :  { %2874 = vmatpush1.bf16.msra.mxu0 %v4471_v28  ;;  %2956 = vmatpush1.bf16.msra.mxu1 %v4474_v52 }
 0x247   :  { %2875 = vmatprep.subr.bf16.mxu0 %v4479_v54  ;;  %2957 = vmatprep.subr.bf16.mxu1 %v4482_v55 }
 0x24a   :  { %2876 = vmatpush1.bf16.msra.mxu0 %v4477_v56  ;;  %2958 = vmatpush1.bf16.msra.mxu1 %v4480_v48 }
 0x24b   :  { %3828 = vmatprep.subr.bf16.mxu0 %v4483_v59  ;;  %3850 = vmatprep.subr.bf16.mxu1 %v4484_v60 }
 0x24d   :  { %2878 = vmatmul.mubr.bf16.vlgmr.msra.gmra.mrb[4].mxu0 %v2034_v58  ;;  %2960 = vmatmul.mubr.bf16.vlgmr.msra.gmra.mrb[4].mxu1 %v2034_v58 }
 0x24e   :  { %3829 = vmatpush3.bf16.msra.mxu0 %v4485_v61  ;;  %3851 = vmatpush3.bf16.msra.mxu1 %v4486_v62 }
 0x24f   :  { %3830 = vmatprep.subr.bf16.mxu0 %v4487_v63  ;;  %3852 = vmatprep.subr.bf16.mxu1 %v4488_v0 }
 0x252   :  { %3831 = vmatpush3.bf16.msra.mxu0 %v4489_v1  ;;  %3853 = vmatpush3.bf16.msra.mxu1 %v4490_v2 }
 0x253   :  { %3832 = vmatprep.subr.bf16.mxu0 %v4491_v3  ;;  %3854 = vmatprep.subr.bf16.mxu1 %v4492_v4 }
 0x256   :  { %3833 = vmatpush3.bf16.msra.mxu0 %v4493_v5  ;;  %3855 = vmatpush3.bf16.msra.mxu1 %v4494_v6 }
 0x257   :  { %3834 = vmatprep.subr.bf16.mxu0 %v4495_v7  ;;  %3856 = vmatprep.subr.bf16.mxu1 %v4496_v8 }
 0x25a   :  { %3835 = vmatpush3.bf16.msra.mxu0 %v4497_v9  ;;  %3857 = vmatpush3.bf16.msra.mxu1 %v4498_v10 }
 0x25b   :  { %3836 = vmatprep.subr.bf16.mxu0 %v4499_v11  ;;  %3858 = vmatprep.subr.bf16.mxu1 %v4500_v12 }
 0x25e   :  { %3837 = vmatpush3.bf16.msra.mxu0 %v4501_v13  ;;  %3859 = vmatpush3.bf16.msra.mxu1 %v4502_v14 }
 0x25f   :  { %3838 = vmatprep.subr.bf16.mxu0 %v4503_v16  ;;  %3860 = vmatprep.subr.bf16.mxu1 %v4504_v17 }
 0x262   :  { %3839 = vmatpush3.bf16.msra.mxu0 %v4505_v18  ;;  %3861 = vmatpush3.bf16.msra.mxu1 %v4506_v19 }
 0x263   :  { %3840 = vmatprep.subr.bf16.mxu0 %v4507_v22  ;;  %3862 = vmatprep.subr.bf16.mxu1 %v4508_v23 }
 0x266   :  { %3841 = vmatpush3.bf16.msra.mxu0 %v4509_v24  ;;  %3863 = vmatpush3.bf16.msra.mxu1 %v4510_v25 }
 0x267   :  { %3842 = vmatprep.subr.bf16.mxu0 %v4511_v26  ;;  %3864 = vmatprep.subr.bf16.mxu1 %v4512_v15 }
 0x26a   :  { %3843 = vmatpush3.bf16.msra.mxu0 %v4513_v27  ;;  %3865 = vmatpush3.bf16.msra.mxu1 %v4514_v29 }
 0x320   :  { %v2879_v21 = vpop.f32.mrb[4].mxu0  ;;  %v2961_v30 = vpop.f32.mrb[4].mxu1 }
 0x321   :  { %v2968_v31 = vsel %vm1942_vm0, %v2879_v21, 0.0  ;;  %v2982_v32 = vsel %vm1942_vm0, %v2961_v30, 0.0  ;;  %v2881_v20 = vpop.f32.mrb[5].mxu0  ;;  %v2963_v33 = vpop.f32.mrb[5].mxu1 }
 0x322   :  { %v2969_v34 = vrot.slane %v2968_v31, 4  ;;  %v2983_v35 = vrot.slane %v2982_v32, 4  ;;  %v2975_v36 = vsel %vm1942_vm0, %v2881_v20, 0.0  ;;  %v2989_v37 = vsel %vm1942_vm0, %v2963_v33, 0.0  ;;  %v2883_v38 = vpop.f32.mrb[6].mxu0  ;;  %v2965_v39 = vpop.f32.mrb[6].mxu1 }
 0x323   :  { %v2976_v40 = vrot.slane %v2975_v36, 4  ;;  %v2990_v41 = vrot.slane %v2989_v37, 4  ;;  %v2884_v42 = vpop.f32.mrb[7].mxu0  ;;  %v2966_v43 = vpop.f32.mrb[7].mxu1 }
 0x324   :  { %v2970_v44 = vadd.f32 %v2969_v34, %v2968_v31  ;;  %v2984_v45 = vadd.f32 %v2983_v35, %v2982_v32 }
 0x325   :  { %v2977_v46 = vadd.f32 %v2976_v40, %v2975_v36  ;;  %v2991_v47 = vadd.f32 %v2990_v41, %v2989_v37 }
 0x326   :  { %v2971_v49 = vrot.slane %v2970_v44, 2  ;;  %v2985_v50 = vrot.slane %v2984_v45, 2 }
 0x327   :  { %v2978_v51 = vrot.slane %v2977_v46, 2  ;;  %v2992_v28 = vrot.slane %v2991_v47, 2 }
 0x328   :  { %v2972_v52 = vadd.f32 %v2971_v49, %v2970_v44  ;;  %v2986_v53 = vadd.f32 %v2985_v50, %v2984_v45 }
 0x329   :  { %v2979_v54 = vadd.f32 %v2978_v51, %v2977_v46  ;;  %v2993_v55 = vadd.f32 %v2992_v28, %v2991_v47 }
 0x32a   :  { %v2973_v56 = vrot.slane %v2972_v52, 1  ;;  %v2987_v48 = vrot.slane %v2986_v53, 1 }
 0x32b   :  { %v2980_v57 = vrot.slane %v2979_v54, 1  ;;  %v2994_v58 = vrot.slane %v2993_v55, 1 }
 0x32c   :  { %v2974_v59 = vadd.f32 %v2973_v56, %v2972_v52  ;;  %v2988_v60 = vadd.f32 %v2987_v48, %v2986_v53 }
 0x32d   :  { %v2981_v61 = vadd.f32 %v2980_v57, %v2979_v54  ;;  %v2995_v62 = vadd.f32 %v2994_v58, %v2993_v55 }
 0x32e   :  { %v2996_v63 = vmul.f32 0.5, %v2974_v59  ;;  %v2998_v0 = vmul.f32 0.5, %v2988_v60 }
 0x32f   :  { %v2997_v1 = vmul.f32 0.5, %v2981_v61  ;;  %v2999_v2 = vmul.f32 0.5, %v2995_v62 }
 0x330   :  { %v3000_v3 = vsub.f32 %v2879_v21, %v2996_v63  ;;  %v3002_v4 = vsub.f32 %v2961_v30, %v2998_v0 }
 0x331   :  { %v3001_v5 = vsub.f32 %v2881_v20, %v2997_v1  ;;  %v3003_v6 = vsub.f32 %v2963_v33, %v2999_v2 }
 0x332   :  { %v3004_v7 = vmul.f32 %v3000_v3, %v3000_v3  ;;  %v3006_v8 = vmul.f32 %v3002_v4, %v3002_v4 }
 0x333   :  { %v3005_v9 = vmul.f32 %v3001_v5, %v3001_v5  ;;  %v3007_v10 = vmul.f32 %v3003_v6, %v3003_v6 }
 0x334   :  { %v3008_v11 = vsel %vm1942_vm0, %v3004_v7, 0.0  ;;  %v3022_v12 = vsel %vm1942_vm0, %v3006_v8, 0.0 }
 0x335   :  { %v3009_v13 = vrot.slane %v3008_v11, 4  ;;  %v3023_v14 = vrot.slane %v3022_v12, 4  ;;  %v3015_v16 = vsel %vm1942_vm0, %v3005_v9, 0.0  ;;  %v3029_v17 = vsel %vm1942_vm0, %v3007_v10, 0.0 }
 0x336   :  { %v3016_v18 = vrot.slane %v3015_v16, 4  ;;  %v3030_v19 = vrot.slane %v3029_v17, 4 }
 0x337   :  { %v3010_v22 = vadd.f32 %v3009_v13, %v3008_v11  ;;  %v3024_v23 = vadd.f32 %v3023_v14, %v3022_v12 }
 0x338   :  { %v3017_v24 = vadd.f32 %v3016_v18, %v3015_v16  ;;  %v3031_v25 = vadd.f32 %v3030_v19, %v3029_v17 }
 0x339   :  { %v3011_v26 = vrot.slane %v3010_v22, 2  ;;  %v3025_v15 = vrot.slane %v3024_v23, 2 }
 0x33a   :  { %v3018_v27 = vrot.slane %v3017_v24, 2  ;;  %v3032_v29 = vrot.slane %v3031_v25, 2 }
 0x33b   :  { %v3012_v21 = vadd.f32 %v3011_v26, %v3010_v22  ;;  %v3026_v30 = vadd.f32 %v3025_v15, %v3024_v23 }
 0x33c   :  { %v3019_v31 = vadd.f32 %v3018_v27, %v3017_v24  ;;  %v3033_v32 = vadd.f32 %v3032_v29, %v3031_v25 }
 0x33d   :  { %v3013_v20 = vrot.slane %v3012_v21, 1  ;;  %v3027_v33 = vrot.slane %v3026_v30, 1 }
 0x33e   :  { %v3020_v34 = vrot.slane %v3019_v31, 1  ;;  %v3034_v35 = vrot.slane %v3033_v32, 1 }
 0x33f   :  { %v3014_v36 = vadd.f32 %v3013_v20, %v3012_v21  ;;  %v3028_v37 = vadd.f32 %v3027_v33, %v3026_v30 }
 0x340   :  { %v3021_v38 = vadd.f32 %v3020_v34, %v3019_v31  ;;  %v3035_v39 = vadd.f32 %v3034_v35, %v3033_v32 }
 0x341   :  { %v3036_v40 = vmul.f32 0.5, %v3014_v36  ;;  %v3038_v41 = vmul.f32 0.5, %v3028_v37 }
 0x342   :  { %v3037_v42 = vmul.f32 0.5, %v3021_v38  ;;  %v3039_v43 = vmul.f32 0.5, %v3035_v39 }
 0x343   :  { %v3040_v44 = vadd.f32 1e-05, %v3036_v40  ;;  %v3042_v45 = vadd.f32 1e-05, %v3038_v41 }
 0x344   :  { %v3041_v46 = vadd.f32 1e-05, %v3037_v42  ;;  %v3043_v47 = vadd.f32 1e-05, %v3039_v43 }
 0x345   :  { %4523 = vrsqrt.f32 %v3040_v44 }
 0x346   :  { %4525 = vrsqrt.f32 %v3042_v45 }
 0x347   :  { %4527 = vrsqrt.f32 %v3041_v46 }
 0x348   :  { %4529 = vrsqrt.f32 %v3043_v47 }
 0x34f   :  { %v4524_v49 = vpop.eup %4523 }
 0x350   :  { %v4526_v50 = vpop.eup %4525  ;;  %v3048_v51 = vmul.f32 %v4524_v49, %v3000_v3 }
 0x351   :  { %v4528_v28 = vpop.eup %4527  ;;  %v3050_v52 = vmul.f32 %v4526_v50, %v3002_v4 }
 0x352   :  { %v4530_v53 = vpop.eup %4529  ;;  %v3049_v54 = vmul.f32 %v4528_v28, %v3001_v5  ;;  %v3052_v55 = vmax.f32 %v3048_v51, 0.0 }
 0x353   :  { %v3051_v56 = vmul.f32 %v4530_v53, %v3003_v6  ;;  %v3054_v48 = vmax.f32 %v3050_v52, 0.0 }
 0x354   :  { %v3053_v57 = vmax.f32 %v3049_v54, 0.0  ;;  %v3056_v60 = vpack.c.bf16 %v3052_v55, %v3052_v55 }
 0x355   :  { %v3055_v58 = vmax.f32 %v3051_v56, 0.0  ;;  %v3058_v62 = vpack.c.bf16 %v3054_v48, %v3054_v48 }
 0x356   :  { %v3057_v59 = vpack.c.bf16 %v3053_v57, %v3053_v57 }
 0x357   :  { %v3059_v61 = vpack.c.bf16 %v3055_v58, %v3055_v58 }
 0x358   :  { %3348 = vmatprep.mubr.bf16.mxu0 %v3057_v59 }
 0x359   :  { %3388 = vmatprep.mubr.bf16.mxu1 %v3059_v61  ;;  %3349 = vmatmul.mubr.bf16.vlgmr.msra.gmra.mrb[8].mxu0 %v3056_v60 }
 0x35a   :  { %3389 = vmatmul.mubr.bf16.vlgmr.msra.gmra.mrb[8].mxu1 %v3058_v62 }
 0x42c   :  { %v3844_v63 = vpop.f32.mrb[8].mxu0 }
 0x42d   :  { %v3866_v0 = vpop.f32.mrb[8].mxu1  ;;  %v3845_v1 = vpop.f32.mrb[9].mxu0 }
 0x42e   :  { %v3846_v2 = vadd.f32 %v3845_v1, %v3844_v63  ;;  %v3867_v3 = vpop.f32.mrb[9].mxu1  ;;  %v3847_v4 = vpop.f32.mrb[10].mxu0 }
 0x42f   :  { %v3868_v5 = vadd.f32 %v3867_v3, %v3866_v0  ;;  %v3869_v6 = vpop.f32.mrb[10].mxu1  ;;  %v3848_v7 = vpop.f32.mrb[11].mxu0 }
 0x430   :  { %v3870_v8 = vpop.f32.mrb[11].mxu1 }
 0x431   :  { %v3391_v9 = vadd.f32 %v3868_v5, %v3846_v2 }
 0x433   :  { %3397 = vst.msk [vmem:[#allocation2] sm:$0x3] %vm3396_vm1, %v3391_v9 }
 0x434   :  { %4542 = shalt.err (!%p4539_p4)
}
 0x435   :  { %s4543_s5 = scalar_lea.hbm %s5900_s4, 32 }
 0x436   :  { %p4544_p5 = scmp.ne.s32.totalorder %s5900_s4, %s4543_s5  ;;  %p4547_p6 = scmp.lt.u32.totalorder %s4543_s5, %s5900_s4 }
 0x438   :  { %p4549_p7 = pnand %p4547_p6, %p4544_p5 }
 0x43a   :  { %4552 = shalt.err (!%p4549_p7)
}
 0x43b   :  { %3407 = dma.vmem_to_hbm [thread:$0]  %s3405_s2, 32, %s5900_s4, [#allocation3]  }
 0x43c   :  { %4553 = dma.done.wait [#allocation3], 32  }
 0x43d   :  { %4554 = vsyncadd [#allocation3], 4294967264 }
 0x43e   :  { %3411 = vsyncpa [#allocation3], 1 }

</bundles_post_ra>
